<compile_context>
chip_gen: v7x
topology: tpu7x:2x2x1
jax: 0.10.0
libtpu: 0.0.40
codegen_flags: <defaults>
</compile_context>

<pallas_src>
import numpy as np
import jax
import jax.numpy as jnp
from jax import lax
from jax.experimental import pallas as pl
from jax.experimental.pallas import tpu as pltpu

EPS = 1e-5  # PyTorch LayerNorm default eps


def _round_up(v, m):
    return (v + m - 1) // m * m


# ----------------------------------------------------------------------------
# Pallas kernel
# ----------------------------------------------------------------------------
def _make_kernel(C, A, num_convs, G, NG, HW_pad):
    Cp = G * C
    Mg = NG * HW_pad

    def roll_up(v, k):      # result[p] = v[(p + k) % Mg]
        k = k % Mg
        if k == 0:
            return v
        return pltpu.roll(v, shift=Mg - k, axis=0)

    def roll_down(v, k):    # result[p] = v[(p - k) % Mg]
        k = k % Mg
        if k == 0:
            return v
        return pltpu.roll(v, shift=k, axis=0)

    def kernel(x_ref, selT_ref, bsel_ref, ln_g_ref, ln_b_ref, w3_ref, cb_ref,
               wsc_ref, wsh_ref, bs_ref, mc_ref, selp_ref, psum_ref, pexp_ref,
               gnr_ref, bnr_ref, wfc_ref, bfc_ref, o_ref):
        feat = x_ref[0]                          # (Mg, Cp) f32, lane-packed
        bsel = bsel_ref[...]                     # (Mg, NG)
        psum = psum_ref[...]                     # (Cp, G)  lane-block sum
        pexp = pexp_ref[...]                     # (G, Cp)  lane-block expand

        # ---- num_convs x (LayerNorm([C,Hi,Hi]) -> Conv3x3 valid -> ReLU) ----
        for i in range(num_convs):
            Hi = A - 2 * i
            inv_n = 1.0 / float(C * Hi * Hi)

            # fused masked LN stats: one selT matmul over [x | x^2]
            x2 = jnp.concatenate([feat, feat * feat], axis=1)        # (Mg,2Cp)
            rs = jnp.dot(selT_ref[i], x2,
                         preferred_element_type=jnp.float32)          # (NG,2Cp)
            mu = jnp.dot(rs[:, :Cp], psum,
                         preferred_element_type=jnp.float32) * inv_n  # (NG, G)
            ex2 = jnp.dot(rs[:, Cp:], psum,
                          preferred_element_type=jnp.float32) * inv_n
            inv = lax.rsqrt(jnp.maximum(ex2 - mu * mu, 0.0) + EPS)

            # broadcast [mu | inv] back to every row with one bsel matmul
            lanes = jnp.concatenate(
                [jnp.dot(mu, pexp, preferred_element_type=jnp.float32),
                 jnp.dot(inv, pexp, preferred_element_type=jnp.float32)],
                axis=1)                                                # (NG,2Cp)
            bcast = jnp.dot(bsel, lanes,
                            preferred_element_type=jnp.float32)        # (Mg,2Cp)

            # affine params are zero outside the valid Hi x Hi region, so this
            # also masks invalid / padded rows to zero.
            y = ((feat - bcast[:, :Cp]) * bcast[:, Cp:]
                 * ln_g_ref[i] + ln_b_ref[i])                          # (Mg,Cp)

            # 3x3 valid conv: (Mg,3Cp) staging, one bf16 matmul, 2 output rolls
            y3 = jnp.concatenate(
                [y.astype(jnp.bfloat16),
                 roll_up(y, A).astype(jnp.bfloat16),
                 roll_up(y, 2 * A).astype(jnp.bfloat16)], axis=1)      # (Mg,3Cp)
            p3 = jnp.dot(y3, w3_ref[i],
                         preferred_element_type=jnp.float32)           # (Mg,3Cp)
            acc = (p3[:, :Cp]
                   + roll_up(p3[:, Cp:2 * Cp], 1)
                   + roll_up(p3[:, 2 * Cp:], 2)
                   + cb_ref[i])
            feat = jnp.maximum(acc, 0.0)

        # ---- Spatial crosswise (strip) conv: 1x3 + 3x1, 'same' padding ----
        # TODO(synk): SpatialCrosswiseConvModule's body is not in the reference
        # source; implemented as 1x3 conv + 3x1 conv (zero 'same' pad), summed.
        fm = feat * mc_ref[...]                                        # masked
        fm_bf = fm.astype(jnp.bfloat16)
        s3 = jnp.concatenate(
            [fm_bf,
             roll_down(fm, A).astype(jnp.bfloat16),                    # (h-1,w)
             roll_up(fm, A).astype(jnp.bfloat16)], axis=1)             # (h+1,w)
        out_c = jnp.dot(s3, wsc_ref[...],
                        preferred_element_type=jnp.float32)            # (Mg,Cp)
        ph = jnp.dot(fm_bf, wsh_ref[...],
                     preferred_element_type=jnp.float32)               # (Mg,2Cp)
        feat = (out_c
                + roll_down(ph[:, :Cp], 1)                             # (h,w-1)
                + roll_up(ph[:, Cp:], 1)                               # (h,w+1)
                + bs_ref[...])

        # ---- head: masked spatial mean -> LayerNorm(C) -> Linear ----
        pooled = jnp.dot(selp_ref[...], feat,
                         preferred_element_type=jnp.float32)           # (NG,Cp)
        pm = jnp.dot(pooled, psum,
                     preferred_element_type=jnp.float32) * (1.0 / C)   # (NG, G)
        pm2 = jnp.dot(pooled * pooled, psum,
                      preferred_element_type=jnp.float32) * (1.0 / C)
        pinv = lax.rsqrt(jnp.maximum(pm2 - pm * pm, 0.0) + EPS)
        mu_l = jnp.dot(pm, pexp, preferred_element_type=jnp.float32)   # (NG,Cp)
        inv_l = jnp.dot(pinv, pexp, preferred_element_type=jnp.float32)
        pn = (pooled - mu_l) * inv_l * gnr_ref[...] + bnr_ref[...]
        res = jnp.dot(pn.astype(jnp.bfloat16), wfc_ref[...],
                      preferred_element_type=jnp.float32) + bfc_ref[...]
        o_ref[0] = res.astype(o_ref.dtype)                  # (NG, G*OUTp) dense

    return kernel


# ----------------------------------------------------------------------------
# Factory: one-time parameter packing (numpy) + jitted pallas_call wrapper
# ----------------------------------------------------------------------------
def make_layer_reg_with_strip_conv(params, *, feat_size, num_convs,
                                   out_channels, batch_tile=None):
    """Returns a jitted fn(x: (B, N, C) f32) -> (B, out_channels) f32.

    batch_tile=None folds (up to 32) batch elements into one grid step
    (best for single-TC v5e/v6e).  On v7x pass batch_tile=ceil(B/2) rounded
    to the packing factor so both TensorCores get real work.
    """
    A = feat_size
    nc = num_convs
    assert nc >= 1  # TODO(synk): num_convs == 0 path (strip conv on raw x) not implemented.
    HW = A * A
    Hf = A - 2 * nc
    assert Hf >= 1

    f32 = np.float32

    def npa(v):
        return np.asarray(jax.device_get(v), dtype=f32)

    C = int(npa(params["gnr"]).shape[0])

    # lane-packing factor: largest power of two with G*C <= 128
    G = 1
    while G * 2 * C <= 128:
        G *= 2
    Cp = G * C
    HW_pad = _round_up(HW + 2 * A + 2, 8)      # zero rows between elements
    OUTp = _round_up(max(out_channels, 1), max(128 // G, 1))
    OUT_LANES = G * OUTp

    eye_G = np.eye(G, dtype=f32)

    # ---- validity masks on the (padded) flat A x A layout ----
    hh, ww = np.meshgrid(np.arange(A), np.arange(A), indexing="ij")

    def region(hv):
        r = ((hh < hv) & (ww < hv)).astype(f32).reshape(HW)
        return np.pad(r, (0, HW_pad - HW))

    region_i = [region(A - 2 * i) for i in range(nc)]
    region_f = region(Hf)

    # ---- LayerNorm affine, lane-replicated (row replication added per NG) ----
    ln_g_rows, ln_b_rows = [], []
    for i in range(nc):
        Hi = A - 2 * i
        for src, dst in ((npa(params["ln_g"][i]), ln_g_rows),
                         (npa(params["ln_b"][i]), ln_b_rows)):
            t = np.transpose(src, (1, 2, 0))                         # (Hi,Hi,C)
            t = np.pad(t, ((0, A - Hi), (0, A - Hi), (0, 0))).reshape(HW, C)
            t = np.pad(t, ((0, HW_pad - HW), (0, 0)))                # (HW_pad,C)
            dst.append(np.tile(t, (1, G)))                           # (HW_pad,Cp)

    # ---- fused 3x3 conv weights, block-diagonal over G, bf16 ----
    w3 = np.zeros((nc, 3 * Cp, 3 * Cp), f32)
    cb = np.zeros((nc, 1, Cp), f32)
    for i in range(nc):
        w = npa(params["conv_w"][i])                                 # (Co,Ci,3,3)
        for di in range(3):
            for dj in range(3):
                w3[i, di * Cp:(di + 1) * Cp, dj * Cp:(dj + 1) * Cp] = \
                    np.kron(eye_G, w[:, :, di, dj].T)
        cb[i, 0] = np.tile(npa(params["conv_b"][i]), G)

    # ---- strip conv weights (center+vertical fused; +/-1 horiz separate) ----
    wh = npa(params["wh"])                                           # (C,C,1,3)
    wv = npa(params["wv"])                                           # (C,C,3,1)
    wh_t = [wh[:, :, 0, k].T for k in range(3)]
    wv_t = [wv[:, :, k, 0].T for k in range(3)]
    wsc = np.concatenate([np.kron(eye_G, wh_t[1] + wv_t[1]),
                          np.kron(eye_G, wv_t[0]),
                          np.kron(eye_G, wv_t[2])], axis=0)          # (3Cp,Cp)
    wsh = np.concatenate([np.kron(eye_G, wh_t[0]),
                          np.kron(eye_G, wh_t[2])], axis=1)          # (Cp,2Cp)
    bs = np.tile(npa(params["bh"]) + npa(params["bv"]), G)[None, :]  # (1,Cp)

    # ---- lane-block reduce / expand constants ----
    psum = np.kron(eye_G, np.ones((C, 1), f32))                      # (Cp,G)
    pexp = np.kron(eye_G, np.ones((1, C), f32))                      # (G,Cp)

    # ---- head params ----
    gnr = np.tile(npa(params["gnr"]), G)[None, :]                    # (1,Cp)
    bnr = np.tile(npa(params["bnr"]), G)[None, :]
    wfc_big = np.zeros((Cp, OUT_LANES), f32)
    bfc_big = np.zeros((1, OUT_LANES), f32)
    wfcT = npa(params["wfc"]).T                                      # (C,out)
    bfc = npa(params["bfc"])
    for g in range(G):
        wfc_big[g * C:(g + 1) * C, g * OUTp:g * OUTp + out_channels] = wfcT
        bfc_big[0, g * OUTp:g * OUTp + out_channels] = bfc

    def fn(x):
        B, N, C_in = x.shape
        assert N == HW and C_in == C
        BT = _round_up(batch_tile if batch_tile is not None else min(B, 32), G)
        BT = max(BT, G)
        num_tiles = max(1, -(-B // BT))
        Bpad = num_tiles * BT
        NG = BT // G
        Mg = NG * HW_pad

        # trace-time constants (numpy -> baked into the compiled program)
        eye_NG = np.eye(NG, dtype=f32)
        selT = np.stack([np.kron(eye_NG, r[None, :]) for r in region_i])
        bsel = np.kron(eye_NG, np.ones((HW_pad, 1), f32))            # (Mg,NG)
        selp = np.kron(eye_NG, (region_f / float(Hf * Hf))[None, :])  # (NG,Mg)
        mc = np.tile(region_f[:, None], (NG, 1))                     # (Mg,1)
        ln_g = np.stack([np.tile(v, (NG, 1)) for v in ln_g_rows])    # (nc,Mg,Cp)
        ln_b = np.stack([np.tile(v, (NG, 1)) for v in ln_b_rows])

        consts = (jnp.asarray(selT), jnp.asarray(bsel),
                  jnp.asarray(ln_g), jnp.asarray(ln_b),
                  jnp.asarray(w3, dtype=jnp.bfloat16), jnp.asarray(cb),
                  jnp.asarray(wsc, dtype=jnp.bfloat16),
                  jnp.asarray(wsh, dtype=jnp.bfloat16),
                  jnp.asarray(bs), jnp.asarray(mc), jnp.asarray(selp),
                  jnp.asarray(psum), jnp.asarray(pexp),
                  jnp.asarray(gnr), jnp.asarray(bnr),
                  jnp.asarray(wfc_big, dtype=jnp.bfloat16),
                  jnp.asarray(bfc_big))

        # pack input: (B, HW, C) -> (num_tiles, Mg, Cp), G elements per lane blk
        xpad = jnp.pad(x.astype(jnp.float32),
                       ((0, Bpad - B), (0, HW_pad - HW), (0, 0)))
        xp = xpad.reshape(num_tiles, NG, G, HW_pad, C)
        xp = jnp.transpose(xp, (0, 1, 3, 2, 4)).reshape(num_tiles, Mg, Cp)

        kernel = _make_kernel(C, A, nc, G, NG, HW_pad)

        def full_spec(a):
            return pl.BlockSpec(a.shape, lambda t, _nd=a.ndim: (0,) * _nd)

        out = pl.pallas_call(
            kernel,
            out_shape=jax.ShapeDtypeStruct((num_tiles, NG, OUT_LANES),
                                           jnp.float32),
            grid=(num_tiles,),
            in_specs=[pl.BlockSpec((1, Mg, Cp), lambda t: (t, 0, 0))]
                     + [full_spec(a) for a in consts],
            out_specs=pl.BlockSpec((1, NG, OUT_LANES), lambda t: (t, 0, 0)),
            compiler_params=pltpu.CompilerParams(
                dimension_semantics=("parallel",),
                vmem_limit_bytes=32 * 1024 * 1024),
        )(xp, *consts)

        out = out.reshape(num_tiles * NG * G, OUTp)
        return out[:B, :out_channels]

    return jax.jit(fn)


# ----------------------------------------------------------------------------
# Pure-JAX reference (mirrors the PyTorch forward) for validation
# ----------------------------------------------------------------------------
def reference_forward(x, params, *, feat_size, num_convs):
    B, N, C = x.shape
    A = feat_size
    hp = lax.Precision.HIGHEST
    dn = ("NCHW", "OIHW", "NCHW")
    feat = jnp.transpose(x, (0, 2, 1)).reshape(B, C, A, A)
    for i in range(num_convs):
        mu = feat.mean(axis=(1, 2, 3), keepdims=True)
        var = ((feat - mu) ** 2).mean(axis=(1, 2, 3), keepdims=True)
        feat = (feat - mu) / jnp.sqrt(var + EPS)
        feat = feat * params["ln_g"][i][None] + params["ln_b"][i][None]
        feat = lax.conv_general_dilated(feat, params["conv_w"][i], (1, 1),
                                        "VALID", dimension_numbers=dn,
                                        precision=hp)
        feat = feat + params["conv_b"][i][None, :, None, None]
        feat = jnp.maximum(feat, 0.0)
    oh = lax.conv_general_dilated(feat, params["wh"], (1, 1), ((0, 0), (1, 1)),
                                  dimension_numbers=dn, precision=hp)
    oh = oh + params["bh"][None, :, None, None]
    ov = lax.conv_general_dilated(feat, params["wv"], (1, 1), ((1, 1), (0, 0)),
                                  dimension_numbers=dn, precision=hp)
    ov = ov + params["bv"][None, :, None, None]
    feat = oh + ov
    pooled = feat.reshape(B, C, -1).mean(axis=2)
    mu = pooled.mean(axis=1, keepdims=True)
    var = ((pooled - mu) ** 2).mean(axis=1, keepdims=True)
    pn = (pooled - mu) / jnp.sqrt(var + EPS) * params["gnr"][None] + params["bnr"][None]
    return jnp.dot(pn, params["wfc"].T, precision=hp) + params["bfc"][None]


def init_params(key, C, out_channels, num_convs, feat_size):
    ks = iter(jax.random.split(key, 4 * num_convs + 10))
    p = {"ln_g": [], "ln_b": [], "conv_w": [], "conv_b": []}
    for i in range(num_convs):
        Hi = feat_size - 2 * i
        p["ln_g"].append(1.0 + 0.05 * jax.random.normal(next(ks), (C, Hi, Hi), jnp.float32))
        p["ln_b"].append(0.05 * jax.random.normal(next(ks), (C, Hi, Hi), jnp.float32))
        p["conv_w"].append(jax.random.normal(next(ks), (C, C, 3, 3), jnp.float32) / np.sqrt(9 * C))
        p["conv_b"].append(0.02 * jax.random.normal(next(ks), (C,), jnp.float32))
    p["wh"] = jax.random.normal(next(ks), (C, C, 1, 3), jnp.float32) / np.sqrt(3 * C)
    p["bh"] = 0.02 * jax.random.normal(next(ks), (C,), jnp.float32)
    p["wv"] = jax.random.normal(next(ks), (C, C, 3, 1), jnp.float32) / np.sqrt(3 * C)
    p["bv"] = 0.02 * jax.random.normal(next(ks), (C,), jnp.float32)
    p["gnr"] = 1.0 + 0.05 * jax.random.normal(next(ks), (C,), jnp.float32)
    p["bnr"] = 0.05 * jax.random.normal(next(ks), (C,), jnp.float32)
    p["wfc"] = jax.random.normal(next(ks), (out_channels, C), jnp.float32) / np.sqrt(C)
    p["bfc"] = 0.02 * jax.random.normal(next(ks), (out_channels,), jnp.float32)
    return p


if __name__ == "__main__":
    B, C, A, NUM_CONVS, OUT = 10, 32, 9, 3, 2   # small shapes; N = A*A = 81
    N = A * A
    key = jax.random.PRNGKey(0)
    kx, kp = jax.random.split(key)
    x = jax.random.normal(kx, (B, N, C), jnp.float32)
    params = init_params(kp, C, OUT, NUM_CONVS, A)

    fwd = make_layer_reg_with_strip_conv(params, feat_size=A,
                                         num_convs=NUM_CONVS,
                                         out_channels=OUT)
    out = jax.block_until_ready(fwd(x))

    ref = reference_forward(x, params, feat_size=A, num_convs=NUM_CONVS)
    # bf16 matmul operands (f32 accumulation) -> relaxed tolerance
    np.testing.assert_allclose(np.asarray(out), np.asarray(ref),
                               rtol=5e-2, atol=5e-2)
    print("KERNEL_OK")
</pallas_src>

<mosaic_0001>
module attributes {stable_mosaic.version = 11 : i64} {
  func.func @kernel(%arg0: i32, %arg1: memref<1x312x128xf32, #tpu.memory_space<vmem>>, %arg2: memref<3x3x312xf32, #tpu.memory_space<vmem>>, %arg3: memref<312x3xf32, #tpu.memory_space<vmem>>, %arg4: memref<3x312x128xf32, #tpu.memory_space<vmem>>, %arg5: memref<3x312x128xf32, #tpu.memory_space<vmem>>, %arg6: memref<3x384x384xbf16, #tpu.memory_space<vmem>>, %arg7: memref<3x1x128xf32, #tpu.memory_space<vmem>>, %arg8: memref<384x128xbf16, #tpu.memory_space<vmem>>, %arg9: memref<128x256xbf16, #tpu.memory_space<vmem>>, %arg10: memref<1x128xf32, #tpu.memory_space<vmem>>, %arg11: memref<312x1xf32, #tpu.memory_space<vmem>>, %arg12: memref<3x312xf32, #tpu.memory_space<vmem>>, %arg13: memref<128x4xf32, #tpu.memory_space<vmem>>, %arg14: memref<4x128xf32, #tpu.memory_space<vmem>>, %arg15: memref<1x128xf32, #tpu.memory_space<vmem>>, %arg16: memref<1x128xf32, #tpu.memory_space<vmem>>, %arg17: memref<128x128xbf16, #tpu.memory_space<vmem>>, %arg18: memref<1x128xf32, #tpu.memory_space<vmem>>, %arg19: memref<1x3x128xf32, #tpu.memory_space<vmem>>) attributes {dimension_semantics = [#tpu.dimension_semantics<parallel>], iteration_bounds = array<i64: 1>, scalar_prefetch = 0 : i64, scratch_operands = 0 : i64, tpu.core_type = #tpu.core_type<tc>, window_params = [{transform_indices = @transform_0, window_bounds = array<i64: 1, 312, 128>}, {pipeline_mode = #tpu.pipeline_mode<synchronous>, transform_indices = @transform_1, window_bounds = array<i64: 3, 3, 312>}, {pipeline_mode = #tpu.pipeline_mode<synchronous>, transform_indices = @transform_2, window_bounds = array<i64: 312, 3>}, {pipeline_mode = #tpu.pipeline_mode<synchronous>, transform_indices = @transform_3, window_bounds = array<i64: 3, 312, 128>}, {pipeline_mode = #tpu.pipeline_mode<synchronous>, transform_indices = @transform_4, window_bounds = array<i64: 3, 312, 128>}, {pipeline_mode = #tpu.pipeline_mode<synchronous>, transform_indices = @transform_5, window_bounds = array<i64: 3, 384, 384>}, {pipeline_mode = #tpu.pipeline_mode<synchronous>, transform_indices = @transform_6, window_bounds = array<i64: 3, 1, 128>}, {pipeline_mode = #tpu.pipeline_mode<synchronous>, transform_indices = @transform_7, window_bounds = array<i64: 384, 128>}, {pipeline_mode = #tpu.pipeline_mode<synchronous>, transform_indices = @transform_8, window_bounds = array<i64: 128, 256>}, {pipeline_mode = #tpu.pipeline_mode<synchronous>, transform_indices = @transform_9, window_bounds = array<i64: 1, 128>}, {pipeline_mode = #tpu.pipeline_mode<synchronous>, transform_indices = @transform_10, window_bounds = array<i64: 312, 1>}, {pipeline_mode = #tpu.pipeline_mode<synchronous>, transform_indices = @transform_11, window_bounds = array<i64: 3, 312>}, {pipeline_mode = #tpu.pipeline_mode<synchronous>, transform_indices = @transform_12, window_bounds = array<i64: 128, 4>}, {pipeline_mode = #tpu.pipeline_mode<synchronous>, transform_indices = @transform_13, window_bounds = array<i64: 4, 128>}, {pipeline_mode = #tpu.pipeline_mode<synchronous>, transform_indices = @transform_14, window_bounds = array<i64: 1, 128>}, {pipeline_mode = #tpu.pipeline_mode<synchronous>, transform_indices = @transform_15, window_bounds = array<i64: 1, 128>}, {pipeline_mode = #tpu.pipeline_mode<synchronous>, transform_indices = @transform_16, window_bounds = array<i64: 128, 128>}, {pipeline_mode = #tpu.pipeline_mode<synchronous>, transform_indices = @transform_17, window_bounds = array<i64: 1, 128>}, {transform_indices = @transform_18, window_bounds = array<i64: 1, 3, 128>}]} {
    %c0 = arith.constant 0 : index
    %c0_0 = arith.constant 0 : index
    %c0_1 = arith.constant 0 : index
    %0 = vector.load %arg1[%c0, %c0_0, %c0_1] : memref<1x312x128xf32, #tpu.memory_space<vmem>>, vector<1x312x128xf32>
    %1 = vector.shape_cast %0 : vector<1x312x128xf32> to vector<312x128xf32>
    %c0_2 = arith.constant 0 : index
    %c0_3 = arith.constant 0 : index
    %2 = vector.load %arg3[%c0_2, %c0_3] : memref<312x3xf32, #tpu.memory_space<vmem>>, vector<312x3xf32>
    %c0_4 = arith.constant 0 : index
    %c0_5 = arith.constant 0 : index
    %3 = vector.load %arg13[%c0_4, %c0_5] : memref<128x4xf32, #tpu.memory_space<vmem>>, vector<128x4xf32>
    %c0_6 = arith.constant 0 : index
    %c0_7 = arith.constant 0 : index
    %4 = vector.load %arg14[%c0_6, %c0_7] : memref<4x128xf32, #tpu.memory_space<vmem>>, vector<4x128xf32>
    %5 = arith.mulf %1, %1 : vector<312x128xf32>
    %6 = tpu.concatenate %1, %5 in 1 : vector<312x128xf32>, vector<312x128xf32> -> vector<312x256xf32>
    %c0_8 = arith.constant 0 : index
    %c0_9 = arith.constant 0 : index
    %c0_10 = arith.constant 0 : index
    %7 = vector.load %arg2[%c0_8, %c0_9, %c0_10] : memref<3x3x312xf32, #tpu.memory_space<vmem>>, vector<1x3x312xf32>
    %8 = vector.shape_cast %7 : vector<1x3x312xf32> to vector<3x312xf32>
    %cst = arith.constant dense<0.000000e+00> : vector<3x256xf32>
    %9 = tpu.matmul %8, %6, %cst {dimension_numbers = #tpu.dot_dimension_numbers<[1], [0], [0], [1], [0, 0, 1, 1], [], []>} : vector<3x312xf32>, vector<312x256xf32>, vector<3x256xf32> -> vector<3x256xf32>
    %10 = vector.extract_strided_slice %9 {offsets = [0, 0], sizes = [3, 128], strides = [1, 1]} : vector<3x256xf32> to vector<3x128xf32>
    %cst_11 = arith.constant dense<0.000000e+00> : vector<3x4xf32>
    %11 = tpu.matmul %10, %3, %cst_11 {dimension_numbers = #tpu.dot_dimension_numbers<[1], [0], [0], [1], [0, 0, 1, 1], [], []>} : vector<3x128xf32>, vector<128x4xf32>, vector<3x4xf32> -> vector<3x4xf32>
    %cst_12 = arith.constant 3.85802472E-4 : f32
    %12 = vector.broadcast %cst_12 : f32 to vector<3x4xf32>
    %13 = arith.mulf %11, %12 : vector<3x4xf32>
    %14 = vector.extract_strided_slice %9 {offsets = [0, 128], sizes = [3, 128], strides = [1, 1]} : vector<3x256xf32> to vector<3x128xf32>
    %cst_13 = arith.constant dense<0.000000e+00> : vector<3x4xf32>
    %15 = tpu.matmul %14, %3, %cst_13 {dimension_numbers = #tpu.dot_dimension_numbers<[1], [0], [0], [1], [0, 0, 1, 1], [], []>} : vector<3x128xf32>, vector<128x4xf32>, vector<3x4xf32> -> vector<3x4xf32>
    %cst_14 = arith.constant 3.85802472E-4 : f32
    %16 = vector.broadcast %cst_14 : f32 to vector<3x4xf32>
    %17 = arith.mulf %15, %16 : vector<3x4xf32>
    %18 = arith.mulf %13, %13 : vector<3x4xf32>
    %19 = arith.subf %17, %18 : vector<3x4xf32>
    %cst_15 = arith.constant 0.000000e+00 : f32
    %20 = vector.broadcast %cst_15 : f32 to vector<3x4xf32>
    %21 = arith.maximumf %19, %20 : vector<3x4xf32>
    %cst_16 = arith.constant 9.99999974E-6 : f32
    %22 = vector.broadcast %cst_16 : f32 to vector<3x4xf32>
    %23 = arith.addf %21, %22 : vector<3x4xf32>
    %24 = math.rsqrt %23 : vector<3x4xf32>
    %cst_17 = arith.constant dense<0.000000e+00> : vector<3x128xf32>
    %25 = tpu.matmul %13, %4, %cst_17 {dimension_numbers = #tpu.dot_dimension_numbers<[1], [0], [0], [1], [0, 0, 1, 1], [], []>} : vector<3x4xf32>, vector<4x128xf32>, vector<3x128xf32> -> vector<3x128xf32>
    %cst_18 = arith.constant dense<0.000000e+00> : vector<3x128xf32>
    %26 = tpu.matmul %24, %4, %cst_18 {dimension_numbers = #tpu.dot_dimension_numbers<[1], [0], [0], [1], [0, 0, 1, 1], [], []>} : vector<3x4xf32>, vector<4x128xf32>, vector<3x128xf32> -> vector<3x128xf32>
    %27 = tpu.concatenate %25, %26 in 1 : vector<3x128xf32>, vector<3x128xf32> -> vector<3x256xf32>
    %cst_19 = arith.constant dense<0.000000e+00> : vector<312x256xf32>
    %28 = tpu.matmul %2, %27, %cst_19 {dimension_numbers = #tpu.dot_dimension_numbers<[1], [0], [0], [1], [0, 0, 1, 1], [], []>} : vector<312x3xf32>, vector<3x256xf32>, vector<312x256xf32> -> vector<312x256xf32>
    %29 = vector.extract_strided_slice %28 {offsets = [0, 0], sizes = [312, 128], strides = [1, 1]} : vector<312x256xf32> to vector<312x128xf32>
    %30 = arith.subf %1, %29 : vector<312x128xf32>
    %31 = vector.extract_strided_slice %28 {offsets = [0, 128], sizes = [312, 128], strides = [1, 1]} : vector<312x256xf32> to vector<312x128xf32>
    %32 = arith.mulf %30, %31 : vector<312x128xf32>
    %c0_20 = arith.constant 0 : index
    %c0_21 = arith.constant 0 : index
    %c0_22 = arith.constant 0 : index
    %33 = vector.load %arg4[%c0_20, %c0_21, %c0_22] : memref<3x312x128xf32, #tpu.memory_space<vmem>>, vector<1x312x128xf32>
    %34 = vector.shape_cast %33 : vector<1x312x128xf32> to vector<312x128xf32>
    %35 = arith.mulf %32, %34 : vector<312x128xf32>
    %c0_23 = arith.constant 0 : index
    %c0_24 = arith.constant 0 : index
    %c0_25 = arith.constant 0 : index
    %36 = vector.load %arg5[%c0_23, %c0_24, %c0_25] : memref<3x312x128xf32, #tpu.memory_space<vmem>>, vector<1x312x128xf32>
    %37 = vector.shape_cast %36 : vector<1x312x128xf32> to vector<312x128xf32>
    %38 = arith.addf %35, %37 : vector<312x128xf32>
    %39 = arith.truncf %38 : vector<312x128xf32> to vector<312x128xbf16>
    %c303_i32 = arith.constant 303 : i32
    %40 = tpu.dynamic_rotate %38 by %c303_i32 dim 0 : vector<312x128xf32>, i32 -> vector<312x128xf32>
    %41 = arith.truncf %40 : vector<312x128xf32> to vector<312x128xbf16>
    %c294_i32 = arith.constant 294 : i32
    %42 = tpu.dynamic_rotate %38 by %c294_i32 dim 0 : vector<312x128xf32>, i32 -> vector<312x128xf32>
    %43 = arith.truncf %42 : vector<312x128xf32> to vector<312x128xbf16>
    %44 = tpu.concatenate %39, %41, %43 in 1 : vector<312x128xbf16>, vector<312x128xbf16>, vector<312x128xbf16> -> vector<312x384xbf16>
    %c0_26 = arith.constant 0 : index
    %c0_27 = arith.constant 0 : index
    %c0_28 = arith.constant 0 : index
    %45 = vector.load %arg6[%c0_26, %c0_27, %c0_28] : memref<3x384x384xbf16, #tpu.memory_space<vmem>>, vector<1x384x384xbf16>
    %46 = vector.shape_cast %45 : vector<1x384x384xbf16> to vector<384x384xbf16>
    %cst_29 = arith.constant dense<0.000000e+00> : vector<312x384xf32>
    %47 = tpu.matmul %44, %46, %cst_29 {dimension_numbers = #tpu.dot_dimension_numbers<[1], [0], [0], [1], [0, 0, 1, 1], [], []>} : vector<312x384xbf16>, vector<384x384xbf16>, vector<312x384xf32> -> vector<312x384xf32>
    %48 = vector.extract_strided_slice %47 {offsets = [0, 0], sizes = [312, 128], strides = [1, 1]} : vector<312x384xf32> to vector<312x128xf32>
    %49 = vector.extract_strided_slice %47 {offsets = [0, 128], sizes = [312, 128], strides = [1, 1]} : vector<312x384xf32> to vector<312x128xf32>
    %c311_i32 = arith.constant 311 : i32
    %50 = tpu.dynamic_rotate %49 by %c311_i32 dim 0 : vector<312x128xf32>, i32 -> vector<312x128xf32>
    %51 = arith.addf %48, %50 : vector<312x128xf32>
    %52 = vector.extract_strided_slice %47 {offsets = [0, 256], sizes = [312, 128], strides = [1, 1]} : vector<312x384xf32> to vector<312x128xf32>
    %c310_i32 = arith.constant 310 : i32
    %53 = tpu.dynamic_rotate %52 by %c310_i32 dim 0 : vector<312x128xf32>, i32 -> vector<312x128xf32>
    %54 = arith.addf %51, %53 : vector<312x128xf32>
    %c0_30 = arith.constant 0 : index
    %c0_31 = arith.constant 0 : index
    %c0_32 = arith.constant 0 : index
    %55 = vector.load %arg7[%c0_30, %c0_31, %c0_32] : memref<3x1x128xf32, #tpu.memory_space<vmem>>, vector<1x1x128xf32>
    %56 = vector.shape_cast %55 : vector<1x1x128xf32> to vector<1x128xf32>
    %57 = vector.broadcast %56 : vector<1x128xf32> to vector<312x128xf32>
    %58 = arith.addf %54, %57 : vector<312x128xf32>
    %cst_33 = arith.constant 0.000000e+00 : f32
    %59 = vector.broadcast %cst_33 : f32 to vector<312x128xf32>
    %60 = arith.maximumf %58, %59 : vector<312x128xf32>
    %61 = arith.mulf %60, %60 : vector<312x128xf32>
    %62 = tpu.concatenate %60, %61 in 1 : vector<312x128xf32>, vector<312x128xf32> -> vector<312x256xf32>
    %c1 = arith.constant 1 : index
    %c0_34 = arith.constant 0 : index
    %c0_35 = arith.constant 0 : index
    %63 = vector.load %arg2[%c1, %c0_34, %c0_35] : memref<3x3x312xf32, #tpu.memory_space<vmem>>, vector<1x3x312xf32>
    %64 = vector.shape_cast %63 : vector<1x3x312xf32> to vector<3x312xf32>
    %cst_36 = arith.constant dense<0.000000e+00> : vector<3x256xf32>
    %65 = tpu.matmul %64, %62, %cst_36 {dimension_numbers = #tpu.dot_dimension_numbers<[1], [0], [0], [1], [0, 0, 1, 1], [], []>} : vector<3x312xf32>, vector<312x256xf32>, vector<3x256xf32> -> vector<3x256xf32>
    %66 = vector.extract_strided_slice %65 {offsets = [0, 0], sizes = [3, 128], strides = [1, 1]} : vector<3x256xf32> to vector<3x128xf32>
    %cst_37 = arith.constant dense<0.000000e+00> : vector<3x4xf32>
    %67 = tpu.matmul %66, %3, %cst_37 {dimension_numbers = #tpu.dot_dimension_numbers<[1], [0], [0], [1], [0, 0, 1, 1], [], []>} : vector<3x128xf32>, vector<128x4xf32>, vector<3x4xf32> -> vector<3x4xf32>
    %cst_38 = arith.constant 6.37755089E-4 : f32
    %68 = vector.broadcast %cst_38 : f32 to vector<3x4xf32>
    %69 = arith.mulf %67, %68 : vector<3x4xf32>
    %70 = vector.extract_strided_slice %65 {offsets = [0, 128], sizes = [3, 128], strides = [1, 1]} : vector<3x256xf32> to vector<3x128xf32>
    %cst_39 = arith.constant dense<0.000000e+00> : vector<3x4xf32>
    %71 = tpu.matmul %70, %3, %cst_39 {dimension_numbers = #tpu.dot_dimension_numbers<[1], [0], [0], [1], [0, 0, 1, 1], [], []>} : vector<3x128xf32>, vector<128x4xf32>, vector<3x4xf32> -> vector<3x4xf32>
    %cst_40 = arith.constant 6.37755089E-4 : f32
    %72 = vector.broadcast %cst_40 : f32 to vector<3x4xf32>
    %73 = arith.mulf %71, %72 : vector<3x4xf32>
    %74 = arith.mulf %69, %69 : vector<3x4xf32>
    %75 = arith.subf %73, %74 : vector<3x4xf32>
    %cst_41 = arith.constant 0.000000e+00 : f32
    %76 = vector.broadcast %cst_41 : f32 to vector<3x4xf32>
    %77 = arith.maximumf %75, %76 : vector<3x4xf32>
    %cst_42 = arith.constant 9.99999974E-6 : f32
    %78 = vector.broadcast %cst_42 : f32 to vector<3x4xf32>
    %79 = arith.addf %77, %78 : vector<3x4xf32>
    %80 = math.rsqrt %79 : vector<3x4xf32>
    %cst_43 = arith.constant dense<0.000000e+00> : vector<3x128xf32>
    %81 = tpu.matmul %69, %4, %cst_43 {dimension_numbers = #tpu.dot_dimension_numbers<[1], [0], [0], [1], [0, 0, 1, 1], [], []>} : vector<3x4xf32>, vector<4x128xf32>, vector<3x128xf32> -> vector<3x128xf32>
    %cst_44 = arith.constant dense<0.000000e+00> : vector<3x128xf32>
    %82 = tpu.matmul %80, %4, %cst_44 {dimension_numbers = #tpu.dot_dimension_numbers<[1], [0], [0], [1], [0, 0, 1, 1], [], []>} : vector<3x4xf32>, vector<4x128xf32>, vector<3x128xf32> -> vector<3x128xf32>
    %83 = tpu.concatenate %81, %82 in 1 : vector<3x128xf32>, vector<3x128xf32> -> vector<3x256xf32>
    %cst_45 = arith.constant dense<0.000000e+00> : vector<312x256xf32>
    %84 = tpu.matmul %2, %83, %cst_45 {dimension_numbers = #tpu.dot_dimension_numbers<[1], [0], [0], [1], [0, 0, 1, 1], [], []>} : vector<312x3xf32>, vector<3x256xf32>, vector<312x256xf32> -> vector<312x256xf32>
    %85 = vector.extract_strided_slice %84 {offsets = [0, 0], sizes = [312, 128], strides = [1, 1]} : vector<312x256xf32> to vector<312x128xf32>
    %86 = arith.subf %60, %85 : vector<312x128xf32>
    %87 = vector.extract_strided_slice %84 {offsets = [0, 128], sizes = [312, 128], strides = [1, 1]} : vector<312x256xf32> to vector<312x128xf32>
    %88 = arith.mulf %86, %87 : vector<312x128xf32>
    %c1_46 = arith.constant 1 : index
    %c0_47 = arith.constant 0 : index
    %c0_48 = arith.constant 0 : index
    %89 = vector.load %arg4[%c1_46, %c0_47, %c0_48] : memref<3x312x128xf32, #tpu.memory_space<vmem>>, vector<1x312x128xf32>
    %90 = vector.shape_cast %89 : vector<1x312x128xf32> to vector<312x128xf32>
    %91 = arith.mulf %88, %90 : vector<312x128xf32>
    %c1_49 = arith.constant 1 : index
    %c0_50 = arith.constant 0 : index
    %c0_51 = arith.constant 0 : index
    %92 = vector.load %arg5[%c1_49, %c0_50, %c0_51] : memref<3x312x128xf32, #tpu.memory_space<vmem>>, vector<1x312x128xf32>
    %93 = vector.shape_cast %92 : vector<1x312x128xf32> to vector<312x128xf32>
    %94 = arith.addf %91, %93 : vector<312x128xf32>
    %95 = arith.truncf %94 : vector<312x128xf32> to vector<312x128xbf16>
    %c303_i32_52 = arith.constant 303 : i32
    %96 = tpu.dynamic_rotate %94 by %c303_i32_52 dim 0 : vector<312x128xf32>, i32 -> vector<312x128xf32>
    %97 = arith.truncf %96 : vector<312x128xf32> to vector<312x128xbf16>
    %c294_i32_53 = arith.constant 294 : i32
    %98 = tpu.dynamic_rotate %94 by %c294_i32_53 dim 0 : vector<312x128xf32>, i32 -> vector<312x128xf32>
    %99 = arith.truncf %98 : vector<312x128xf32> to vector<312x128xbf16>
    %100 = tpu.concatenate %95, %97, %99 in 1 : vector<312x128xbf16>, vector<312x128xbf16>, vector<312x128xbf16> -> vector<312x384xbf16>
    %c1_54 = arith.constant 1 : index
    %c0_55 = arith.constant 0 : index
    %c0_56 = arith.constant 0 : index
    %101 = vector.load %arg6[%c1_54, %c0_55, %c0_56] : memref<3x384x384xbf16, #tpu.memory_space<vmem>>, vector<1x384x384xbf16>
    %102 = vector.shape_cast %101 : vector<1x384x384xbf16> to vector<384x384xbf16>
    %cst_57 = arith.constant dense<0.000000e+00> : vector<312x384xf32>
    %103 = tpu.matmul %100, %102, %cst_57 {dimension_numbers = #tpu.dot_dimension_numbers<[1], [0], [0], [1], [0, 0, 1, 1], [], []>} : vector<312x384xbf16>, vector<384x384xbf16>, vector<312x384xf32> -> vector<312x384xf32>
    %104 = vector.extract_strided_slice %103 {offsets = [0, 0], sizes = [312, 128], strides = [1, 1]} : vector<312x384xf32> to vector<312x128xf32>
    %105 = vector.extract_strided_slice %103 {offsets = [0, 128], sizes = [312, 128], strides = [1, 1]} : vector<312x384xf32> to vector<312x128xf32>
    %c311_i32_58 = arith.constant 311 : i32
    %106 = tpu.dynamic_rotate %105 by %c311_i32_58 dim 0 : vector<312x128xf32>, i32 -> vector<312x128xf32>
    %107 = arith.addf %104, %106 : vector<312x128xf32>
    %108 = vector.extract_strided_slice %103 {offsets = [0, 256], sizes = [312, 128], strides = [1, 1]} : vector<312x384xf32> to vector<312x128xf32>
    %c310_i32_59 = arith.constant 310 : i32
    %109 = tpu.dynamic_rotate %108 by %c310_i32_59 dim 0 : vector<312x128xf32>, i32 -> vector<312x128xf32>
    %110 = arith.addf %107, %109 : vector<312x128xf32>
    %c1_60 = arith.constant 1 : index
    %c0_61 = arith.constant 0 : index
    %c0_62 = arith.constant 0 : index
    %111 = vector.load %arg7[%c1_60, %c0_61, %c0_62] : memref<3x1x128xf32, #tpu.memory_space<vmem>>, vector<1x1x128xf32>
    %112 = vector.shape_cast %111 : vector<1x1x128xf32> to vector<1x128xf32>
    %113 = vector.broadcast %112 : vector<1x128xf32> to vector<312x128xf32>
    %114 = arith.addf %110, %113 : vector<312x128xf32>
    %cst_63 = arith.constant 0.000000e+00 : f32
    %115 = vector.broadcast %cst_63 : f32 to vector<312x128xf32>
    %116 = arith.maximumf %114, %115 : vector<312x128xf32>
    %117 = arith.mulf %116, %116 : vector<312x128xf32>
    %118 = tpu.concatenate %116, %117 in 1 : vector<312x128xf32>, vector<312x128xf32> -> vector<312x256xf32>
    %c2 = arith.constant 2 : index
    %c0_64 = arith.constant 0 : index
    %c0_65 = arith.constant 0 : index
    %119 = vector.load %arg2[%c2, %c0_64, %c0_65] : memref<3x3x312xf32, #tpu.memory_space<vmem>>, vector<1x3x312xf32>
    %120 = vector.shape_cast %119 : vector<1x3x312xf32> to vector<3x312xf32>
    %cst_66 = arith.constant dense<0.000000e+00> : vector<3x256xf32>
    %121 = tpu.matmul %120, %118, %cst_66 {dimension_numbers = #tpu.dot_dimension_numbers<[1], [0], [0], [1], [0, 0, 1, 1], [], []>} : vector<3x312xf32>, vector<312x256xf32>, vector<3x256xf32> -> vector<3x256xf32>
    %122 = vector.extract_strided_slice %121 {offsets = [0, 0], sizes = [3, 128], strides = [1, 1]} : vector<3x256xf32> to vector<3x128xf32>
    %cst_67 = arith.constant dense<0.000000e+00> : vector<3x4xf32>
    %123 = tpu.matmul %122, %3, %cst_67 {dimension_numbers = #tpu.dot_dimension_numbers<[1], [0], [0], [1], [0, 0, 1, 1], [], []>} : vector<3x128xf32>, vector<128x4xf32>, vector<3x4xf32> -> vector<3x4xf32>
    %cst_68 = arith.constant 1.250000e-03 : f32
    %124 = vector.broadcast %cst_68 : f32 to vector<3x4xf32>
    %125 = arith.mulf %123, %124 : vector<3x4xf32>
    %126 = vector.extract_strided_slice %121 {offsets = [0, 128], sizes = [3, 128], strides = [1, 1]} : vector<3x256xf32> to vector<3x128xf32>
    %cst_69 = arith.constant dense<0.000000e+00> : vector<3x4xf32>
    %127 = tpu.matmul %126, %3, %cst_69 {dimension_numbers = #tpu.dot_dimension_numbers<[1], [0], [0], [1], [0, 0, 1, 1], [], []>} : vector<3x128xf32>, vector<128x4xf32>, vector<3x4xf32> -> vector<3x4xf32>
    %cst_70 = arith.constant 1.250000e-03 : f32
    %128 = vector.broadcast %cst_70 : f32 to vector<3x4xf32>
    %129 = arith.mulf %127, %128 : vector<3x4xf32>
    %130 = arith.mulf %125, %125 : vector<3x4xf32>
    %131 = arith.subf %129, %130 : vector<3x4xf32>
    %cst_71 = arith.constant 0.000000e+00 : f32
    %132 = vector.broadcast %cst_71 : f32 to vector<3x4xf32>
    %133 = arith.maximumf %131, %132 : vector<3x4xf32>
    %cst_72 = arith.constant 9.99999974E-6 : f32
    %134 = vector.broadcast %cst_72 : f32 to vector<3x4xf32>
    %135 = arith.addf %133, %134 : vector<3x4xf32>
    %136 = math.rsqrt %135 : vector<3x4xf32>
    %cst_73 = arith.constant dense<0.000000e+00> : vector<3x128xf32>
    %137 = tpu.matmul %125, %4, %cst_73 {dimension_numbers = #tpu.dot_dimension_numbers<[1], [0], [0], [1], [0, 0, 1, 1], [], []>} : vector<3x4xf32>, vector<4x128xf32>, vector<3x128xf32> -> vector<3x128xf32>
    %cst_74 = arith.constant dense<0.000000e+00> : vector<3x128xf32>
    %138 = tpu.matmul %136, %4, %cst_74 {dimension_numbers = #tpu.dot_dimension_numbers<[1], [0], [0], [1], [0, 0, 1, 1], [], []>} : vector<3x4xf32>, vector<4x128xf32>, vector<3x128xf32> -> vector<3x128xf32>
    %139 = tpu.concatenate %137, %138 in 1 : vector<3x128xf32>, vector<3x128xf32> -> vector<3x256xf32>
    %cst_75 = arith.constant dense<0.000000e+00> : vector<312x256xf32>
    %140 = tpu.matmul %2, %139, %cst_75 {dimension_numbers = #tpu.dot_dimension_numbers<[1], [0], [0], [1], [0, 0, 1, 1], [], []>} : vector<312x3xf32>, vector<3x256xf32>, vector<312x256xf32> -> vector<312x256xf32>
    %141 = vector.extract_strided_slice %140 {offsets = [0, 0], sizes = [312, 128], strides = [1, 1]} : vector<312x256xf32> to vector<312x128xf32>
    %142 = arith.subf %116, %141 : vector<312x128xf32>
    %143 = vector.extract_strided_slice %140 {offsets = [0, 128], sizes = [312, 128], strides = [1, 1]} : vector<312x256xf32> to vector<312x128xf32>
    %144 = arith.mulf %142, %143 : vector<312x128xf32>
    %c2_76 = arith.constant 2 : index
    %c0_77 = arith.constant 0 : index
    %c0_78 = arith.constant 0 : index
    %145 = vector.load %arg4[%c2_76, %c0_77, %c0_78] : memref<3x312x128xf32, #tpu.memory_space<vmem>>, vector<1x312x128xf32>
    %146 = vector.shape_cast %145 : vector<1x312x128xf32> to vector<312x128xf32>
    %147 = arith.mulf %144, %146 : vector<312x128xf32>
    %c2_79 = arith.constant 2 : index
    %c0_80 = arith.constant 0 : index
    %c0_81 = arith.constant 0 : index
    %148 = vector.load %arg5[%c2_79, %c0_80, %c0_81] : memref<3x312x128xf32, #tpu.memory_space<vmem>>, vector<1x312x128xf32>
    %149 = vector.shape_cast %148 : vector<1x312x128xf32> to vector<312x128xf32>
    %150 = arith.addf %147, %149 : vector<312x128xf32>
    %151 = arith.truncf %150 : vector<312x128xf32> to vector<312x128xbf16>
    %c303_i32_82 = arith.constant 303 : i32
    %152 = tpu.dynamic_rotate %150 by %c303_i32_82 dim 0 : vector<312x128xf32>, i32 -> vector<312x128xf32>
    %153 = arith.truncf %152 : vector<312x128xf32> to vector<312x128xbf16>
    %c294_i32_83 = arith.constant 294 : i32
    %154 = tpu.dynamic_rotate %150 by %c294_i32_83 dim 0 : vector<312x128xf32>, i32 -> vector<312x128xf32>
    %155 = arith.truncf %154 : vector<312x128xf32> to vector<312x128xbf16>
    %156 = tpu.concatenate %151, %153, %155 in 1 : vector<312x128xbf16>, vector<312x128xbf16>, vector<312x128xbf16> -> vector<312x384xbf16>
    %c2_84 = arith.constant 2 : index
    %c0_85 = arith.constant 0 : index
    %c0_86 = arith.constant 0 : index
    %157 = vector.load %arg6[%c2_84, %c0_85, %c0_86] : memref<3x384x384xbf16, #tpu.memory_space<vmem>>, vector<1x384x384xbf16>
    %158 = vector.shape_cast %157 : vector<1x384x384xbf16> to vector<384x384xbf16>
    %cst_87 = arith.constant dense<0.000000e+00> : vector<312x384xf32>
    %159 = tpu.matmul %156, %158, %cst_87 {dimension_numbers = #tpu.dot_dimension_numbers<[1], [0], [0], [1], [0, 0, 1, 1], [], []>} : vector<312x384xbf16>, vector<384x384xbf16>, vector<312x384xf32> -> vector<312x384xf32>
    %160 = vector.extract_strided_slice %159 {offsets = [0, 0], sizes = [312, 128], strides = [1, 1]} : vector<312x384xf32> to vector<312x128xf32>
    %161 = vector.extract_strided_slice %159 {offsets = [0, 128], sizes = [312, 128], strides = [1, 1]} : vector<312x384xf32> to vector<312x128xf32>
    %c311_i32_88 = arith.constant 311 : i32
    %162 = tpu.dynamic_rotate %161 by %c311_i32_88 dim 0 : vector<312x128xf32>, i32 -> vector<312x128xf32>
    %163 = arith.addf %160, %162 : vector<312x128xf32>
    %164 = vector.extract_strided_slice %159 {offsets = [0, 256], sizes = [312, 128], strides = [1, 1]} : vector<312x384xf32> to vector<312x128xf32>
    %c310_i32_89 = arith.constant 310 : i32
    %165 = tpu.dynamic_rotate %164 by %c310_i32_89 dim 0 : vector<312x128xf32>, i32 -> vector<312x128xf32>
    %166 = arith.addf %163, %165 : vector<312x128xf32>
    %c2_90 = arith.constant 2 : index
    %c0_91 = arith.constant 0 : index
    %c0_92 = arith.constant 0 : index
    %167 = vector.load %arg7[%c2_90, %c0_91, %c0_92] : memref<3x1x128xf32, #tpu.memory_space<vmem>>, vector<1x1x128xf32>
    %168 = vector.shape_cast %167 : vector<1x1x128xf32> to vector<1x128xf32>
    %169 = vector.broadcast %168 : vector<1x128xf32> to vector<312x128xf32>
    %170 = arith.addf %166, %169 : vector<312x128xf32>
    %cst_93 = arith.constant 0.000000e+00 : f32
    %171 = vector.broadcast %cst_93 : f32 to vector<312x128xf32>
    %172 = arith.maximumf %170, %171 : vector<312x128xf32>
    %c0_94 = arith.constant 0 : index
    %c0_95 = arith.constant 0 : index
    %173 = vector.load %arg11[%c0_94, %c0_95] : memref<312x1xf32, #tpu.memory_space<vmem>>, vector<312x1xf32>
    %174 = vector.broadcast %173 : vector<312x1xf32> to vector<312x128xf32>
    %175 = arith.mulf %172, %174 : vector<312x128xf32>
    %176 = arith.truncf %175 : vector<312x128xf32> to vector<312x128xbf16>
    %c9_i32 = arith.constant 9 : i32
    %177 = tpu.dynamic_rotate %175 by %c9_i32 dim 0 : vector<312x128xf32>, i32 -> vector<312x128xf32>
    %178 = arith.truncf %177 : vector<312x128xf32> to vector<312x128xbf16>
    %c303_i32_96 = arith.constant 303 : i32
    %179 = tpu.dynamic_rotate %175 by %c303_i32_96 dim 0 : vector<312x128xf32>, i32 -> vector<312x128xf32>
    %180 = arith.truncf %179 : vector<312x128xf32> to vector<312x128xbf16>
    %181 = tpu.concatenate %176, %178, %180 in 1 : vector<312x128xbf16>, vector<312x128xbf16>, vector<312x128xbf16> -> vector<312x384xbf16>
    %c0_97 = arith.constant 0 : index
    %c0_98 = arith.constant 0 : index
    %182 = vector.load %arg8[%c0_97, %c0_98] : memref<384x128xbf16, #tpu.memory_space<vmem>>, vector<384x128xbf16>
    %cst_99 = arith.constant dense<0.000000e+00> : vector<312x128xf32>
    %183 = tpu.matmul %181, %182, %cst_99 {dimension_numbers = #tpu.dot_dimension_numbers<[1], [0], [0], [1], [0, 0, 1, 1], [], []>} : vector<312x384xbf16>, vector<384x128xbf16>, vector<312x128xf32> -> vector<312x128xf32>
    %c0_100 = arith.constant 0 : index
    %c0_101 = arith.constant 0 : index
    %184 = vector.load %arg9[%c0_100, %c0_101] : memref<128x256xbf16, #tpu.memory_space<vmem>>, vector<128x256xbf16>
    %cst_102 = arith.constant dense<0.000000e+00> : vector<312x256xf32>
    %185 = tpu.matmul %176, %184, %cst_102 {dimension_numbers = #tpu.dot_dimension_numbers<[1], [0], [0], [1], [0, 0, 1, 1], [], []>} : vector<312x128xbf16>, vector<128x256xbf16>, vector<312x256xf32> -> vector<312x256xf32>
    %186 = vector.extract_strided_slice %185 {offsets = [0, 0], sizes = [312, 128], strides = [1, 1]} : vector<312x256xf32> to vector<312x128xf32>
    %c1_i32 = arith.constant 1 : i32
    %187 = tpu.dynamic_rotate %186 by %c1_i32 dim 0 : vector<312x128xf32>, i32 -> vector<312x128xf32>
    %188 = arith.addf %183, %187 : vector<312x128xf32>
    %189 = vector.extract_strided_slice %185 {offsets = [0, 128], sizes = [312, 128], strides = [1, 1]} : vector<312x256xf32> to vector<312x128xf32>
    %c311_i32_103 = arith.constant 311 : i32
    %190 = tpu.dynamic_rotate %189 by %c311_i32_103 dim 0 : vector<312x128xf32>, i32 -> vector<312x128xf32>
    %191 = arith.addf %188, %190 : vector<312x128xf32>
    %c0_104 = arith.constant 0 : index
    %c0_105 = arith.constant 0 : index
    %192 = vector.load %arg10[%c0_104, %c0_105] : memref<1x128xf32, #tpu.memory_space<vmem>>, vector<1x128xf32>
    %193 = vector.broadcast %192 : vector<1x128xf32> to vector<312x128xf32>
    %194 = arith.addf %191, %193 : vector<312x128xf32>
    %c0_106 = arith.constant 0 : index
    %c0_107 = arith.constant 0 : index
    %195 = vector.load %arg12[%c0_106, %c0_107] : memref<3x312xf32, #tpu.memory_space<vmem>>, vector<3x312xf32>
    %cst_108 = arith.constant dense<0.000000e+00> : vector<3x128xf32>
    %196 = tpu.matmul %195, %194, %cst_108 {dimension_numbers = #tpu.dot_dimension_numbers<[1], [0], [0], [1], [0, 0, 1, 1], [], []>} : vector<3x312xf32>, vector<312x128xf32>, vector<3x128xf32> -> vector<3x128xf32>
    %cst_109 = arith.constant dense<0.000000e+00> : vector<3x4xf32>
    %197 = tpu.matmul %196, %3, %cst_109 {dimension_numbers = #tpu.dot_dimension_numbers<[1], [0], [0], [1], [0, 0, 1, 1], [], []>} : vector<3x128xf32>, vector<128x4xf32>, vector<3x4xf32> -> vector<3x4xf32>
    %cst_110 = arith.constant 3.125000e-02 : f32
    %198 = vector.broadcast %cst_110 : f32 to vector<3x4xf32>
    %199 = arith.mulf %197, %198 : vector<3x4xf32>
    %200 = arith.mulf %196, %196 : vector<3x128xf32>
    %cst_111 = arith.constant dense<0.000000e+00> : vector<3x4xf32>
    %201 = tpu.matmul %200, %3, %cst_111 {dimension_numbers = #tpu.dot_dimension_numbers<[1], [0], [0], [1], [0, 0, 1, 1], [], []>} : vector<3x128xf32>, vector<128x4xf32>, vector<3x4xf32> -> vector<3x4xf32>
    %cst_112 = arith.constant 3.125000e-02 : f32
    %202 = vector.broadcast %cst_112 : f32 to vector<3x4xf32>
    %203 = arith.mulf %201, %202 : vector<3x4xf32>
    %204 = arith.mulf %199, %199 : vector<3x4xf32>
    %205 = arith.subf %203, %204 : vector<3x4xf32>
    %cst_113 = arith.constant 0.000000e+00 : f32
    %206 = vector.broadcast %cst_113 : f32 to vector<3x4xf32>
    %207 = arith.maximumf %205, %206 : vector<3x4xf32>
    %cst_114 = arith.constant 9.99999974E-6 : f32
    %208 = vector.broadcast %cst_114 : f32 to vector<3x4xf32>
    %209 = arith.addf %207, %208 : vector<3x4xf32>
    %210 = math.rsqrt %209 : vector<3x4xf32>
    %cst_115 = arith.constant dense<0.000000e+00> : vector<3x128xf32>
    %211 = tpu.matmul %199, %4, %cst_115 {dimension_numbers = #tpu.dot_dimension_numbers<[1], [0], [0], [1], [0, 0, 1, 1], [], []>} : vector<3x4xf32>, vector<4x128xf32>, vector<3x128xf32> -> vector<3x128xf32>
    %cst_116 = arith.constant dense<0.000000e+00> : vector<3x128xf32>
    %212 = tpu.matmul %210, %4, %cst_116 {dimension_numbers = #tpu.dot_dimension_numbers<[1], [0], [0], [1], [0, 0, 1, 1], [], []>} : vector<3x4xf32>, vector<4x128xf32>, vector<3x128xf32> -> vector<3x128xf32>
    %213 = arith.subf %196, %211 : vector<3x128xf32>
    %214 = arith.mulf %213, %212 : vector<3x128xf32>
    %c0_117 = arith.constant 0 : index
    %c0_118 = arith.constant 0 : index
    %215 = vector.load %arg15[%c0_117, %c0_118] : memref<1x128xf32, #tpu.memory_space<vmem>>, vector<1x128xf32>
    %216 = vector.broadcast %215 : vector<1x128xf32> to vector<3x128xf32>
    %217 = arith.mulf %214, %216 : vector<3x128xf32>
    %c0_119 = arith.constant 0 : index
    %c0_120 = arith.constant 0 : index
    %218 = vector.load %arg16[%c0_119, %c0_120] : memref<1x128xf32, #tpu.memory_space<vmem>>, vector<1x128xf32>
    %219 = vector.broadcast %218 : vector<1x128xf32> to vector<3x128xf32>
    %220 = arith.addf %217, %219 : vector<3x128xf32>
    %221 = arith.truncf %220 : vector<3x128xf32> to vector<3x128xbf16>
    %c0_121 = arith.constant 0 : index
    %c0_122 = arith.constant 0 : index
    %222 = vector.load %arg17[%c0_121, %c0_122] : memref<128x128xbf16, #tpu.memory_space<vmem>>, vector<128x128xbf16>
    %cst_123 = arith.constant dense<0.000000e+00> : vector<3x128xf32>
    %223 = tpu.matmul %221, %222, %cst_123 {dimension_numbers = #tpu.dot_dimension_numbers<[1], [0], [0], [1], [0, 0, 1, 1], [], []>} : vector<3x128xbf16>, vector<128x128xbf16>, vector<3x128xf32> -> vector<3x128xf32>
    %c0_124 = arith.constant 0 : index
    %c0_125 = arith.constant 0 : index
    %224 = vector.load %arg18[%c0_124, %c0_125] : memref<1x128xf32, #tpu.memory_space<vmem>>, vector<1x128xf32>
    %225 = vector.broadcast %224 : vector<1x128xf32> to vector<3x128xf32>
    %226 = arith.addf %223, %225 : vector<3x128xf32>
    %c0_126 = arith.constant 0 : index
    %c0_127 = arith.constant 0 : index
    %c0_128 = arith.constant 0 : index
    %227 = vector.load %arg19[%c0_126, %c0_127, %c0_128] : memref<1x3x128xf32, #tpu.memory_space<vmem>>, vector<1x3x128xf32>
    %228 = vector.shape_cast %227 : vector<1x3x128xf32> to vector<3x128xf32>
    %229 = vector.shape_cast %226 : vector<3x128xf32> to vector<1x3x128xf32>
    tpu.vector_store %arg19[%c0_126, %c0_127, %c0_128], %229 {strides = array<i32>} : memref<1x3x128xf32, #tpu.memory_space<vmem>>, vector<1x3x128xf32>,
    return
  }
  func.func @transform_0(%arg0: i32) -> (i32, i32, i32) {
    %c0_i32 = arith.constant 0 : i32
    %c0_i32_0 = arith.constant 0 : i32
    %c0_i32_1 = arith.constant 0 : i32
    return %arg0, %c0_i32, %c0_i32_0 : i32, i32, i32
  }
  func.func @transform_1(%arg0: i32) -> (i32, i32, i32) {
    %c0_i32 = arith.constant 0 : i32
    %c0_i32_0 = arith.constant 0 : i32
    %c0_i32_1 = arith.constant 0 : i32
    %c0_i32_2 = arith.constant 0 : i32
    return %c0_i32, %c0_i32_0, %c0_i32_1 : i32, i32, i32
  }
  func.func @transform_2(%arg0: i32) -> (i32, i32) {
    %c0_i32 = arith.constant 0 : i32
    %c0_i32_0 = arith.constant 0 : i32
    %c0_i32_1 = arith.constant 0 : i32
    return %c0_i32, %c0_i32_0 : i32, i32
  }
  func.func @transform_3(%arg0: i32) -> (i32, i32, i32) {
    %c0_i32 = arith.constant 0 : i32
    %c0_i32_0 = arith.constant 0 : i32
    %c0_i32_1 = arith.constant 0 : i32
    %c0_i32_2 = arith.constant 0 : i32
    return %c0_i32, %c0_i32_0, %c0_i32_1 : i32, i32, i32
  }
  func.func @transform_4(%arg0: i32) -> (i32, i32, i32) {
    %c0_i32 = arith.constant 0 : i32
    %c0_i32_0 = arith.constant 0 : i32
    %c0_i32_1 = arith.constant 0 : i32
    %c0_i32_2 = arith.constant 0 : i32
    return %c0_i32, %c0_i32_0, %c0_i32_1 : i32, i32, i32
  }
  func.func @transform_5(%arg0: i32) -> (i32, i32, i32) {
    %c0_i32 = arith.constant 0 : i32
    %c0_i32_0 = arith.constant 0 : i32
    %c0_i32_1 = arith.constant 0 : i32
    %c0_i32_2 = arith.constant 0 : i32
    return %c0_i32, %c0_i32_0, %c0_i32_1 : i32, i32, i32
  }
  func.func @transform_6(%arg0: i32) -> (i32, i32, i32) {
    %c0_i32 = arith.constant 0 : i32
    %c0_i32_0 = arith.constant 0 : i32
    %c0_i32_1 = arith.constant 0 : i32
    %c0_i32_2 = arith.constant 0 : i32
    return %c0_i32, %c0_i32_0, %c0_i32_1 : i32, i32, i32
  }
  func.func @transform_7(%arg0: i32) -> (i32, i32) {
    %c0_i32 = arith.constant 0 : i32
    %c0_i32_0 = arith.constant 0 : i32
    %c0_i32_1 = arith.constant 0 : i32
    return %c0_i32, %c0_i32_0 : i32, i32
  }
  func.func @transform_8(%arg0: i32) -> (i32, i32) {
    %c0_i32 = arith.constant 0 : i32
    %c0_i32_0 = arith.constant 0 : i32
    %c0_i32_1 = arith.constant 0 : i32
    return %c0_i32, %c0_i32_0 : i32, i32
  }
  func.func @transform_9(%arg0: i32) -> (i32, i32) {
    %c0_i32 = arith.constant 0 : i32
    %c0_i32_0 = arith.constant 0 : i32
    %c0_i32_1 = arith.constant 0 : i32
    return %c0_i32, %c0_i32_0 : i32, i32
  }
  func.func @transform_10(%arg0: i32) -> (i32, i32) {
    %c0_i32 = arith.constant 0 : i32
    %c0_i32_0 = arith.constant 0 : i32
    %c0_i32_1 = arith.constant 0 : i32
    return %c0_i32, %c0_i32_0 : i32, i32
  }
  func.func @transform_11(%arg0: i32) -> (i32, i32) {
    %c0_i32 = arith.constant 0 : i32
    %c0_i32_0 = arith.constant 0 : i32
    %c0_i32_1 = arith.constant 0 : i32
    return %c0_i32, %c0_i32_0 : i32, i32
  }
  func.func @transform_12(%arg0: i32) -> (i32, i32) {
    %c0_i32 = arith.constant 0 : i32
    %c0_i32_0 = arith.constant 0 : i32
    %c0_i32_1 = arith.constant 0 : i32
    return %c0_i32, %c0_i32_0 : i32, i32
  }
  func.func @transform_13(%arg0: i32) -> (i32, i32) {
    %c0_i32 = arith.constant 0 : i32
    %c0_i32_0 = arith.constant 0 : i32
    %c0_i32_1 = arith.constant 0 : i32
    return %c0_i32, %c0_i32_0 : i32, i32
  }
  func.func @transform_14(%arg0: i32) -> (i32, i32) {
    %c0_i32 = arith.constant 0 : i32
    %c0_i32_0 = arith.constant 0 : i32
    %c0_i32_1 = arith.constant 0 : i32
    return %c0_i32, %c0_i32_0 : i32, i32
  }
  func.func @transform_15(%arg0: i32) -> (i32, i32) {
    %c0_i32 = arith.constant 0 : i32
    %c0_i32_0 = arith.constant 0 : i32
    %c0_i32_1 = arith.constant 0 : i32
    return %c0_i32, %c0_i32_0 : i32, i32
  }
  func.func @transform_16(%arg0: i32) -> (i32, i32) {
    %c0_i32 = arith.constant 0 : i32
    %c0_i32_0 = arith.constant 0 : i32
    %c0_i32_1 = arith.constant 0 : i32
    return %c0_i32, %c0_i32_0 : i32, i32
  }
  func.func @transform_17(%arg0: i32) -> (i32, i32) {
    %c0_i32 = arith.constant 0 : i32
    %c0_i32_0 = arith.constant 0 : i32
    %c0_i32_1 = arith.constant 0 : i32
    return %c0_i32, %c0_i32_0 : i32, i32
  }
  func.func @transform_18(%arg0: i32) -> (i32, i32, i32) {
    %c0_i32 = arith.constant 0 : i32
    %c0_i32_0 = arith.constant 0 : i32
    %c0_i32_1 = arith.constant 0 : i32
    return %arg0, %c0_i32, %c0_i32_0 : i32, i32, i32
  }
}

</mosaic_0001>

<bundles_post_ra>
// kernel: fn.1
= control target key start
LH: loop header
LB: loop body
LE: loop exit
PB: predicated region body
PF: predicated region fallthrough
CT: control target
= control target key end

     0   :  { %v21133_v3 = vmov 0.0|0.0   ;;  %vm200_vm0 = vcmask 457728   ;;  %vm13998_vm1 = vmmov 0   ;;  %vm496_vm2 = vcmask 1043456   ;;  %s21109_s0 = inlined_call_operand.vmem [shape: f32[1,312,128], index: 0, kind: input, shape index: {}]   ;;  %s21110_s1 = inlined_call_operand.vmem [shape: f32[3,3,312], index: 1, kind: input, shape index: {}]   ;;  %s21111_s12 = inlined_call_operand.vmem [shape: f32[128,4], index: 12, kind: input, shape index: {}]   ;;  %s21112_s13 = inlined_call_operand.vmem [shape: f32[4,128], index: 13, kind: input, shape index: {}]   ;;  %s21113_s2 = inlined_call_operand.vmem [shape: f32[312,3], index: 2, kind: input, shape index: {}]   ;;  %s21114_s5 = inlined_call_operand.vmem [shape: bf16[3,384,384], index: 5, kind: input, shape index: {}]   ;;  %s21115_s3 = inlined_call_operand.vmem [shape: f32[3,312,128], index: 3, kind: input, shape index: {}]   ;;  %s21116_s4 = inlined_call_operand.vmem [shape: f32[3,312,128], index: 4, kind: input, shape index: {}]   ;;  %s21117_s6 = inlined_call_operand.vmem [shape: f32[3,1,128], index: 6, kind: input, shape index: {}]   ;;  %s21118_s10 = inlined_call_operand.vmem [shape: f32[312,1], index: 10, kind: input, shape index: {}]   ;;  %s21119_s8 = inlined_call_operand.vmem [shape: bf16[128,256], index: 8, kind: input, shape index: {}]   ;;  %s21120_s7 = inlined_call_operand.vmem [shape: bf16[384,128], index: 7, kind: input, shape index: {}]   ;;  %s21121_s9 = inlined_call_operand.vmem [shape: f32[1,128], index: 9, kind: input, shape index: {}]   ;;  %s21122_s11 = inlined_call_operand.vmem [shape: f32[3,312], index: 11, kind: input, shape index: {}]   ;;  %s21123_s16 = inlined_call_operand.vmem [shape: bf16[128,128], index: 16, kind: input, shape index: {}]   ;;  %s21124_s14 = inlined_call_operand.vmem [shape: f32[1,128], index: 14, kind: input, shape index: {}]   ;;  %s21125_s15 = inlined_call_operand.vmem [shape: f32[1,128], index: 15, kind: input, shape index: {}]   ;;  %s21126_s17 = inlined_call_operand.vmem [shape: f32[1,128], index: 17, kind: input, shape index: {}]   ;;  %s21127_s18 = inlined_call_operand.vmem [shape: f32[1,3,128], index: 18, kind: output, shape index: {}]  }
   0x1   :  { %21238 = sst [smem:[#allocation66_spill]] %s21109_s0  ;;  %12892 = vmatprep.subr.bf16.mxu1 %v21133_v3  ;;  %vm492_vm3 = vcmask 31744   ;;  %vm761_vm4 = vcmask 1042432   ;;  %vm643_vm5 = vcmask 23552  }
   0x2   :  { %21239 = sst [smem:[#allocation67_spill]] %s21110_s1  ;;  %s21241_s29 = sld [smem:[#allocation66_spill]] }
   0x3   :  { %21240 = sst [smem:[#allocation68_spill]] %s21111_s12  ;;  %s21242_s25 = sld [smem:[#allocation67_spill]] }
   0x4   :  { %s21243_s1 = sld [smem:[#allocation68_spill]] }
   0x8   :  { %v60_v0 = vld [vmem:[%s21241_s29] sm:$0xff]  ;;  %v61_v1 = vld [vmem:[%s21241_s29 + $0x8] sm:$0xff]  ;;  %v62_v2 = vld [vmem:[%s21241_s29 + $0x10] sm:$0xff] }
   0x9   :  { %v155_v4 = vmul.f32 %v60_v0, %v60_v0  ;;  %v156_v5 = vmul.f32 %v61_v1, %v61_v1  ;;  %v63_v6 = vld [vmem:[%s21241_s29 + $0x18] sm:$0xff]  ;;  %v157_v7 = vmul.f32 %v62_v2, %v62_v2  ;;  %v64_v8 = vld [vmem:[%s21241_s29 + $0x20] sm:$0xff]  ;;  %v65_v9 = vld [vmem:[%s21241_s29 + $0x28] sm:$0xff]  ;;  %v12818_v10 = vpack.c.bf16 %v61_v1, %v60_v0 }
   0xa   :  { %v158_v11 = vmul.f32 %v63_v6, %v63_v6  ;;  %v159_v13 = vmul.f32 %v64_v8, %v64_v8  ;;  %v160_v14 = vmul.f32 %v65_v9, %v65_v9  ;;  %v66_v16 = vld [vmem:[%s21241_s29 + $0x30] sm:$0xff]  ;;  %v67_v17 = vld [vmem:[%s21241_s29 + $0x38] sm:$0xff]  ;;  %v12822_v18 = vpack.c.bf16 %v63_v6, %v62_v2  ;;  %v68_v22 = vld [vmem:[%s21241_s29 + $0x40] sm:$0xff] }
   0xb   :  { %v12816_v12 = vpack.c.bf16 %v156_v5, %v155_v4  ;;  %v161_v20 = vmul.f32 %v66_v16, %v66_v16  ;;  %v162_v21 = vmul.f32 %v67_v17, %v67_v17  ;;  %v69_v23 = vld [vmem:[%s21241_s29 + $0x48] sm:$0xff]  ;;  %v12826_v24 = vpack.c.bf16 %v65_v9, %v64_v8  ;;  %v70_v28 = vld [vmem:[%s21241_s29 + $0x50] sm:$0xff]  ;;  %v71_v29 = vld [vmem:[%s21241_s29 + $0x58] sm:$0xff] }
   0xc   :  { %v12820_v15 = vpack.c.bf16 %v158_v11, %v157_v7  ;;  %v12824_v19 = vpack.c.bf16 %v160_v14, %v159_v13  ;;  %v163_v26 = vmul.f32 %v68_v22, %v68_v22  ;;  %v164_v27 = vmul.f32 %v69_v23, %v69_v23  ;;  %v14135_v30 = vld [vmem:[%s21242_s25] sm:$0x77]  ;;  %v73_v36 = vld [vmem:[%s21241_s29 + $0x68] sm:$0xff]  ;;  %v140_v44 = vld [vmem:[%s21243_s1 + $0x10] sm:$0xff] }
   0xd   :  { %12817 = vmatprep.subr.bf16.mxu0 %v12816_v12  ;;  %v12828_v25 = vpack.c.bf16 %v162_v21, %v161_v20  ;;  %v12830_v31 = vpack.c.bf16 %v67_v17, %v66_v16  ;;  %v165_v33 = vmul.f32 %v70_v28, %v70_v28  ;;  %v166_v34 = vmul.f32 %v71_v29, %v71_v29  ;;  %v72_v35 = vld [vmem:[%s21241_s29 + $0x60] sm:$0xff]  ;;  %v139_v39 = vld [vmem:[%s21243_s1 + $0x8] sm:$0xff]  ;;  %v141_v45 = vld [vmem:[%s21243_s1 + $0x18] sm:$0xff] }
   0xe   :  { %12819 = vmatpush1.bf16.msra.mxu0 %v12818_v10  ;;  %v12832_v32 = vpack.c.bf16 %v164_v27, %v163_v26  ;;  %v198_v37 = vcombine.high %v14135_v30, %v14135_v30  ;;  %v138_v38 = vld [vmem:[%s21243_s1] sm:$0xff]  ;;  %v12834_v40 = vpack.c.bf16 %v69_v23, %v68_v22  ;;  %v167_v42 = vmul.f32 %v72_v35, %v72_v35  ;;  %v74_v46 = vld [vmem:[%s21241_s29 + $0x70] sm:$0xff]  ;;  %v75_v47 = vld [vmem:[%s21241_s29 + $0x78] sm:$0xff] }
   0xf   :  { %12821 = vmatprep.subr.bf16.mxu0 %v12820_v15  ;;  %v12836_v41 = vpack.c.bf16 %v166_v34, %v165_v33  ;;  %v168_v43 = vmul.f32 %v73_v36, %v73_v36  ;;  %v14163_v48 = vpack.c.bf16 %v139_v39, %v138_v38  ;;  %v12838_v49 = vpack.c.bf16 %v71_v29, %v70_v28  ;;  %v142_v54 = vld [vmem:[%s21243_s1 + $0x20] sm:$0xff]  ;;  %v143_v55 = vld [vmem:[%s21243_s1 + $0x28] sm:$0xff]  ;;  %v144_v63 = vld [vmem:[%s21243_s1 + $0x30] sm:$0xff] }
  0x10   :  { %267 = vmatprep.mubr.f32.mxu0 %v198_v37  ;;  %v14166_v50 = vpack.c.bf16 %v141_v45, %v140_v44  ;;  %v169_v52 = vmul.f32 %v74_v46, %v74_v46  ;;  %v170_v53 = vmul.f32 %v75_v47, %v75_v47  ;;  %v76_v56 = vld [vmem:[%s21241_s29 + $0x80] sm:$0xff]  ;;  %v77_v57 = vld [vmem:[%s21241_s29 + $0x88] sm:$0xff]  ;;  %v12842_v58 = vpack.c.bf16 %v73_v36, %v72_v35  ;;  %v145_v0 = vld [vmem:[%s21243_s1 + $0x38] sm:$0xff] }
  0x11   :  { %21244 = vst [vmem:[#allocation2_spill] sm:$0xff] %v14163_v48  ;;  %12894 = vmatpush3.bf16.msra.mxu1 %v14163_v48  ;;  %v12840_v51 = vpack.c.bf16 %v168_v43, %v167_v42  ;;  %v14182_v59 = vpack.c.bf16 %v143_v55, %v142_v54  ;;  %v171_v61 = vmul.f32 %v76_v56, %v76_v56  ;;  %v78_v1 = vld [vmem:[%s21241_s29 + $0x90] sm:$0xff]  ;;  %v79_v2 = vld [vmem:[%s21241_s29 + $0x98] sm:$0xff]  ;;  %v146_v9 = vld [vmem:[%s21243_s1 + $0x40] sm:$0xff] }
  0x12   :  { %12823 = vmatpush1.bf16.msra.mxu0 %v12822_v18  ;;  %21245 = vst [vmem:[#allocation3_spill] sm:$0xff] %v14166_v50  ;;  %12895 = vmatprep.subr.bf16.mxu1 %v21133_v3  ;;  %v12844_v60 = vpack.c.bf16 %v170_v53, %v169_v52  ;;  %v172_v62 = vmul.f32 %v77_v57, %v77_v57  ;;  %v147_v10 = vld [vmem:[%s21243_s1 + $0x48] sm:$0xff]  ;;  %v80_v11 = vld [vmem:[%s21241_s29 + $0xa0] sm:$0xff]  ;;  %v148_v18 = vld [vmem:[%s21243_s1 + $0x50] sm:$0xff] }
  0x13   :  { %12825 = vmatprep.subr.bf16.mxu0 %v12824_v19  ;;  %21246 = vst [vmem:[#allocation4_spill] sm:$0xff] %v14182_v59  ;;  %v12846_v4 = vpack.c.bf16 %v75_v47, %v74_v46  ;;  %v14198_v5 = vpack.c.bf16 %v145_v0, %v144_v63  ;;  %v173_v7 = vmul.f32 %v78_v1, %v78_v1  ;;  %v81_v12 = vld [vmem:[%s21241_s29 + $0xa8] sm:$0xff]  ;;  %v149_v19 = vld [vmem:[%s21243_s1 + $0x58] sm:$0xff]  ;;  %v82_v20 = vld [vmem:[%s21241_s29 + $0xb0] sm:$0xff] }
  0x14   :  { %v12848_v6 = vpack.c.bf16 %v172_v62, %v171_v61  ;;  %v174_v8 = vmul.f32 %v79_v2, %v79_v2  ;;  %v12850_v13 = vpack.c.bf16 %v77_v57, %v76_v56  ;;  %v14214_v14 = vpack.c.bf16 %v147_v10, %v146_v9  ;;  %v83_v21 = vld [vmem:[%s21241_s29 + $0xb8] sm:$0xff]  ;;  %v150_v27 = vld [vmem:[%s21243_s1 + $0x60] sm:$0xff]  ;;  %v151_v28 = vld [vmem:[%s21243_s1 + $0x68] sm:$0xff] }
  0x15   :  { %12897 = vmatpush3.bf16.msra.mxu1 %v14166_v50  ;;  %21247 = vst [vmem:[#allocation5_spill] sm:$0xff] %v14198_v5  ;;  %v175_v16 = vmul.f32 %v80_v11, %v80_v11  ;;  %v176_v17 = vmul.f32 %v81_v12, %v81_v12  ;;  %v12854_v22 = vpack.c.bf16 %v79_v2, %v78_v1  ;;  %v84_v29 = vld [vmem:[%s21241_s29 + $0xc0] sm:$0xff]  ;;  %v152_v37 = vld [vmem:[%s21243_s1 + $0x70] sm:$0xff]  ;;  %v153_v38 = vld [vmem:[%s21243_s1 + $0x78] sm:$0xff] }
  0x16   :  { %12827 = vmatpush1.bf16.msra.mxu0 %v12826_v24  ;;  %12898 = vmatprep.subr.bf16.mxu1 %v21133_v3  ;;  %21248 = vst [vmem:[#allocation6_spill] sm:$0xff] %v14214_v14  ;;  %v12852_v15 = vpack.c.bf16 %v174_v8, %v173_v7  ;;  %v14230_v23 = vpack.c.bf16 %v149_v19, %v148_v18  ;;  %v86_v39 = vld [vmem:[%s21241_s29 + $0xd0] sm:$0xff]  ;;  %v88_v46 = vld [vmem:[%s21241_s29 + $0xe0] sm:$0xff]  ;;  %v89_v47 = vld [vmem:[%s21241_s29 + $0xe8] sm:$0xff]  ;;  %v21135_v19 = vmov 0.0  }
  0x17   :  { %12829 = vmatprep.subr.bf16.mxu0 %v12828_v25  ;;  %v12856_v24 = vpack.c.bf16 %v176_v17, %v175_v16  ;;  %v177_v25 = vmul.f32 %v82_v20, %v82_v20  ;;  %v178_v26 = vmul.f32 %v83_v21, %v83_v21  ;;  %v14246_v33 = vpack.c.bf16 %v151_v28, %v150_v27  ;;  %v90_v54 = vld [vmem:[%s21241_s29 + $0xf0] sm:$0xff]  ;;  %v91_v55 = vld [vmem:[%s21241_s29 + $0xf8] sm:$0xff]  ;;  %v92_v61 = vld [vmem:[%s21241_s29 + $0x100] sm:$0xff] }
  0x18   :  { %21249 = vst [vmem:[#allocation7_spill] sm:$0xff] %v14230_v23  ;;  %v179_v35 = vmul.f32 %v84_v29, %v84_v29  ;;  %v14262_v42 = vpack.c.bf16 %v153_v38, %v152_v37  ;;  %v181_v44 = vmul.f32 %v86_v39, %v86_v39  ;;  %v183_v52 = vmul.f32 %v88_v46, %v88_v46  ;;  %v93_v62 = vld [vmem:[%s21241_s29 + $0x108] sm:$0xff]  ;;  %v154_v27 = vld [vmem:[%s21112_s13] sm:$0xf] }
  0x19   :  { %12900 = vmatpush3.bf16.msra.mxu1 %v14182_v59  ;;  %21250 = vst [vmem:[#allocation8_spill] sm:$0xff] %v14246_v33  ;;  %v12860_v34 = vpack.c.bf16 %v178_v26, %v177_v25  ;;  %v184_v53 = vmul.f32 %v89_v47, %v89_v47  ;;  %v12874_v63 = vpack.c.bf16 %v89_v47, %v88_v46  ;;  %v100_v47 = vld [vmem:[%s21113_s2 + $0x8] sm:$0xff] }
  0x1a   :  { %12831 = vmatpush1.bf16.msra.mxu0 %v12830_v31  ;;  %12901 = vmatprep.subr.bf16.mxu1 %v21133_v3  ;;  %v85_v31 = vld [vmem:[%s21241_s29 + $0xc8] sm:$0xff]  ;;  %21251 = vst [vmem:[#allocation9_spill] sm:$0xff] %v14262_v42  ;;  %v187_v1 = vmul.f32 %v92_v61, %v92_v61  ;;  %v188_v2 = vmul.f32 %v93_v62, %v93_v62 }
  0x1b   :  { %12833 = vmatprep.subr.bf16.mxu0 %v12832_v32  ;;  %v12858_v32 = vpack.c.bf16 %v81_v12, %v80_v11  ;;  %v180_v36 = vmul.f32 %v85_v31, %v85_v31  ;;  %v12872_v57 = vpack.c.bf16 %v184_v53, %v183_v52  ;;  %v12878_v7 = vpack.c.bf16 %v91_v55, %v90_v54  ;;  %v96_v11 = vld [vmem:[%s21241_s29 + $0x120] sm:$0xff]  ;;  %v97_v12 = vld [vmem:[%s21241_s29 + $0x128] sm:$0xff] }
  0x1c   :  { %v12880_v8 = vpack.c.bf16 %v188_v2, %v187_v1  ;;  %v191_v16 = vmul.f32 %v96_v11, %v96_v11  ;;  %v192_v17 = vmul.f32 %v97_v12, %v97_v12  ;;  %12267 = vmatprep.mubr.msk.f32.mxu1 %vm13998_vm1, %v21135_v19  ;;  %v103_v52 = vld [vmem:[%s21113_s2 + $0x20] sm:$0xff]  ;;  %v104_v53 = vld [vmem:[%s21113_s2 + $0x28] sm:$0xff] }
  0x1d   :  { %12903 = vmatpush3.bf16.msra.mxu1 %v14198_v5  ;;  %v12864_v43 = vpack.c.bf16 %v180_v36, %v179_v35  ;;  %v13528_v1 = vld [vmem:[%s21114_s5 + $0x34] ss:$12 sps:$4 sm:$0xff]   ;;  %v108_v2 = vld [vmem:[%s21113_s2 + $0x48] sm:$0xff] }
  0x1e   :  { %12835 = vmatpush1.bf16.msra.mxu0 %v12834_v40  ;;  %12904 = vmatprep.subr.bf16.mxu1 %v21133_v3  ;;  %v87_v40 = vld [vmem:[%s21241_s29 + $0xd8] sm:$0xff] }
  0x1f   :  { %12837 = vmatprep.subr.bf16.mxu0 %v12836_v41  ;;  %v12862_v41 = vpack.c.bf16 %v83_v21, %v82_v20  ;;  %v182_v45 = vmul.f32 %v87_v40, %v87_v40  ;;  %v12870_v56 = vpack.c.bf16 %v87_v40, %v86_v39  ;;  %v12888_v20 = vpack.c.bf16 %v192_v17, %v191_v16  ;;  %v98_v21 = vld [vmem:[%s21241_s29 + $0x130] sm:$0xff]  ;;  %v13540_v16 = vld [vmem:[%s21114_s5 + $0x7c] ss:$12 sps:$4 sm:$0xff]   ;;  %v111_v17 = vld [vmem:[%s21113_s2 + $0x60] sm:$0xff] }
  0x21   :  { %12906 = vmatpush3.bf16.msra.mxu1 %v14214_v14 }
  0x22   :  { %12839 = vmatpush1.bf16.msra.mxu0 %v12838_v49  ;;  %12907 = vmatprep.subr.bf16.mxu1 %v21133_v3  ;;  %v12866_v49 = vpack.c.bf16 %v85_v31, %v84_v29 }
  0x23   :  { %12841 = vmatprep.subr.bf16.mxu0 %v12840_v51  ;;  %v12868_v51 = vpack.c.bf16 %v182_v45, %v181_v44  ;;  %v99_v45 = vld [vmem:[%s21113_s2] sm:$0xff] }
  0x25   :  { %12909 = vmatpush3.bf16.msra.mxu1 %v14230_v23 }
  0x26   :  { %12843 = vmatpush1.bf16.msra.mxu0 %v12842_v58  ;;  %12910 = vmatprep.subr.bf16.mxu1 %v21133_v3  ;;  %v185_v58 = vmul.f32 %v90_v54, %v90_v54  ;;  %v105_v54 = vld [vmem:[%s21113_s2 + $0x30] sm:$0xff] }
  0x27   :  { %12845 = vmatprep.subr.bf16.mxu0 %v12844_v60  ;;  %v186_v60 = vmul.f32 %v91_v55, %v91_v55  ;;  %v106_v55 = vld [vmem:[%s21113_s2 + $0x38] sm:$0xff] }
  0x29   :  { %12912 = vmatpush3.bf16.msra.mxu1 %v14246_v33  ;;  %v12876_v0 = vpack.c.bf16 %v186_v60, %v185_v58  ;;  %v13520_v58 = vld [vmem:[%s21114_s5 + $0x4] ss:$12 sps:$4 sm:$0xff]   ;;  %v13521_v60 = vld [vmem:[%s21114_s5 + $0x8] ss:$12 sps:$4 sm:$0xff]  }
  0x2a   :  { %12847 = vmatpush1.bf16.msra.mxu0 %v12846_v4  ;;  %12913 = vmatprep.subr.bf16.mxu1 %v21133_v3  ;;  %v94_v4 = vld [vmem:[%s21241_s29 + $0x110] sm:$0xff] }
  0x2b   :  { %12849 = vmatprep.subr.bf16.mxu0 %v12848_v6  ;;  %v95_v6 = vld [vmem:[%s21241_s29 + $0x118] sm:$0xff]  ;;  %v189_v9 = vmul.f32 %v94_v4, %v94_v4 }
  0x2c   :  { %v190_v10 = vmul.f32 %v95_v6, %v95_v6  ;;  %v12886_v18 = vpack.c.bf16 %v95_v6, %v94_v4  ;;  %v13526_v4 = vld [vmem:[%s21114_s5 + $0x30] ss:$12 sps:$4 sm:$0xff]   ;;  %v13529_v6 = vld [vmem:[%s21114_s5 + $0x38] ss:$12 sps:$4 sm:$0xff]  }
  0x2d   :  { %12915 = vmatpush3.bf16.msra.mxu1 %v14262_v42 }
  0x2e   :  { %12851 = vmatpush1.bf16.msra.mxu0 %v12850_v13  ;;  %12916 = vmatprep.subr.bf16.mxu1 %v21133_v3  ;;  %v12882_v13 = vpack.c.bf16 %v93_v62, %v92_v61  ;;  %v107_v61 = vld [vmem:[%s21113_s2 + $0x40] sm:$0xff]  ;;  %v13524_v62 = vld [vmem:[%s21114_s5 + $0x1c] ss:$12 sps:$4 sm:$0xff]  }
  0x2f   :  { %12853 = vmatprep.subr.bf16.mxu0 %v12852_v15  ;;  %v12884_v15 = vpack.c.bf16 %v190_v10, %v189_v9  ;;  %v13530_v9 = vld [vmem:[%s21114_s5 + $0x48] ss:$12 sps:$4 sm:$0xff]   ;;  %v13533_v10 = vld [vmem:[%s21114_s5 + $0x50] ss:$12 sps:$4 sm:$0xff]  }
  0x32   :  { %12855 = vmatpush1.bf16.msra.mxu0 %v12854_v22  ;;  %v12890_v22 = vpack.c.bf16 %v97_v12, %v96_v11  ;;  %v13536_v11 = vld [vmem:[%s21114_s5 + $0x64] ss:$12 sps:$4 sm:$0xff]   ;;  %v110_v12 = vld [vmem:[%s21113_s2 + $0x58] sm:$0xff] }
  0x33   :  { %12857 = vmatprep.subr.bf16.mxu0 %v12856_v24  ;;  %v193_v24 = vmul.f32 %v98_v21, %v98_v21 }
  0x36   :  { %12859 = vmatpush1.bf16.msra.mxu0 %v12858_v32 }
  0x37   :  { %12861 = vmatprep.subr.bf16.mxu0 %v12860_v34 }
  0x3a   :  { %12863 = vmatpush1.bf16.msra.mxu0 %v12862_v41 }
  0x3b   :  { %12865 = vmatprep.subr.bf16.mxu0 %v12864_v43 }
  0x3e   :  { %12867 = vmatpush1.bf16.msra.mxu0 %v12866_v49  ;;  %v101_v49 = vld [vmem:[%s21113_s2 + $0x10] sm:$0xff] }
  0x3f   :  { %12869 = vmatprep.subr.bf16.mxu0 %v12868_v51  ;;  %v102_v51 = vld [vmem:[%s21113_s2 + $0x18] sm:$0xff] }
  0x42   :  { %12871 = vmatpush1.bf16.msra.mxu0 %v12870_v56  ;;  %v13518_v56 = vld [vmem:[%s21114_s5] ss:$12 sps:$4 sm:$0xff]  }
  0x43   :  { %12873 = vmatprep.subr.bf16.mxu0 %v12872_v57  ;;  %v21131_v57 = vmov 0  }
  0x44   :  { %13515 = vset.pattern.permute.xlu0 %v21131_v57  ;;  %13516 = vset.pattern.permute.xlu1 %v21131_v57 }
  0x46   :  { %12875 = vmatpush1.bf16.msra.mxu0 %v12874_v63  ;;  %v13522_v63 = vld [vmem:[%s21114_s5 + $0x18] ss:$12 sps:$4 sm:$0xff]  }
  0x47   :  { %12877 = vmatprep.subr.bf16.mxu0 %v12876_v0  ;;  %v13525_v0 = vld [vmem:[%s21114_s5 + $0x20] ss:$12 sps:$4 sm:$0xff]  }
  0x4a   :  { %12879 = vmatpush1.bf16.msra.mxu0 %v12878_v7  ;;  %v13532_v7 = vld [vmem:[%s21114_s5 + $0x4c] ss:$12 sps:$4 sm:$0xff]  }
  0x4b   :  { %12881 = vmatprep.subr.bf16.mxu0 %v12880_v8  ;;  %v109_v8 = vld [vmem:[%s21113_s2 + $0x50] sm:$0xff] }
  0x4d   :  { %268 = vmatmul.mubr.f32.vlgmr.msra.gmra.mrb[0].mxu0 %v14135_v30  ;;  %v195_v30 = vld [vmem:[%s21242_s25 + $0x8] sm:$0x7] }
  0x4e   :  { %12883 = vmatpush1.bf16.msra.mxu0 %v12882_v13  ;;  %338 = vmatprep.mubr.f32.mxu0 %v21135_v19  ;;  %v13534_v13 = vld [vmem:[%s21114_s5 + $0x60] ss:$12 sps:$4 sm:$0xff]  }
  0x4f   :  { %12885 = vmatprep.subr.bf16.mxu0 %v12884_v15  ;;  %v13537_v15 = vld [vmem:[%s21114_s5 + $0x68] ss:$12 sps:$4 sm:$0xff]  }
  0x52   :  { %12887 = vmatpush1.bf16.msra.mxu0 %v12886_v18  ;;  %v13538_v18 = vld [vmem:[%s21114_s5 + $0x78] ss:$12 sps:$4 sm:$0xff]  }
  0x53   :  { %12889 = vmatprep.subr.bf16.mxu0 %v12888_v20  ;;  %v13541_v20 = vld [vmem:[%s21114_s5 + $0x80] ss:$12 sps:$4 sm:$0xff]  }
  0x56   :  { %12891 = vmatpush1.bf16.msra.mxu0 %v12890_v22  ;;  %v112_v22 = vld [vmem:[%s21113_s2 + $0x68] sm:$0xff] }
  0x57   :  { %286 = vmatprep.subr.mxu0 %v193_v24  ;;  %v13542_v24 = vld [vmem:[%s21114_s5 + $0x90] ss:$12 sps:$4 sm:$0xff]  }
  0x5a   :  { %287 = vmatpush1.msra.mxu0 %v98_v21  ;;  %v13544_v21 = vld [vmem:[%s21114_s5 + $0x94] ss:$12 sps:$4 sm:$0xff]  }
  0x5b   :  { %11151 = vmatmul.mubr.msk.f32.vlgmr.msra.gmra.mrb[0].mxu0 %vm200_vm0, %v195_v30  ;;  %2001 = vmatprep.subr.bf16.mxu0 %v13520_v58  ;;  %v13545_v30 = vld [vmem:[%s21114_s5 + $0x98] ss:$12 sps:$4 sm:$0xff]   ;;  %v13566_v58 = vld [vmem:[%s21114_s5 + $0x120] ss:$12 sps:$4 sm:$0xff]  }
  0x5c   :  { %2002 = vmatpush1.bf16.msra.mxu0 %v13518_v56  ;;  %v13568_v56 = vld [vmem:[%s21114_s5 + $0x124] ss:$12 sps:$4 sm:$0xff]  }
  0x5d   :  { %2003 = vmatprep.subr.bf16.mxu0 %v13524_v62  ;;  %v13572_v62 = vld [vmem:[%s21114_s5 + $0x13c] ss:$12 sps:$4 sm:$0xff]  }
  0x60   :  { %2004 = vmatpush1.bf16.msra.mxu0 %v13522_v63  ;;  %v13570_v63 = vld [vmem:[%s21114_s5 + $0x138] ss:$12 sps:$4 sm:$0xff]  }
  0x61   :  { %2005 = vmatprep.subr.bf16.mxu0 %v13528_v1  ;;  %v125_v1 = vld [vmem:[%s21113_s2 + $0xd0] sm:$0xff] }
  0x64   :  { %2006 = vmatpush1.bf16.msra.mxu0 %v13526_v4  ;;  %v13574_v4 = vld [vmem:[%s21114_s5 + $0x150] ss:$12 sps:$4 sm:$0xff]  }
  0x65   :  { %2007 = vmatprep.subr.bf16.mxu0 %v13532_v7  ;;  %v126_v7 = vld [vmem:[%s21113_s2 + $0xd8] sm:$0xff] }
  0x68   :  { %2008 = vmatpush1.bf16.msra.mxu0 %v13530_v9  ;;  %v13578_v9 = vld [vmem:[%s21114_s5 + $0x168] ss:$12 sps:$4 sm:$0xff]  }
  0x69   :  { %2009 = vmatprep.subr.bf16.mxu0 %v13536_v11  ;;  %v127_v11 = vld [vmem:[%s21113_s2 + $0xe0] sm:$0xff] }
  0x6c   :  { %2010 = vmatpush1.bf16.msra.mxu0 %v13534_v13  ;;  %v129_v13 = vld [vmem:[%s21113_s2 + $0xf0] sm:$0xff] }
  0x6d   :  { %2011 = vmatprep.subr.bf16.mxu0 %v13540_v16  ;;  %v131_v16 = vld [vmem:[%s21113_s2 + $0x100] sm:$0xff] }
  0x70   :  { %2012 = vmatpush1.bf16.msra.mxu0 %v13538_v18  ;;  %v133_v18 = vld [vmem:[%s21113_s2 + $0x110] sm:$0xff] }
  0x71   :  { %2013 = vmatprep.subr.bf16.mxu0 %v13544_v21  ;;  %v135_v21 = vld [vmem:[%s21113_s2 + $0x120] sm:$0xff] }
  0x74   :  { %2014 = vmatpush1.bf16.msra.mxu0 %v13542_v24  ;;  %v137_v24 = vld [vmem:[%s21113_s2 + $0x130] sm:$0xff] }
 0x12e   :  { %v340_v25 = vpop.f32.mrb[0].mxu0 }
 0x12f   :  { %v342_v26 = vpop.f32.mrb[1].mxu0  ;;  %12268 = vmatmul.mubr.f32.vlgmr.msra.gmra.mrb[0].mxu1 %v340_v25  ;;  %v13548_v25 = vld [vmem:[%s21114_s5 + $0xac] ss:$12 sps:$4 sm:$0xff]  }
 0x130   :  { %12918 = vmatpush3.bf16.msra.mxu1 %v14163_v48  ;;  %12302 = vmatprep.mubr.msk.f32.mxu1 %vm13998_vm1, %v21135_v19 }
 0x131   :  { %12919 = vmatprep.subr.bf16.mxu1 %v21133_v3  ;;  %2015 = vmatprep.subr.bf16.mxu0 %v13548_v25 }
 0x134   :  { %12921 = vmatpush3.bf16.msra.mxu1 %v14166_v50 }
 0x135   :  { %12922 = vmatprep.subr.bf16.mxu1 %v21133_v3 }
 0x138   :  { %12924 = vmatpush3.bf16.msra.mxu1 %v14182_v59 }
 0x139   :  { %12925 = vmatprep.subr.bf16.mxu1 %v21133_v3 }
 0x13c   :  { %12927 = vmatpush3.bf16.msra.mxu1 %v14198_v5 }
 0x13d   :  { %12928 = vmatprep.subr.bf16.mxu1 %v21133_v3 }
 0x140   :  { %12930 = vmatpush3.bf16.msra.mxu1 %v14214_v14 }
 0x141   :  { %12931 = vmatprep.subr.bf16.mxu1 %v21133_v3 }
 0x144   :  { %12933 = vmatpush3.bf16.msra.mxu1 %v14230_v23 }
 0x145   :  { %12934 = vmatprep.subr.bf16.mxu1 %v21133_v3 }
 0x148   :  { %12936 = vmatpush3.bf16.msra.mxu1 %v14246_v33 }
 0x149   :  { %12937 = vmatprep.subr.bf16.mxu1 %v21133_v3 }
 0x14c   :  { %12939 = vmatpush3.bf16.msra.mxu1 %v14262_v42 }
 0x14d   :  { %12305 = vmatprep.subr.mxu1 %v21135_v19 }
 0x14f   :  { %12303 = vmatmul.mubr.f32.vlgmr.msra.gmra.mrb[2].mxu1 %v342_v26  ;;  %v113_v26 = vld [vmem:[%s21113_s2 + $0x70] sm:$0xff] }
 0x150   :  { %12307 = vmatprep.mubr.msk.f32.mxu1 %vm13998_vm1, %v21135_v19  ;;  %12306 = vmatpush3.msk.msra.mxu1 %vm496_vm2, %v154_v27 }
 0x151   :  { %12310 = vmatprep.subr.mxu1 %v21135_v19 }
 0x202   :  { %v411_v28 = vpop.f32.mrb[0].mxu1 }
 0x203   :  { %v415_v29 = vmul.f32 0.00038580247, %v411_v28  ;;  %v12269_v31 = vpop.f32.mrb[1].mxu1  ;;  %v13549_v28 = vld [vmem:[%s21114_s5 + $0xb0] ss:$12 sps:$4 sm:$0xff]  }
 0x204   :  { %v114_v31 = vld [vmem:[%s21113_s2 + $0x78] sm:$0xff] }
 0x205   :  { %12308 = vmatmul.mubr.msk.f32.vlgmr.msra.gmra.mrb[4].mxu1 %vm492_vm3, %v415_v29  ;;  %v487_v34 = vmul.f32 %v415_v29, %v415_v29  ;;  %v13552_v29 = vld [vmem:[%s21114_s5 + $0xc4] ss:$12 sps:$4 sm:$0xff]  }
 0x206   :  { %12311 = vmatpush3.msk.msra.mxu1 %vm496_vm2, %v154_v27  ;;  %12312 = vmatprep.mubr.msk.f32.mxu1 %vm13998_vm1, %v21135_v19  ;;  %v13546_v27 = vld [vmem:[%s21114_s5 + $0xa8] ss:$12 sps:$4 sm:$0xff]  }
 0x207   :  { %2016 = vmatpush1.bf16.msra.mxu0 %v13546_v27 }
 0x208   :  { %2017 = vmatprep.subr.bf16.mxu0 %v13552_v29  ;;  %v1145_v29 = vld [vmem:[%s21115_s3] sm:$0xff] }
 0x222   :  { %v482_v32 = vpop.f32.mrb[2].mxu1 }
 0x223   :  { %v486_v35 = vmul.f32 0.00038580247, %v482_v32  ;;  %v12304_v36 = vpop.f32.mrb[3].mxu1  ;;  %v13550_v32 = vld [vmem:[%s21114_s5 + $0xc0] ss:$12 sps:$4 sm:$0xff]  }
 0x224   :  { %v115_v36 = vld [vmem:[%s21113_s2 + $0x80] sm:$0xff]  ;;  %2018 = vmatpush1.bf16.msra.mxu0 %v13550_v32 }
 0x225   :  { %v488_v37 = vsub.f32 %v486_v35, %v487_v34  ;;  %v13553_v34 = vld [vmem:[%s21114_s5 + $0xc8] ss:$12 sps:$4 sm:$0xff]  }
 0x226   :  { %v13556_v35 = vld [vmem:[%s21114_s5 + $0xdc] ss:$12 sps:$4 sm:$0xff]  }
 0x227   :  { %v489_v38 = vmax.f32 %v488_v37, 0.0  ;;  %v13554_v37 = vld [vmem:[%s21114_s5 + $0xd8] ss:$12 sps:$4 sm:$0xff]   ;;  %2019 = vmatprep.subr.bf16.mxu0 %v13556_v35 }
 0x228   :  { %2020 = vmatpush1.bf16.msra.mxu0 %v13554_v37  ;;  %v13874_v37 = vld [vmem:[%s21241_s29 + $0x8] sm:$0xff] }
 0x229   :  { %v490_v39 = vadd.f32 1e-05, %v489_v38  ;;  %v116_v38 = vld [vmem:[%s21113_s2 + $0x88] sm:$0xff] }
 0x22b   :  { %13865 = vrsqrt.f32 %v490_v39  ;;  %v117_v39 = vld [vmem:[%s21113_s2 + $0x90] sm:$0xff] }
 0x235   :  { %v13866_v40 = vpop.eup %13865 }
 0x236   :  { %12313 = vmatmul.mubr.msk.f32.vlgmr.msra.gmra.mrb[6].mxu1 %vm492_vm3, %v13866_v40  ;;  %v118_v40 = vld [vmem:[%s21113_s2 + $0x98] sm:$0xff] }
 0x237   :  { %832 = vmatprep.mubr.f32.mxu1 %v21135_v19 }
 0x2d8   :  { %v566_v41 = vpop.f32.mrb[4].mxu1 }
 0x2d9   :  { %v12309_v43 = vpop.f32.mrb[5].mxu1 }
 0x2da   :  { %v120_v43 = vld [vmem:[%s21113_s2 + $0xa8] sm:$0xff] }
 0x309   :  { %v639_v44 = vpop.f32.mrb[6].mxu1 }
 0x30a   :  { %v12314_v46 = vpop.f32.mrb[7].mxu1  ;;  %11156 = vmatprep.subr.msk.mxu1 %vm761_vm4, %v639_v44  ;;  %v13557_v44 = vld [vmem:[%s21114_s5 + $0xe0] ss:$12 sps:$4 sm:$0xff]  }
 0x30b   :  { %11157 = vmatpush1.msk.msra.mxu1 %vm761_vm4, %v566_v41  ;;  %v119_v41 = vld [vmem:[%s21113_s2 + $0xa0] sm:$0xff] }
 0x30c   :  { %11158 = vmatmul.mubr.msk.f32.vlgmr.msra.gmra.mrb[8].mxu1 %vm643_vm5, %v99_v45  ;;  %2463 = vmatprep.subr.bf16.mxu1 %v21131_v57  ;;  %v121_v45 = vld [vmem:[%s21113_s2 + $0xb0] sm:$0xff] }
 0x30d   :  { %838 = vmatprep.mubr.f32.mxu1 %v21135_v19  ;;  %2464 = vmatpush1.bf16.msra.mxu1 %v13521_v60  ;;  %v13560_v46 = vld [vmem:[%s21114_s5 + $0xf4] ss:$12 sps:$4 sm:$0xff]  }
 0x30e   :  { %2465 = vmatprep.subr.bf16.mxu1 %v21131_v57  ;;  %2021 = vmatprep.subr.bf16.mxu0 %v13560_v46  ;;  %v13569_v60 = vld [vmem:[%s21114_s5 + $0x128] ss:$12 sps:$4 sm:$0xff]  }
 0x310   :  { %11159 = vmatmul.mubr.msk.f32.gmra.mrb[10].mxu1 %vm643_vm5, %v100_v47  ;;  %v13558_v47 = vld [vmem:[%s21114_s5 + $0xf0] ss:$12 sps:$4 sm:$0xff]  }
 0x311   :  { %844 = vmatprep.mubr.f32.mxu1 %v21135_v19  ;;  %2466 = vmatpush1.bf16.msra.mxu1 %v13525_v0  ;;  %v13573_v0 = vld [vmem:[%s21114_s5 + $0x140] ss:$12 sps:$4 sm:$0xff]  }
 0x312   :  { %2467 = vmatprep.subr.bf16.mxu1 %v21131_v57  ;;  %2022 = vmatpush1.bf16.msra.mxu0 %v13558_v47 }
 0x314   :  { %11160 = vmatmul.mubr.msk.f32.gmra.mrb[12].mxu1 %vm643_vm5, %v101_v49  ;;  %v13561_v49 = vld [vmem:[%s21114_s5 + $0xf8] ss:$12 sps:$4 sm:$0xff]  }
 0x315   :  { %850 = vmatprep.mubr.f32.mxu1 %v21135_v19  ;;  %2468 = vmatpush1.bf16.msra.mxu1 %v13529_v6  ;;  %v13577_v6 = vld [vmem:[%s21114_s5 + $0x158] ss:$12 sps:$4 sm:$0xff]  }
 0x316   :  { %2469 = vmatprep.subr.bf16.mxu1 %v21131_v57 }
 0x318   :  { %11161 = vmatmul.mubr.msk.f32.gmra.mrb[14].mxu1 %vm643_vm5, %v102_v51  ;;  %v122_v51 = vld [vmem:[%s21113_s2 + $0xb8] sm:$0xff] }
 0x319   :  { %856 = vmatprep.mubr.f32.mxu1 %v21135_v19  ;;  %2470 = vmatpush1.bf16.msra.mxu1 %v13533_v10  ;;  %v13581_v10 = vld [vmem:[%s21114_s5 + $0x170] ss:$12 sps:$4 sm:$0xff]  }
 0x31a   :  { %2471 = vmatprep.subr.bf16.mxu1 %v21131_v57 }
 0x31c   :  { %11162 = vmatmul.mubr.msk.f32.gmra.mrb[16].mxu1 %vm643_vm5, %v103_v52  ;;  %v13564_v52 = vld [vmem:[%s21114_s5 + $0x10c] ss:$12 sps:$4 sm:$0xff]  }
 0x31d   :  { %862 = vmatprep.mubr.f32.mxu1 %v21135_v19  ;;  %2472 = vmatpush1.bf16.msra.mxu1 %v13537_v15  ;;  %v130_v15 = vld [vmem:[%s21113_s2 + $0xf8] sm:$0xff] }
 0x31e   :  { %2473 = vmatprep.subr.bf16.mxu1 %v21131_v57  ;;  %2023 = vmatprep.subr.bf16.mxu0 %v13564_v52 }
 0x320   :  { %11163 = vmatmul.mubr.msk.f32.gmra.mrb[18].mxu1 %vm643_vm5, %v104_v53  ;;  %v13562_v53 = vld [vmem:[%s21114_s5 + $0x108] ss:$12 sps:$4 sm:$0xff]  }
 0x321   :  { %868 = vmatprep.mubr.f32.mxu1 %v21135_v19  ;;  %2474 = vmatpush1.bf16.msra.mxu1 %v13541_v20  ;;  %v134_v20 = vld [vmem:[%s21113_s2 + $0x118] sm:$0xff] }
 0x322   :  { %2475 = vmatprep.subr.bf16.mxu1 %v21131_v57  ;;  %2024 = vmatpush1.bf16.msra.mxu0 %v13562_v53  ;;  %v1147_v53 = vld [vmem:[%s21115_s3 + $0x10] sm:$0xff] }
 0x323   :  { %2025 = vmatprep.subr.bf16.mxu0 %v13568_v56  ;;  %v1225_v56 = vld [vmem:[%s21116_s4 + $0x10] sm:$0xff] }
 0x324   :  { %11164 = vmatmul.mubr.msk.f32.gmra.mrb[20].mxu1 %vm643_vm5, %v105_v54  ;;  %v13565_v54 = vld [vmem:[%s21114_s5 + $0x110] ss:$12 sps:$4 sm:$0xff]  }
 0x325   :  { %874 = vmatprep.mubr.f32.mxu1 %v21135_v19  ;;  %2476 = vmatpush1.bf16.msra.mxu1 %v13545_v30  ;;  %v13584_v30 = vld [vmem:[%s21114_s5 + $0x184] ss:$12 sps:$4 sm:$0xff]  }
 0x326   :  { %2477 = vmatprep.subr.bf16.mxu1 %v21131_v57  ;;  %2026 = vmatpush1.bf16.msra.mxu0 %v13566_v58 }
 0x327   :  { %2027 = vmatprep.subr.bf16.mxu0 %v13572_v62  ;;  %v13876_v62 = vld [vmem:[%s21241_s29 + $0x18] sm:$0xff] }
 0x328   :  { %11165 = vmatmul.mubr.msk.f32.gmra.mrb[22].mxu1 %vm643_vm5, %v106_v55  ;;  %v123_v55 = vld [vmem:[%s21113_s2 + $0xc0] sm:$0xff] }
 0x329   :  { %880 = vmatprep.mubr.f32.mxu1 %v21135_v19  ;;  %2478 = vmatpush1.bf16.msra.mxu1 %v13549_v28 }
 0x32a   :  { %2479 = vmatprep.subr.bf16.mxu1 %v21131_v57  ;;  %2028 = vmatpush1.bf16.msra.mxu0 %v13570_v63 }
 0x32c   :  { %11166 = vmatmul.mubr.msk.f32.gmra.mrb[24].mxu1 %vm643_vm5, %v107_v61  ;;  %v124_v61 = vld [vmem:[%s21113_s2 + $0xc8] sm:$0xff] }
 0x32d   :  { %886 = vmatprep.mubr.f32.mxu1 %v21135_v19  ;;  %2480 = vmatpush1.bf16.msra.mxu1 %v13553_v34  ;;  %v1360_v34 = vlaneseq }
 0x32e   :  { %2481 = vmatprep.subr.bf16.mxu1 %v21131_v57 }
 0x32f   :  { %v14720_v46 = vshrl.u32 %v1360_v34, 7 }
 0x330   :  { %11167 = vmatmul.mubr.msk.f32.gmra.mrb[26].mxu1 %vm643_vm5, %v108_v2  ;;  %v13576_v2 = vld [vmem:[%s21114_s5 + $0x154] ss:$12 sps:$4 sm:$0xff]  }
 0x331   :  { %892 = vmatprep.mubr.f32.mxu1 %v21135_v19  ;;  %2482 = vmatpush1.bf16.msra.mxu1 %v13557_v44  ;;  %v1224_v44 = vld [vmem:[%s21116_s4 + $0x8] sm:$0xff]  ;;  %vm1362_vm6 = vcmp.lt.s32.totalorder %v14720_v46, 7  ;;  %vm1461_vm7 = vcmp.lt.s32.totalorder %v14720_v46, 6  ;;  %vm9272_vm8 = vcmp.lt.s32.totalorder %v14720_v46, 1 }
 0x332   :  { %2483 = vmatprep.subr.bf16.mxu1 %v21131_v57  ;;  %2029 = vmatprep.subr.bf16.mxu0 %v13576_v2  ;;  %v21572_v46 = vld [vmem:[#allocation3_spill] sm:$0xff] }
 0x333   :  { %2030 = vmatpush1.bf16.msra.mxu0 %v13574_v4  ;;  %v1148_v4 = vld [vmem:[%s21115_s3 + $0x18] sm:$0xff] }
 0x334   :  { %11168 = vmatmul.mubr.msk.f32.gmra.mrb[28].mxu1 %vm643_vm5, %v109_v8  ;;  %v13580_v8 = vld [vmem:[%s21114_s5 + $0x16c] ss:$12 sps:$4 sm:$0xff]  }
 0x335   :  { %898 = vmatprep.mubr.f32.mxu1 %v21135_v19  ;;  %2484 = vmatpush1.bf16.msra.mxu1 %v13561_v49  ;;  %v13875_v49 = vld [vmem:[%s21241_s29 + $0x10] sm:$0xff] }
 0x336   :  { %2485 = vmatprep.subr.bf16.mxu1 %v21131_v57  ;;  %2031 = vmatprep.subr.bf16.mxu0 %v13580_v8 }
 0x337   :  { %2032 = vmatpush1.bf16.msra.mxu0 %v13578_v9 }
 0x338   :  { %11169 = vmatmul.mubr.msk.f32.gmra.mrb[30].mxu1 %vm643_vm5, %v110_v12  ;;  %v128_v12 = vld [vmem:[%s21113_s2 + $0xe8] sm:$0xff]  ;;  %2232 = vmatprep.subr.bf16.mxu0 %v13584_v30 }
 0x339   :  { %904 = vmatprep.mubr.f32.mxu1 %v21135_v19  ;;  %2486 = vmatpush1.bf16.msra.mxu1 %v13565_v54 }
 0x33a   :  { %2487 = vmatprep.subr.bf16.mxu1 %v21131_v57 }
 0x33c   :  { %11170 = vmatmul.mubr.msk.f32.gmra.mrb[32].mxu1 %vm643_vm5, %v111_v17  ;;  %v132_v17 = vld [vmem:[%s21113_s2 + $0x108] sm:$0xff] }
 0x33d   :  { %910 = vmatprep.mubr.f32.mxu1 %v21135_v19  ;;  %2488 = vmatpush1.bf16.msra.mxu1 %v13569_v60 }
 0x33e   :  { %2489 = vmatprep.subr.bf16.mxu1 %v21131_v57 }
 0x340   :  { %11171 = vmatmul.mubr.msk.f32.gmra.mrb[34].mxu1 %vm643_vm5, %v112_v22  ;;  %v136_v22 = vld [vmem:[%s21113_s2 + $0x128] sm:$0xff] }
 0x341   :  { %916 = vmatprep.mubr.f32.mxu1 %v21135_v19  ;;  %2490 = vmatpush1.bf16.msra.mxu1 %v13573_v0 }
 0x342   :  { %2491 = vmatprep.subr.bf16.mxu1 %v21131_v57 }
 0x344   :  { %11172 = vmatmul.mubr.msk.f32.gmra.mrb[36].mxu1 %vm643_vm5, %v113_v26  ;;  %v13873_v26 = vld [vmem:[%s21241_s29] sm:$0xff] }
 0x345   :  { %922 = vmatprep.mubr.f32.mxu1 %v21135_v19  ;;  %2492 = vmatpush1.bf16.msra.mxu1 %v13577_v6 }
 0x346   :  { %2493 = vmatprep.subr.bf16.mxu1 %v21131_v57 }
 0x348   :  { %11173 = vmatmul.mubr.msk.f32.gmra.mrb[38].mxu1 %vm643_vm5, %v114_v31 }
 0x349   :  { %928 = vmatprep.mubr.f32.mxu1 %v21135_v19  ;;  %2494 = vmatpush1.bf16.msra.mxu1 %v13581_v10 }
 0x34c   :  { %11174 = vmatmul.mubr.msk.f32.gmra.mrb[40].mxu1 %vm643_vm5, %v115_v36  ;;  %v1223_v36 = vld [vmem:[%s21116_s4] sm:$0xff] }
 0x34d   :  { %934 = vmatprep.mubr.f32.mxu1 %v21135_v19 }
 0x350   :  { %11175 = vmatmul.mubr.msk.f32.gmra.mrb[42].mxu1 %vm643_vm5, %v116_v38 }
 0x351   :  { %940 = vmatprep.mubr.f32.mxu1 %v21135_v19 }
 0x354   :  { %11176 = vmatmul.mubr.msk.f32.gmra.mrb[44].mxu1 %vm643_vm5, %v117_v39 }
 0x355   :  { %946 = vmatprep.mubr.f32.mxu1 %v21135_v19 }
 0x358   :  { %11177 = vmatmul.mubr.msk.f32.gmra.mrb[46].mxu1 %vm643_vm5, %v118_v40  ;;  %v1146_v40 = vld [vmem:[%s21115_s3 + $0x8] sm:$0xff] }
 0x359   :  { %952 = vmatprep.mubr.f32.mxu1 %v21135_v19 }
 0x35c   :  { %11178 = vmatmul.mubr.msk.f32.gmra.mrb[48].mxu1 %vm643_vm5, %v119_v41 }
 0x35d   :  { %958 = vmatprep.mubr.f32.mxu1 %v21135_v19 }
 0x360   :  { %11179 = vmatmul.mubr.msk.f32.gmra.mrb[50].mxu1 %vm643_vm5, %v120_v43 }
 0x361   :  { %964 = vmatprep.mubr.f32.mxu1 %v21135_v19 }
 0x364   :  { %11180 = vmatmul.mubr.msk.f32.gmra.mrb[52].mxu1 %vm643_vm5, %v121_v45 }
 0x365   :  { %970 = vmatprep.mubr.f32.mxu1 %v21135_v19 }
 0x368   :  { %11181 = vmatmul.mubr.msk.f32.gmra.mrb[54].mxu1 %vm643_vm5, %v122_v51 }
 0x369   :  { %976 = vmatprep.mubr.f32.mxu1 %v21135_v19 }
 0x36c   :  { %11182 = vmatmul.mubr.msk.f32.gmra.mrb[56].mxu1 %vm643_vm5, %v123_v55 }
 0x36d   :  { %982 = vmatprep.mubr.f32.mxu1 %v21135_v19 }
 0x370   :  { %11183 = vmatmul.mubr.msk.f32.gmra.mrb[58].mxu1 %vm643_vm5, %v124_v61 }
 0x371   :  { %988 = vmatprep.mubr.f32.mxu1 %v21135_v19 }
 0x374   :  { %11184 = vmatmul.mubr.msk.f32.gmra.mrb[60].mxu1 %vm643_vm5, %v125_v1 }
 0x375   :  { %994 = vmatprep.mubr.f32.mxu1 %v21135_v19 }
 0x378   :  { %11185 = vmatmul.mubr.msk.f32.gmra.mrb[62].mxu1 %vm643_vm5, %v126_v7 }
 0x379   :  { %1000 = vmatprep.mubr.f32.mxu1 %v21135_v19 }
 0x37c   :  { %11186 = vmatmul.mubr.msk.f32.gmra.mrb[64].mxu1 %vm643_vm5, %v127_v11  ;;  %v1226_v11 = vld [vmem:[%s21116_s4 + $0x18] sm:$0xff] }
 0x37d   :  { %1006 = vmatprep.mubr.f32.mxu1 %v21135_v19 }
 0x380   :  { %11187 = vmatmul.mubr.msk.f32.gmra.mrb[66].mxu1 %vm643_vm5, %v128_v12 }
 0x381   :  { %1012 = vmatprep.mubr.f32.mxu1 %v21135_v19 }
 0x384   :  { %11188 = vmatmul.mubr.msk.f32.gmra.mrb[68].mxu1 %vm643_vm5, %v129_v13 }
 0x385   :  { %1018 = vmatprep.mubr.f32.mxu1 %v21135_v19 }
 0x388   :  { %11189 = vmatmul.mubr.msk.f32.gmra.mrb[70].mxu1 %vm643_vm5, %v130_v15 }
 0x389   :  { %1024 = vmatprep.mubr.f32.mxu1 %v21135_v19 }
 0x38c   :  { %11190 = vmatmul.mubr.msk.f32.gmra.mrb[72].mxu1 %vm643_vm5, %v131_v16  ;;  %v13877_v16 = vld [vmem:[%s21241_s29 + $0x20] sm:$0xff] }
 0x38d   :  { %1030 = vmatprep.mubr.f32.mxu1 %v21135_v19 }
 0x390   :  { %11191 = vmatmul.mubr.msk.f32.gmra.mrb[74].mxu1 %vm643_vm5, %v132_v17 }
 0x391   :  { %1036 = vmatprep.mubr.f32.mxu1 %v21135_v19 }
 0x394   :  { %11192 = vmatmul.mubr.msk.f32.gmra.mrb[76].mxu1 %vm643_vm5, %v133_v18 }
 0x395   :  { %1042 = vmatprep.mubr.f32.mxu1 %v21135_v19 }
 0x398   :  { %11193 = vmatmul.mubr.msk.f32.gmra.mrb[78].mxu1 %vm643_vm5, %v134_v20 }
 0x399   :  { %1048 = vmatprep.mubr.f32.mxu1 %v21135_v19 }
 0x39c   :  { %11194 = vmatmul.mubr.msk.f32.gmra.mrb[80].mxu1 %vm643_vm5, %v135_v21 }
 0x39d   :  { %1054 = vmatprep.mubr.f32.mxu1 %v21135_v19 }
 0x3a0   :  { %11195 = vmatmul.mubr.msk.f32.gmra.mrb[82].mxu1 %vm643_vm5, %v136_v22  ;;  %v1149_v22 = vld [vmem:[%s21115_s3 + $0x20] sm:$0xff] }
 0x3a1   :  { %1060 = vmatprep.mubr.f32.mxu1 %v21135_v19 }
 0x3a4   :  { %11196 = vmatmul.mubr.msk.f32.gmra.mrb[84].mxu1 %vm643_vm5, %v137_v24 }
 0x3df   :  { %v834_v25 = vpop.f32.mrb[8].mxu1 }
 0x3e0   :  { %v1067_v27 = vsub.f32 %v13873_v26, %v834_v25  ;;  %v836_v28 = vpop.f32.mrb[9].mxu1 }
 0x3e2   :  { %v1106_v31 = vmul.f32 %v1067_v27, %v836_v28  ;;  %v1227_v27 = vld [vmem:[%s21116_s4 + $0x20] sm:$0xff] }
 0x3e3   :  { %v840_v32 = vpop.f32.mrb[10].mxu1 }
 0x3e4   :  { %v1184_v35 = vmul.f32 %v1145_v29, %v1106_v31  ;;  %v1068_v38 = vsub.f32 %v13874_v37, %v840_v32  ;;  %v842_v39 = vpop.f32.mrb[11].mxu1  ;;  %v13878_v31 = vld [vmem:[%s21241_s29 + $0x28] sm:$0xff] }
 0x3e5   :  { %v1150_v37 = vld [vmem:[%s21115_s3 + $0x28] sm:$0xff] }
 0x3e6   :  { %v1107_v41 = vmul.f32 %v1068_v38, %v842_v39  ;;  %v14715_v43 = vadd.f32 %v1223_v36, %v1184_v35 }
 0x3e7   :  { %v846_v45 = vpop.f32.mrb[12].mxu1 }
 0x3e8   :  { %v1185_v47 = vmul.f32 %v1146_v40, %v1107_v41  ;;  %v1069_v51 = vsub.f32 %v13875_v49, %v846_v45  ;;  %v848_v52 = vpop.f32.mrb[13].mxu1  ;;  %v1321_v60 = vrot.slane %v14715_v43, 1  ;;  %v1422_v6 = vrot.slane %v14715_v43, 2  ;;  %v13582_v49 = vld [vmem:[%s21114_s5 + $0x180] ss:$12 sps:$4 sm:$0xff]  }
 0x3ea   :  { %v1263_v54 = vadd.f32 %v1224_v44, %v1185_v47  ;;  %v1108_v55 = vmul.f32 %v1069_v51, %v848_v52  ;;  %v1228_v44 = vld [vmem:[%s21116_s4 + $0x28] sm:$0xff] }
 0x3eb   :  { %v852_v58 = vpop.f32.mrb[14].mxu1 }
 0x3ec   :  { %v1186_v61 = vmul.f32 %v1147_v53, %v1108_v55  ;;  %v1070_v63 = vsub.f32 %v13876_v62, %v852_v58  ;;  %v854_v0 = vpop.f32.mrb[15].mxu1  ;;  %v1322_v1 = vrot.slane %v1263_v54, 1  ;;  %v1301_v2 = vpack.c.bf16 %v1263_v54, %v14715_v43  ;;  %v13879_v53 = vld [vmem:[%s21241_s29 + $0x30] sm:$0xff]  ;;  %v13587_v58 = vld [vmem:[%s21114_s5 + $0x19c] ss:$12 sps:$4 sm:$0xff]  }
 0x3ed   :  { %v1423_v7 = vrot.slane %v1263_v54, 2  ;;  %v1151_v62 = vld [vmem:[%s21115_s3 + $0x30] sm:$0xff] }
 0x3ee   :  { %v1264_v8 = vadd.f32 %v1225_v56, %v1186_v61  ;;  %v1109_v9 = vmul.f32 %v1070_v63, %v854_v0  ;;  %v14746_v10 = vsel %vm1362_vm6, %v1321_v60, %v1322_v1  ;;  %v13591_v63 = vld [vmem:[%s21114_s5 + $0x188] ss:$12 sps:$4 sm:$0xff]  }
 0x3ef   :  { %v858_v12 = vpop.f32.mrb[16].mxu1  ;;  %v14755_v13 = vsel %vm1461_vm7, %v1422_v6, %v1423_v7  ;;  %12315 = vmatprep.subr.bf16.mxu1 %v13591_v63 }
 0x3f0   :  { %v1187_v15 = vmul.f32 %v1148_v4, %v1109_v9  ;;  %v1071_v17 = vsub.f32 %v13877_v16, %v858_v12  ;;  %v860_v18 = vpop.f32.mrb[17].mxu1  ;;  %v1323_v20 = vrot.slane %v1264_v8, 1  ;;  %v1424_v21 = vrot.slane %v1264_v8, 2  ;;  %v13585_v9 = vld [vmem:[%s21114_s5 + $0x198] ss:$12 sps:$4 sm:$0xff]  }
 0x3f2   :  { %v1265_v24 = vadd.f32 %v1226_v11, %v1187_v15  ;;  %v1110_v30 = vmul.f32 %v1071_v17, %v860_v18  ;;  %v1399_v25 = vsel %vm1362_vm6, %v1322_v1, %v1323_v20  ;;  %v14767_v26 = vsel %vm1461_vm7, %v1423_v7, %v1424_v21  ;;  %v1229_v7 = vld [vmem:[%s21116_s4 + $0x30] sm:$0xff] }
 0x3f3   :  { %v864_v28 = vpop.f32.mrb[18].mxu1 }
 0x3f4   :  { %v1188_v29 = vmul.f32 %v1149_v22, %v1110_v30  ;;  %v1072_v32 = vsub.f32 %v13878_v31, %v864_v28  ;;  %v866_v34 = vpop.f32.mrb[19].mxu1  ;;  %v1324_v35 = vrot.slane %v1265_v24, 1  ;;  %v14775_v36 = vpack.c.bf16 %v1265_v24, %v1264_v8  ;;  %v13592_v22 = vld [vmem:[%s21114_s5 + $0x1a0] ss:$12 sps:$4 sm:$0xff]   ;;  %v1230_v31 = vld [vmem:[%s21116_s4 + $0x38] sm:$0xff] }
 0x3f5   :  { %v1425_v38 = vrot.slane %v1265_v24, 2  ;;  %v13590_v28 = vld [vmem:[%s21114_s5 + $0x1b4] ss:$12 sps:$4 sm:$0xff]  }
 0x3f6   :  { %v1266_v39 = vadd.f32 %v1227_v27, %v1188_v29  ;;  %v1111_v40 = vmul.f32 %v1072_v32, %v866_v34  ;;  %v1398_v41 = vsel %vm1362_vm6, %v1323_v20, %v1324_v35  ;;  %v1152_v20 = vld [vmem:[%s21115_s3 + $0x38] sm:$0xff] }
 0x3f7   :  { %v870_v45 = vpop.f32.mrb[20].mxu1  ;;  %v1402_v47 = vpack.c.bf16 %v1398_v41, %v1399_v25  ;;  %v1497_v51 = vsel %vm1461_vm7, %v1424_v21, %v1425_v38 }
 0x3f8   :  { %v1189_v52 = vmul.f32 %v1150_v37, %v1111_v40  ;;  %v1073_v54 = vsub.f32 %v13879_v53, %v870_v45  ;;  %v872_v55 = vpop.f32.mrb[21].mxu1  ;;  %v1325_v56 = vrot.slane %v1266_v39, 1  ;;  %v1426_v61 = vrot.slane %v1266_v39, 2  ;;  %v1153_v45 = vld [vmem:[%s21115_s3 + $0x40] sm:$0xff] }
 0x3f9   :  { %2033 = vmatprep.mubr.bf16.mxu0 %v1402_v47  ;;  %2495 = vmatprep.mubr.bf16.mxu1 %v1402_v47  ;;  %v13593_v47 = vld [vmem:[%s21114_s5 + $0x1b8] ss:$12 sps:$4 sm:$0xff]  }
 0x3fa   :  { %v1267_v0 = vadd.f32 %v1228_v44, %v1189_v52  ;;  %v1112_v1 = vmul.f32 %v1073_v54, %v872_v55  ;;  %2034 = vmatmul.mubr.bf16.vlgmr.msra.gmra.mrb[4].mxu0 %v1301_v2  ;;  %2496 = vmatmul.mubr.bf16.vlgmr.msra.gmra.mrb[88].mxu1 %v1301_v2  ;;  %v1397_v4 = vsel %vm1362_vm6, %v1324_v35, %v1325_v56  ;;  %v13880_v2 = vld [vmem:[%s21241_s29 + $0x38] sm:$0xff]  ;;  %v1231_v53 = vld [vmem:[%s21116_s4 + $0x40] sm:$0xff] }
 0x3fb   :  { %v876_v8 = vpop.f32.mrb[22].mxu1  ;;  %2233 = vmatpush1.bf16.msra.mxu0 %v13582_v49  ;;  %v1496_v11 = vsel %vm1461_vm7, %v1425_v38, %v1426_v61  ;;  %12316 = vmatpush3.bf16.msra.mxu1 %v13591_v63  ;;  %v13588_v35 = vld [vmem:[%s21114_s5 + $0x1b0] ss:$12 sps:$4 sm:$0xff]  }
 0x3fc   :  { %v1427_v12 = vrot.slane %v1267_v0, 2  ;;  %v1190_v15 = vmul.f32 %v1151_v62, %v1112_v1  ;;  %v1074_v16 = vsub.f32 %v13880_v2, %v876_v8  ;;  %v878_v17 = vpop.f32.mrb[23].mxu1  ;;  %v1326_v18 = vrot.slane %v1267_v0, 1  ;;  %2234 = vmatprep.subr.bf16.mxu0 %v13587_v58  ;;  %12317 = vmatprep.subr.bf16.mxu1 %v13592_v22  ;;  %v13882_v58 = vld [vmem:[%s21241_s29 + $0x48] sm:$0xff] }
 0x3fd   :  { %v14818_v21 = vpack.c.bf16 %v1267_v0, %v1266_v39  ;;  %v14823_v24 = vpack.c.bf16 %v1496_v11, %v1497_v51  ;;  %v13881_v39 = vld [vmem:[%s21241_s29 + $0x40] sm:$0xff]  ;;  %v1154_v62 = vld [vmem:[%s21115_s3 + $0x48] sm:$0xff] }
 0x3fe   :  { %v14825_v30 = vadd.f32 %v1229_v7, %v1190_v15  ;;  %v1113_v25 = vmul.f32 %v1074_v16, %v878_v17  ;;  %v1396_v27 = vsel %vm1362_vm6, %v1325_v56, %v1326_v18  ;;  %v1495_v29 = vsel %vm1461_vm7, %v1426_v61, %v1427_v12  ;;  %v13594_v1 = vld [vmem:[%s21114_s5 + $0x1c8] ss:$12 sps:$4 sm:$0xff]   ;;  %v13597_v7 = vld [vmem:[%s21114_s5 + $0x1d0] ss:$12 sps:$4 sm:$0xff]  }
 0x3ff   :  { %v882_v32 = vpop.f32.mrb[24].mxu1  ;;  %v1403_v34 = vpack.c.bf16 %v1396_v27, %v1397_v4  ;;  %2235 = vmatpush1.bf16.msra.mxu0 %v13585_v9  ;;  %12318 = vmatpush3.bf16.msra.mxu1 %v13592_v22  ;;  %v13596_v4 = vld [vmem:[%s21114_s5 + $0x1cc] ss:$12 sps:$4 sm:$0xff]  }
 0x400   :  { %v1428_v37 = vrot.slane %v14825_v30, 2  ;;  %v1191_v38 = vmul.f32 %v1152_v20, %v1113_v25  ;;  %v1075_v40 = vsub.f32 %v13881_v39, %v882_v32  ;;  %v884_v41 = vpop.f32.mrb[25].mxu1  ;;  %v1327_v44 = vrot.slane %v14825_v30, 1  ;;  %2236 = vmatprep.subr.bf16.mxu0 %v13590_v28  ;;  %12319 = vmatprep.subr.bf16.mxu1 %v13593_v47  ;;  %v1232_v2 = vld [vmem:[%s21116_s4 + $0x48] sm:$0xff]  ;;  %v13883_v20 = vld [vmem:[%s21241_s29 + $0x50] sm:$0xff] }
 0x401   :  { %2043 = vmatprep.mubr.bf16.mxu0 %v1403_v34  ;;  %2503 = vmatprep.mubr.bf16.mxu1 %v1403_v34  ;;  %v1155_v28 = vld [vmem:[%s21115_s3 + $0x50] sm:$0xff]  ;;  %v13598_v39 = vld [vmem:[%s21114_s5 + $0x1e0] ss:$12 sps:$4 sm:$0xff]  }
 0x402   :  { %v1269_v49 = vadd.f32 %v1230_v31, %v1191_v38  ;;  %v1114_v51 = vmul.f32 %v1075_v40, %v884_v41  ;;  %2044 = vmatmul.mubr.bf16.gmra.mrb[8].mxu0 %v14775_v36  ;;  %2504 = vmatmul.mubr.bf16.gmra.mrb[92].mxu1 %v14775_v36  ;;  %v1395_v52 = vsel %vm1362_vm6, %v1326_v18, %v1327_v44  ;;  %v13601_v31 = vld [vmem:[%s21114_s5 + $0x1e8] ss:$12 sps:$4 sm:$0xff]  }
 0x403   :  { %v888_v54 = vpop.f32.mrb[26].mxu1  ;;  %2237 = vmatpush1.bf16.msra.mxu0 %v13588_v35  ;;  %v1494_v55 = vsel %vm1461_vm7, %v1427_v12, %v1428_v37  ;;  %12320 = vmatpush3.bf16.msra.mxu1 %v13593_v47  ;;  %v1233_v40 = vld [vmem:[%s21116_s4 + $0x50] sm:$0xff] }
 0x404   :  { %v1192_v56 = vmul.f32 %v1153_v45, %v1114_v51  ;;  %v1076_v61 = vsub.f32 %v13882_v58, %v888_v54  ;;  %v890_v36 = vpop.f32.mrb[27].mxu1  ;;  %v1328_v63 = vrot.slane %v1269_v49, 1  ;;  %v14867_v0 = vpack.c.bf16 %v1269_v49, %v14825_v30  ;;  %2238 = vmatprep.subr.bf16.mxu0 %v13596_v4  ;;  %12321 = vmatprep.subr.bf16.mxu1 %v13597_v7  ;;  %v13884_v45 = vld [vmem:[%s21241_s29 + $0x58] sm:$0xff]  ;;  %v13605_v54 = vld [vmem:[%s21114_s5 + $0x200] ss:$12 sps:$4 sm:$0xff]  }
 0x405   :  { %v14878_v8 = vpack.c.bf16 %v1494_v55, %v1495_v29  ;;  %v1429_v15 = vrot.slane %v1269_v49, 2  ;;  %v13600_v29 = vld [vmem:[%s21114_s5 + $0x1e4] ss:$12 sps:$4 sm:$0xff]   ;;  %v1156_v55 = vld [vmem:[%s21115_s3 + $0x58] sm:$0xff] }
 0x406   :  { %v1270_v9 = vadd.f32 %v1231_v53, %v1192_v56  ;;  %v1115_v11 = vmul.f32 %v1076_v61, %v890_v36  ;;  %v1394_v12 = vsel %vm1362_vm6, %v1327_v44, %v1328_v63  ;;  %v13602_v53 = vld [vmem:[%s21114_s5 + $0x1f8] ss:$12 sps:$4 sm:$0xff]  }
 0x407   :  { %v894_v16 = vpop.f32.mrb[28].mxu1  ;;  %v1404_v17 = vpack.c.bf16 %v1394_v12, %v1395_v52  ;;  %2239 = vmatpush1.bf16.msra.mxu0 %v13594_v1  ;;  %12322 = vmatpush3.bf16.msra.mxu1 %v13597_v7  ;;  %v1493_v32 = vsel %vm1461_vm7, %v1428_v37, %v1429_v15  ;;  %v13604_v37 = vld [vmem:[%s21114_s5 + $0x1fc] ss:$12 sps:$4 sm:$0xff]  }
 0x408   :  { %v1193_v18 = vmul.f32 %v1154_v62, %v1115_v11  ;;  %v1077_v22 = vsub.f32 %v13883_v20, %v894_v16  ;;  %v896_v30 = vpop.f32.mrb[29].mxu1  ;;  %v1329_v25 = vrot.slane %v1270_v9, 1  ;;  %v1430_v27 = vrot.slane %v1270_v9, 2  ;;  %2240 = vmatprep.subr.bf16.mxu0 %v13600_v29  ;;  %12323 = vmatprep.subr.bf16.mxu1 %v13601_v31  ;;  %v13885_v11 = vld [vmem:[%s21241_s29 + $0x60] sm:$0xff] }
 0x409   :  { %2053 = vmatprep.mubr.bf16.mxu0 %v1404_v17  ;;  %2511 = vmatprep.mubr.bf16.mxu1 %v1404_v17  ;;  %v1157_v17 = vld [vmem:[%s21115_s3 + $0x60] sm:$0xff] }
 0x40a   :  { %v1271_v34 = vadd.f32 %v1232_v2, %v1193_v18  ;;  %v1116_v35 = vmul.f32 %v1077_v22, %v896_v30  ;;  %2054 = vmatmul.mubr.bf16.gmra.mrb[12].mxu0 %v14818_v21  ;;  %2512 = vmatmul.mubr.bf16.gmra.mrb[96].mxu1 %v14818_v21  ;;  %v1393_v38 = vsel %vm1362_vm6, %v1328_v63, %v1329_v25  ;;  %v1234_v63 = vld [vmem:[%s21116_s4 + $0x58] sm:$0xff]  ;;  %v13608_v18 = vld [vmem:[%s21114_s5 + $0x214] ss:$12 sps:$4 sm:$0xff]  }
 0x40b   :  { %v900_v41 = vpop.f32.mrb[30].mxu1  ;;  %v1492_v21 = vsel %vm1461_vm7, %v1429_v15, %v1430_v27  ;;  %2241 = vmatpush1.bf16.msra.mxu0 %v13598_v39  ;;  %12324 = vmatpush3.bf16.msra.mxu1 %v13601_v31  ;;  %v13609_v20 = vld [vmem:[%s21114_s5 + $0x218] ss:$12 sps:$4 sm:$0xff]  }
 0x40c   :  { %v1194_v44 = vmul.f32 %v1155_v28, %v1116_v35  ;;  %v1078_v47 = vsub.f32 %v13884_v45, %v900_v41  ;;  %v902_v49 = vpop.f32.mrb[31].mxu1  ;;  %v1330_v51 = vrot.slane %v1271_v34, 1  ;;  %v14917_v52 = vpack.c.bf16 %v1271_v34, %v1270_v9  ;;  %2242 = vmatprep.subr.bf16.mxu0 %v13604_v37  ;;  %12325 = vmatprep.subr.bf16.mxu1 %v13605_v54  ;;  %v1235_v28 = vld [vmem:[%s21116_s4 + $0x60] sm:$0xff]  ;;  %v13612_v31 = vld [vmem:[%s21114_s5 + $0x22c] ss:$12 sps:$4 sm:$0xff]  }
 0x40d   :  { %v14928_v56 = vpack.c.bf16 %v1492_v21, %v1493_v32  ;;  %v1431_v58 = vrot.slane %v1271_v34, 2  ;;  %v13886_v34 = vld [vmem:[%s21241_s29 + $0x68] sm:$0xff]  ;;  %v13613_v37 = vld [vmem:[%s21114_s5 + $0x230] ss:$12 sps:$4 sm:$0xff]  }
 0x40e   :  { %v1272_v61 = vadd.f32 %v1233_v40, %v1194_v44  ;;  %v1117_v36 = vmul.f32 %v1078_v47, %v902_v49  ;;  %v1392_v62 = vsel %vm1362_vm6, %v1329_v25, %v1330_v51  ;;  %v13610_v41 = vld [vmem:[%s21114_s5 + $0x228] ss:$12 sps:$4 sm:$0xff]  }
 0x40f   :  { %v906_v1 = vpop.f32.mrb[32].mxu1  ;;  %v1405_v4 = vpack.c.bf16 %v1392_v62, %v1393_v38  ;;  %v1491_v7 = vsel %vm1461_vm7, %v1430_v27, %v1431_v58  ;;  %2243 = vmatpush1.bf16.msra.mxu0 %v13602_v53  ;;  %12326 = vmatpush3.bf16.msra.mxu1 %v13605_v54  ;;  %v13606_v27 = vld [vmem:[%s21114_s5 + $0x210] ss:$12 sps:$4 sm:$0xff]   ;;  %v1158_v21 = vld [vmem:[%s21115_s3 + $0x68] sm:$0xff] }
 0x410   :  { %v1195_v9 = vmul.f32 %v1156_v55, %v1117_v36  ;;  %v1079_v12 = vsub.f32 %v13885_v11, %v906_v1  ;;  %v908_v15 = vpop.f32.mrb[33].mxu1  ;;  %v1331_v2 = vrot.slane %v1272_v61, 1  ;;  %v1432_v16 = vrot.slane %v1272_v61, 2  ;;  %2244 = vmatprep.subr.bf16.mxu0 %v13608_v18  ;;  %12327 = vmatprep.subr.bf16.mxu1 %v13609_v20  ;;  %v1236_v53 = vld [vmem:[%s21116_s4 + $0x68] sm:$0xff]  ;;  %v13887_v36 = vld [vmem:[%s21241_s29 + $0x70] sm:$0xff]  ;;  %v13888_v18 = vld [vmem:[%s21241_s29 + $0x78] sm:$0xff] }
 0x411   :  { %2063 = vmatprep.mubr.bf16.mxu0 %v1405_v4  ;;  %2519 = vmatprep.mubr.bf16.mxu1 %v1405_v4 }
 0x412   :  { %v1273_v22 = vadd.f32 %v1234_v63, %v1195_v9  ;;  %v1118_v30 = vmul.f32 %v1079_v12, %v908_v15  ;;  %2064 = vmatmul.mubr.bf16.gmra.mrb[16].mxu0 %v14867_v0  ;;  %2520 = vmatmul.mubr.bf16.gmra.mrb[100].mxu1 %v14867_v0  ;;  %v1391_v25 = vsel %vm1362_vm6, %v1330_v51, %v1331_v2  ;;  %v1237_v15 = vld [vmem:[%s21116_s4 + $0x70] sm:$0xff] }
 0x413   :  { %v912_v29 = vpop.f32.mrb[34].mxu1  ;;  %v1490_v0 = vsel %vm1461_vm7, %v1431_v58, %v1432_v16  ;;  %2245 = vmatpush1.bf16.msra.mxu0 %v13606_v27  ;;  %12328 = vmatpush3.bf16.msra.mxu1 %v13609_v20 }
 0x414   :  { %v1196_v32 = vmul.f32 %v1157_v17, %v1118_v30  ;;  %v1080_v35 = vsub.f32 %v13886_v34, %v912_v29  ;;  %v914_v38 = vpop.f32.mrb[35].mxu1  ;;  %v1332_v39 = vrot.slane %v1273_v22, 1  ;;  %v14967_v40 = vpack.c.bf16 %v1273_v22, %v1272_v61  ;;  %2246 = vmatprep.subr.bf16.mxu0 %v13612_v31  ;;  %12329 = vmatprep.subr.bf16.mxu1 %v13613_v37 }
 0x415   :  { %v14978_v44 = vpack.c.bf16 %v1490_v0, %v1491_v7  ;;  %v1433_v45 = vrot.slane %v1273_v22, 2  ;;  %v1159_v7 = vld [vmem:[%s21115_s3 + $0x70] sm:$0xff] }
 0x416   :  { %v1274_v47 = vadd.f32 %v1235_v28, %v1196_v32  ;;  %v1119_v49 = vmul.f32 %v1080_v35, %v914_v38  ;;  %v1390_v51 = vsel %vm1362_vm6, %v1331_v2, %v1332_v39  ;;  %v1238_v32 = vld [vmem:[%s21116_s4 + $0x78] sm:$0xff] }
 0x417   :  { %v918_v54 = vpop.f32.mrb[36].mxu1  ;;  %v1406_v55 = vpack.c.bf16 %v1390_v51, %v1391_v25  ;;  %v1489_v58 = vsel %vm1461_vm7, %v1432_v16, %v1433_v45  ;;  %2247 = vmatpush1.bf16.msra.mxu0 %v13610_v41  ;;  %12330 = vmatpush3.bf16.msra.mxu1 %v13613_v37  ;;  %v1160_v25 = vld [vmem:[%s21115_s3 + $0x78] sm:$0xff]  ;;  %v13889_v41 = vld [vmem:[%s21241_s29 + $0x80] sm:$0xff] }
 0x418   :  { %v1197_v61 = vmul.f32 %v1158_v21, %v1119_v49  ;;  %v1081_v62 = vsub.f32 %v13887_v36, %v918_v54  ;;  %v920_v63 = vpop.f32.mrb[37].mxu1  ;;  %v1333_v1 = vrot.slane %v1274_v47, 1  ;;  %v1434_v4 = vrot.slane %v1274_v47, 2  ;;  %13016 = vmatprep.subr.bf16.mxu1 %v21133_v3  ;;  %v1161_v49 = vld [vmem:[%s21115_s3 + $0x80] sm:$0xff] }
 0x419   :  { %2073 = vmatprep.mubr.bf16.mxu0 %v1406_v55  ;;  %2527 = vmatprep.mubr.bf16.mxu1 %v1406_v55  ;;  %v1239_v55 = vld [vmem:[%s21116_s4 + $0x80] sm:$0xff] }
 0x41a   :  { %v1275_v9 = vadd.f32 %v1236_v53, %v1197_v61  ;;  %v1120_v11 = vmul.f32 %v1081_v62, %v920_v63  ;;  %2074 = vmatmul.mubr.bf16.gmra.mrb[20].mxu0 %v14917_v52  ;;  %2528 = vmatmul.mubr.bf16.gmra.mrb[104].mxu1 %v14917_v52  ;;  %v1389_v12 = vsel %vm1362_vm6, %v1332_v39, %v1333_v1  ;;  %v13890_v62 = vld [vmem:[%s21241_s29 + $0x88] sm:$0xff] }
 0x41b   :  { %v924_v2 = vpop.f32.mrb[38].mxu1  ;;  %v1488_v16 = vsel %vm1461_vm7, %v1433_v45, %v1434_v4 }
 0x41c   :  { %v1198_v17 = vmul.f32 %v1159_v7, %v1120_v11  ;;  %v1082_v20 = vsub.f32 %v13888_v18, %v924_v2  ;;  %v926_v52 = vpop.f32.mrb[39].mxu1  ;;  %v1334_v22 = vrot.slane %v1275_v9, 1  ;;  %v1307_v30 = vpack.c.bf16 %v1275_v9, %v1274_v47  ;;  %v1162_v7 = vld [vmem:[%s21115_s3 + $0x88] sm:$0xff] }
 0x41d   :  { %v15009_v27 = vpack.c.bf16 %v1488_v16, %v1489_v58  ;;  %v1435_v28 = vrot.slane %v1275_v9, 2  ;;  %v1240_v16 = vld [vmem:[%s21116_s4 + $0x88] sm:$0xff] }
 0x41e   :  { %v1276_v29 = vadd.f32 %v1237_v15, %v1198_v17  ;;  %v1121_v31 = vmul.f32 %v1082_v20, %v926_v52  ;;  %v1388_v0 = vsel %vm1362_vm6, %v1333_v1, %v1334_v22 }
 0x41f   :  { %v930_v34 = vpop.f32.mrb[40].mxu1  ;;  %v1407_v35 = vpack.c.bf16 %v1388_v0, %v1389_v12  ;;  %v1487_v38 = vsel %vm1461_vm7, %v1434_v4, %v1435_v28  ;;  %v1163_v0 = vld [vmem:[%s21115_s3 + $0x90] sm:$0xff] }
 0x420   :  { %v1199_v39 = vmul.f32 %v1160_v25, %v1121_v31  ;;  %v1083_v37 = vsub.f32 %v13889_v41, %v930_v34  ;;  %v932_v21 = vpop.f32.mrb[41].mxu1  ;;  %v1335_v45 = vrot.slane %v1276_v29, 1  ;;  %v1436_v47 = vrot.slane %v1276_v29, 2 }
 0x421   :  { %2083 = vmatprep.mubr.bf16.mxu0 %v1407_v35  ;;  %2535 = vmatprep.mubr.bf16.mxu1 %v1407_v35 }
 0x422   :  { %v1277_v51 = vadd.f32 %v1238_v32, %v1199_v39  ;;  %v1122_v53 = vmul.f32 %v1083_v37, %v932_v21  ;;  %2084 = vmatmul.mubr.bf16.gmra.mrb[24].mxu0 %v14967_v40  ;;  %2536 = vmatmul.mubr.bf16.gmra.mrb[108].mxu1 %v14967_v40  ;;  %v1387_v54 = vsel %vm1362_vm6, %v1334_v22, %v1335_v45  ;;  %v13891_v22 = vld [vmem:[%s21241_s29 + $0x90] sm:$0xff] }
 0x423   :  { %v936_v58 = vpop.f32.mrb[42].mxu1  ;;  %v1486_v61 = vsel %vm1461_vm7, %v1435_v28, %v1436_v47 }
 0x424   :  { %v1200_v36 = vmul.f32 %v1161_v49, %v1122_v53  ;;  %v1084_v63 = vsub.f32 %v13890_v62, %v936_v58  ;;  %v938_v1 = vpop.f32.mrb[43].mxu1  ;;  %v1336_v4 = vrot.slane %v1277_v51, 1  ;;  %v1308_v40 = vpack.c.bf16 %v1277_v51, %v1276_v29  ;;  %v1242_v62 = vld [vmem:[%s21116_s4 + $0x98] sm:$0xff] }
 0x425   :  { %v15039_v9 = vpack.c.bf16 %v1486_v61, %v1487_v38  ;;  %v1437_v11 = vrot.slane %v1277_v51, 2  ;;  %v1241_v38 = vld [vmem:[%s21116_s4 + $0x90] sm:$0xff]  ;;  %v1164_v51 = vld [vmem:[%s21115_s3 + $0x98] sm:$0xff] }
 0x426   :  { %v1278_v12 = vadd.f32 %v1239_v55, %v1200_v36  ;;  %v1123_v15 = vmul.f32 %v1084_v63, %v938_v1  ;;  %v1386_v2 = vsel %vm1362_vm6, %v1335_v45, %v1336_v4 }
 0x427   :  { %v942_v17 = vpop.f32.mrb[44].mxu1  ;;  %v1408_v18 = vpack.c.bf16 %v1386_v2, %v1387_v54  ;;  %v1485_v20 = vsel %vm1461_vm7, %v1436_v47, %v1437_v11  ;;  %v13892_v47 = vld [vmem:[%s21241_s29 + $0x98] sm:$0xff] }
 0x428   :  { %v1201_v52 = vmul.f32 %v1162_v7, %v1123_v15  ;;  %v1085_v25 = vsub.f32 %v13891_v22, %v942_v17  ;;  %v944_v28 = vpop.f32.mrb[45].mxu1  ;;  %v1337_v29 = vrot.slane %v1278_v12, 1  ;;  %v1438_v31 = vrot.slane %v1278_v12, 2  ;;  %v13893_v7 = vld [vmem:[%s21241_s29 + $0xa0] sm:$0xff] }
 0x429   :  { %2093 = vmatprep.mubr.bf16.mxu0 %v1408_v18  ;;  %2543 = vmatprep.mubr.bf16.mxu1 %v1408_v18 }
 0x42a   :  { %v1279_v32 = vadd.f32 %v1240_v16, %v1201_v52  ;;  %v1124_v34 = vmul.f32 %v1085_v25, %v944_v28  ;;  %2094 = vmatmul.mubr.bf16.gmra.mrb[28].mxu0 %v1307_v30  ;;  %2544 = vmatmul.mubr.bf16.gmra.mrb[112].mxu1 %v1307_v30  ;;  %v1385_v35 = vsel %vm1362_vm6, %v1336_v4, %v1337_v29  ;;  %v1165_v16 = vld [vmem:[%s21115_s3 + $0xa0] sm:$0xff] }
 0x42b   :  { %v948_v39 = vpop.f32.mrb[46].mxu1  ;;  %v1484_v41 = vsel %vm1461_vm7, %v1437_v11, %v1438_v31  ;;  %v1243_v52 = vld [vmem:[%s21116_s4 + $0xa0] sm:$0xff] }
 0x42c   :  { %v1338_v37 = vrot.slane %v1279_v32, 1  ;;  %v1439_v21 = vrot.slane %v1279_v32, 2  ;;  %v1202_v45 = vmul.f32 %v1163_v0, %v1124_v34  ;;  %v1086_v49 = vsub.f32 %v13892_v47, %v948_v39  ;;  %v950_v30 = vpop.f32.mrb[47].mxu1  ;;  %v1166_v34 = vld [vmem:[%s21115_s3 + $0xa8] sm:$0xff] }
 0x42d   :  { %v1309_v53 = vpack.c.bf16 %v1279_v32, %v1278_v12  ;;  %v15067_v54 = vpack.c.bf16 %v1484_v41, %v1485_v20 }
 0x42e   :  { %v1280_v55 = vadd.f32 %v1241_v38, %v1202_v45  ;;  %v1125_v58 = vmul.f32 %v1086_v49, %v950_v30  ;;  %v1384_v61 = vsel %vm1362_vm6, %v1337_v29, %v1338_v37  ;;  %v1483_v36 = vsel %vm1461_vm7, %v1438_v31, %v1439_v21  ;;  %v13894_v29 = vld [vmem:[%s21241_s29 + $0xa8] sm:$0xff] }
 0x42f   :  { %v954_v63 = vpop.f32.mrb[48].mxu1  ;;  %v1409_v1 = vpack.c.bf16 %v1384_v61, %v1385_v35 }
 0x430   :  { %v1203_v4 = vmul.f32 %v1164_v51, %v1125_v58  ;;  %v1087_v11 = vsub.f32 %v13893_v7, %v954_v63  ;;  %v956_v12 = vpop.f32.mrb[49].mxu1  ;;  %v1339_v15 = vrot.slane %v1280_v55, 1  ;;  %v1440_v2 = vrot.slane %v1280_v55, 2  ;;  %v13895_v51 = vld [vmem:[%s21241_s29 + $0xb0] sm:$0xff] }
 0x431   :  { %2103 = vmatprep.mubr.bf16.mxu0 %v1409_v1  ;;  %2551 = vmatprep.mubr.bf16.mxu1 %v1409_v1  ;;  %v1245_v7 = vld [vmem:[%s21116_s4 + $0xb0] sm:$0xff] }
 0x432   :  { %v1281_v17 = vadd.f32 %v1242_v62, %v1203_v4  ;;  %v1126_v18 = vmul.f32 %v1087_v11, %v956_v12  ;;  %2104 = vmatmul.mubr.bf16.gmra.mrb[32].mxu0 %v1308_v40  ;;  %2552 = vmatmul.mubr.bf16.gmra.mrb[116].mxu1 %v1308_v40  ;;  %v1383_v20 = vsel %vm1362_vm6, %v1338_v37, %v1339_v15  ;;  %v1167_v62 = vld [vmem:[%s21115_s3 + $0xb0] sm:$0xff] }
 0x433   :  { %v960_v22 = vpop.f32.mrb[50].mxu1  ;;  %v1482_v25 = vsel %vm1461_vm7, %v1439_v21, %v1440_v2  ;;  %v1244_v21 = vld [vmem:[%s21116_s4 + $0xa8] sm:$0xff] }
 0x434   :  { %v1204_v28 = vmul.f32 %v1165_v16, %v1126_v18  ;;  %v1088_v31 = vsub.f32 %v13894_v29, %v960_v22  ;;  %v962_v0 = vpop.f32.mrb[51].mxu1  ;;  %v1340_v32 = vrot.slane %v1281_v17, 1  ;;  %v1310_v40 = vpack.c.bf16 %v1281_v17, %v1280_v55 }
 0x435   :  { %v15095_v35 = vpack.c.bf16 %v1482_v25, %v1483_v36  ;;  %v1441_v38 = vrot.slane %v1281_v17, 2 }
 0x436   :  { %v1282_v39 = vadd.f32 %v1243_v52, %v1204_v28  ;;  %v1127_v41 = vmul.f32 %v1088_v31, %v962_v0  ;;  %v1382_v37 = vsel %vm1362_vm6, %v1339_v15, %v1340_v32  ;;  %v1246_v31 = vld [vmem:[%s21116_s4 + $0xb8] sm:$0xff] }
 0x437   :  { %v966_v45 = vpop.f32.mrb[52].mxu1  ;;  %v1410_v47 = vpack.c.bf16 %v1382_v37, %v1383_v20  ;;  %v1481_v49 = vsel %vm1461_vm7, %v1440_v2, %v1441_v38  ;;  %v13896_v2 = vld [vmem:[%s21241_s29 + $0xb8] sm:$0xff] }
 0x438   :  { %v1205_v30 = vmul.f32 %v1166_v34, %v1127_v41  ;;  %v1089_v55 = vsub.f32 %v13895_v51, %v966_v45  ;;  %v968_v58 = vpop.f32.mrb[53].mxu1  ;;  %v1341_v61 = vrot.slane %v1282_v39, 1  ;;  %v1442_v36 = vrot.slane %v1282_v39, 2  ;;  %v1168_v20 = vld [vmem:[%s21115_s3 + $0xb8] sm:$0xff] }
 0x439   :  { %2113 = vmatprep.mubr.bf16.mxu0 %v1410_v47  ;;  %2559 = vmatprep.mubr.bf16.mxu1 %v1410_v47  ;;  %v1169_v47 = vld [vmem:[%s21115_s3 + $0xc0] sm:$0xff] }
 0x43a   :  { %v1283_v63 = vadd.f32 %v1244_v21, %v1205_v30  ;;  %v1128_v1 = vmul.f32 %v1089_v55, %v968_v58  ;;  %2114 = vmatmul.mubr.bf16.gmra.mrb[36].mxu0 %v1309_v53  ;;  %2560 = vmatmul.mubr.bf16.gmra.mrb[120].mxu1 %v1309_v53  ;;  %v1381_v4 = vsel %vm1362_vm6, %v1340_v32, %v1341_v61  ;;  %v1247_v55 = vld [vmem:[%s21116_s4 + $0xc0] sm:$0xff] }
 0x43b   :  { %v972_v11 = vpop.f32.mrb[54].mxu1  ;;  %v1480_v12 = vsel %vm1461_vm7, %v1441_v38, %v1442_v36 }
 0x43c   :  { %v1206_v15 = vmul.f32 %v1167_v62, %v1128_v1  ;;  %v1090_v16 = vsub.f32 %v13896_v2, %v972_v11  ;;  %v974_v17 = vpop.f32.mrb[55].mxu1  ;;  %v1342_v18 = vrot.slane %v1283_v63, 1  ;;  %v1311_v53 = vpack.c.bf16 %v1283_v63, %v1282_v39  ;;  %v13897_v39 = vld [vmem:[%s21241_s29 + $0xc0] sm:$0xff]  ;;  %v13898_v62 = vld [vmem:[%s21241_s29 + $0xc8] sm:$0xff] }
 0x43d   :  { %v15123_v52 = vpack.c.bf16 %v1480_v12, %v1481_v49  ;;  %v1443_v22 = vrot.slane %v1283_v63, 2 }
 0x43e   :  { %v1284_v25 = vadd.f32 %v1245_v7, %v1206_v15  ;;  %v1129_v28 = vmul.f32 %v1090_v16, %v974_v17  ;;  %v1380_v29 = vsel %vm1362_vm6, %v1341_v61, %v1342_v18  ;;  %v1170_v7 = vld [vmem:[%s21115_s3 + $0xc8] sm:$0xff] }
 0x43f   :  { %v978_v0 = vpop.f32.mrb[56].mxu1  ;;  %v1411_v32 = vpack.c.bf16 %v1380_v29, %v1381_v4  ;;  %v1479_v34 = vsel %vm1461_vm7, %v1442_v36, %v1443_v22  ;;  %v1248_v17 = vld [vmem:[%s21116_s4 + $0xc8] sm:$0xff] }
 0x440   :  { %v1207_v38 = vmul.f32 %v1168_v20, %v1129_v28  ;;  %v1091_v41 = vsub.f32 %v13897_v39, %v978_v0  ;;  %v980_v37 = vpop.f32.mrb[57].mxu1  ;;  %v1343_v21 = vrot.slane %v1284_v25, 1  ;;  %v1444_v45 = vrot.slane %v1284_v25, 2  ;;  %v13899_v28 = vld [vmem:[%s21241_s29 + $0xd0] sm:$0xff] }
 0x441   :  { %2123 = vmatprep.mubr.bf16.mxu0 %v1411_v32  ;;  %2567 = vmatprep.mubr.bf16.mxu1 %v1411_v32 }
 0x442   :  { %v1285_v49 = vadd.f32 %v1246_v31, %v1207_v38  ;;  %v1130_v30 = vmul.f32 %v1091_v41, %v980_v37  ;;  %2124 = vmatmul.mubr.bf16.gmra.mrb[40].mxu0 %v1310_v40  ;;  %2568 = vmatmul.mubr.bf16.gmra.mrb[124].mxu1 %v1310_v40  ;;  %v1379_v51 = vsel %vm1362_vm6, %v1342_v18, %v1343_v21  ;;  %v1249_v37 = vld [vmem:[%s21116_s4 + $0xd0] sm:$0xff] }
 0x443   :  { %v984_v58 = vpop.f32.mrb[58].mxu1  ;;  %v1478_v61 = vsel %vm1461_vm7, %v1443_v22, %v1444_v45 }
 0x444   :  { %v1208_v36 = vmul.f32 %v1169_v47, %v1130_v30  ;;  %v1092_v63 = vsub.f32 %v13898_v62, %v984_v58  ;;  %v986_v1 = vpop.f32.mrb[59].mxu1  ;;  %v1344_v4 = vrot.slane %v1285_v49, 1  ;;  %v1312_v40 = vpack.c.bf16 %v1285_v49, %v1284_v25  ;;  %v1172_v58 = vld [vmem:[%s21115_s3 + $0xd8] sm:$0xff] }
 0x445   :  { %v15151_v11 = vpack.c.bf16 %v1478_v61, %v1479_v34  ;;  %v1445_v12 = vrot.slane %v1285_v49, 2  ;;  %v1171_v34 = vld [vmem:[%s21115_s3 + $0xd0] sm:$0xff]  ;;  %v13900_v49 = vld [vmem:[%s21241_s29 + $0xd8] sm:$0xff] }
 0x446   :  { %v1286_v15 = vadd.f32 %v1247_v55, %v1208_v36  ;;  %v1131_v2 = vmul.f32 %v1092_v63, %v986_v1  ;;  %v1378_v16 = vsel %vm1362_vm6, %v1343_v21, %v1344_v4 }
 0x447   :  { %v990_v18 = vpop.f32.mrb[60].mxu1  ;;  %v1412_v20 = vpack.c.bf16 %v1378_v16, %v1379_v51  ;;  %v1477_v22 = vsel %vm1461_vm7, %v1444_v45, %v1445_v12  ;;  %v13901_v16 = vld [vmem:[%s21241_s29 + $0xe0] sm:$0xff] }
 0x448   :  { %v1209_v25 = vmul.f32 %v1170_v7, %v1131_v2  ;;  %v1093_v29 = vsub.f32 %v13899_v28, %v990_v18  ;;  %v992_v31 = vpop.f32.mrb[61].mxu1  ;;  %v1345_v0 = vrot.slane %v1286_v15, 1  ;;  %v1446_v32 = vrot.slane %v1286_v15, 2 }
 0x449   :  { %2133 = vmatprep.mubr.bf16.mxu0 %v1412_v20  ;;  %2575 = vmatprep.mubr.bf16.mxu1 %v1412_v20 }
 0x44a   :  { %v1287_v38 = vadd.f32 %v1248_v17, %v1209_v25  ;;  %v1132_v39 = vmul.f32 %v1093_v29, %v992_v31  ;;  %2134 = vmatmul.mubr.bf16.gmra.mrb[44].mxu0 %v1311_v53  ;;  %2576 = vmatmul.mubr.bf16.gmra.mrb[128].mxu1 %v1311_v53  ;;  %v1377_v41 = vsel %vm1362_vm6, %v1344_v4, %v1345_v0  ;;  %v1250_v4 = vld [vmem:[%s21116_s4 + $0xd8] sm:$0xff]  ;;  %v1173_v25 = vld [vmem:[%s21115_s3 + $0xe0] sm:$0xff] }
 0x44b   :  { %v996_v21 = vpop.f32.mrb[62].mxu1  ;;  %v1476_v45 = vsel %vm1461_vm7, %v1445_v12, %v1446_v32 }
 0x44c   :  { %v1210_v47 = vmul.f32 %v1171_v34, %v1132_v39  ;;  %v1094_v30 = vsub.f32 %v13900_v49, %v996_v21  ;;  %v998_v51 = vpop.f32.mrb[63].mxu1  ;;  %v1346_v55 = vrot.slane %v1287_v38, 1  ;;  %v1313_v53 = vpack.c.bf16 %v1287_v38, %v1286_v15  ;;  %v13902_v39 = vld [vmem:[%s21241_s29 + $0xe8] sm:$0xff] }
 0x44d   :  { %v15179_v61 = vpack.c.bf16 %v1476_v45, %v1477_v22  ;;  %v1447_v36 = vrot.slane %v1287_v38, 2  ;;  %v1174_v45 = vld [vmem:[%s21115_s3 + $0xe8] sm:$0xff] }
 0x44e   :  { %v1288_v62 = vadd.f32 %v1249_v37, %v1210_v47  ;;  %v1133_v63 = vmul.f32 %v1094_v30, %v998_v51  ;;  %v1376_v1 = vsel %vm1362_vm6, %v1345_v0, %v1346_v55  ;;  %v1251_v0 = vld [vmem:[%s21116_s4 + $0xe0] sm:$0xff] }
 0x44f   :  { %v1002_v7 = vpop.f32.mrb[64].mxu1  ;;  %v1413_v12 = vpack.c.bf16 %v1376_v1, %v1377_v41  ;;  %v1475_v15 = vsel %vm1461_vm7, %v1446_v32, %v1447_v36 }
 0x450   :  { %v1211_v2 = vmul.f32 %v1172_v58, %v1133_v63  ;;  %v1095_v17 = vsub.f32 %v13901_v16, %v1002_v7  ;;  %v1004_v18 = vpop.f32.mrb[65].mxu1  ;;  %v1347_v20 = vrot.slane %v1288_v62, 1  ;;  %v1448_v22 = vrot.slane %v1288_v62, 2  ;;  %v1252_v58 = vld [vmem:[%s21116_s4 + $0xe8] sm:$0xff]  ;;  %v1175_v16 = vld [vmem:[%s21115_s3 + $0xf0] sm:$0xff] }
 0x451   :  { %2143 = vmatprep.mubr.bf16.mxu0 %v1413_v12  ;;  %2583 = vmatprep.mubr.bf16.mxu1 %v1413_v12 }
 0x452   :  { %v1289_v28 = vadd.f32 %v1250_v4, %v1211_v2  ;;  %v1134_v29 = vmul.f32 %v1095_v17, %v1004_v18  ;;  %2144 = vmatmul.mubr.bf16.gmra.mrb[48].mxu0 %v1312_v40  ;;  %2584 = vmatmul.mubr.bf16.gmra.mrb[132].mxu1 %v1312_v40  ;;  %v1375_v31 = vsel %vm1362_vm6, %v1346_v55, %v1347_v20  ;;  %v13903_v4 = vld [vmem:[%s21241_s29 + $0xf0] sm:$0xff] }
 0x453   :  { %v1008_v32 = vpop.f32.mrb[66].mxu1  ;;  %v1474_v34 = vsel %vm1461_vm7, %v1447_v36, %v1448_v22 }
 0x454   :  { %v1212_v38 = vmul.f32 %v1173_v25, %v1134_v29  ;;  %v1096_v41 = vsub.f32 %v13902_v39, %v1008_v32  ;;  %v1010_v37 = vpop.f32.mrb[67].mxu1  ;;  %v1348_v21 = vrot.slane %v1289_v28, 1  ;;  %v1314_v40 = vpack.c.bf16 %v1289_v28, %v1288_v62 }
 0x455   :  { %v15207_v47 = vpack.c.bf16 %v1474_v34, %v1475_v15  ;;  %v1449_v49 = vrot.slane %v1289_v28, 2 }
 0x456   :  { %v1290_v30 = vadd.f32 %v1251_v0, %v1212_v38  ;;  %v1135_v51 = vmul.f32 %v1096_v41, %v1010_v37  ;;  %v1374_v55 = vsel %vm1362_vm6, %v1347_v20, %v1348_v21  ;;  %v1176_v38 = vld [vmem:[%s21115_s3 + $0xf8] sm:$0xff] }
 0x457   :  { %v1014_v36 = vpop.f32.mrb[68].mxu1  ;;  %v1414_v63 = vpack.c.bf16 %v1374_v55, %v1375_v31  ;;  %v1473_v62 = vsel %vm1461_vm7, %v1448_v22, %v1449_v49  ;;  %v1253_v22 = vld [vmem:[%s21116_s4 + $0xf0] sm:$0xff]  ;;  %v13904_v31 = vld [vmem:[%s21241_s29 + $0xf8] sm:$0xff] }
 0x458   :  { %v1213_v1 = vmul.f32 %v1174_v45, %v1135_v51  ;;  %v1097_v7 = vsub.f32 %v13903_v4, %v1014_v36  ;;  %v1016_v12 = vpop.f32.mrb[69].mxu1  ;;  %v1349_v15 = vrot.slane %v1290_v30, 1  ;;  %v1450_v2 = vrot.slane %v1290_v30, 2  ;;  %v13905_v36 = vld [vmem:[%s21241_s29 + $0x100] sm:$0xff] }
 0x459   :  { %2153 = vmatprep.mubr.bf16.mxu0 %v1414_v63  ;;  %2591 = vmatprep.mubr.bf16.mxu1 %v1414_v63 }
 0x45a   :  { %v1291_v17 = vadd.f32 %v1252_v58, %v1213_v1  ;;  %v1136_v18 = vmul.f32 %v1097_v7, %v1016_v12  ;;  %2154 = vmatmul.mubr.bf16.gmra.mrb[52].mxu0 %v1313_v53  ;;  %2592 = vmatmul.mubr.bf16.gmra.mrb[136].mxu1 %v1313_v53  ;;  %v1373_v20 = vsel %vm1362_vm6, %v1348_v21, %v1349_v15  ;;  %v1177_v7 = vld [vmem:[%s21115_s3 + $0x100] sm:$0xff] }
 0x45b   :  { %v1020_v25 = vpop.f32.mrb[70].mxu1  ;;  %v1472_v28 = vsel %vm1461_vm7, %v1449_v49, %v1450_v2  ;;  %v1254_v49 = vld [vmem:[%s21116_s4 + $0xf8] sm:$0xff] }
 0x45c   :  { %v1214_v29 = vmul.f32 %v1175_v16, %v1136_v18  ;;  %v1098_v0 = vsub.f32 %v13904_v31, %v1020_v25  ;;  %v1022_v32 = vpop.f32.mrb[71].mxu1  ;;  %v1350_v34 = vrot.slane %v1291_v17, 1  ;;  %v1315_v53 = vpack.c.bf16 %v1291_v17, %v1290_v30  ;;  %v1255_v16 = vld [vmem:[%s21116_s4 + $0x100] sm:$0xff]  ;;  %v1178_v31 = vld [vmem:[%s21115_s3 + $0x108] sm:$0xff] }
 0x45d   :  { %v15235_v39 = vpack.c.bf16 %v1472_v28, %v1473_v62  ;;  %v1451_v41 = vrot.slane %v1291_v17, 2 }
 0x45e   :  { %v1292_v37 = vadd.f32 %v1253_v22, %v1214_v29  ;;  %v1137_v21 = vmul.f32 %v1098_v0, %v1022_v32  ;;  %v1372_v45 = vsel %vm1362_vm6, %v1349_v15, %v1350_v34  ;;  %v13906_v22 = vld [vmem:[%s21241_s29 + $0x108] sm:$0xff] }
 0x45f   :  { %v1026_v51 = vpop.f32.mrb[72].mxu1  ;;  %v1415_v55 = vpack.c.bf16 %v1372_v45, %v1373_v20  ;;  %v1471_v30 = vsel %vm1461_vm7, %v1450_v2, %v1451_v41 }
 0x460   :  { %v1215_v58 = vmul.f32 %v1176_v38, %v1137_v21  ;;  %v1099_v63 = vsub.f32 %v13905_v36, %v1026_v51  ;;  %v1028_v62 = vpop.f32.mrb[73].mxu1  ;;  %v1351_v1 = vrot.slane %v1292_v37, 1  ;;  %v1452_v4 = vrot.slane %v1292_v37, 2  ;;  %v1256_v21 = vld [vmem:[%s21116_s4 + $0x108] sm:$0xff] }
 0x461   :  { %2163 = vmatprep.mubr.bf16.mxu0 %v1415_v55  ;;  %2599 = vmatprep.mubr.bf16.mxu1 %v1415_v55  ;;  %v13907_v55 = vld [vmem:[%s21241_s29 + $0x110] sm:$0xff] }
 0x462   :  { %v1293_v12 = vadd.f32 %v1254_v49, %v1215_v58  ;;  %v1138_v15 = vmul.f32 %v1099_v63, %v1028_v62  ;;  %2164 = vmatmul.mubr.bf16.gmra.mrb[56].mxu0 %v1314_v40  ;;  %2600 = vmatmul.mubr.bf16.gmra.mrb[140].mxu1 %v1314_v40  ;;  %v1371_v2 = vsel %vm1362_vm6, %v1350_v34, %v1351_v1  ;;  %v1179_v62 = vld [vmem:[%s21115_s3 + $0x110] sm:$0xff] }
 0x463   :  { %v1032_v17 = vpop.f32.mrb[74].mxu1  ;;  %v1470_v18 = vsel %vm1461_vm7, %v1451_v41, %v1452_v4 }
 0x464   :  { %v1216_v20 = vmul.f32 %v1177_v7, %v1138_v15  ;;  %v1100_v25 = vsub.f32 %v13906_v22, %v1032_v17  ;;  %v1034_v28 = vpop.f32.mrb[75].mxu1  ;;  %v1352_v29 = vrot.slane %v1293_v12, 1  ;;  %v1316_v40 = vpack.c.bf16 %v1293_v12, %v1292_v37  ;;  %v13908_v17 = vld [vmem:[%s21241_s29 + $0x118] sm:$0xff] }
 0x465   :  { %v15263_v0 = vpack.c.bf16 %v1470_v18, %v1471_v30  ;;  %v1453_v32 = vrot.slane %v1293_v12, 2  ;;  %v1257_v12 = vld [vmem:[%s21116_s4 + $0x110] sm:$0xff] }
 0x466   :  { %v1294_v34 = vadd.f32 %v1255_v16, %v1216_v20  ;;  %v1139_v38 = vmul.f32 %v1100_v25, %v1034_v28  ;;  %v1370_v41 = vsel %vm1362_vm6, %v1351_v1, %v1352_v29  ;;  %v1180_v25 = vld [vmem:[%s21115_s3 + $0x118] sm:$0xff] }
 0x467   :  { %v1038_v45 = vpop.f32.mrb[76].mxu1  ;;  %v1416_v49 = vpack.c.bf16 %v1370_v41, %v1371_v2  ;;  %v1469_v37 = vsel %vm1461_vm7, %v1452_v4, %v1453_v32  ;;  %v1258_v41 = vld [vmem:[%s21116_s4 + $0x118] sm:$0xff] }
 0x468   :  { %v1217_v51 = vmul.f32 %v1178_v31, %v1139_v38  ;;  %v1101_v30 = vsub.f32 %v13907_v55, %v1038_v45  ;;  %v1040_v58 = vpop.f32.mrb[77].mxu1  ;;  %v1353_v36 = vrot.slane %v1294_v34, 1  ;;  %v1454_v63 = vrot.slane %v1294_v34, 2 }
 0x469   :  { %2173 = vmatprep.mubr.bf16.mxu0 %v1416_v49  ;;  %2607 = vmatprep.mubr.bf16.mxu1 %v1416_v49 }
 0x46a   :  { %v1295_v1 = vadd.f32 %v1256_v21, %v1217_v51  ;;  %v1140_v7 = vmul.f32 %v1101_v30, %v1040_v58  ;;  %2174 = vmatmul.mubr.bf16.gmra.mrb[60].mxu0 %v1315_v53  ;;  %2608 = vmatmul.mubr.bf16.gmra.mrb[144].mxu1 %v1315_v53  ;;  %v1369_v4 = vsel %vm1362_vm6, %v1352_v29, %v1353_v36 }
 0x46b   :  { %v1044_v15 = vpop.f32.mrb[78].mxu1  ;;  %v1468_v2 = vsel %vm1461_vm7, %v1453_v32, %v1454_v63 }
 0x46c   :  { %v1218_v16 = vmul.f32 %v1179_v62, %v1140_v7  ;;  %v1102_v18 = vsub.f32 %v13908_v17, %v1044_v15  ;;  %v1046_v20 = vpop.f32.mrb[79].mxu1  ;;  %v1354_v22 = vrot.slane %v1295_v1, 1  ;;  %v1317_v53 = vpack.c.bf16 %v1295_v1, %v1294_v34  ;;  %v1259_v7 = vld [vmem:[%s21116_s4 + $0x120] sm:$0xff] }
 0x46d   :  { %v15291_v28 = vpack.c.bf16 %v1468_v2, %v1469_v37  ;;  %v1455_v29 = vrot.slane %v1295_v1, 2  ;;  %v13909_v37 = vld [vmem:[%s21241_s29 + $0x120] sm:$0xff]  ;;  %v13910_v2 = vld [vmem:[%s21241_s29 + $0x128] sm:$0xff] }
 0x46e   :  { %v1296_v31 = vadd.f32 %v1257_v12, %v1218_v16  ;;  %v1141_v38 = vmul.f32 %v1102_v18, %v1046_v20  ;;  %v1368_v32 = vsel %vm1362_vm6, %v1353_v36, %v1354_v22  ;;  %v1181_v36 = vld [vmem:[%s21115_s3 + $0x120] sm:$0xff]  ;;  %v1182_v20 = vld [vmem:[%s21115_s3 + $0x128] sm:$0xff] }
 0x46f   :  { %v1050_v21 = vpop.f32.mrb[80].mxu1  ;;  %v1417_v45 = vpack.c.bf16 %v1368_v32, %v1369_v4  ;;  %v1467_v34 = vsel %vm1461_vm7, %v1454_v63, %v1455_v29 }
 0x470   :  { %v1219_v49 = vmul.f32 %v1180_v25, %v1141_v38  ;;  %v1103_v51 = vsub.f32 %v13909_v37, %v1050_v21  ;;  %v1052_v55 = vpop.f32.mrb[81].mxu1  ;;  %v1355_v30 = vrot.slane %v1296_v31, 1  ;;  %v1456_v58 = vrot.slane %v1296_v31, 2 }
 0x471   :  { %2183 = vmatprep.mubr.bf16.mxu0 %v1417_v45  ;;  %2615 = vmatprep.mubr.bf16.mxu1 %v1417_v45 }
 0x472   :  { %v1297_v62 = vadd.f32 %v1258_v41, %v1219_v49  ;;  %v1142_v1 = vmul.f32 %v1103_v51, %v1052_v55  ;;  %2184 = vmatmul.mubr.bf16.gmra.mrb[64].mxu0 %v1316_v40  ;;  %2616 = vmatmul.mubr.bf16.gmra.mrb[148].mxu1 %v1316_v40  ;;  %v1367_v63 = vsel %vm1362_vm6, %v1354_v22, %v1355_v30  ;;  %v1260_v41 = vld [vmem:[%s21116_s4 + $0x128] sm:$0xff] }
 0x473   :  { %v1056_v4 = vpop.f32.mrb[82].mxu1  ;;  %v1466_v12 = vsel %vm1461_vm7, %v1455_v29, %v1456_v58 }
 0x474   :  { %v1220_v15 = vmul.f32 %v1181_v36, %v1142_v1  ;;  %v1104_v16 = vsub.f32 %v13910_v2, %v1056_v4  ;;  %v1058_v17 = vpop.f32.mrb[83].mxu1  ;;  %v1356_v18 = vrot.slane %v1297_v62, 1  ;;  %v1318_v40 = vpack.c.bf16 %v1297_v62, %v1296_v31 }
 0x475   :  { %v15319_v22 = vpack.c.bf16 %v1466_v12, %v1467_v34  ;;  %v1457_v25 = vrot.slane %v1297_v62, 2  ;;  %v13911_v34 = vld [vmem:[%s21241_s29 + $0x130] sm:$0xff] }
 0x476   :  { %v1298_v38 = vadd.f32 %v1259_v7, %v1220_v15  ;;  %v1143_v32 = vmul.f32 %v1104_v16, %v1058_v17  ;;  %v1366_v29 = vsel %vm1362_vm6, %v1355_v30, %v1356_v18  ;;  %v1183_v30 = vld [vmem:[%s21115_s3 + $0x130] sm:$0xff] }
 0x477   :  { %v1062_v21 = vpop.f32.mrb[84].mxu1  ;;  %v1418_v45 = vpack.c.bf16 %v1366_v29, %v1367_v63  ;;  %v1465_v31 = vsel %vm1461_vm7, %v1456_v58, %v1457_v25  ;;  %v1261_v63 = vld [vmem:[%s21116_s4 + $0x130] sm:$0xff] }
 0x478   :  { %v1221_v49 = vmul.f32 %v1182_v20, %v1143_v32  ;;  %v1105_v37 = vsub.f32 %v13911_v34, %v1062_v21  ;;  %v1064_v51 = vpop.f32.mrb[85].mxu1  ;;  %v1357_v55 = vrot.slane %v1298_v38, 1  ;;  %v1458_v36 = vrot.slane %v1298_v38, 2 }
 0x479   :  { %2193 = vmatprep.mubr.bf16.mxu0 %v1418_v45  ;;  %2623 = vmatprep.mubr.bf16.mxu1 %v1418_v45  ;;  %v1520_v34 = vpack.c.bf16 %v14767_v26, %v14767_v26 }
 0x47a   :  { %v1299_v62 = vadd.f32 %v1260_v41, %v1221_v49  ;;  %v1144_v1 = vmul.f32 %v1105_v37, %v1064_v51  ;;  %2194 = vmatmul.mubr.bf16.gmra.mrb[68].mxu0 %v1317_v53  ;;  %2624 = vmatmul.mubr.bf16.gmra.mrb[152].mxu1 %v1317_v53  ;;  %v1365_v58 = vsel %vm1362_vm6, %v1356_v18, %v1357_v55 }
 0x47b   :  { %v1464_v7 = vsel %vm1461_vm7, %v1457_v25, %v1458_v36  ;;  %v1421_v49 = vpack.c.bf16 %v14746_v10, %v14746_v10 }
 0x47c   :  { %v1222_v4 = vmul.f32 %v1183_v30, %v1144_v1  ;;  %v1358_v12 = vrot.slane %v1299_v62, 1  ;;  %v1319_v15 = vpack.c.bf16 %v1299_v62, %v1298_v38  ;;  %v15341_v2 = vpack.c.bf16 %v1464_v7, %v1465_v31 }
 0x47d   :  { %v1459_v16 = vrot.slane %v1299_v62, 2 }
 0x47e   :  { %v1300_v17 = vadd.f32 %v1261_v63, %v1222_v4  ;;  %v1364_v53 = vsel %vm1362_vm6, %v1357_v55, %v1358_v12 }
 0x47f   :  { %v1419_v20 = vpack.c.bf16 %v1364_v53, %v1365_v58  ;;  %v1463_v18 = vsel %vm1461_vm7, %v1458_v36, %v1459_v16 }
 0x480   :  { %v1359_v32 = vrot.slane %v1300_v17, 1  ;;  %v1460_v29 = vrot.slane %v1300_v17, 2 }
 0x481   :  { %2203 = vmatprep.mubr.bf16.mxu0 %v1419_v20  ;;  %2631 = vmatprep.mubr.bf16.mxu1 %v1419_v20 }
 0x482   :  { %2204 = vmatmul.mubr.bf16.gmra.mrb[72].mxu0 %v1318_v40  ;;  %2632 = vmatmul.mubr.bf16.gmra.mrb[156].mxu1 %v1318_v40  ;;  %v1363_v25 = vsel %vm1362_vm6, %v1358_v12, %v1359_v32  ;;  %v1401_v38 = vsel %vm1362_vm6, %v1359_v32, %v1321_v60  ;;  %v1462_v41 = vsel %vm1461_vm7, %v1459_v16, %v1460_v29 }
 0x483   :  { %v1420_v21 = vpack.c.bf16 %v1401_v38, %v1363_v25  ;;  %v15355_v45 = vpack.c.bf16 %v1462_v41, %v1463_v18  ;;  %v1500_v31 = vsel %vm1461_vm7, %v1460_v29, %v1422_v6  ;;  %v1320_v60 = vpack.c.bf16 %v1300_v17, %v1300_v17 }
 0x484   :  { %v15362_v40 = vpack.c.bf16 %v14755_v13, %v1500_v31 }
 0x485   :  { %2213 = vmatprep.mubr.bf16.mxu0 %v1420_v21  ;;  %2639 = vmatprep.mubr.bf16.mxu1 %v1420_v21 }
 0x48a   :  { %2214 = vmatmul.mubr.bf16.gmra.mrb[76].mxu0 %v1319_v15  ;;  %2640 = vmatmul.mubr.bf16.gmra.mrb[160].mxu1 %v1319_v15 }
 0x48b   :  { %2223 = vmatprep.mubr.bf16.mxu0 %v1421_v49  ;;  %2647 = vmatprep.mubr.bf16.mxu1 %v1421_v49 }
 0x492   :  { %2224 = vmatmul.mubr.bf16.gmra.mrb[80].mxu0 %v1320_v60  ;;  %2648 = vmatmul.mubr.bf16.gmra.mrb[164].mxu1 %v1320_v60 }
 0x493   :  { %12331 = vmatprep.mubr.bf16.mxu1 %v14823_v24  ;;  %2264 = vmatprep.mubr.bf16.mxu0 %v21131_v57 }
 0x49a   :  { %2265 = vmatmul.mubr.bf16.vlgmr.msra.gmra.mrb[4].mxu0 %v14823_v24  ;;  %12332 = vmatmul.mubr.bf16.vlgmr.msra.gmra.mrb[168].mxu1 %v14878_v8 }
 0x49b   :  { %12335 = vmatprep.mubr.bf16.mxu1 %v14928_v56  ;;  %2274 = vmatprep.mubr.bf16.mxu0 %v21131_v57 }
 0x49c   :  { %13018 = vmatpush3.bf16.msra.mxu1 %v14163_v48 }
 0x49d   :  { %13019 = vmatprep.subr.bf16.mxu1 %v21133_v3 }
 0x4a0   :  { %13021 = vmatpush3.bf16.msra.mxu1 %v14166_v50 }
 0x4a1   :  { %13022 = vmatprep.subr.bf16.mxu1 %v21133_v3 }
 0x4a2   :  { %2275 = vmatmul.mubr.bf16.gmra.mrb[8].mxu0 %v14878_v8  ;;  %12336 = vmatmul.mubr.bf16.gmra.mrb[172].mxu1 %v14978_v44 }
 0x4a3   :  { %12339 = vmatprep.mubr.bf16.mxu1 %v15009_v27  ;;  %2284 = vmatprep.mubr.bf16.mxu0 %v21131_v57 }
 0x4a4   :  { %13024 = vmatpush3.bf16.msra.mxu1 %v14182_v59 }
 0x4a5   :  { %13025 = vmatprep.subr.bf16.mxu1 %v21133_v3 }
 0x4a8   :  { %13027 = vmatpush3.bf16.msra.mxu1 %v14198_v5 }
 0x4a9   :  { %13028 = vmatprep.subr.bf16.mxu1 %v21133_v3 }
 0x4aa   :  { %2285 = vmatmul.mubr.bf16.gmra.mrb[12].mxu0 %v14928_v56  ;;  %12340 = vmatmul.mubr.bf16.gmra.mrb[176].mxu1 %v15039_v9 }
 0x4ab   :  { %12343 = vmatprep.mubr.bf16.mxu1 %v15067_v54  ;;  %2294 = vmatprep.mubr.bf16.mxu0 %v21131_v57 }
 0x4ac   :  { %13030 = vmatpush3.bf16.msra.mxu1 %v14214_v14 }
 0x4ad   :  { %13031 = vmatprep.subr.bf16.mxu1 %v21133_v3 }
 0x4b0   :  { %13033 = vmatpush3.bf16.msra.mxu1 %v14230_v23 }
 0x4b1   :  { %13034 = vmatprep.subr.bf16.mxu1 %v21133_v3 }
 0x4b2   :  { %2295 = vmatmul.mubr.bf16.gmra.mrb[16].mxu0 %v14978_v44  ;;  %12344 = vmatmul.mubr.bf16.gmra.mrb[180].mxu1 %v15095_v35 }
 0x4b3   :  { %12347 = vmatprep.mubr.bf16.mxu1 %v15123_v52  ;;  %2304 = vmatprep.mubr.bf16.mxu0 %v21131_v57 }
 0x4b4   :  { %13036 = vmatpush3.bf16.msra.mxu1 %v14246_v33 }
 0x4b5   :  { %13037 = vmatprep.subr.bf16.mxu1 %v21133_v3 }
 0x4b8   :  { %13039 = vmatpush3.bf16.msra.mxu1 %v14262_v42 }
 0x4b9   :  { %13040 = vmatprep.subr.bf16.mxu1 %v21133_v3 }
 0x4ba   :  { %2305 = vmatmul.mubr.bf16.gmra.mrb[20].mxu0 %v15009_v27  ;;  %12348 = vmatmul.mubr.bf16.gmra.mrb[184].mxu1 %v15151_v11 }
 0x4bb   :  { %12351 = vmatprep.mubr.bf16.mxu1 %v15179_v61  ;;  %2314 = vmatprep.mubr.bf16.mxu0 %v21131_v57 }
 0x4c2   :  { %2315 = vmatmul.mubr.bf16.gmra.mrb[24].mxu0 %v15039_v9  ;;  %12352 = vmatmul.mubr.bf16.gmra.mrb[188].mxu1 %v15207_v47 }
 0x4c3   :  { %12355 = vmatprep.mubr.bf16.mxu1 %v15235_v39  ;;  %2324 = vmatprep.mubr.bf16.mxu0 %v21131_v57 }
 0x4ca   :  { %2325 = vmatmul.mubr.bf16.gmra.mrb[28].mxu0 %v15067_v54  ;;  %12356 = vmatmul.mubr.bf16.gmra.mrb[192].mxu1 %v15263_v0 }
 0x4cb   :  { %12359 = vmatprep.mubr.bf16.mxu1 %v15291_v28  ;;  %2334 = vmatprep.mubr.bf16.mxu0 %v21131_v57 }
 0x4cd   :  { %v15412_v43 = vpop.f32.mrb[88].mxu1 }
 0x4ce   :  { %v2499_v6 = vpop.f32.mrb[89].mxu1 }
 0x4cf   :  { %v15414_v10 = vpop.f32.mrb[90].mxu1 }
 0x4d0   :  { %v2502_v13 = vpop.f32.mrb[91].mxu1 }
 0x4d2   :  { %2335 = vmatmul.mubr.bf16.gmra.mrb[32].mxu0 %v15095_v35  ;;  %12360 = vmatmul.mubr.bf16.gmra.mrb[196].mxu1 %v15319_v22 }
 0x4d3   :  { %12363 = vmatprep.mubr.bf16.mxu1 %v15341_v2  ;;  %2344 = vmatprep.mubr.bf16.mxu0 %v21131_v57 }
 0x4d5   :  { %v15420_v24 = vpop.f32.mrb[92].mxu1 }
 0x4d6   :  { %v2507_v8 = vpop.f32.mrb[93].mxu1 }
 0x4d7   :  { %v15422_v56 = vpop.f32.mrb[94].mxu1 }
 0x4d8   :  { %v2510_v44 = vpop.f32.mrb[95].mxu1 }
 0x4da   :  { %2345 = vmatmul.mubr.bf16.gmra.mrb[36].mxu0 %v15123_v52  ;;  %12364 = vmatmul.mubr.bf16.gmra.mrb[200].mxu1 %v15355_v45 }
 0x4db   :  { %12367 = vmatprep.mubr.bf16.mxu1 %v15362_v40  ;;  %2354 = vmatprep.mubr.bf16.mxu0 %v21131_v57 }
 0x4dd   :  { %v15428_v27 = vpop.f32.mrb[96].mxu1 }
 0x4de   :  { %v2515_v9 = vpop.f32.mrb[97].mxu1 }
 0x4df   :  { %v15430_v54 = vpop.f32.mrb[98].mxu1 }
 0x4e0   :  { %v2518_v35 = vpop.f32.mrb[99].mxu1 }
 0x4e2   :  { %2355 = vmatmul.mubr.bf16.gmra.mrb[40].mxu0 %v15151_v11  ;;  %12368 = vmatmul.mubr.bf16.gmra.mrb[204].mxu1 %v1520_v34 }
 0x4e3   :  { %2364 = vmatprep.mubr.bf16.mxu0 %v21131_v57  ;;  %12403 = vmatprep.mubr.msk.f32.mxu1 %vm13998_vm1, %v21135_v19 }
 0x4e5   :  { %v15438_v52 = vpop.f32.mrb[100].mxu1 }
 0x4e6   :  { %v2523_v37 = vpop.f32.mrb[101].mxu1 }
 0x4e7   :  { %v15440_v51 = vpop.f32.mrb[102].mxu1 }
 0x4e8   :  { %v2526_v55 = vpop.f32.mrb[103].mxu1 }
 0x4ea   :  { %2365 = vmatmul.mubr.bf16.gmra.mrb[44].mxu0 %v15179_v61 }
 0x4eb   :  { %2374 = vmatprep.mubr.bf16.mxu0 %v21131_v57 }
 0x4ed   :  { %v15444_v36 = vpop.f32.mrb[104].mxu1 }
 0x4ee   :  { %v2531_v26 = vpop.f32.mrb[105].mxu1 }
 0x4ef   :  { %v15446_v11 = vpop.f32.mrb[106].mxu1 }
 0x4f0   :  { %v2534_v30 = vpop.f32.mrb[107].mxu1 }
 0x4f2   :  { %2375 = vmatmul.mubr.bf16.gmra.mrb[48].mxu0 %v15207_v47 }
 0x4f3   :  { %2384 = vmatprep.mubr.bf16.mxu0 %v21131_v57 }
 0x4f5   :  { %v15450_v62 = vpop.f32.mrb[108].mxu1 }
 0x4f6   :  { %v2539_v1 = vpop.f32.mrb[109].mxu1 }
 0x4f7   :  { %v15452_v58 = vpop.f32.mrb[110].mxu1 }
 0x4f8   :  { %v2542_v63 = vpop.f32.mrb[111].mxu1 }
 0x4fa   :  { %2385 = vmatmul.mubr.bf16.gmra.mrb[52].mxu0 %v15235_v39 }
 0x4fb   :  { %2394 = vmatprep.mubr.bf16.mxu0 %v21131_v57 }
 0x4fd   :  { %v15456_v61 = vpop.f32.mrb[112].mxu1 }
 0x4fe   :  { %v2547_v7 = vpop.f32.mrb[113].mxu1 }
 0x4ff   :  { %v15458_v4 = vpop.f32.mrb[114].mxu1 }
 0x500   :  { %v2550_v12 = vpop.f32.mrb[115].mxu1 }
 0x502   :  { %2395 = vmatmul.mubr.bf16.gmra.mrb[56].mxu0 %v15263_v0 }
 0x503   :  { %2404 = vmatprep.mubr.bf16.mxu0 %v21131_v57 }
 0x505   :  { %v15462_v47 = vpop.f32.mrb[116].mxu1 }
 0x506   :  { %v2555_v15 = vpop.f32.mrb[117].mxu1 }
 0x507   :  { %v15464_v16 = vpop.f32.mrb[118].mxu1 }
 0x508   :  { %v2558_v17 = vpop.f32.mrb[119].mxu1 }
 0x50a   :  { %2405 = vmatmul.mubr.bf16.gmra.mrb[60].mxu0 %v15291_v28 }
 0x50b   :  { %2414 = vmatprep.mubr.bf16.mxu0 %v21131_v57 }
 0x50d   :  { %v15468_v39 = vpop.f32.mrb[120].mxu1 }
 0x50e   :  { %v2563_v53 = vpop.f32.mrb[121].mxu1 }
 0x50f   :  { %v15470_v20 = vpop.f32.mrb[122].mxu1 }
 0x510   :  { %v2566_v18 = vpop.f32.mrb[123].mxu1 }
 0x512   :  { %2415 = vmatmul.mubr.bf16.gmra.mrb[64].mxu0 %v15319_v22 }
 0x513   :  { %2424 = vmatprep.mubr.bf16.mxu0 %v21131_v57 }
 0x515   :  { %v15474_v0 = vpop.f32.mrb[124].mxu1 }
 0x516   :  { %v2571_v32 = vpop.f32.mrb[125].mxu1 }
 0x517   :  { %v15476_v29 = vpop.f32.mrb[126].mxu1 }
 0x518   :  { %v2574_v25 = vpop.f32.mrb[127].mxu1 }
 0x51a   :  { %2425 = vmatmul.mubr.bf16.gmra.mrb[68].mxu0 %v15341_v2 }
 0x51b   :  { %2434 = vmatprep.mubr.bf16.mxu0 %v21131_v57 }
 0x51d   :  { %v15480_v28 = vpop.f32.mrb[128].mxu1 }
 0x51e   :  { %v2579_v38 = vpop.f32.mrb[129].mxu1 }
 0x51f   :  { %v15482_v41 = vpop.f32.mrb[130].mxu1 }
 0x520   :  { %v2582_v21 = vpop.f32.mrb[131].mxu1 }
 0x522   :  { %2435 = vmatmul.mubr.bf16.gmra.mrb[72].mxu0 %v15355_v45 }
 0x523   :  { %2444 = vmatprep.mubr.bf16.mxu0 %v21131_v57 }
 0x525   :  { %v15486_v22 = vpop.f32.mrb[132].mxu1 }
 0x526   :  { %v2587_v31 = vpop.f32.mrb[133].mxu1 }
 0x527   :  { %v15488_v49 = vpop.f32.mrb[134].mxu1 }
 0x528   :  { %v2590_v60 = vpop.f32.mrb[135].mxu1 }
 0x52a   :  { %2445 = vmatmul.mubr.bf16.gmra.mrb[76].mxu0 %v15362_v40 }
 0x52b   :  { %2454 = vmatprep.mubr.bf16.mxu0 %v21131_v57 }
 0x52d   :  { %v15492_v2 = vpop.f32.mrb[136].mxu1 }
 0x52e   :  { %v2595_v6 = vpop.f32.mrb[137].mxu1 }
 0x52f   :  { %v15494_v13 = vpop.f32.mrb[138].mxu1 }
 0x530   :  { %v2598_v8 = vpop.f32.mrb[139].mxu1 }
 0x532   :  { %2455 = vmatmul.mubr.bf16.gmra.mrb[84].mxu0 %v1520_v34 }
 0x535   :  { %v15496_v45 = vpop.f32.mrb[140].mxu1 }
 0x536   :  { %v2603_v44 = vpop.f32.mrb[141].mxu1 }
 0x537   :  { %v15498_v9 = vpop.f32.mrb[142].mxu1 }
 0x538   :  { %v2606_v35 = vpop.f32.mrb[143].mxu1 }
 0x53d   :  { %v15500_v37 = vpop.f32.mrb[144].mxu1 }
 0x53e   :  { %v2611_v55 = vpop.f32.mrb[145].mxu1 }
 0x53f   :  { %v15502_v26 = vpop.f32.mrb[146].mxu1 }
 0x540   :  { %v2614_v40 = vpop.f32.mrb[147].mxu1 }
 0x545   :  { %v15504_v30 = vpop.f32.mrb[148].mxu1 }
 0x546   :  { %v2619_v1 = vpop.f32.mrb[149].mxu1 }
 0x547   :  { %v15506_v63 = vpop.f32.mrb[150].mxu1 }
 0x548   :  { %v2622_v7 = vpop.f32.mrb[151].mxu1 }
 0x54d   :  { %v15508_v12 = vpop.f32.mrb[152].mxu1 }
 0x54e   :  { %v2627_v34 = vpop.f32.mrb[153].mxu1 }
 0x54f   :  { %v15510_v15 = vpop.f32.mrb[154].mxu1 }
 0x550   :  { %v2630_v17 = vpop.f32.mrb[155].mxu1 }
 0x555   :  { %v15512_v53 = vpop.f32.mrb[156].mxu1 }
 0x556   :  { %v2635_v18 = vpop.f32.mrb[157].mxu1 }
 0x557   :  { %v15514_v32 = vpop.f32.mrb[158].mxu1 }
 0x558   :  { %v2638_v25 = vpop.f32.mrb[159].mxu1 }
 0x55d   :  { %v15516_v38 = vpop.f32.mrb[160].mxu1 }
 0x55e   :  { %v2643_v21 = vpop.f32.mrb[161].mxu1 }
 0x55f   :  { %v15518_v31 = vpop.f32.mrb[162].mxu1 }
 0x560   :  { %v2646_v60 = vpop.f32.mrb[163].mxu1 }
 0x565   :  { %v15520_v6 = vpop.f32.mrb[80].mxu0  ;;  %v15522_v8 = vpop.f32.mrb[164].mxu1 }
 0x566   :  { %v15524_v44 = vpop.f32.mrb[81].mxu0  ;;  %v2651_v35 = vpop.f32.mrb[165].mxu1 }
 0x567   :  { %v2229_v55 = vpop.f32.mrb[82].mxu0  ;;  %v2652_v40 = vpop.f32.mrb[166].mxu1 }
 0x568   :  { %v2230_v1 = vpop.f32.mrb[83].mxu0  ;;  %v2653_v7 = vpop.f32.mrb[167].mxu1 }
 0x56d   :  { %v2266_v34 = vpop.f32.mrb[4].mxu0  ;;  %v12333_v17 = vpop.f32.mrb[168].mxu1 }
 0x56e   :  { %v2698_v18 = vadd.f32 %v12333_v17, %v15420_v24  ;;  %v15527_v25 = vpop.f32.mrb[5].mxu0  ;;  %v2689_v21 = vpop.f32.mrb[169].mxu1 }
 0x56f   :  { %v15530_v60 = vadd.f32 %v2689_v21, %v15412_v43  ;;  %v2270_v57 = vpop.f32.mrb[6].mxu0  ;;  %v12334_v3 = vpop.f32.mrb[170].mxu1  ;;  %v21141_v55 = vrot.slane %v15527_v25, 1 }
 0x570   :  { %v2701_v19 = vadd.f32 %v12334_v3, %v15422_v56  ;;  %v2272_v42 = vpop.f32.mrb[7].mxu0  ;;  %v2692_v35 = vpop.f32.mrb[171].mxu1  ;;  %v2966_v7 = vrot.slane %v2698_v18, 2  ;;  %v15551_v18 = vld [vmem:[%s21117_s6] ss:$0 sm:$0xff] }
 0x571   :  { %21252 = vst [vmem:[#allocation10_spill] sm:$0xff] %v15530_v60  ;;  %v2848_v40 = vrot.slane %v2272_v42, 1  ;;  %v2693_v1 = vadd.f32 %v2692_v35, %v15414_v10  ;;  %v21148_v24 = vrot.slane %v15530_v60, 2 }
 0x572   :  { %v2967_v33 = vrot.slane %v2701_v19, 2 }
 0x573   :  { %v2923_v43 = vsel %vm1362_vm6, %v21141_v55, %v2848_v40  ;;  %v2965_v17 = vrot.slane %v2693_v1, 2 }
 0x574   :  { %v3038_v3 = vsel %vm1461_vm7, %v2966_v7, %v2967_v33  ;;  %v2925_v56 = vadd.f32 %v2923_v43, %v2266_v34 }
 0x575   :  { %v3039_v21 = vsel %vm1461_vm7, %v2965_v17, %v2966_v7  ;;  %v3040_v42 = vsel %vm1461_vm7, %v21148_v24, %v2965_v17  ;;  %v2276_v19 = vpop.f32.mrb[8].mxu0  ;;  %v12337_v10 = vpop.f32.mrb[172].mxu1 }
 0x576   :  { %v3042_v35 = vadd.f32 %v3040_v42, %v2925_v56  ;;  %v2714_v1 = vadd.f32 %v12337_v10, %v15438_v52  ;;  %v2278_v55 = vpop.f32.mrb[9].mxu0  ;;  %v2705_v34 = vpop.f32.mrb[173].mxu1 }
 0x577   :  { %v2849_v43 = vrot.slane %v2278_v55, 1  ;;  %v2706_v7 = vadd.f32 %v2705_v34, %v15428_v27  ;;  %v2280_v23 = vpop.f32.mrb[10].mxu0  ;;  %v12338_v14 = vpop.f32.mrb[174].mxu1 }
 0x578   :  { %v2717_v5 = vadd.f32 %v12338_v14, %v15440_v51  ;;  %v2282_v17 = vpop.f32.mrb[11].mxu0  ;;  %v2708_v24 = vpop.f32.mrb[175].mxu1  ;;  %v3088_v59 = vadd.f32 %v15551_v18, %v3042_v35  ;;  %v2970_v42 = vrot.slane %v2714_v1, 2 }
 0x579   :  { %v2922_v50 = vsel %vm1362_vm6, %v2848_v40, %v2849_v43  ;;  %v2968_v48 = vrot.slane %v2706_v7, 2  ;;  %v2850_v56 = vrot.slane %v2282_v17, 1  ;;  %v2709_v52 = vadd.f32 %v2708_v24, %v15430_v54 }
 0x57a   :  { %v2926_v10 = vadd.f32 %v2922_v50, %v2270_v57  ;;  %v2971_v55 = vrot.slane %v2717_v5, 2  ;;  %v15568_v7 = vmax.f32 %v3088_v59, 0.0 }
 0x57b   :  { %v3037_v27 = vsel %vm1461_vm7, %v2967_v33, %v2968_v48  ;;  %v2921_v14 = vsel %vm1362_vm6, %v2849_v43, %v2850_v56  ;;  %v2969_v51 = vrot.slane %v2709_v52, 2 }
 0x57c   :  { %v3043_v34 = vadd.f32 %v3039_v21, %v2926_v10  ;;  %v15566_v35 = vsel %vm1461_vm7, %v2970_v42, %v2971_v55  ;;  %v2927_v40 = vadd.f32 %v2921_v14, %v2276_v19 }
 0x57d   :  { %v15572_v54 = vsel %vm1461_vm7, %v2969_v51, %v2970_v42  ;;  %v3036_v50 = vsel %vm1461_vm7, %v2968_v48, %v2969_v51  ;;  %v2286_v5 = vpop.f32.mrb[12].mxu0  ;;  %v12341_v33 = vpop.f32.mrb[176].mxu1  ;;  %v3166_v48 = vmul.f32 %v15568_v7, %v15568_v7 }
 0x57e   :  { %v3044_v57 = vadd.f32 %v3038_v3, %v2927_v40  ;;  %v2730_v24 = vadd.f32 %v12341_v33, %v15450_v62  ;;  %v2288_v21 = vpop.f32.mrb[13].mxu0  ;;  %v2721_v1 = vpop.f32.mrb[177].mxu1  ;;  %v3089_v43 = vadd.f32 %v15551_v18, %v3043_v34 }
 0x57f   :  { %v2851_v17 = vrot.slane %v2288_v21, 1  ;;  %v2722_v59 = vadd.f32 %v2721_v1, %v15444_v36  ;;  %v2290_v19 = vpop.f32.mrb[14].mxu0  ;;  %v12342_v52 = vpop.f32.mrb[178].mxu1 }
 0x580   :  { %v2733_v42 = vadd.f32 %v12342_v52, %v15452_v58  ;;  %v2292_v10 = vpop.f32.mrb[15].mxu0  ;;  %v2724_v14 = vpop.f32.mrb[179].mxu1  ;;  %v15580_v60 = vmax.f32 %v3089_v43, 0.0  ;;  %v3090_v62 = vadd.f32 %v15551_v18, %v3044_v57  ;;  %v2974_v40 = vrot.slane %v2730_v24, 2 }
 0x581   :  { %v2920_v3 = vsel %vm1362_vm6, %v2850_v56, %v2851_v17  ;;  %v2972_v51 = vrot.slane %v2722_v59, 2  ;;  %v2852_v34 = vrot.slane %v2292_v10, 1  ;;  %v2725_v36 = vadd.f32 %v2724_v14, %v15446_v11 }
 0x582   :  { %21253 = vst [vmem:[#allocation11_spill] sm:$0xff] %v15580_v60  ;;  %v2928_v33 = vadd.f32 %v2920_v3, %v2280_v23  ;;  %v2975_v21 = vrot.slane %v2733_v42, 2  ;;  %v3167_v58 = vmul.f32 %v15580_v60, %v15580_v60  ;;  %v15596_v52 = vmax.f32 %v3090_v62, 0.0 }
 0x583   :  { %v15592_v1 = vsel %vm1461_vm7, %v2971_v55, %v2972_v51  ;;  %v2919_v57 = vsel %vm1362_vm6, %v2851_v17, %v2852_v34  ;;  %v2973_v43 = vrot.slane %v2725_v36, 2  ;;  %v12942_v10 = vpack.c.bf16 %v15580_v60, %v15568_v7 }
 0x584   :  { %v3045_v56 = vadd.f32 %v3037_v27, %v2928_v33  ;;  %v15600_v11 = vsel %vm1461_vm7, %v2974_v40, %v2975_v21  ;;  %v2929_v23 = vadd.f32 %v2919_v57, %v2286_v5  ;;  %v12940_v24 = vpack.c.bf16 %v3167_v58, %v3166_v48  ;;  %v15617_v48 = vld [vmem:[%s21242_s25 + $0xc] sm:$0x77] }
 0x585   :  { %v15604_v59 = vsel %vm1461_vm7, %v2973_v43, %v2974_v40  ;;  %v15608_v55 = vsel %vm1461_vm7, %v2972_v51, %v2973_v43  ;;  %v2296_v42 = vpop.f32.mrb[16].mxu0  ;;  %v12345_v17 = vpop.f32.mrb[180].mxu1 }
 0x586   :  { %v3046_v27 = vadd.f32 %v3036_v50, %v2929_v23  ;;  %v2746_v14 = vadd.f32 %v12345_v17, %v15462_v47  ;;  %v2298_v62 = vpop.f32.mrb[17].mxu0  ;;  %v2737_v3 = vpop.f32.mrb[181].mxu1  ;;  %12941 = vmatprep.subr.bf16.mxu0 %v12940_v24  ;;  %v3091_v5 = vadd.f32 %v15551_v18, %v3045_v56  ;;  %v3210_v50 = vcombine.high %v15617_v48, %v15617_v48 }
 0x587   :  { %v2853_v51 = vrot.slane %v2298_v62, 1  ;;  %v2738_v36 = vadd.f32 %v2737_v3, %v15456_v61  ;;  %v2300_v40 = vpop.f32.mrb[18].mxu0  ;;  %v12346_v33 = vpop.f32.mrb[182].mxu1  ;;  %12943 = vmatpush1.bf16.msra.mxu0 %v12942_v10  ;;  %v3168_v56 = vmul.f32 %v15596_v52, %v15596_v52 }
 0x588   :  { %v2749_v47 = vadd.f32 %v12346_v33, %v15464_v16  ;;  %v2302_v58 = vpop.f32.mrb[19].mxu0  ;;  %v2740_v57 = vpop.f32.mrb[183].mxu1  ;;  %v15623_v43 = vmax.f32 %v3091_v5, 0.0  ;;  %v3092_v23 = vadd.f32 %v15551_v18, %v3046_v27  ;;  %3278 = vmatprep.mubr.f32.mxu0 %v3210_v50  ;;  %v2978_v62 = vrot.slane %v2746_v14, 2 }
 0x589   :  { %v2918_v61 = vsel %vm1362_vm6, %v2852_v34, %v2853_v51  ;;  %v2976_v24 = vrot.slane %v2738_v36, 2  ;;  %v2854_v17 = vrot.slane %v2302_v58, 1  ;;  %v2741_v10 = vadd.f32 %v2740_v57, %v15458_v4 }
 0x58a   :  { %v2930_v3 = vadd.f32 %v2918_v61, %v2290_v19  ;;  %v2979_v16 = vrot.slane %v2749_v47, 2  ;;  %v3169_v5 = vmul.f32 %v15623_v43, %v15623_v43  ;;  %v15639_v34 = vmax.f32 %v3092_v23, 0.0 }
 0x58b   :  { %v15635_v33 = vsel %vm1461_vm7, %v2975_v21, %v2976_v24  ;;  %v2917_v27 = vsel %vm1362_vm6, %v2853_v51, %v2854_v17  ;;  %v2977_v60 = vrot.slane %v2741_v10, 2  ;;  %v12946_v58 = vpack.c.bf16 %v15623_v43, %v15596_v52 }
 0x58c   :  { %v3047_v36 = vadd.f32 %v15572_v54, %v2930_v3  ;;  %v15644_v4 = vsel %vm1461_vm7, %v2978_v62, %v2979_v16  ;;  %v2931_v19 = vadd.f32 %v2917_v27, %v2296_v42  ;;  %v12944_v14 = vpack.c.bf16 %v3169_v5, %v3168_v56 }
 0x58d   :  { %v15648_v50 = vsel %vm1461_vm7, %v2977_v60, %v2978_v62  ;;  %v15652_v21 = vsel %vm1461_vm7, %v2976_v24, %v2977_v60  ;;  %v2306_v51 = vpop.f32.mrb[20].mxu0  ;;  %v12349_v47 = vpop.f32.mrb[184].mxu1 }
 0x58e   :  { %v3048_v54 = vadd.f32 %v15566_v35, %v2931_v19  ;;  %v2762_v57 = vadd.f32 %v12349_v47, %v15474_v0  ;;  %v2308_v23 = vpop.f32.mrb[21].mxu0  ;;  %v2753_v42 = vpop.f32.mrb[185].mxu1  ;;  %12945 = vmatprep.subr.bf16.mxu0 %v12944_v14  ;;  %v3093_v56 = vadd.f32 %v15551_v18, %v3047_v36  ;;  %v3170_v0 = vmul.f32 %v15639_v34, %v15639_v34 }
 0x58f   :  { %v2855_v61 = vrot.slane %v2308_v23, 1  ;;  %v2754_v10 = vadd.f32 %v2753_v42, %v15468_v39  ;;  %v2310_v62 = vpop.f32.mrb[22].mxu0  ;;  %v12350_v60 = vpop.f32.mrb[186].mxu1  ;;  %12947 = vmatpush1.bf16.msra.mxu0 %v12946_v58 }
 0x590   :  { %v2765_v24 = vadd.f32 %v12350_v60, %v15476_v29  ;;  %v2312_v3 = vpop.f32.mrb[23].mxu0  ;;  %v2756_v5 = vpop.f32.mrb[187].mxu1  ;;  %v15661_v27 = vmax.f32 %v3093_v56, 0.0  ;;  %v3094_v35 = vadd.f32 %v15551_v18, %v3048_v54  ;;  %v2982_v47 = vrot.slane %v2762_v57, 2 }
 0x591   :  { %v2916_v36 = vsel %vm1362_vm6, %v2854_v17, %v2855_v61  ;;  %v2980_v19 = vrot.slane %v2754_v10, 2  ;;  %v2856_v14 = vrot.slane %v2312_v3, 1  ;;  %v2757_v39 = vadd.f32 %v2756_v5, %v15470_v20 }
 0x592   :  { %v2932_v58 = vadd.f32 %v2916_v36, %v2300_v40  ;;  %v2983_v23 = vrot.slane %v2765_v24, 2  ;;  %v3171_v29 = vmul.f32 %v15661_v27, %v15661_v27  ;;  %v15677_v60 = vmax.f32 %v3094_v35, 0.0 }
 0x593   :  { %v15673_v42 = vsel %vm1461_vm7, %v2979_v16, %v2980_v19  ;;  %v2915_v54 = vsel %vm1362_vm6, %v2855_v61, %v2856_v14  ;;  %v2981_v56 = vrot.slane %v2757_v39, 2  ;;  %v12950_v3 = vpack.c.bf16 %v15661_v27, %v15639_v34 }
 0x594   :  { %v3049_v17 = vadd.f32 %v15592_v1, %v2932_v58  ;;  %v15682_v20 = vsel %vm1461_vm7, %v2982_v47, %v2983_v23  ;;  %v2933_v40 = vadd.f32 %v2915_v54, %v2306_v51  ;;  %v12948_v57 = vpack.c.bf16 %v3171_v29, %v3170_v0 }
 0x595   :  { %v15686_v10 = vsel %vm1461_vm7, %v2981_v56, %v2982_v47  ;;  %v15690_v16 = vsel %vm1461_vm7, %v2980_v19, %v2981_v56  ;;  %v2316_v61 = vpop.f32.mrb[24].mxu0  ;;  %v12353_v24 = vpop.f32.mrb[188].mxu1 }
 0x596   :  { %v3050_v1 = vadd.f32 %v15608_v55, %v2933_v40  ;;  %v2778_v5 = vadd.f32 %v12353_v24, %v15486_v22  ;;  %v2318_v35 = vpop.f32.mrb[25].mxu0  ;;  %v2769_v51 = vpop.f32.mrb[189].mxu1  ;;  %12949 = vmatprep.subr.bf16.mxu0 %v12948_v57  ;;  %v3095_v0 = vadd.f32 %v15551_v18, %v3049_v17  ;;  %v3172_v22 = vmul.f32 %v15677_v60, %v15677_v60 }
 0x597   :  { %v2857_v36 = vrot.slane %v2318_v35, 1  ;;  %v2770_v39 = vadd.f32 %v2769_v51, %v15480_v28  ;;  %v2320_v47 = vpop.f32.mrb[26].mxu0  ;;  %v12354_v19 = vpop.f32.mrb[190].mxu1  ;;  %12951 = vmatpush1.bf16.msra.mxu0 %v12950_v3 }
 0x598   :  { %v2781_v58 = vadd.f32 %v12354_v19, %v15488_v49  ;;  %v2322_v29 = vpop.f32.mrb[27].mxu0  ;;  %v2772_v54 = vpop.f32.mrb[191].mxu1  ;;  %v15699_v56 = vmax.f32 %v3095_v0, 0.0  ;;  %v3096_v55 = vadd.f32 %v15551_v18, %v3050_v1  ;;  %v2986_v24 = vrot.slane %v2778_v5, 2 }
 0x599   :  { %v2914_v17 = vsel %vm1362_vm6, %v2856_v14, %v2857_v36  ;;  %v2984_v40 = vrot.slane %v2770_v39, 2  ;;  %v2858_v57 = vrot.slane %v2322_v29, 1  ;;  %v2773_v28 = vadd.f32 %v2772_v54, %v15482_v41 }
 0x59a   :  { %v2934_v3 = vadd.f32 %v2914_v17, %v2310_v62  ;;  %v2987_v35 = vrot.slane %v2781_v58, 2  ;;  %v3173_v49 = vmul.f32 %v15699_v56, %v15699_v56  ;;  %v15715_v19 = vmax.f32 %v3096_v55, 0.0 }
 0x59b   :  { %v15711_v51 = vsel %vm1461_vm7, %v2983_v23, %v2984_v40  ;;  %v2913_v1 = vsel %vm1362_vm6, %v2857_v36, %v2858_v57  ;;  %v2985_v0 = vrot.slane %v2773_v28, 2  ;;  %v12954_v29 = vpack.c.bf16 %v15699_v56, %v15677_v60 }
 0x59c   :  { %v3051_v14 = vadd.f32 %v15604_v59, %v2934_v3  ;;  %v15720_v41 = vsel %vm1461_vm7, %v2986_v24, %v2987_v35  ;;  %v2935_v62 = vadd.f32 %v2913_v1, %v2316_v61  ;;  %v12952_v5 = vpack.c.bf16 %v3173_v49, %v3172_v22 }
 0x59d   :  { %v15724_v39 = vsel %vm1461_vm7, %v2985_v0, %v2986_v24  ;;  %v15728_v23 = vsel %vm1461_vm7, %v2984_v40, %v2985_v0  ;;  %v2326_v36 = vpop.f32.mrb[28].mxu0  ;;  %v12357_v58 = vpop.f32.mrb[192].mxu1 }
 0x59e   :  { %v3052_v59 = vadd.f32 %v15600_v11, %v2935_v62  ;;  %v2794_v54 = vadd.f32 %v12357_v58, %v15496_v45  ;;  %v2328_v55 = vpop.f32.mrb[29].mxu0  ;;  %v2785_v61 = vpop.f32.mrb[193].mxu1  ;;  %12953 = vmatprep.subr.bf16.mxu0 %v12952_v5  ;;  %v3097_v22 = vadd.f32 %v15551_v18, %v3051_v14  ;;  %v3174_v45 = vmul.f32 %v15715_v19, %v15715_v19 }
 0x59f   :  { %v2859_v17 = vrot.slane %v2328_v55, 1  ;;  %v2786_v28 = vadd.f32 %v2785_v61, %v15492_v2  ;;  %v2330_v24 = vpop.f32.mrb[30].mxu0  ;;  %v12358_v40 = vpop.f32.mrb[194].mxu1  ;;  %12955 = vmatpush1.bf16.msra.mxu0 %v12954_v29 }
 0x5a0   :  { %v2797_v3 = vadd.f32 %v12358_v40, %v15498_v9  ;;  %v2332_v49 = vpop.f32.mrb[31].mxu0  ;;  %v2788_v1 = vpop.f32.mrb[195].mxu1  ;;  %v15737_v0 = vmax.f32 %v3097_v22, 0.0  ;;  %v3098_v11 = vadd.f32 %v15551_v18, %v3052_v59  ;;  %v2990_v58 = vrot.slane %v2794_v54, 2 }
 0x5a1   :  { %v2912_v14 = vsel %vm1362_vm6, %v2858_v57, %v2859_v17  ;;  %v2988_v62 = vrot.slane %v2786_v28, 2  ;;  %v2860_v5 = vrot.slane %v2332_v49, 1  ;;  %v2789_v2 = vadd.f32 %v2788_v1, %v15494_v13 }
 0x5a2   :  { %v2936_v29 = vadd.f32 %v2912_v14, %v2320_v47  ;;  %v2991_v55 = vrot.slane %v2797_v3, 2  ;;  %v3175_v9 = vmul.f32 %v15737_v0, %v15737_v0  ;;  %v15753_v40 = vmax.f32 %v3098_v11, 0.0 }
 0x5a3   :  { %v15749_v61 = vsel %vm1461_vm7, %v2987_v35, %v2988_v62  ;;  %v2911_v59 = vsel %vm1362_vm6, %v2859_v17, %v2860_v5  ;;  %v2989_v22 = vrot.slane %v2789_v2, 2  ;;  %v12958_v49 = vpack.c.bf16 %v15737_v0, %v15715_v19 }
 0x5a4   :  { %v3053_v57 = vadd.f32 %v15635_v33, %v2936_v29  ;;  %v15758_v13 = vsel %vm1461_vm7, %v2990_v58, %v2991_v55  ;;  %v2937_v47 = vadd.f32 %v2911_v59, %v2326_v36  ;;  %v12956_v54 = vpack.c.bf16 %v3175_v9, %v3174_v45 }
 0x5a5   :  { %v15762_v28 = vsel %vm1461_vm7, %v2989_v22, %v2990_v58  ;;  %v15766_v35 = vsel %vm1461_vm7, %v2988_v62, %v2989_v22  ;;  %v2336_v17 = vpop.f32.mrb[32].mxu0  ;;  %v12361_v3 = vpop.f32.mrb[196].mxu1 }
 0x5a6   :  { %v3054_v33 = vadd.f32 %v15652_v21, %v2937_v47  ;;  %v2810_v1 = vadd.f32 %v12361_v3, %v15504_v30  ;;  %v2338_v11 = vpop.f32.mrb[33].mxu0  ;;  %v2801_v36 = vpop.f32.mrb[197].mxu1  ;;  %12957 = vmatprep.subr.bf16.mxu0 %v12956_v54  ;;  %v3099_v45 = vadd.f32 %v15551_v18, %v3053_v57  ;;  %v3176_v30 = vmul.f32 %v15753_v40, %v15753_v40 }
 0x5a7   :  { %v2861_v14 = vrot.slane %v2338_v11, 1  ;;  %v2802_v2 = vadd.f32 %v2801_v36, %v15500_v37  ;;  %v2340_v58 = vpop.f32.mrb[34].mxu0  ;;  %v12362_v62 = vpop.f32.mrb[198].mxu1  ;;  %12959 = vmatpush1.bf16.msra.mxu0 %v12958_v49 }
 0x5a8   :  { %v2813_v29 = vadd.f32 %v12362_v62, %v15506_v63  ;;  %v2342_v9 = vpop.f32.mrb[35].mxu0  ;;  %v2804_v59 = vpop.f32.mrb[199].mxu1  ;;  %v15775_v22 = vmax.f32 %v3099_v45, 0.0  ;;  %v3100_v21 = vadd.f32 %v15551_v18, %v3054_v33  ;;  %v2994_v3 = vrot.slane %v2810_v1, 2 }
 0x5a9   :  { %v2910_v57 = vsel %vm1362_vm6, %v2860_v5, %v2861_v14  ;;  %v2992_v47 = vrot.slane %v2802_v2, 2  ;;  %v2862_v54 = vrot.slane %v2342_v9, 1  ;;  %v2805_v37 = vadd.f32 %v2804_v59, %v15502_v26 }
 0x5aa   :  { %21254 = vst [vmem:[#allocation12_spill] sm:$0xff] %v15775_v22  ;;  %v2938_v49 = vadd.f32 %v2910_v57, %v2330_v24  ;;  %v2995_v11 = vrot.slane %v2813_v29, 2  ;;  %v3177_v63 = vmul.f32 %v15775_v22, %v15775_v22  ;;  %v15791_v62 = vmax.f32 %v3100_v21, 0.0 }
 0x5ab   :  { %v15787_v36 = vsel %vm1461_vm7, %v2991_v55, %v2992_v47  ;;  %v2909_v33 = vsel %vm1362_vm6, %v2861_v14, %v2862_v54  ;;  %v2993_v45 = vrot.slane %v2805_v37, 2  ;;  %v12962_v9 = vpack.c.bf16 %v15775_v22, %v15753_v40 }
 0x5ac   :  { %v3055_v5 = vadd.f32 %v15648_v50, %v2938_v49  ;;  %v15796_v26 = vsel %vm1461_vm7, %v2994_v3, %v2995_v11  ;;  %v2939_v24 = vadd.f32 %v2909_v33, %v2336_v17  ;;  %v12960_v1 = vpack.c.bf16 %v3177_v63, %v3176_v30 }
 0x5ad   :  { %v15800_v2 = vsel %vm1461_vm7, %v2993_v45, %v2994_v3  ;;  %v15804_v55 = vsel %vm1461_vm7, %v2992_v47, %v2993_v45  ;;  %v2346_v14 = vpop.f32.mrb[36].mxu0  ;;  %v12365_v29 = vpop.f32.mrb[200].mxu1 }
 0x5ae   :  { %v3056_v50 = vadd.f32 %v15644_v4, %v2939_v24  ;;  %v2826_v59 = vadd.f32 %v12365_v29, %v15512_v53  ;;  %v2348_v21 = vpop.f32.mrb[37].mxu0  ;;  %v2817_v17 = vpop.f32.mrb[201].mxu1  ;;  %12961 = vmatprep.subr.bf16.mxu0 %v12960_v1  ;;  %v3101_v30 = vadd.f32 %v15551_v18, %v3055_v5  ;;  %v3178_v53 = vmul.f32 %v15791_v62, %v15791_v62 }
 0x5af   :  { %v2863_v57 = vrot.slane %v2348_v21, 1  ;;  %v2818_v37 = vadd.f32 %v2817_v17, %v15508_v12  ;;  %v2350_v3 = vpop.f32.mrb[38].mxu0  ;;  %v12366_v47 = vpop.f32.mrb[202].mxu1  ;;  %12963 = vmatpush1.bf16.msra.mxu0 %v12962_v9 }
 0x5b0   :  { %v2998_v49 = vrot.slane %v2826_v59, 2  ;;  %v2829_v63 = vadd.f32 %v12366_v47, %v15514_v32  ;;  %v2352_v33 = vpop.f32.mrb[39].mxu0  ;;  %v2820_v45 = vpop.f32.mrb[203].mxu1  ;;  %v15813_v22 = vmax.f32 %v3101_v30, 0.0  ;;  %v3102_v32 = vadd.f32 %v15551_v18, %v3056_v50 }
 0x5b1   :  { %v2908_v4 = vsel %vm1362_vm6, %v2862_v54, %v2863_v57  ;;  %v2996_v5 = vrot.slane %v2818_v37, 2  ;;  %v2864_v24 = vrot.slane %v2352_v33, 1  ;;  %v2821_v12 = vadd.f32 %v2820_v45, %v15510_v15 }
 0x5b2   :  { %v2940_v1 = vadd.f32 %v2908_v4, %v2340_v58  ;;  %v2999_v29 = vrot.slane %v2829_v63, 2  ;;  %v3179_v9 = vmul.f32 %v15813_v22, %v15813_v22  ;;  %v15849_v45 = vmax.f32 %v3102_v32, 0.0 }
 0x5b3   :  { %v15825_v59 = vsel %vm1461_vm7, %v2995_v11, %v2996_v5  ;;  %v2907_v21 = vsel %vm1362_vm6, %v2863_v57, %v2864_v24  ;;  %v2997_v17 = vrot.slane %v2821_v12, 2  ;;  %v12966_v57 = vpack.c.bf16 %v15813_v22, %v15791_v62 }
 0x5b4   :  { %v3057_v54 = vadd.f32 %v15673_v42, %v2940_v1  ;;  %v15832_v15 = vsel %vm1461_vm7, %v2998_v49, %v2999_v29  ;;  %v2941_v58 = vadd.f32 %v2907_v21, %v2346_v14  ;;  %v12964_v30 = vpack.c.bf16 %v3179_v9, %v3178_v53 }
 0x5b5   :  { %v15836_v37 = vsel %vm1461_vm7, %v2997_v17, %v2998_v49  ;;  %v15840_v11 = vsel %vm1461_vm7, %v2996_v5, %v2997_v17  ;;  %v2356_v50 = vpop.f32.mrb[40].mxu0  ;;  %v12369_v47 = vpop.f32.mrb[204].mxu1  ;;  %v3180_v32 = vmul.f32 %v15849_v45, %v15849_v45 }
 0x5b6   :  { %v3058_v42 = vadd.f32 %v15690_v16, %v2941_v58  ;;  %v15846_v63 = vadd.f32 %v12369_v47, %v15522_v8  ;;  %v2358_v14 = vpop.f32.mrb[41].mxu0  ;;  %v2833_v33 = vpop.f32.mrb[205].mxu1  ;;  %12965 = vmatprep.subr.bf16.mxu0 %v12964_v30  ;;  %v3103_v49 = vadd.f32 %v15551_v18, %v3057_v54 }
 0x5b7   :  { %v2865_v53 = vrot.slane %v2358_v14, 1  ;;  %v2834_v4 = vadd.f32 %v2833_v33, %v15516_v38  ;;  %v2360_v5 = vpop.f32.mrb[42].mxu0  ;;  %v12370_v12 = vpop.f32.mrb[206].mxu1  ;;  %12967 = vmatpush1.bf16.msra.mxu0 %v12966_v57 }
 0x5b8   :  { %v2362_v1 = vpop.f32.mrb[43].mxu0  ;;  %v2836_v9 = vpop.f32.mrb[207].mxu1  ;;  %v15852_v21 = vmax.f32 %v3103_v49, 0.0  ;;  %v3104_v30 = vadd.f32 %v15551_v18, %v3058_v42  ;;  %v3002_v47 = vrot.slane %v15846_v63, 2 }
 0x5b9   :  { %v2906_v8 = vsel %vm1362_vm6, %v2864_v24, %v2865_v53  ;;  %v3000_v16 = vrot.slane %v2834_v4, 2  ;;  %v2866_v17 = vrot.slane %v2362_v1, 1  ;;  %v2837_v58 = vadd.f32 %v2836_v9, %v15518_v31 }
 0x5ba   :  { %v2942_v54 = vadd.f32 %v2906_v8, %v2350_v3  ;;  %v3181_v38 = vmul.f32 %v15852_v21, %v15852_v21  ;;  %v12970_v4 = vpack.c.bf16 %v15852_v21, %v15849_v45 }
 0x5bb   :  { %v15865_v57 = vsel %vm1461_vm7, %v2999_v29, %v3000_v16  ;;  %v2905_v24 = vsel %vm1362_vm6, %v2865_v53, %v2866_v17  ;;  %v3001_v14 = vrot.slane %v2837_v58, 2 }
 0x5bc   :  { %v3059_v31 = vadd.f32 %v15686_v10, %v2942_v54  ;;  %v2943_v3 = vadd.f32 %v2905_v24, %v2356_v50  ;;  %v12968_v33 = vpack.c.bf16 %v3181_v38, %v3180_v32  ;;  %v15884_v50 = vmax.f32 %v3104_v30, 0.0 }
 0x5bd   :  { %v15874_v49 = vsel %vm1461_vm7, %v3001_v14, %v3002_v47  ;;  %v15878_v42 = vsel %vm1461_vm7, %v3000_v16, %v3001_v14  ;;  %v2366_v29 = vpop.f32.mrb[44].mxu0 }
 0x5be   :  { %v3060_v53 = vadd.f32 %v15682_v20, %v2943_v3  ;;  %v2368_v12 = vpop.f32.mrb[45].mxu0  ;;  %12969 = vmatprep.subr.bf16.mxu0 %v12968_v33  ;;  %v3105_v10 = vadd.f32 %v15551_v18, %v3059_v31  ;;  %v3182_v20 = vmul.f32 %v15884_v50, %v15884_v50 }
 0x5bf   :  { %v2867_v1 = vrot.slane %v2368_v12, 1  ;;  %v2370_v9 = vpop.f32.mrb[46].mxu0  ;;  %12971 = vmatpush1.bf16.msra.mxu0 %v12970_v4 }
 0x5c0   :  { %v2372_v8 = vpop.f32.mrb[47].mxu0  ;;  %v15886_v58 = vmax.f32 %v3105_v10, 0.0  ;;  %v3106_v30 = vadd.f32 %v15551_v18, %v3060_v53 }
 0x5c1   :  { %v2904_v16 = vsel %vm1362_vm6, %v2866_v17, %v2867_v1  ;;  %v2868_v54 = vrot.slane %v2372_v8, 1 }
 0x5c2   :  { %v2944_v32 = vadd.f32 %v2904_v16, %v2360_v5  ;;  %v3183_v38 = vmul.f32 %v15886_v58, %v15886_v58  ;;  %v12974_v17 = vpack.c.bf16 %v15886_v58, %v15884_v50  ;;  %v15902_v10 = vmax.f32 %v3106_v30, 0.0 }
 0x5c3   :  { %v2903_v24 = vsel %vm1362_vm6, %v2867_v1, %v2868_v54 }
 0x5c4   :  { %v3061_v14 = vadd.f32 %v15711_v51, %v2944_v32  ;;  %v2945_v31 = vadd.f32 %v2903_v24, %v2366_v29  ;;  %v12972_v3 = vpack.c.bf16 %v3183_v38, %v3182_v20 }
 0x5c5   :  { %v2376_v33 = vpop.f32.mrb[48].mxu0 }
 0x5c6   :  { %v3062_v5 = vadd.f32 %v15728_v23, %v2945_v31  ;;  %v2378_v4 = vpop.f32.mrb[49].mxu0  ;;  %12973 = vmatprep.subr.bf16.mxu0 %v12972_v3  ;;  %v3107_v12 = vadd.f32 %v15551_v18, %v3061_v14  ;;  %v3184_v23 = vmul.f32 %v15902_v10, %v15902_v10 }
 0x5c7   :  { %v2869_v53 = vrot.slane %v2378_v4, 1  ;;  %v2380_v8 = vpop.f32.mrb[50].mxu0  ;;  %12975 = vmatpush1.bf16.msra.mxu0 %v12974_v17 }
 0x5c8   :  { %v2382_v1 = vpop.f32.mrb[51].mxu0  ;;  %v15904_v16 = vmax.f32 %v3107_v12, 0.0  ;;  %v3108_v38 = vadd.f32 %v15551_v18, %v3062_v5 }
 0x5c9   :  { %v2902_v51 = vsel %vm1362_vm6, %v2868_v54, %v2869_v53  ;;  %v2870_v29 = vrot.slane %v2382_v1, 1 }
 0x5ca   :  { %v2946_v32 = vadd.f32 %v2902_v51, %v2370_v9  ;;  %v3185_v20 = vmul.f32 %v15904_v16, %v15904_v16  ;;  %v12978_v54 = vpack.c.bf16 %v15904_v16, %v15902_v10  ;;  %v15920_v12 = vmax.f32 %v3108_v38, 0.0 }
 0x5cb   :  { %v2901_v30 = vsel %vm1362_vm6, %v2869_v53, %v2870_v29 }
 0x5cc   :  { %v3063_v24 = vadd.f32 %v15724_v39, %v2946_v32  ;;  %v2947_v14 = vadd.f32 %v2901_v30, %v2376_v33  ;;  %v12976_v31 = vpack.c.bf16 %v3185_v20, %v3184_v23 }
 0x5cd   :  { %v2386_v3 = vpop.f32.mrb[52].mxu0 }
 0x5ce   :  { %v3064_v9 = vadd.f32 %v15720_v41, %v2947_v14  ;;  %v2388_v17 = vpop.f32.mrb[53].mxu0  ;;  %12977 = vmatprep.subr.bf16.mxu0 %v12976_v31  ;;  %v3109_v4 = vadd.f32 %v15551_v18, %v3063_v24  ;;  %v3186_v41 = vmul.f32 %v15920_v12, %v15920_v12 }
 0x5cf   :  { %v2871_v5 = vrot.slane %v2388_v17, 1  ;;  %v2390_v1 = vpop.f32.mrb[54].mxu0  ;;  %12979 = vmatpush1.bf16.msra.mxu0 %v12978_v54 }
 0x5d0   :  { %v2392_v53 = vpop.f32.mrb[55].mxu0  ;;  %v15922_v51 = vmax.f32 %v3109_v4, 0.0  ;;  %v3110_v20 = vadd.f32 %v15551_v18, %v3064_v9 }
 0x5d1   :  { %v2900_v39 = vsel %vm1362_vm6, %v2870_v29, %v2871_v5  ;;  %v2872_v33 = vrot.slane %v2392_v53, 1 }
 0x5d2   :  { %v2948_v32 = vadd.f32 %v2900_v39, %v2380_v8  ;;  %v3187_v23 = vmul.f32 %v15922_v51, %v15922_v51  ;;  %v12982_v29 = vpack.c.bf16 %v15922_v51, %v15920_v12  ;;  %v15938_v4 = vmax.f32 %v3110_v20, 0.0 }
 0x5d3   :  { %v2899_v38 = vsel %vm1362_vm6, %v2871_v5, %v2872_v33 }
 0x5d4   :  { %v3065_v30 = vadd.f32 %v15749_v61, %v2948_v32  ;;  %v2949_v24 = vadd.f32 %v2899_v38, %v2386_v3  ;;  %v12980_v14 = vpack.c.bf16 %v3187_v23, %v3186_v41 }
 0x5d5   :  { %v2396_v31 = vpop.f32.mrb[56].mxu0 }
 0x5d6   :  { %v3066_v8 = vadd.f32 %v15766_v35, %v2949_v24  ;;  %v2398_v54 = vpop.f32.mrb[57].mxu0  ;;  %12981 = vmatprep.subr.bf16.mxu0 %v12980_v14  ;;  %v3111_v17 = vadd.f32 %v15551_v18, %v3065_v30  ;;  %v3188_v35 = vmul.f32 %v15938_v4, %v15938_v4 }
 0x5d7   :  { %v2873_v9 = vrot.slane %v2398_v54, 1  ;;  %v2400_v53 = vpop.f32.mrb[58].mxu0  ;;  %12983 = vmatpush1.bf16.msra.mxu0 %v12982_v29 }
 0x5d8   :  { %v2402_v5 = vpop.f32.mrb[59].mxu0  ;;  %v15940_v39 = vmax.f32 %v3111_v17, 0.0  ;;  %v3112_v23 = vadd.f32 %v15551_v18, %v3066_v8 }
 0x5d9   :  { %v2898_v61 = vsel %vm1362_vm6, %v2872_v33, %v2873_v9  ;;  %v2874_v3 = vrot.slane %v2402_v5, 1 }
 0x5da   :  { %v2950_v32 = vadd.f32 %v2898_v61, %v2390_v1  ;;  %v3189_v41 = vmul.f32 %v15940_v39, %v15940_v39  ;;  %v12986_v33 = vpack.c.bf16 %v15940_v39, %v15938_v4  ;;  %v15956_v17 = vmax.f32 %v3112_v23, 0.0 }
 0x5db   :  { %v2897_v20 = vsel %vm1362_vm6, %v2873_v9, %v2874_v3 }
 0x5dc   :  { %v3067_v38 = vadd.f32 %v15762_v28, %v2950_v32  ;;  %v2951_v30 = vadd.f32 %v2897_v20, %v2396_v31  ;;  %v12984_v24 = vpack.c.bf16 %v3189_v41, %v3188_v35 }
 0x5dd   :  { %v2406_v14 = vpop.f32.mrb[60].mxu0 }
 0x5de   :  { %v3068_v1 = vadd.f32 %v15758_v13, %v2951_v30  ;;  %v2408_v29 = vpop.f32.mrb[61].mxu0  ;;  %12985 = vmatprep.subr.bf16.mxu0 %v12984_v24  ;;  %v3113_v54 = vadd.f32 %v15551_v18, %v3067_v38  ;;  %v3190_v13 = vmul.f32 %v15956_v17, %v15956_v17 }
 0x5df   :  { %v2875_v8 = vrot.slane %v2408_v29, 1  ;;  %v2410_v5 = vpop.f32.mrb[62].mxu0  ;;  %12987 = vmatpush1.bf16.msra.mxu0 %v12986_v33 }
 0x5e0   :  { %v2412_v9 = vpop.f32.mrb[63].mxu0  ;;  %v15958_v61 = vmax.f32 %v3113_v54, 0.0  ;;  %v3114_v41 = vadd.f32 %v15551_v18, %v3068_v1 }
 0x5e1   :  { %v2896_v28 = vsel %vm1362_vm6, %v2874_v3, %v2875_v8  ;;  %v2876_v31 = vrot.slane %v2412_v9, 1 }
 0x5e2   :  { %v2952_v32 = vadd.f32 %v2896_v28, %v2400_v53  ;;  %v3191_v35 = vmul.f32 %v15958_v61, %v15958_v61  ;;  %v12990_v3 = vpack.c.bf16 %v15958_v61, %v15956_v17  ;;  %v15974_v54 = vmax.f32 %v3114_v41, 0.0 }
 0x5e3   :  { %v2895_v23 = vsel %vm1362_vm6, %v2875_v8, %v2876_v31 }
 0x5e4   :  { %v3069_v20 = vadd.f32 %v15787_v36, %v2952_v32  ;;  %v2953_v38 = vadd.f32 %v2895_v23, %v2406_v14  ;;  %v12988_v30 = vpack.c.bf16 %v3191_v35, %v3190_v13 }
 0x5e5   :  { %v2416_v24 = vpop.f32.mrb[64].mxu0 }
 0x5e6   :  { %v3070_v53 = vadd.f32 %v15804_v55, %v2953_v38  ;;  %v2418_v33 = vpop.f32.mrb[65].mxu0  ;;  %12989 = vmatprep.subr.bf16.mxu0 %v12988_v30  ;;  %v3115_v29 = vadd.f32 %v15551_v18, %v3069_v20  ;;  %v3192_v55 = vmul.f32 %v15974_v54, %v15974_v54 }
 0x5e7   :  { %v2877_v1 = vrot.slane %v2418_v33, 1  ;;  %v2420_v9 = vpop.f32.mrb[66].mxu0  ;;  %12991 = vmatpush1.bf16.msra.mxu0 %v12990_v3 }
 0x5e8   :  { %v2422_v8 = vpop.f32.mrb[67].mxu0  ;;  %v15976_v28 = vmax.f32 %v3115_v29, 0.0  ;;  %v3116_v35 = vadd.f32 %v15551_v18, %v3070_v53 }
 0x5e9   :  { %v2894_v36 = vsel %vm1362_vm6, %v2876_v31, %v2877_v1  ;;  %v2878_v14 = vrot.slane %v2422_v8, 1 }
 0x5ea   :  { %v2954_v32 = vadd.f32 %v2894_v36, %v2410_v5  ;;  %v3193_v13 = vmul.f32 %v15976_v28, %v15976_v28  ;;  %v12994_v31 = vpack.c.bf16 %v15976_v28, %v15974_v54  ;;  %v15992_v29 = vmax.f32 %v3116_v35, 0.0 }
 0x5eb   :  { %v2893_v41 = vsel %vm1362_vm6, %v2877_v1, %v2878_v14 }
 0x5ec   :  { %v3071_v23 = vadd.f32 %v15800_v2, %v2954_v32  ;;  %v2955_v20 = vadd.f32 %v2893_v41, %v2416_v24  ;;  %v12992_v38 = vpack.c.bf16 %v3193_v13, %v3192_v55 }
 0x5ed   :  { %v2426_v30 = vpop.f32.mrb[68].mxu0 }
 0x5ee   :  { %v3072_v5 = vadd.f32 %v15796_v26, %v2955_v20  ;;  %v2428_v3 = vpop.f32.mrb[69].mxu0  ;;  %12993 = vmatprep.subr.bf16.mxu0 %v12992_v38  ;;  %v3117_v33 = vadd.f32 %v15551_v18, %v3071_v23  ;;  %v3194_v26 = vmul.f32 %v15992_v29, %v15992_v29 }
 0x5ef   :  { %v2879_v53 = vrot.slane %v2428_v3, 1  ;;  %v2430_v8 = vpop.f32.mrb[70].mxu0  ;;  %12995 = vmatpush1.bf16.msra.mxu0 %v12994_v31 }
 0x5f0   :  { %v2432_v1 = vpop.f32.mrb[71].mxu0  ;;  %v15994_v36 = vmax.f32 %v3117_v33, 0.0  ;;  %v3118_v13 = vadd.f32 %v15551_v18, %v3072_v5 }
 0x5f1   :  { %v2892_v2 = vsel %vm1362_vm6, %v2878_v14, %v2879_v53  ;;  %v2880_v24 = vrot.slane %v2432_v1, 1 }
 0x5f2   :  { %v2956_v32 = vadd.f32 %v2892_v2, %v2420_v9  ;;  %v3195_v55 = vmul.f32 %v15994_v36, %v15994_v36  ;;  %v12998_v14 = vpack.c.bf16 %v15994_v36, %v15992_v29  ;;  %v16010_v33 = vmax.f32 %v3118_v13, 0.0 }
 0x5f3   :  { %v2891_v35 = vsel %vm1362_vm6, %v2879_v53, %v2880_v24 }
 0x5f4   :  { %v3073_v41 = vadd.f32 %v15825_v59, %v2956_v32  ;;  %v2957_v23 = vadd.f32 %v2891_v35, %v2426_v30  ;;  %v12996_v20 = vpack.c.bf16 %v3195_v55, %v3194_v26 }
 0x5f5   :  { %v2436_v38 = vpop.f32.mrb[72].mxu0 }
 0x5f6   :  { %v3074_v9 = vadd.f32 %v15840_v11, %v2957_v23  ;;  %v2438_v31 = vpop.f32.mrb[73].mxu0  ;;  %12997 = vmatprep.subr.bf16.mxu0 %v12996_v20  ;;  %v3119_v3 = vadd.f32 %v15551_v18, %v3073_v41  ;;  %v3196_v11 = vmul.f32 %v16010_v33, %v16010_v33 }
 0x5f7   :  { %v2881_v5 = vrot.slane %v2438_v31, 1  ;;  %v2440_v1 = vpop.f32.mrb[74].mxu0  ;;  %12999 = vmatpush1.bf16.msra.mxu0 %v12998_v14 }
 0x5f8   :  { %v2442_v53 = vpop.f32.mrb[75].mxu0  ;;  %v16012_v2 = vmax.f32 %v3119_v3, 0.0  ;;  %v3120_v55 = vadd.f32 %v15551_v18, %v3074_v9 }
 0x5f9   :  { %v2890_v59 = vsel %vm1362_vm6, %v2880_v24, %v2881_v5  ;;  %v2882_v30 = vrot.slane %v2442_v53, 1 }
 0x5fa   :  { %v2958_v32 = vadd.f32 %v2890_v59, %v2430_v8  ;;  %v3197_v26 = vmul.f32 %v16012_v2, %v16012_v2  ;;  %v13002_v24 = vpack.c.bf16 %v16012_v2, %v16010_v33  ;;  %v16028_v3 = vmax.f32 %v3120_v55, 0.0 }
 0x5fb   :  { %v2889_v13 = vsel %vm1362_vm6, %v2881_v5, %v2882_v30 }
 0x5fc   :  { %v3075_v35 = vadd.f32 %v15836_v37, %v2958_v32  ;;  %v2959_v41 = vadd.f32 %v2889_v13, %v2436_v38  ;;  %v13000_v23 = vpack.c.bf16 %v3197_v26, %v3196_v11  ;;  %v21255_v13 = vmov 0.0  }
 0x5fd   :  { %v2446_v20 = vpop.f32.mrb[76].mxu0 }
 0x5fe   :  { %v3076_v8 = vadd.f32 %v15832_v15, %v2959_v41  ;;  %v2448_v14 = vpop.f32.mrb[77].mxu0  ;;  %13001 = vmatprep.subr.bf16.mxu0 %v13000_v23  ;;  %v3121_v31 = vadd.f32 %v15551_v18, %v3075_v35  ;;  %v3198_v15 = vmul.f32 %v16028_v3, %v16028_v3  ;;  %v13912_v18 = vld [vmem:[%s21117_s6] ss:$0 sm:$0xff] }
 0x5ff   :  { %v2883_v9 = vrot.slane %v2448_v14, 1  ;;  %v2450_v53 = vpop.f32.mrb[78].mxu0  ;;  %13003 = vmatpush1.bf16.msra.mxu0 %v13002_v24 }
 0x600   :  { %v2452_v5 = vpop.f32.mrb[79].mxu0  ;;  %v16030_v59 = vmax.f32 %v3121_v31, 0.0  ;;  %v3122_v26 = vadd.f32 %v13912_v18, %v3076_v8 }
 0x601   :  { %v2888_v37 = vsel %vm1362_vm6, %v2882_v30, %v2883_v9  ;;  %v2884_v38 = vrot.slane %v2452_v5, 1 }
 0x602   :  { %v2960_v32 = vadd.f32 %v2888_v37, %v2440_v1  ;;  %v3199_v11 = vmul.f32 %v16030_v59, %v16030_v59  ;;  %3279 = vmatmul.mubr.f32.vlgmr.msra.gmra.mrb[2].mxu0 %v15617_v48  ;;  %v13006_v23 = vpack.c.bf16 %v16030_v59, %v16028_v3  ;;  %v16050_v31 = vmax.f32 %v3122_v26, 0.0 }
 0x603   :  { %v2887_v55 = vsel %vm1362_vm6, %v2883_v9, %v2884_v38  ;;  %3349 = vmatprep.mubr.f32.mxu0 %v21255_v13 }
 0x604   :  { %v3077_v1 = vadd.f32 %v15865_v57, %v2960_v32  ;;  %v2961_v30 = vadd.f32 %v2887_v55, %v2446_v20  ;;  %v13004_v35 = vpack.c.bf16 %v3199_v11, %v3198_v15  ;;  %v3200_v32 = vmul.f32 %v16050_v31, %v16050_v31 }
 0x605   :  { %v2456_v41 = vpop.f32.mrb[84].mxu0  ;;  %v21256_v15 = vrot.slane %v15527_v25, 1 }
 0x606   :  { %v3078_v48 = vadd.f32 %v15878_v42, %v2961_v30  ;;  %v2457_v24 = vadd.f32 %v2456_v41, %v15520_v6  ;;  %v2458_v14 = vpop.f32.mrb[85].mxu0  ;;  %13005 = vmatprep.subr.bf16.mxu0 %v13004_v35  ;;  %v3123_v8 = vadd.f32 %v13912_v18, %v3077_v1  ;;  %v21257_v30 = vld [vmem:[#allocation10_spill] sm:$0xff] }
 0x607   :  { %v2459_v9 = vadd.f32 %v2458_v14, %v15524_v44  ;;  %v2460_v5 = vpop.f32.mrb[86].mxu0  ;;  %13007 = vmatpush1.bf16.msra.mxu0 %v13006_v23  ;;  %v21258_v35 = vrot.slane %v21257_v30, 2  ;;  %v21267_v30 = vld [vmem:[#allocation9_spill] sm:$0xff] }
 0x608   :  { %v2461_v57 = vpop.f32.mrb[87].mxu0  ;;  %v16053_v20 = vmax.f32 %v3123_v8, 0.0  ;;  %v3124_v1 = vadd.f32 %v13912_v18, %v3078_v48 }
 0x609   :  { %v2885_v37 = vrot.slane %v2459_v9, 1  ;;  %v3041_v41 = vsel %vm1461_vm7, %v3002_v47, %v21258_v35  ;;  %v13913_v57 = vld [vmem:[%s21112_s13] sm:$0xf] }
 0x60a   :  { %v3201_v42 = vmul.f32 %v16053_v20, %v16053_v20  ;;  %v13010_v23 = vpack.c.bf16 %v16053_v20, %v16050_v31 }
 0x60b   :  { %v2886_v6 = vsel %vm1362_vm6, %v2884_v38, %v2885_v37  ;;  %v2924_v44 = vsel %vm1362_vm6, %v2885_v37, %v21256_v15  ;;  %v21261_v15 = vld [vmem:[#allocation3_spill] sm:$0xff] }
 0x60c   :  { %v2962_v11 = vadd.f32 %v2886_v6, %v2450_v53  ;;  %v2963_v26 = vadd.f32 %v2924_v44, %v2457_v24  ;;  %v13008_v55 = vpack.c.bf16 %v3201_v42, %v3200_v32  ;;  %v16074_v53 = vmax.f32 %v3124_v1, 0.0  ;;  %v21259_v42 = vld [vmem:[#allocation2_spill] sm:$0xff]  ;;  %v21262_v44 = vld [vmem:[#allocation4_spill] sm:$0xff] }
 0x60d   :  { %v21260_v6 = vmov 0.0|0.0   ;;  %v21266_v1 = vld [vmem:[#allocation8_spill] sm:$0xff] }
 0x60e   :  { %v3079_v38 = vadd.f32 %v15874_v49, %v2962_v11  ;;  %13009 = vmatprep.subr.bf16.mxu0 %v13008_v55  ;;  %v3080_v25 = vadd.f32 %v3041_v41, %v2963_v26  ;;  %v3202_v63 = vmul.f32 %v16074_v53, %v16074_v53  ;;  %v21263_v11 = vld [vmem:[#allocation5_spill] sm:$0xff]  ;;  %v21264_v26 = vld [vmem:[#allocation6_spill] sm:$0xff]  ;;  %v21265_v55 = vld [vmem:[#allocation7_spill] sm:$0xff] }
 0x60f   :  { %13011 = vmatpush1.bf16.msra.mxu0 %v13010_v23 }
 0x610   :  { %v3125_v14 = vadd.f32 %v13912_v18, %v3079_v38  ;;  %v3126_v24 = vadd.f32 %v13912_v18, %v3080_v25  ;;  %v11271_v18 = vld [vmem:[%s21242_s25 + $0x14] sm:$0x7] }
 0x612   :  { %v16076_v48 = vmax.f32 %v3125_v14, 0.0  ;;  %v16082_v8 = vmax.f32 %v3126_v24, 0.0 }
 0x614   :  { %v3203_v47 = vmul.f32 %v16076_v48, %v16076_v48  ;;  %v13014_v49 = vpack.c.bf16 %v16076_v48, %v16074_v53  ;;  %v3204_v5 = vmul.f32 %v16082_v8, %v16082_v8 }
 0x616   :  { %v13012_v9 = vpack.c.bf16 %v3203_v47, %v3202_v63 }
 0x618   :  { %13013 = vmatprep.subr.bf16.mxu0 %v13012_v9 }
 0x619   :  { %13015 = vmatpush1.bf16.msra.mxu0 %v13014_v49 }
 0x61a   :  { %3297 = vmatprep.subr.mxu0 %v3204_v5 }
 0x61d   :  { %3298 = vmatpush1.msra.mxu0 %v16082_v8 }
 0x61e   :  { %11272 = vmatmul.mubr.msk.f32.vlgmr.msra.gmra.mrb[2].mxu0 %vm200_vm0, %v11271_v18  ;;  %12441 = vmatprep.subr.mxu0 %v21255_v13 }
 0x61f   :  { %12442 = vmatpush3.msk.msra.mxu0 %vm496_vm2, %v13913_v57  ;;  %12443 = vmatprep.mubr.msk.f32.mxu0 %vm13998_vm1, %v21255_v13 }
 0x620   :  { %12446 = vmatprep.subr.mxu0 %v21255_v13 }
 0x6f1   :  { %v3351_v37 = vpop.f32.mrb[2].mxu0 }
 0x6f2   :  { %v3353_v32 = vpop.f32.mrb[3].mxu0  ;;  %12404 = vmatmul.mubr.f32.vlgmr.msra.gmra.mrb[86].mxu1 %v3351_v37 }
 0x6f3   :  { %13042 = vmatpush3.bf16.msra.mxu1 %v21259_v42  ;;  %12438 = vmatprep.mubr.msk.f32.mxu1 %vm13998_vm1, %v21255_v13 }
 0x6f4   :  { %13043 = vmatprep.subr.bf16.mxu1 %v21260_v6 }
 0x6f7   :  { %13045 = vmatpush3.bf16.msra.mxu1 %v21261_v15 }
 0x6f8   :  { %13046 = vmatprep.subr.bf16.mxu1 %v21260_v6 }
 0x6fb   :  { %13048 = vmatpush3.bf16.msra.mxu1 %v21262_v44 }
 0x6fc   :  { %13049 = vmatprep.subr.bf16.mxu1 %v21260_v6 }
 0x6ff   :  { %13051 = vmatpush3.bf16.msra.mxu1 %v21263_v11 }
 0x700   :  { %13052 = vmatprep.subr.bf16.mxu1 %v21260_v6 }
 0x703   :  { %13054 = vmatpush3.bf16.msra.mxu1 %v21264_v26 }
 0x704   :  { %13055 = vmatprep.subr.bf16.mxu1 %v21260_v6 }
 0x707   :  { %13057 = vmatpush3.bf16.msra.mxu1 %v21265_v55 }
 0x708   :  { %13058 = vmatprep.subr.bf16.mxu1 %v21260_v6 }
 0x70b   :  { %13060 = vmatpush3.bf16.msra.mxu1 %v21266_v1 }
 0x70c   :  { %13061 = vmatprep.subr.bf16.mxu1 %v21260_v6 }
 0x70f   :  { %13063 = vmatpush3.bf16.msra.mxu1 %v21267_v30 }
 0x712   :  { %12439 = vmatmul.mubr.f32.vlgmr.msra.gmra.mrb[208].mxu1 %v3353_v32  ;;  %v13914_v32 = vld [vmem:[%s21113_s2] sm:$0xff] }
 0x7c5   :  { %v3422_v35 = vpop.f32.mrb[86].mxu1 }
 0x7c6   :  { %v3426_v41 = vmul.f32 0.0006377551, %v3422_v35  ;;  %v12405_v23 = vpop.f32.mrb[87].mxu1  ;;  %v21268_v35 = vmov 0  }
 0x7c7   :  { %v13916_v23 = vld [vmem:[%s21113_s2 + $0x10] sm:$0xff] }
 0x7c8   :  { %12444 = vmatmul.mubr.msk.f32.vlgmr.msra.gmra.mrb[88].mxu0 %vm492_vm3, %v3426_v41  ;;  %v3498_v14 = vmul.f32 %v3426_v41, %v3426_v41  ;;  %v13915_v41 = vld [vmem:[%s21113_s2 + $0x8] sm:$0xff] }
 0x7c9   :  { %12447 = vmatpush3.msk.msra.mxu0 %vm496_vm2, %v13913_v57  ;;  %12448 = vmatprep.mubr.msk.f32.mxu0 %vm13998_vm1, %v21255_v13 }
 0x7e5   :  { %v3493_v38 = vpop.f32.mrb[208].mxu1 }
 0x7e6   :  { %v3497_v25 = vmul.f32 0.0006377551, %v3493_v38  ;;  %v12440_v24 = vpop.f32.mrb[209].mxu1  ;;  %v13917_v38 = vld [vmem:[%s21113_s2 + $0x18] sm:$0xff] }
 0x7e7   :  { %v13920_v24 = vld [vmem:[%s21113_s2 + $0x30] sm:$0xff] }
 0x7e8   :  { %v3499_v63 = vsub.f32 %v3497_v25, %v3498_v14  ;;  %v13918_v25 = vld [vmem:[%s21113_s2 + $0x20] sm:$0xff]  ;;  %v13919_v14 = vld [vmem:[%s21113_s2 + $0x28] sm:$0xff] }
 0x7ea   :  { %v3500_v47 = vmax.f32 %v3499_v63, 0.0  ;;  %v13615_v63 = vld [vmem:[%s21114_s5 + $0x240] ss:$12 sps:$4 sm:$0xff]  }
 0x7ec   :  { %v3501_v9 = vadd.f32 1e-05, %v3500_v47  ;;  %v13617_v47 = vld [vmem:[%s21114_s5 + $0x244] ss:$12 sps:$4 sm:$0xff]  }
 0x7ed   :  { %4887 = vmatprep.subr.bf16.mxu1 %v13617_v47  ;;  %v13634_v47 = vld [vmem:[%s21114_s5 + $0x2a8] ss:$12 sps:$4 sm:$0xff]  }
 0x7ee   :  { %13867 = vrsqrt.f32 %v3501_v9  ;;  %v13618_v9 = vld [vmem:[%s21114_s5 + $0x248] ss:$12 sps:$4 sm:$0xff]   ;;  %4888 = vmatpush1.bf16.msra.mxu1 %v13615_v63  ;;  %v13633_v63 = vld [vmem:[%s21114_s5 + $0x2a4] ss:$12 sps:$4 sm:$0xff]  }
 0x7f8   :  { %v13868_v49 = vpop.eup %13867 }
 0x7f9   :  { %12449 = vmatmul.mubr.msk.f32.vlgmr.msra.gmra.mrb[90].mxu0 %vm492_vm3, %v13868_v49  ;;  %v13621_v49 = vld [vmem:[%s21114_s5 + $0x25c] ss:$12 sps:$4 sm:$0xff]  }
 0x7fa   :  { %3719 = vmatprep.mubr.f32.mxu0 %v21255_v13  ;;  %4889 = vmatprep.subr.bf16.mxu1 %v13621_v49  ;;  %v13924_v49 = vld [vmem:[%s21113_s2 + $0x50] sm:$0xff] }
 0x89b   :  { %v3572_v5 = vpop.f32.mrb[88].mxu0 }
 0x89c   :  { %v12445_v18 = vpop.f32.mrb[89].mxu0 }
 0x89d   :  { %v13619_v18 = vld [vmem:[%s21114_s5 + $0x258] ss:$12 sps:$4 sm:$0xff]  }
 0x89e   :  { %4890 = vmatpush1.bf16.msra.mxu1 %v13619_v18  ;;  %v13638_v18 = vld [vmem:[%s21114_s5 + $0x2c0] ss:$12 sps:$4 sm:$0xff]  }
 0x8cc   :  { %v3645_v37 = vpop.f32.mrb[90].mxu0 }
 0x8cd   :  { %v12450_v57 = vpop.f32.mrb[91].mxu0  ;;  %11277 = vmatprep.subr.msk.mxu0 %vm761_vm4, %v3645_v37  ;;  %v13921_v37 = vld [vmem:[%s21113_s2 + $0x38] sm:$0xff] }
 0x8ce   :  { %11278 = vmatpush1.msk.msra.mxu0 %vm761_vm4, %v3572_v5  ;;  %v13622_v5 = vld [vmem:[%s21114_s5 + $0x260] ss:$12 sps:$4 sm:$0xff]  }
 0x8cf   :  { %11279 = vmatmul.mubr.msk.f32.vlgmr.msra.gmra.mrb[92].mxu0 %vm643_vm5, %v13914_v32  ;;  %5349 = vmatprep.subr.bf16.mxu0 %v21268_v35  ;;  %v13625_v57 = vld [vmem:[%s21114_s5 + $0x274] ss:$12 sps:$4 sm:$0xff]   ;;  %v13626_v32 = vld [vmem:[%s21114_s5 + $0x278] ss:$12 sps:$4 sm:$0xff]  }
 0x8d0   :  { %3725 = vmatprep.mubr.f32.mxu0 %v21255_v13  ;;  %5350 = vmatpush1.bf16.msra.mxu0 %v13618_v9  ;;  %v13631_v9 = vld [vmem:[%s21114_s5 + $0x2a0] ss:$12 sps:$4 sm:$0xff]  }
 0x8d1   :  { %5351 = vmatprep.subr.bf16.mxu0 %v21268_v35  ;;  %4891 = vmatprep.subr.bf16.mxu1 %v13625_v57  ;;  %v13925_v57 = vld [vmem:[%s21113_s2 + $0x58] sm:$0xff] }
 0x8d3   :  { %11280 = vmatmul.mubr.msk.f32.gmra.mrb[94].mxu0 %vm643_vm5, %v13915_v41  ;;  %v13623_v41 = vld [vmem:[%s21114_s5 + $0x270] ss:$12 sps:$4 sm:$0xff]  }
 0x8d4   :  { %3731 = vmatprep.mubr.f32.mxu0 %v21255_v13  ;;  %5352 = vmatpush1.bf16.msra.mxu0 %v13622_v5  ;;  %v13637_v5 = vld [vmem:[%s21114_s5 + $0x2bc] ss:$12 sps:$4 sm:$0xff]  }
 0x8d5   :  { %5353 = vmatprep.subr.bf16.mxu0 %v21268_v35  ;;  %4892 = vmatpush1.bf16.msra.mxu1 %v13623_v41  ;;  %v13642_v41 = vld [vmem:[%s21114_s5 + $0x2d8] ss:$12 sps:$4 sm:$0xff]  }
 0x8d7   :  { %11281 = vmatmul.mubr.msk.f32.gmra.mrb[96].mxu0 %vm643_vm5, %v13916_v23  ;;  %v13922_v23 = vld [vmem:[%s21113_s2 + $0x40] sm:$0xff] }
 0x8d8   :  { %3737 = vmatprep.mubr.f32.mxu0 %v21255_v13  ;;  %5354 = vmatpush1.bf16.msra.mxu0 %v13626_v32  ;;  %v13641_v32 = vld [vmem:[%s21114_s5 + $0x2d4] ss:$12 sps:$4 sm:$0xff]  }
 0x8d9   :  { %5355 = vmatprep.subr.bf16.mxu0 %v21268_v35 }
 0x8db   :  { %11282 = vmatmul.mubr.msk.f32.gmra.mrb[98].mxu0 %vm643_vm5, %v13917_v38  ;;  %v13629_v38 = vld [vmem:[%s21114_s5 + $0x28c] ss:$12 sps:$4 sm:$0xff]  }
 0x8dc   :  { %3743 = vmatprep.mubr.f32.mxu0 %v21255_v13  ;;  %4893 = vmatprep.subr.bf16.mxu1 %v13629_v38  ;;  %v13926_v38 = vld [vmem:[%s21113_s2 + $0x60] sm:$0xff] }
 0x8df   :  { %11283 = vmatmul.mubr.msk.f32.gmra.mrb[100].mxu0 %vm643_vm5, %v13918_v25  ;;  %v13630_v25 = vld [vmem:[%s21114_s5 + $0x290] ss:$12 sps:$4 sm:$0xff]  }
 0x8e0   :  { %3749 = vmatprep.mubr.f32.mxu0 %v21255_v13  ;;  %5356 = vmatpush1.bf16.msra.mxu0 %v13630_v25  ;;  %v13645_v25 = vld [vmem:[%s21114_s5 + $0x2ec] ss:$12 sps:$4 sm:$0xff]  }
 0x8e1   :  { %5357 = vmatprep.subr.bf16.mxu0 %v21268_v35 }
 0x8e3   :  { %11284 = vmatmul.mubr.msk.f32.gmra.mrb[102].mxu0 %vm643_vm5, %v13919_v14  ;;  %v13627_v14 = vld [vmem:[%s21114_s5 + $0x288] ss:$12 sps:$4 sm:$0xff]  }
 0x8e4   :  { %3755 = vmatprep.mubr.f32.mxu0 %v21255_v13  ;;  %4894 = vmatpush1.bf16.msra.mxu1 %v13627_v14  ;;  %v13646_v14 = vld [vmem:[%s21114_s5 + $0x2f0] ss:$12 sps:$4 sm:$0xff]  }
 0x8e5   :  { %4895 = vmatprep.subr.bf16.mxu1 %v13633_v63  ;;  %5358 = vmatpush1.bf16.msra.mxu0 %v13634_v47  ;;  %v13927_v63 = vld [vmem:[%s21113_s2 + $0x68] sm:$0xff]  ;;  %v13649_v47 = vld [vmem:[%s21114_s5 + $0x304] ss:$12 sps:$4 sm:$0xff]  }
 0x8e6   :  { %5359 = vmatprep.subr.bf16.mxu0 %v21268_v35 }
 0x8e7   :  { %11285 = vmatmul.mubr.msk.f32.gmra.mrb[104].mxu0 %vm643_vm5, %v13920_v24  ;;  %v13923_v24 = vld [vmem:[%s21113_s2 + $0x48] sm:$0xff] }
 0x8e8   :  { %3761 = vmatprep.mubr.f32.mxu0 %v21255_v13  ;;  %4896 = vmatpush1.bf16.msra.mxu1 %v13631_v9  ;;  %v13650_v9 = vld [vmem:[%s21114_s5 + $0x308] ss:$12 sps:$4 sm:$0xff]  }
 0x8e9   :  { %4897 = vmatprep.subr.bf16.mxu1 %v13637_v5  ;;  %5360 = vmatpush1.bf16.msra.mxu0 %v13638_v18  ;;  %v13928_v5 = vld [vmem:[%s21113_s2 + $0x70] sm:$0xff]  ;;  %v13653_v18 = vld [vmem:[%s21114_s5 + $0x31c] ss:$12 sps:$4 sm:$0xff]  }
 0x8ea   :  { %5361 = vmatprep.subr.bf16.mxu0 %v21268_v35 }
 0x8eb   :  { %11286 = vmatmul.mubr.msk.f32.gmra.mrb[106].mxu0 %vm643_vm5, %v13921_v37  ;;  %v13635_v37 = vld [vmem:[%s21114_s5 + $0x2b8] ss:$12 sps:$4 sm:$0xff]  }
 0x8ec   :  { %3767 = vmatprep.mubr.f32.mxu0 %v21255_v13  ;;  %4898 = vmatpush1.bf16.msra.mxu1 %v13635_v37  ;;  %v13651_v37 = vld [vmem:[%s21114_s5 + $0x318] ss:$12 sps:$4 sm:$0xff]  }
 0x8ed   :  { %4899 = vmatprep.subr.bf16.mxu1 %v13641_v32  ;;  %5362 = vmatpush1.bf16.msra.mxu0 %v13642_v41  ;;  %v13930_v32 = vld [vmem:[%s21113_s2 + $0x80] sm:$0xff]  ;;  %v13931_v41 = vld [vmem:[%s21113_s2 + $0x88] sm:$0xff] }
 0x8ee   :  { %5363 = vmatprep.subr.bf16.mxu0 %v21268_v35 }
 0x8ef   :  { %11287 = vmatmul.mubr.msk.f32.gmra.mrb[108].mxu0 %vm643_vm5, %v13922_v23  ;;  %v13639_v23 = vld [vmem:[%s21114_s5 + $0x2d0] ss:$12 sps:$4 sm:$0xff]  }
 0x8f0   :  { %3773 = vmatprep.mubr.f32.mxu0 %v21255_v13  ;;  %4900 = vmatpush1.bf16.msra.mxu1 %v13639_v23  ;;  %v13932_v23 = vld [vmem:[%s21113_s2 + $0x90] sm:$0xff] }
 0x8f1   :  { %4901 = vmatprep.subr.bf16.mxu1 %v13645_v25  ;;  %5364 = vmatpush1.bf16.msra.mxu0 %v13646_v14  ;;  %v13934_v25 = vld [vmem:[%s21113_s2 + $0xa0] sm:$0xff] }
 0x8f2   :  { %5365 = vmatprep.subr.bf16.mxu0 %v21268_v35  ;;  %v13654_v14 = vld [vmem:[%s21114_s5 + $0x320] ss:$12 sps:$4 sm:$0xff]  }
 0x8f3   :  { %11288 = vmatmul.mubr.msk.f32.gmra.mrb[110].mxu0 %vm643_vm5, %v13923_v24  ;;  %v13643_v24 = vld [vmem:[%s21114_s5 + $0x2e8] ss:$12 sps:$4 sm:$0xff]  }
 0x8f4   :  { %3779 = vmatprep.mubr.f32.mxu0 %v21255_v13  ;;  %4902 = vmatpush1.bf16.msra.mxu1 %v13643_v24  ;;  %v13935_v24 = vld [vmem:[%s21113_s2 + $0xa8] sm:$0xff] }
 0x8f5   :  { %4903 = vmatprep.subr.bf16.mxu1 %v13649_v47  ;;  %5366 = vmatpush1.bf16.msra.mxu0 %v13650_v9  ;;  %v13655_v47 = vld [vmem:[%s21114_s5 + $0x330] ss:$12 sps:$4 sm:$0xff]   ;;  %v13658_v9 = vld [vmem:[%s21114_s5 + $0x338] ss:$12 sps:$4 sm:$0xff]  }
 0x8f6   :  { %5367 = vmatprep.subr.bf16.mxu0 %v21268_v35 }
 0x8f7   :  { %11289 = vmatmul.mubr.msk.f32.gmra.mrb[112].mxu0 %vm643_vm5, %v13924_v49  ;;  %v13647_v49 = vld [vmem:[%s21114_s5 + $0x300] ss:$12 sps:$4 sm:$0xff]  }
 0x8f8   :  { %3785 = vmatprep.mubr.f32.mxu0 %v21255_v13  ;;  %4904 = vmatpush1.bf16.msra.mxu1 %v13647_v49  ;;  %v13936_v49 = vld [vmem:[%s21113_s2 + $0xb0] sm:$0xff] }
 0x8f9   :  { %4905 = vmatprep.subr.bf16.mxu1 %v13653_v18  ;;  %5368 = vmatpush1.bf16.msra.mxu0 %v13654_v14  ;;  %v13659_v18 = vld [vmem:[%s21114_s5 + $0x348] ss:$12 sps:$4 sm:$0xff]   ;;  %v13667_v14 = vld [vmem:[%s21114_s5 + $0x378] ss:$12 sps:$4 sm:$0xff]  }
 0x8fa   :  { %5369 = vmatprep.subr.bf16.mxu0 %v21268_v35 }
 0x8fb   :  { %11290 = vmatmul.mubr.msk.f32.gmra.mrb[114].mxu0 %vm643_vm5, %v13925_v57  ;;  %v13929_v57 = vld [vmem:[%s21113_s2 + $0x78] sm:$0xff] }
 0x8fc   :  { %3791 = vmatprep.mubr.f32.mxu0 %v21255_v13  ;;  %4906 = vmatpush1.bf16.msra.mxu1 %v13651_v37  ;;  %v13662_v37 = vld [vmem:[%s21114_s5 + $0x350] ss:$12 sps:$4 sm:$0xff]  }
 0x8fd   :  { %5370 = vmatpush1.bf16.msra.mxu0 %v13658_v9  ;;  %v13671_v9 = vld [vmem:[%s21114_s5 + $0x390] ss:$12 sps:$4 sm:$0xff]  }
 0x8fe   :  { %5371 = vmatprep.subr.bf16.mxu0 %v21268_v35 }
 0x8ff   :  { %11291 = vmatmul.mubr.msk.f32.gmra.mrb[116].mxu0 %vm643_vm5, %v13926_v38  ;;  %v13933_v38 = vld [vmem:[%s21113_s2 + $0x98] sm:$0xff] }
 0x900   :  { %3797 = vmatprep.mubr.f32.mxu0 %v21255_v13 }
 0x901   :  { %5372 = vmatpush1.bf16.msra.mxu0 %v13662_v37  ;;  %v13675_v37 = vld [vmem:[%s21114_s5 + $0x3a8] ss:$12 sps:$4 sm:$0xff]  }
 0x902   :  { %5373 = vmatprep.subr.bf16.mxu0 %v21268_v35 }
 0x903   :  { %11292 = vmatmul.mubr.msk.f32.gmra.mrb[118].mxu0 %vm643_vm5, %v13927_v63  ;;  %v13657_v63 = vld [vmem:[%s21114_s5 + $0x334] ss:$12 sps:$4 sm:$0xff]  }
 0x904   :  { %3803 = vmatprep.mubr.f32.mxu0 %v21255_v13  ;;  %4907 = vmatprep.subr.bf16.mxu1 %v13657_v63  ;;  %v13939_v63 = vld [vmem:[%s21113_s2 + $0xc8] sm:$0xff] }
 0x905   :  { %4908 = vmatpush1.bf16.msra.mxu1 %v13655_v47  ;;  %v13673_v47 = vld [vmem:[%s21114_s5 + $0x394] ss:$12 sps:$4 sm:$0xff]  }
 0x907   :  { %11293 = vmatmul.mubr.msk.f32.gmra.mrb[120].mxu0 %vm643_vm5, %v13928_v5  ;;  %v13661_v5 = vld [vmem:[%s21114_s5 + $0x34c] ss:$12 sps:$4 sm:$0xff]  }
 0x908   :  { %3809 = vmatprep.mubr.f32.mxu0 %v21255_v13  ;;  %4909 = vmatprep.subr.bf16.mxu1 %v13661_v5  ;;  %v13940_v5 = vld [vmem:[%s21113_s2 + $0xd0] sm:$0xff] }
 0x909   :  { %4910 = vmatpush1.bf16.msra.mxu1 %v13659_v18  ;;  %v13677_v18 = vld [vmem:[%s21114_s5 + $0x3ac] ss:$12 sps:$4 sm:$0xff]  }
 0x90b   :  { %11294 = vmatmul.mubr.msk.f32.gmra.mrb[122].mxu0 %vm643_vm5, %v13929_v57  ;;  %v13937_v57 = vld [vmem:[%s21113_s2 + $0xb8] sm:$0xff] }
 0x90c   :  { %3815 = vmatprep.mubr.f32.mxu0 %v21255_v13 }
 0x90f   :  { %11295 = vmatmul.mubr.msk.f32.gmra.mrb[124].mxu0 %vm643_vm5, %v13930_v32  ;;  %v13665_v32 = vld [vmem:[%s21114_s5 + $0x364] ss:$12 sps:$4 sm:$0xff]  }
 0x910   :  { %3821 = vmatprep.mubr.f32.mxu0 %v21255_v13  ;;  %4911 = vmatprep.subr.bf16.mxu1 %v13665_v32  ;;  %v13941_v32 = vld [vmem:[%s21113_s2 + $0xd8] sm:$0xff] }
 0x913   :  { %11296 = vmatmul.mubr.msk.f32.gmra.mrb[126].mxu0 %vm643_vm5, %v13931_v41  ;;  %v13663_v41 = vld [vmem:[%s21114_s5 + $0x360] ss:$12 sps:$4 sm:$0xff]  }
 0x914   :  { %3827 = vmatprep.mubr.f32.mxu0 %v21255_v13  ;;  %4912 = vmatpush1.bf16.msra.mxu1 %v13663_v41  ;;  %v13942_v41 = vld [vmem:[%s21113_s2 + $0xe0] sm:$0xff] }
 0x917   :  { %11297 = vmatmul.mubr.msk.f32.gmra.mrb[128].mxu0 %vm643_vm5, %v13932_v23  ;;  %v13666_v23 = vld [vmem:[%s21114_s5 + $0x368] ss:$12 sps:$4 sm:$0xff]  }
 0x918   :  { %3833 = vmatprep.mubr.f32.mxu0 %v21255_v13  ;;  %5374 = vmatpush1.bf16.msra.mxu0 %v13666_v23  ;;  %v13943_v23 = vld [vmem:[%s21113_s2 + $0xe8] sm:$0xff] }
 0x919   :  { %5375 = vmatprep.subr.bf16.mxu0 %v21268_v35 }
 0x91b   :  { %11298 = vmatmul.mubr.msk.f32.gmra.mrb[130].mxu0 %vm643_vm5, %v13933_v38  ;;  %v13938_v38 = vld [vmem:[%s21113_s2 + $0xc0] sm:$0xff] }
 0x91c   :  { %3839 = vmatprep.mubr.f32.mxu0 %v21255_v13 }
 0x91f   :  { %11299 = vmatmul.mubr.msk.f32.gmra.mrb[132].mxu0 %vm643_vm5, %v13934_v25  ;;  %v13669_v25 = vld [vmem:[%s21114_s5 + $0x37c] ss:$12 sps:$4 sm:$0xff]  }
 0x920   :  { %3845 = vmatprep.mubr.f32.mxu0 %v21255_v13  ;;  %4913 = vmatprep.subr.bf16.mxu1 %v13669_v25  ;;  %v13945_v25 = vld [vmem:[%s21113_s2 + $0xf8] sm:$0xff] }
 0x921   :  { %4914 = vmatpush1.bf16.msra.mxu1 %v13667_v14  ;;  %v13946_v14 = vld [vmem:[%s21113_s2 + $0x100] sm:$0xff] }
 0x922   :  { %4915 = vmatprep.subr.bf16.mxu1 %v13673_v47  ;;  %v13949_v47 = vld [vmem:[%s21113_s2 + $0x118] sm:$0xff] }
 0x923   :  { %11300 = vmatmul.mubr.msk.f32.gmra.mrb[134].mxu0 %vm643_vm5, %v13935_v24  ;;  %v13670_v24 = vld [vmem:[%s21114_s5 + $0x380] ss:$12 sps:$4 sm:$0xff]  }
 0x924   :  { %3851 = vmatprep.mubr.f32.mxu0 %v21255_v13  ;;  %5376 = vmatpush1.bf16.msra.mxu0 %v13670_v24  ;;  %v13947_v24 = vld [vmem:[%s21113_s2 + $0x108] sm:$0xff] }
 0x925   :  { %5377 = vmatprep.subr.bf16.mxu0 %v21268_v35  ;;  %4916 = vmatpush1.bf16.msra.mxu1 %v13671_v9  ;;  %v13950_v9 = vld [vmem:[%s21113_s2 + $0x120] sm:$0xff] }
 0x926   :  { %4917 = vmatprep.subr.bf16.mxu1 %v13677_v18  ;;  %v13681_v18 = vld [vmem:[%s21114_s5 + $0x3c4] ss:$12 sps:$4 sm:$0xff]  }
 0x927   :  { %11301 = vmatmul.mubr.msk.f32.gmra.mrb[136].mxu0 %vm643_vm5, %v13936_v49  ;;  %v13674_v49 = vld [vmem:[%s21114_s5 + $0x398] ss:$12 sps:$4 sm:$0xff]  }
 0x928   :  { %3857 = vmatprep.mubr.f32.mxu0 %v21255_v13  ;;  %5378 = vmatpush1.bf16.msra.mxu0 %v13674_v49  ;;  %v13951_v49 = vld [vmem:[%s21113_s2 + $0x128] sm:$0xff] }
 0x929   :  { %5379 = vmatprep.subr.bf16.mxu0 %v21268_v35  ;;  %4918 = vmatpush1.bf16.msra.mxu1 %v13675_v37 }
 0x92a   :  { %5118 = vmatprep.subr.bf16.mxu1 %v13681_v18 }
 0x92b   :  { %11302 = vmatmul.mubr.msk.f32.gmra.mrb[138].mxu0 %vm643_vm5, %v13937_v57  ;;  %v13678_v57 = vld [vmem:[%s21114_s5 + $0x3b0] ss:$12 sps:$4 sm:$0xff]  }
 0x92c   :  { %3863 = vmatprep.mubr.f32.mxu0 %v21255_v13  ;;  %5380 = vmatpush1.bf16.msra.mxu0 %v13678_v57 }
 0x92f   :  { %11303 = vmatmul.mubr.msk.f32.gmra.mrb[140].mxu0 %vm643_vm5, %v13938_v38  ;;  %v13944_v38 = vld [vmem:[%s21113_s2 + $0xf0] sm:$0xff] }
 0x930   :  { %3869 = vmatprep.mubr.f32.mxu0 %v21255_v13 }
 0x933   :  { %11304 = vmatmul.mubr.msk.f32.gmra.mrb[142].mxu0 %vm643_vm5, %v13939_v63  ;;  %v13948_v63 = vld [vmem:[%s21113_s2 + $0x110] sm:$0xff] }
 0x934   :  { %3875 = vmatprep.mubr.f32.mxu0 %v21255_v13 }
 0x937   :  { %11305 = vmatmul.mubr.msk.f32.gmra.mrb[144].mxu0 %vm643_vm5, %v13940_v5  ;;  %v13952_v5 = vld [vmem:[%s21113_s2 + $0x130] sm:$0xff] }
 0x938   :  { %3881 = vmatprep.mubr.f32.mxu0 %v21255_v13 }
 0x93b   :  { %11306 = vmatmul.mubr.msk.f32.gmra.mrb[146].mxu0 %vm643_vm5, %v13941_v32 }
 0x93c   :  { %3887 = vmatprep.mubr.f32.mxu0 %v21255_v13 }
 0x93f   :  { %11307 = vmatmul.mubr.msk.f32.gmra.mrb[148].mxu0 %vm643_vm5, %v13942_v41  ;;  %v11318_v41 = vld [vmem:[%s21115_s3 + $0x138] sm:$0xff] }
 0x940   :  { %3893 = vmatprep.mubr.f32.mxu0 %v21255_v13 }
 0x943   :  { %11308 = vmatmul.mubr.msk.f32.gmra.mrb[150].mxu0 %vm643_vm5, %v13943_v23 }
 0x944   :  { %3899 = vmatprep.mubr.f32.mxu0 %v21255_v13 }
 0x947   :  { %11309 = vmatmul.mubr.msk.f32.gmra.mrb[152].mxu0 %vm643_vm5, %v13944_v38 }
 0x948   :  { %3905 = vmatprep.mubr.f32.mxu0 %v21255_v13 }
 0x94b   :  { %11310 = vmatmul.mubr.msk.f32.gmra.mrb[154].mxu0 %vm643_vm5, %v13945_v25 }
 0x94c   :  { %3911 = vmatprep.mubr.f32.mxu0 %v21255_v13 }
 0x94f   :  { %11311 = vmatmul.mubr.msk.f32.gmra.mrb[156].mxu0 %vm643_vm5, %v13946_v14  ;;  %v11357_v14 = vld [vmem:[%s21116_s4 + $0x138] sm:$0xff] }
 0x950   :  { %3917 = vmatprep.mubr.f32.mxu0 %v21255_v13 }
 0x953   :  { %11312 = vmatmul.mubr.msk.f32.gmra.mrb[158].mxu0 %vm643_vm5, %v13947_v24  ;;  %v21269_v24 = vld [vmem:[#allocation11_spill] sm:$0xff] }
 0x954   :  { %3923 = vmatprep.mubr.f32.mxu0 %v21255_v13 }
 0x957   :  { %11313 = vmatmul.mubr.msk.f32.gmra.mrb[160].mxu0 %vm643_vm5, %v13948_v63 }
 0x958   :  { %3929 = vmatprep.mubr.f32.mxu0 %v21255_v13 }
 0x95b   :  { %11314 = vmatmul.mubr.msk.f32.gmra.mrb[162].mxu0 %vm643_vm5, %v13949_v47 }
 0x95c   :  { %3935 = vmatprep.mubr.f32.mxu0 %v21255_v13 }
 0x95f   :  { %11315 = vmatmul.mubr.msk.f32.gmra.mrb[164].mxu0 %vm643_vm5, %v13950_v9  ;;  %v11319_v9 = vld [vmem:[%s21115_s3 + $0x140] sm:$0xff] }
 0x960   :  { %3941 = vmatprep.mubr.f32.mxu0 %v21255_v13 }
 0x963   :  { %11316 = vmatmul.mubr.msk.f32.gmra.mrb[166].mxu0 %vm643_vm5, %v13951_v49 }
 0x964   :  { %3947 = vmatprep.mubr.f32.mxu0 %v21255_v13 }
 0x967   :  { %11317 = vmatmul.mubr.msk.f32.gmra.mrb[168].mxu0 %vm643_vm5, %v13952_v5  ;;  %v11358_v5 = vld [vmem:[%s21116_s4 + $0x140] sm:$0xff] }
 0x9a2   :  { %v3721_v37 = vpop.f32.mrb[92].mxu0 }
 0x9a3   :  { %v3954_v57 = vsub.f32 %v15568_v7, %v3721_v37  ;;  %v3723_v32 = vpop.f32.mrb[93].mxu0 }
 0x9a5   :  { %v3993_v23 = vmul.f32 %v3954_v57, %v3723_v32 }
 0x9a6   :  { %v3727_v38 = vpop.f32.mrb[94].mxu0 }
 0x9a7   :  { %v4072_v25 = vmul.f32 %v11318_v41, %v3993_v23  ;;  %v3955_v63 = vsub.f32 %v21269_v24, %v3727_v38  ;;  %v3729_v47 = vpop.f32.mrb[95].mxu0  ;;  %v11320_v41 = vld [vmem:[%s21115_s3 + $0x148] sm:$0xff] }
 0x9a9   :  { %v3994_v7 = vmul.f32 %v3955_v63, %v3729_v47  ;;  %v16494_v49 = vadd.f32 %v11357_v14, %v4072_v25  ;;  %v11359_v25 = vld [vmem:[%s21116_s4 + $0x148] sm:$0xff] }
 0x9aa   :  { %v3733_v18 = vpop.f32.mrb[96].mxu0 }
 0x9ab   :  { %v4073_v37 = vmul.f32 %v11319_v9, %v3994_v7  ;;  %v3956_v57 = vsub.f32 %v15596_v52, %v3733_v18  ;;  %v3735_v32 = vpop.f32.mrb[97].mxu0  ;;  %v21158_v24 = vrot.slane %v16494_v49, 1  ;;  %v11321_v18 = vld [vmem:[%s21115_s3 + $0x150] sm:$0xff] }
 0x9ad   :  { %v4152_v23 = vadd.f32 %v11358_v5, %v4073_v37  ;;  %v3995_v38 = vmul.f32 %v3956_v57, %v3735_v32  ;;  %v21160_v5 = vrot.slane %v16494_v49, 2 }
 0x9ae   :  { %v3739_v14 = vpop.f32.mrb[98].mxu0 }
 0x9af   :  { %v4074_v63 = vmul.f32 %v11320_v41, %v3995_v38  ;;  %v3957_v47 = vsub.f32 %v15623_v43, %v3739_v14  ;;  %v3741_v9 = vpop.f32.mrb[99].mxu0  ;;  %v4211_v7 = vrot.slane %v4152_v23, 1  ;;  %v4190_v52 = vpack.c.bf16 %v4152_v23, %v16494_v49  ;;  %v11360_v43 = vld [vmem:[%s21116_s4 + $0x150] sm:$0xff] }
 0x9b0   :  { %v4309_v37 = vrot.slane %v4152_v23, 2 }
 0x9b1   :  { %v4153_v57 = vadd.f32 %v11359_v25, %v4074_v63  ;;  %v3996_v32 = vmul.f32 %v3957_v47, %v3741_v9  ;;  %v16517_v41 = vsel %vm1362_vm6, %v21158_v24, %v4211_v7  ;;  %v11322_v24 = vld [vmem:[%s21115_s3 + $0x158] sm:$0xff] }
 0x9b2   :  { %v3745_v38 = vpop.f32.mrb[100].mxu0  ;;  %v16526_v14 = vsel %vm1461_vm7, %v21160_v5, %v4309_v37 }
 0x9b3   :  { %v4075_v23 = vmul.f32 %v11321_v18, %v3996_v32  ;;  %v3958_v25 = vsub.f32 %v15639_v34, %v3745_v38  ;;  %v3747_v63 = vpop.f32.mrb[101].mxu0  ;;  %v4212_v47 = vrot.slane %v4153_v57, 1  ;;  %v4310_v9 = vrot.slane %v4153_v57, 2  ;;  %v11361_v34 = vld [vmem:[%s21116_s4 + $0x158] sm:$0xff] }
 0x9b5   :  { %v4154_v13 = vadd.f32 %v11360_v43, %v4075_v23  ;;  %v3997_v30 = vmul.f32 %v3958_v25, %v3747_v63  ;;  %v4285_v1 = vsel %vm1362_vm6, %v4211_v7, %v4212_v47  ;;  %v16536_v55 = vsel %vm1461_vm7, %v4309_v37, %v4310_v9  ;;  %v11323_v7 = vld [vmem:[%s21115_s3 + $0x160] sm:$0xff] }
 0x9b6   :  { %21270 = vst [vmem:[#allocation10_spill] sm:$0xff] %v16536_v55  ;;  %v3751_v18 = vpop.f32.mrb[102].mxu0 }
 0x9b7   :  { %v4076_v32 = vmul.f32 %v11322_v24, %v3997_v30  ;;  %v3959_v38 = vsub.f32 %v15661_v27, %v3751_v18  ;;  %v3753_v5 = vpop.f32.mrb[103].mxu0  ;;  %v4213_v26 = vrot.slane %v4154_v13, 1  ;;  %v16542_v11 = vpack.c.bf16 %v4154_v13, %v4153_v57  ;;  %v11362_v30 = vld [vmem:[%s21116_s4 + $0x160] sm:$0xff] }
 0x9b8   :  { %v4311_v43 = vrot.slane %v4154_v13, 2  ;;  %v13679_v57 = vld [vmem:[%s21114_s5 + $0x3c0] ss:$12 sps:$4 sm:$0xff]  }
 0x9b9   :  { %v4155_v23 = vadd.f32 %v11361_v34, %v4076_v32  ;;  %v3998_v37 = vmul.f32 %v3959_v38, %v3753_v5  ;;  %v4284_v25 = vsel %vm1362_vm6, %v4212_v47, %v4213_v26  ;;  %v13684_v47 = vld [vmem:[%s21114_s5 + $0x3dc] ss:$12 sps:$4 sm:$0xff]  }
 0x9ba   :  { %v3757_v24 = vpop.f32.mrb[104].mxu0  ;;  %v4288_v27 = vpack.c.bf16 %v4284_v25, %v4285_v1  ;;  %v4382_v63 = vsel %vm1461_vm7, %v4310_v9, %v4311_v43  ;;  %v11324_v1 = vld [vmem:[%s21115_s3 + $0x168] sm:$0xff] }
 0x9bb   :  { %v4077_v18 = vmul.f32 %v11323_v7, %v3998_v37  ;;  %v3960_v13 = vsub.f32 %v15677_v60, %v3757_v24  ;;  %v3759_v5 = vpop.f32.mrb[105].mxu0  ;;  %v4214_v34 = vrot.slane %v4155_v23, 1  ;;  %v4312_v32 = vrot.slane %v4155_v23, 2  ;;  %v13688_v9 = vld [vmem:[%s21114_s5 + $0x3c8] ss:$12 sps:$4 sm:$0xff]  }
 0x9bc   :  { %4919 = vmatprep.mubr.bf16.mxu1 %v4288_v27  ;;  %5381 = vmatprep.mubr.bf16.mxu0 %v4288_v27  ;;  %v11363_v7 = vld [vmem:[%s21116_s4 + $0x168] sm:$0xff] }
 0x9bd   :  { %v4156_v38 = vadd.f32 %v11362_v30, %v4077_v18  ;;  %v3999_v25 = vmul.f32 %v3960_v13, %v3759_v5  ;;  %4920 = vmatmul.mubr.bf16.vlgmr.msra.gmra.mrb[212].mxu1 %v4190_v52  ;;  %5382 = vmatmul.mubr.bf16.vlgmr.msra.gmra.mrb[172].mxu0 %v4190_v52  ;;  %v4283_v60 = vsel %vm1362_vm6, %v4213_v26, %v4214_v34  ;;  %v13682_v30 = vld [vmem:[%s21114_s5 + $0x3d8] ss:$12 sps:$4 sm:$0xff]   ;;  %v11325_v5 = vld [vmem:[%s21115_s3 + $0x170] sm:$0xff] }
 0x9be   :  { %v3763_v37 = vpop.f32.mrb[106].mxu0  ;;  %5119 = vmatpush1.bf16.msra.mxu1 %v13679_v57  ;;  %v4381_v52 = vsel %vm1461_vm7, %v4311_v43, %v4312_v32  ;;  %12451 = vmatprep.subr.bf16.mxu0 %v13688_v9 }
 0x9bf   :  { %v4313_v24 = vrot.slane %v4156_v38, 2  ;;  %v4078_v27 = vmul.f32 %v11324_v1, %v3999_v25  ;;  %v3961_v26 = vsub.f32 %v15699_v56, %v3763_v37  ;;  %v3765_v18 = vpop.f32.mrb[107].mxu0  ;;  %v4215_v13 = vrot.slane %v4156_v38, 1  ;;  %5120 = vmatprep.subr.bf16.mxu1 %v13684_v47  ;;  %12452 = vmatpush3.bf16.msra.mxu0 %v13688_v9  ;;  %v13689_v56 = vld [vmem:[%s21114_s5 + $0x3e0] ss:$12 sps:$4 sm:$0xff]  }
 0x9c0   :  { %v16581_v57 = vpack.c.bf16 %v4156_v38, %v4155_v23  ;;  %v16583_v55 = vpack.c.bf16 %v4381_v52, %v4382_v63  ;;  %v11364_v23 = vld [vmem:[%s21116_s4 + $0x170] sm:$0xff]  ;;  %12453 = vmatprep.subr.bf16.mxu0 %v13689_v56 }
 0x9c1   :  { %v16585_v44 = vadd.f32 %v11363_v7, %v4078_v27  ;;  %v4000_v43 = vmul.f32 %v3961_v26, %v3765_v18  ;;  %v4282_v1 = vsel %vm1362_vm6, %v4214_v34, %v4215_v13  ;;  %v4380_v47 = vsel %vm1461_vm7, %v4312_v32, %v4313_v24  ;;  %v13685_v52 = vld [vmem:[%s21114_s5 + $0x3f0] ss:$12 sps:$4 sm:$0xff]   ;;  %v13690_v26 = vld [vmem:[%s21114_s5 + $0x3f8] ss:$12 sps:$4 sm:$0xff]  }
 0x9c2   :  { %v3769_v38 = vpop.f32.mrb[108].mxu0  ;;  %v4289_v63 = vpack.c.bf16 %v4282_v1, %v4283_v60  ;;  %5121 = vmatpush1.bf16.msra.mxu1 %v13682_v30  ;;  %v11326_v32 = vld [vmem:[%s21115_s3 + $0x178] sm:$0xff]  ;;  %v13687_v60 = vld [vmem:[%s21114_s5 + $0x3f4] ss:$12 sps:$4 sm:$0xff]  }
 0x9c3   :  { %v4314_v25 = vrot.slane %v16585_v44, 2  ;;  %v4079_v9 = vmul.f32 %v11325_v5, %v4000_v43  ;;  %v3962_v7 = vsub.f32 %v15715_v19, %v3769_v38  ;;  %v3771_v34 = vpop.f32.mrb[109].mxu0  ;;  %v4216_v37 = vrot.slane %v16585_v44, 1  ;;  %v11365_v18 = vld [vmem:[%s21116_s4 + $0x178] sm:$0xff]  ;;  %5122 = vmatprep.subr.bf16.mxu1 %v13687_v60  ;;  %12454 = vmatpush3.bf16.msra.mxu0 %v13689_v56  ;;  %v13691_v56 = vld [vmem:[%s21114_s5 + $0x408] ss:$12 sps:$4 sm:$0xff]  }
 0x9c4   :  { %4929 = vmatprep.mubr.bf16.mxu1 %v4289_v63  ;;  %5389 = vmatprep.mubr.bf16.mxu0 %v4289_v63 }
 0x9c5   :  { %v4158_v30 = vadd.f32 %v11364_v23, %v4079_v9  ;;  %v4001_v19 = vmul.f32 %v3962_v7, %v3771_v34  ;;  %4930 = vmatmul.mubr.bf16.gmra.mrb[216].mxu1 %v16542_v11  ;;  %5390 = vmatmul.mubr.bf16.gmra.mrb[176].mxu0 %v16542_v11  ;;  %v4281_v27 = vsel %vm1362_vm6, %v4215_v13, %v4216_v37  ;;  %v11327_v13 = vld [vmem:[%s21115_s3 + $0x180] sm:$0xff] }
 0x9c6   :  { %v3775_v5 = vpop.f32.mrb[110].mxu0  ;;  %v4379_v43 = vsel %vm1461_vm7, %v4313_v24, %v4314_v25  ;;  %5123 = vmatpush1.bf16.msra.mxu1 %v13685_v52  ;;  %12455 = vmatprep.subr.bf16.mxu0 %v13690_v26  ;;  %v13693_v24 = vld [vmem:[%s21114_s5 + $0x40c] ss:$12 sps:$4 sm:$0xff]  }
 0x9c7   :  { %v4080_v1 = vmul.f32 %v11326_v32, %v4001_v19  ;;  %v3963_v11 = vsub.f32 %v15737_v0, %v3775_v5  ;;  %v3777_v23 = vpop.f32.mrb[111].mxu0  ;;  %v4217_v38 = vrot.slane %v4158_v30, 1  ;;  %v16626_v63 = vpack.c.bf16 %v4158_v30, %v16585_v44  ;;  %v13694_v0 = vld [vmem:[%s21114_s5 + $0x410] ss:$12 sps:$4 sm:$0xff]   ;;  %v11366_v32 = vld [vmem:[%s21116_s4 + $0x180] sm:$0xff]  ;;  %12456 = vmatpush3.bf16.msra.mxu0 %v13690_v26  ;;  %5124 = vmatprep.subr.bf16.mxu1 %v13693_v24 }
 0x9c8   :  { %v16637_v9 = vpack.c.bf16 %v4379_v43, %v4380_v47  ;;  %v4315_v52 = vrot.slane %v4158_v30, 2  ;;  %12457 = vmatprep.subr.bf16.mxu0 %v13694_v0  ;;  %v13697_v43 = vld [vmem:[%s21114_s5 + $0x424] ss:$12 sps:$4 sm:$0xff]  }
 0x9c9   :  { %v4159_v7 = vadd.f32 %v11365_v18, %v4080_v1  ;;  %v4002_v34 = vmul.f32 %v3963_v11, %v3777_v23  ;;  %v4280_v44 = vsel %vm1362_vm6, %v4216_v37, %v4217_v38  ;;  %v11328_v37 = vld [vmem:[%s21115_s3 + $0x188] sm:$0xff] }
 0x9ca   :  { %v3781_v60 = vpop.f32.mrb[112].mxu0  ;;  %v4290_v19 = vpack.c.bf16 %v4280_v44, %v4281_v27  ;;  %5125 = vmatpush1.bf16.msra.mxu1 %v13691_v56  ;;  %v4378_v30 = vsel %vm1461_vm7, %v4314_v25, %v4315_v52  ;;  %v13698_v1 = vld [vmem:[%s21114_s5 + $0x428] ss:$12 sps:$4 sm:$0xff]  }
 0x9cb   :  { %v4081_v5 = vmul.f32 %v11327_v13, %v4002_v34  ;;  %v3964_v15 = vsub.f32 %v15753_v40, %v3781_v60  ;;  %v3783_v42 = vpop.f32.mrb[113].mxu0  ;;  %v4218_v47 = vrot.slane %v4159_v7, 1  ;;  %v4316_v18 = vrot.slane %v4159_v7, 2  ;;  %v11367_v25 = vld [vmem:[%s21116_s4 + $0x188] sm:$0xff]  ;;  %12458 = vmatpush3.bf16.msra.mxu0 %v13694_v0  ;;  %v21271_v13 = vld [vmem:[#allocation12_spill] sm:$0xff]  ;;  %5126 = vmatprep.subr.bf16.mxu1 %v13697_v43 }
 0x9cc   :  { %4939 = vmatprep.mubr.bf16.mxu1 %v4290_v19  ;;  %5397 = vmatprep.mubr.bf16.mxu0 %v4290_v19  ;;  %v11329_v34 = vld [vmem:[%s21115_s3 + $0x190] sm:$0xff]  ;;  %v13701_v44 = vld [vmem:[%s21114_s5 + $0x43c] ss:$12 sps:$4 sm:$0xff]  }
 0x9cd   :  { %v4160_v27 = vadd.f32 %v11366_v32, %v4081_v5  ;;  %v4003_v26 = vmul.f32 %v3964_v15, %v3783_v42  ;;  %4940 = vmatmul.mubr.bf16.gmra.mrb[220].mxu1 %v16581_v57  ;;  %5398 = vmatmul.mubr.bf16.gmra.mrb[180].mxu0 %v16581_v57  ;;  %v4279_v40 = vsel %vm1362_vm6, %v4217_v38, %v4218_v47  ;;  %v13695_v15 = vld [vmem:[%s21114_s5 + $0x420] ss:$12 sps:$4 sm:$0xff]  }
 0x9ce   :  { %v3787_v42 = vpop.f32.mrb[114].mxu0  ;;  %v4377_v57 = vsel %vm1461_vm7, %v4315_v52, %v4316_v18  ;;  %12459 = vmatprep.subr.bf16.mxu0 %v13698_v1  ;;  %5127 = vmatpush1.bf16.msra.mxu1 %v13695_v15  ;;  %v13702_v52 = vld [vmem:[%s21114_s5 + $0x440] ss:$12 sps:$4 sm:$0xff]  }
 0x9cf   :  { %v4317_v11 = vrot.slane %v4160_v27, 2  ;;  %v4082_v23 = vmul.f32 %v11328_v37, %v4003_v26  ;;  %v3965_v38 = vsub.f32 %v21271_v13, %v3787_v42  ;;  %v3789_v56 = vpop.f32.mrb[115].mxu0  ;;  %v4219_v24 = vrot.slane %v4160_v27, 1  ;;  %v11368_v37 = vld [vmem:[%s21116_s4 + $0x190] sm:$0xff]  ;;  %12460 = vmatpush3.bf16.msra.mxu0 %v13698_v1  ;;  %5128 = vmatprep.subr.bf16.mxu1 %v13701_v44  ;;  %v11369_v13 = vld [vmem:[%s21116_s4 + $0x198] sm:$0xff] }
 0x9d0   :  { %v16672_v0 = vpack.c.bf16 %v4160_v27, %v4159_v7  ;;  %v16680_v32 = vpack.c.bf16 %v4377_v57, %v4378_v30  ;;  %v13699_v30 = vld [vmem:[%s21114_s5 + $0x438] ss:$12 sps:$4 sm:$0xff]   ;;  %12461 = vmatprep.subr.bf16.mxu0 %v13702_v52 }
 0x9d1   :  { %v4161_v60 = vadd.f32 %v11367_v25, %v4082_v23  ;;  %v4004_v19 = vmul.f32 %v3965_v38, %v3789_v56  ;;  %v4278_v5 = vsel %vm1362_vm6, %v4218_v47, %v4219_v24  ;;  %v4376_v7 = vsel %vm1461_vm7, %v4316_v18, %v4317_v11  ;;  %v11330_v18 = vld [vmem:[%s21115_s3 + $0x198] sm:$0xff] }
 0x9d2   :  { %v3793_v27 = vpop.f32.mrb[116].mxu0  ;;  %v4291_v26 = vpack.c.bf16 %v4278_v5, %v4279_v40  ;;  %v13706_v23 = vld [vmem:[%s21114_s5 + $0x458] ss:$12 sps:$4 sm:$0xff]   ;;  %5129 = vmatpush1.bf16.msra.mxu1 %v13699_v30 }
 0x9d3   :  { %v4318_v43 = vrot.slane %v4161_v60, 2  ;;  %v4083_v25 = vmul.f32 %v11329_v34, %v4004_v19  ;;  %v3966_v42 = vsub.f32 %v15791_v62, %v3793_v27  ;;  %v3795_v47 = vpop.f32.mrb[117].mxu0  ;;  %v4220_v15 = vrot.slane %v4161_v60, 1  ;;  %v13705_v62 = vld [vmem:[%s21114_s5 + $0x454] ss:$12 sps:$4 sm:$0xff]   ;;  %12462 = vmatpush3.bf16.msra.mxu0 %v13702_v52 }
 0x9d4   :  { %4949 = vmatprep.mubr.bf16.mxu1 %v4291_v26  ;;  %5405 = vmatprep.mubr.bf16.mxu0 %v4291_v26  ;;  %v13709_v52 = vld [vmem:[%s21114_s5 + $0x46c] ss:$12 sps:$4 sm:$0xff]  }
 0x9d5   :  { %v4162_v40 = vadd.f32 %v11368_v37, %v4083_v25  ;;  %v4005_v1 = vmul.f32 %v3966_v42, %v3795_v47  ;;  %4950 = vmatmul.mubr.bf16.gmra.mrb[224].mxu1 %v16626_v63  ;;  %5406 = vmatmul.mubr.bf16.gmra.mrb[184].mxu0 %v16626_v63  ;;  %v4277_v57 = vsel %vm1362_vm6, %v4219_v24, %v4220_v15  ;;  %v13703_v63 = vld [vmem:[%s21114_s5 + $0x450] ss:$12 sps:$4 sm:$0xff]   ;;  %v11331_v37 = vld [vmem:[%s21115_s3 + $0x1a0] sm:$0xff] }
 0x9d6   :  { %v3799_v38 = vpop.f32.mrb[118].mxu0  ;;  %v4375_v56 = vsel %vm1461_vm7, %v4317_v11, %v4318_v43  ;;  %5130 = vmatprep.subr.bf16.mxu1 %v13705_v62  ;;  %12463 = vmatprep.subr.bf16.mxu0 %v13706_v23  ;;  %v13710_v11 = vld [vmem:[%s21114_s5 + $0x470] ss:$12 sps:$4 sm:$0xff]   ;;  %v11370_v25 = vld [vmem:[%s21116_s4 + $0x1a0] sm:$0xff] }
 0x9d7   :  { %v4084_v24 = vmul.f32 %v11330_v18, %v4005_v1  ;;  %v3967_v34 = vsub.f32 %v15813_v22, %v3799_v38  ;;  %v3801_v44 = vpop.f32.mrb[119].mxu0  ;;  %v4221_v19 = vrot.slane %v4162_v40, 1  ;;  %v16715_v5 = vpack.c.bf16 %v4162_v40, %v4161_v60  ;;  %5131 = vmatpush1.bf16.msra.mxu1 %v13703_v63  ;;  %12464 = vmatpush3.bf16.msra.mxu0 %v13706_v23  ;;  %v13707_v18 = vld [vmem:[%s21114_s5 + $0x468] ss:$12 sps:$4 sm:$0xff]  }
 0x9d8   :  { %v16726_v27 = vpack.c.bf16 %v4375_v56, %v4376_v7  ;;  %v4319_v22 = vrot.slane %v4162_v40, 2  ;;  %5132 = vmatprep.subr.bf16.mxu1 %v13709_v52  ;;  %12465 = vmatprep.subr.bf16.mxu0 %v13710_v11 }
 0x9d9   :  { %v4163_v26 = vadd.f32 %v11369_v13, %v4084_v24  ;;  %v4006_v60 = vmul.f32 %v3967_v34, %v3801_v44  ;;  %v4276_v30 = vsel %vm1362_vm6, %v4220_v15, %v4221_v19 }
 0x9da   :  { %v3805_v42 = vpop.f32.mrb[120].mxu0  ;;  %v4292_v47 = vpack.c.bf16 %v4276_v30, %v4277_v57  ;;  %v4374_v7 = vsel %vm1461_vm7, %v4318_v43, %v4319_v22  ;;  %v11332_v57 = vld [vmem:[%s21115_s3 + $0x1a8] sm:$0xff] }
 0x9db   :  { %v4085_v40 = vmul.f32 %v11331_v37, %v4006_v60  ;;  %v3968_v1 = vsub.f32 %v15849_v45, %v3805_v42  ;;  %v3807_v62 = vpop.f32.mrb[121].mxu0  ;;  %v4222_v15 = vrot.slane %v4163_v26, 1  ;;  %v4320_v13 = vrot.slane %v4163_v26, 2  ;;  %v11371_v43 = vld [vmem:[%s21116_s4 + $0x1a8] sm:$0xff]  ;;  %5133 = vmatpush1.bf16.msra.mxu1 %v13707_v18  ;;  %12466 = vmatpush3.bf16.msra.mxu0 %v13710_v11 }
 0x9dc   :  { %4959 = vmatprep.mubr.bf16.mxu1 %v4292_v47  ;;  %5413 = vmatprep.mubr.bf16.mxu0 %v4292_v47 }
 0x9dd   :  { %v4164_v23 = vadd.f32 %v11370_v25, %v4085_v40  ;;  %v4007_v38 = vmul.f32 %v3968_v1, %v3807_v62  ;;  %4960 = vmatmul.mubr.bf16.gmra.mrb[228].mxu1 %v16672_v0  ;;  %5414 = vmatmul.mubr.bf16.gmra.mrb[188].mxu0 %v16672_v0  ;;  %v4275_v45 = vsel %vm1362_vm6, %v4221_v19, %v4222_v15  ;;  %v11333_v0 = vld [vmem:[%s21115_s3 + $0x1b0] sm:$0xff]  ;;  %v11334_v62 = vld [vmem:[%s21115_s3 + $0x1b8] sm:$0xff] }
 0x9de   :  { %v3811_v63 = vpop.f32.mrb[122].mxu0  ;;  %v4373_v56 = vsel %vm1461_vm7, %v4319_v22, %v4320_v13  ;;  %13140 = vmatprep.subr.bf16.mxu1 %v21260_v6 }
 0x9df   :  { %v4321_v24 = vrot.slane %v4164_v23, 2  ;;  %v4086_v34 = vmul.f32 %v11332_v57, %v4007_v38  ;;  %v3969_v44 = vsub.f32 %v15852_v21, %v3811_v63  ;;  %v3813_v52 = vpop.f32.mrb[123].mxu0  ;;  %v4223_v37 = vrot.slane %v4164_v23, 1  ;;  %v11372_v21 = vld [vmem:[%s21116_s4 + $0x1b0] sm:$0xff] }
 0x9e0   :  { %v4196_v19 = vpack.c.bf16 %v4164_v23, %v4163_v26  ;;  %v16756_v60 = vpack.c.bf16 %v4373_v56, %v4374_v7 }
 0x9e1   :  { %v4165_v30 = vadd.f32 %v11371_v43, %v4086_v34  ;;  %v4008_v11 = vmul.f32 %v3969_v44, %v3813_v52  ;;  %v4274_v22 = vsel %vm1362_vm6, %v4222_v15, %v4223_v37  ;;  %v4372_v25 = vsel %vm1461_vm7, %v4320_v13, %v4321_v24 }
 0x9e2   :  { %v3817_v42 = vpop.f32.mrb[124].mxu0  ;;  %v4293_v47 = vpack.c.bf16 %v4274_v22, %v4275_v45 }
 0x9e3   :  { %v4322_v18 = vrot.slane %v4165_v30, 2  ;;  %v4087_v40 = vmul.f32 %v11333_v0, %v4008_v11  ;;  %v3970_v26 = vsub.f32 %v15884_v50, %v3817_v42  ;;  %v3819_v7 = vpop.f32.mrb[125].mxu0  ;;  %v4224_v1 = vrot.slane %v4165_v30, 1  ;;  %v11373_v50 = vld [vmem:[%s21116_s4 + $0x1b8] sm:$0xff] }
 0x9e4   :  { %4969 = vmatprep.mubr.bf16.mxu1 %v4293_v47  ;;  %5421 = vmatprep.mubr.bf16.mxu0 %v4293_v47 }
 0x9e5   :  { %v4166_v15 = vadd.f32 %v11372_v21, %v4087_v40  ;;  %v4009_v13 = vmul.f32 %v3970_v26, %v3819_v7  ;;  %4970 = vmatmul.mubr.bf16.gmra.mrb[232].mxu1 %v16715_v5  ;;  %5422 = vmatmul.mubr.bf16.gmra.mrb[192].mxu0 %v16715_v5  ;;  %v4273_v57 = vsel %vm1362_vm6, %v4223_v37, %v4224_v1  ;;  %v11335_v5 = vld [vmem:[%s21115_s3 + $0x1c0] sm:$0xff]  ;;  %v11336_v26 = vld [vmem:[%s21115_s3 + $0x1c8] sm:$0xff] }
 0x9e6   :  { %v3823_v23 = vpop.f32.mrb[126].mxu0  ;;  %v4371_v38 = vsel %vm1461_vm7, %v4321_v24, %v4322_v18  ;;  %v11374_v24 = vld [vmem:[%s21116_s4 + $0x1c0] sm:$0xff] }
 0x9e7   :  { %v4088_v45 = vmul.f32 %v11334_v62, %v4009_v13  ;;  %v3971_v43 = vsub.f32 %v15886_v58, %v3823_v23  ;;  %v3825_v63 = vpop.f32.mrb[127].mxu0  ;;  %v4225_v56 = vrot.slane %v4166_v15, 1  ;;  %v4197_v34 = vpack.c.bf16 %v4166_v15, %v4165_v30 }
 0x9e8   :  { %v16782_v44 = vpack.c.bf16 %v4371_v38, %v4372_v25  ;;  %v4323_v52 = vrot.slane %v4166_v15, 2 }
 0x9e9   :  { %v4167_v37 = vadd.f32 %v11373_v50, %v4088_v45  ;;  %v4010_v0 = vmul.f32 %v3971_v43, %v3825_v63  ;;  %v4272_v11 = vsel %vm1362_vm6, %v4224_v1, %v4225_v56 }
 0x9ea   :  { %v3829_v58 = vpop.f32.mrb[128].mxu0  ;;  %v4294_v22 = vpack.c.bf16 %v4272_v11, %v4273_v57  ;;  %v4370_v30 = vsel %vm1461_vm7, %v4322_v18, %v4323_v52 }
 0x9eb   :  { %v4089_v21 = vmul.f32 %v11335_v5, %v4010_v0  ;;  %v3972_v42 = vsub.f32 %v15902_v10, %v3829_v58  ;;  %v3831_v25 = vpop.f32.mrb[129].mxu0  ;;  %v4226_v47 = vrot.slane %v4167_v37, 1  ;;  %v4324_v40 = vrot.slane %v4167_v37, 2  ;;  %v11375_v10 = vld [vmem:[%s21116_s4 + $0x1c8] sm:$0xff] }
 0x9ec   :  { %4979 = vmatprep.mubr.bf16.mxu1 %v4294_v22  ;;  %5429 = vmatprep.mubr.bf16.mxu0 %v4294_v22 }
 0x9ed   :  { %v4168_v7 = vadd.f32 %v11374_v24, %v4089_v21  ;;  %v4011_v1 = vmul.f32 %v3972_v42, %v3831_v25  ;;  %4980 = vmatmul.mubr.bf16.gmra.mrb[236].mxu1 %v4196_v19  ;;  %5430 = vmatmul.mubr.bf16.gmra.mrb[196].mxu0 %v4196_v19  ;;  %v4271_v62 = vsel %vm1362_vm6, %v4225_v56, %v4226_v47  ;;  %v11337_v19 = vld [vmem:[%s21115_s3 + $0x1d0] sm:$0xff]  ;;  %v11338_v21 = vld [vmem:[%s21115_s3 + $0x1d8] sm:$0xff] }
 0x9ee   :  { %v3835_v18 = vpop.f32.mrb[130].mxu0  ;;  %v4369_v15 = vsel %vm1461_vm7, %v4323_v52, %v4324_v40 }
 0x9ef   :  { %v4325_v13 = vrot.slane %v4168_v7, 2  ;;  %v4090_v57 = vmul.f32 %v11336_v26, %v4011_v1  ;;  %v3973_v50 = vsub.f32 %v15904_v16, %v3835_v18  ;;  %v3837_v23 = vpop.f32.mrb[131].mxu0  ;;  %v4227_v38 = vrot.slane %v4168_v7, 1  ;;  %v11376_v16 = vld [vmem:[%s21116_s4 + $0x1d0] sm:$0xff] }
 0x9f0   :  { %v4198_v45 = vpack.c.bf16 %v4168_v7, %v4167_v37  ;;  %v16806_v43 = vpack.c.bf16 %v4369_v15, %v4370_v30 }
 0x9f1   :  { %v4169_v63 = vadd.f32 %v11375_v10, %v4090_v57  ;;  %v4012_v56 = vmul.f32 %v3973_v50, %v3837_v23  ;;  %v4270_v5 = vsel %vm1362_vm6, %v4226_v47, %v4227_v38  ;;  %v4368_v52 = vsel %vm1461_vm7, %v4324_v40, %v4325_v13  ;;  %v11377_v40 = vld [vmem:[%s21116_s4 + $0x1d8] sm:$0xff] }
 0x9f2   :  { %v3841_v0 = vpop.f32.mrb[132].mxu0  ;;  %v4295_v11 = vpack.c.bf16 %v4270_v5, %v4271_v62 }
 0x9f3   :  { %v4326_v24 = vrot.slane %v4169_v63, 2  ;;  %v4091_v58 = vmul.f32 %v11337_v19, %v4012_v56  ;;  %v3974_v37 = vsub.f32 %v15920_v12, %v3841_v0  ;;  %v3843_v22 = vpop.f32.mrb[133].mxu0  ;;  %v4228_v30 = vrot.slane %v4169_v63, 1 }
 0x9f4   :  { %4989 = vmatprep.mubr.bf16.mxu1 %v4295_v11  ;;  %5437 = vmatprep.mubr.bf16.mxu0 %v4295_v11  ;;  %v11340_v11 = vld [vmem:[%s21115_s3 + $0x1e8] sm:$0xff] }
 0x9f5   :  { %v4170_v42 = vadd.f32 %v11376_v16, %v4091_v58  ;;  %v4013_v25 = vmul.f32 %v3974_v37, %v3843_v22  ;;  %4990 = vmatmul.mubr.bf16.gmra.mrb[240].mxu1 %v4197_v34  ;;  %5438 = vmatmul.mubr.bf16.gmra.mrb[200].mxu0 %v4197_v34  ;;  %v4269_v47 = vsel %vm1362_vm6, %v4227_v38, %v4228_v30  ;;  %v11339_v34 = vld [vmem:[%s21115_s3 + $0x1e0] sm:$0xff] }
 0x9f6   :  { %v3847_v12 = vpop.f32.mrb[134].mxu0  ;;  %v4367_v26 = vsel %vm1461_vm7, %v4325_v13, %v4326_v24  ;;  %v11378_v13 = vld [vmem:[%s21116_s4 + $0x1e0] sm:$0xff] }
 0x9f7   :  { %v4092_v7 = vmul.f32 %v11338_v21, %v4013_v25  ;;  %v3975_v1 = vsub.f32 %v15922_v51, %v3847_v12  ;;  %v3849_v62 = vpop.f32.mrb[135].mxu0  ;;  %v4229_v10 = vrot.slane %v4170_v42, 1  ;;  %v4199_v18 = vpack.c.bf16 %v4170_v42, %v4169_v63 }
 0x9f8   :  { %v16830_v15 = vpack.c.bf16 %v4367_v26, %v4368_v52  ;;  %v4327_v57 = vrot.slane %v4170_v42, 2 }
 0x9f9   :  { %v4171_v50 = vadd.f32 %v11377_v40, %v4092_v7  ;;  %v4014_v23 = vmul.f32 %v3975_v1, %v3849_v62  ;;  %v4268_v38 = vsel %vm1362_vm6, %v4228_v30, %v4229_v10 }
 0x9fa   :  { %v3853_v51 = vpop.f32.mrb[136].mxu0  ;;  %v4296_v19 = vpack.c.bf16 %v4268_v38, %v4269_v47  ;;  %v4366_v63 = vsel %vm1461_vm7, %v4326_v24, %v4327_v57 }
 0x9fb   :  { %v4093_v56 = vmul.f32 %v11339_v34, %v4014_v23  ;;  %v3976_v5 = vsub.f32 %v15938_v4, %v3853_v51  ;;  %v3855_v52 = vpop.f32.mrb[137].mxu0  ;;  %v4230_v16 = vrot.slane %v4171_v50, 1  ;;  %v4328_v0 = vrot.slane %v4171_v50, 2  ;;  %v11379_v4 = vld [vmem:[%s21116_s4 + $0x1e8] sm:$0xff] }
 0x9fc   :  { %4999 = vmatprep.mubr.bf16.mxu1 %v4296_v19  ;;  %5445 = vmatprep.mubr.bf16.mxu0 %v4296_v19  ;;  %v11342_v19 = vld [vmem:[%s21115_s3 + $0x1f8] sm:$0xff] }
 0x9fd   :  { %v4172_v58 = vadd.f32 %v11378_v13, %v4093_v56  ;;  %v4015_v37 = vmul.f32 %v3976_v5, %v3855_v52  ;;  %5000 = vmatmul.mubr.bf16.gmra.mrb[244].mxu1 %v4198_v45  ;;  %5446 = vmatmul.mubr.bf16.gmra.mrb[204].mxu0 %v4198_v45  ;;  %v4267_v22 = vsel %vm1362_vm6, %v4229_v10, %v4230_v16  ;;  %v11341_v45 = vld [vmem:[%s21115_s3 + $0x1f0] sm:$0xff]  ;;  %v11381_v52 = vld [vmem:[%s21116_s4 + $0x1f8] sm:$0xff] }
 0x9fe   :  { %v3859_v24 = vpop.f32.mrb[138].mxu0  ;;  %v4365_v30 = vsel %vm1461_vm7, %v4327_v57, %v4328_v0 }
 0x9ff   :  { %v4329_v21 = vrot.slane %v4172_v58, 2  ;;  %v4094_v42 = vmul.f32 %v11340_v11, %v4015_v37  ;;  %v3977_v25 = vsub.f32 %v15940_v39, %v3859_v24  ;;  %v3861_v47 = vpop.f32.mrb[139].mxu0  ;;  %v4231_v40 = vrot.slane %v4172_v58, 1  ;;  %v11380_v39 = vld [vmem:[%s21116_s4 + $0x1f0] sm:$0xff] }
 0xa00   :  { %v4200_v12 = vpack.c.bf16 %v4172_v58, %v4171_v50  ;;  %v16854_v26 = vpack.c.bf16 %v4365_v30, %v4366_v63 }
 0xa01   :  { %v4173_v7 = vadd.f32 %v11379_v4, %v4094_v42  ;;  %v4016_v1 = vmul.f32 %v3977_v25, %v3861_v47  ;;  %v4266_v62 = vsel %vm1362_vm6, %v4230_v16, %v4231_v40  ;;  %v4364_v10 = vsel %vm1461_vm7, %v4328_v0, %v4329_v21 }
 0xa02   :  { %v3865_v34 = vpop.f32.mrb[140].mxu0  ;;  %v4297_v57 = vpack.c.bf16 %v4266_v62, %v4267_v22 }
 0xa03   :  { %v4330_v23 = vrot.slane %v4173_v7, 2  ;;  %v4095_v38 = vmul.f32 %v11341_v45, %v4016_v1  ;;  %v3978_v50 = vsub.f32 %v15956_v17, %v3865_v34  ;;  %v3867_v13 = vpop.f32.mrb[141].mxu0  ;;  %v4232_v51 = vrot.slane %v4173_v7, 1 }
 0xa04   :  { %5009 = vmatprep.mubr.bf16.mxu1 %v4297_v57  ;;  %5453 = vmatprep.mubr.bf16.mxu0 %v4297_v57 }
 0xa05   :  { %v4174_v63 = vadd.f32 %v11380_v39, %v4095_v38  ;;  %v4017_v56 = vmul.f32 %v3978_v50, %v3867_v13  ;;  %5010 = vmatmul.mubr.bf16.gmra.mrb[248].mxu1 %v4199_v18  ;;  %5454 = vmatmul.mubr.bf16.gmra.mrb[208].mxu0 %v4199_v18  ;;  %v4265_v5 = vsel %vm1362_vm6, %v4231_v40, %v4232_v51  ;;  %v11343_v18 = vld [vmem:[%s21115_s3 + $0x200] sm:$0xff]  ;;  %v11344_v39 = vld [vmem:[%s21115_s3 + $0x208] sm:$0xff] }
 0xa06   :  { %v3871_v17 = vpop.f32.mrb[142].mxu0  ;;  %v4363_v16 = vsel %vm1461_vm7, %v4329_v21, %v4330_v23  ;;  %v11382_v21 = vld [vmem:[%s21116_s4 + $0x200] sm:$0xff] }
 0xa07   :  { %v4201_v0 = vpack.c.bf16 %v4174_v63, %v4173_v7  ;;  %v4096_v11 = vmul.f32 %v11342_v19, %v4017_v56  ;;  %v3979_v58 = vsub.f32 %v15958_v61, %v3871_v17  ;;  %v3873_v37 = vpop.f32.mrb[143].mxu0  ;;  %v4233_v22 = vrot.slane %v4174_v63, 1 }
 0xa08   :  { %v16878_v4 = vpack.c.bf16 %v4363_v16, %v4364_v10  ;;  %v4331_v24 = vrot.slane %v4174_v63, 2 }
 0xa09   :  { %v4175_v30 = vadd.f32 %v11381_v52, %v4096_v11  ;;  %v4018_v42 = vmul.f32 %v3979_v58, %v3873_v37  ;;  %v4264_v25 = vsel %vm1362_vm6, %v4232_v51, %v4233_v22  ;;  %v11384_v58 = vld [vmem:[%s21116_s4 + $0x210] sm:$0xff] }
 0xa0a   :  { %v3877_v47 = vpop.f32.mrb[144].mxu0  ;;  %v4298_v61 = vpack.c.bf16 %v4264_v25, %v4265_v5  ;;  %v4362_v40 = vsel %vm1461_vm7, %v4330_v23, %v4331_v24  ;;  %v11346_v25 = vld [vmem:[%s21115_s3 + $0x218] sm:$0xff] }
 0xa0b   :  { %v4097_v45 = vmul.f32 %v11343_v18, %v4018_v42  ;;  %v3980_v7 = vsub.f32 %v15974_v54, %v3877_v47  ;;  %v3879_v1 = vpop.f32.mrb[145].mxu0  ;;  %v4234_v62 = vrot.slane %v4175_v30, 1  ;;  %v4332_v10 = vrot.slane %v4175_v30, 2  ;;  %v11383_v54 = vld [vmem:[%s21116_s4 + $0x208] sm:$0xff] }
 0xa0c   :  { %5019 = vmatprep.mubr.bf16.mxu1 %v4298_v61  ;;  %5461 = vmatprep.mubr.bf16.mxu0 %v4298_v61 }
 0xa0d   :  { %v4176_v34 = vadd.f32 %v11382_v21, %v4097_v45  ;;  %v4019_v57 = vmul.f32 %v3980_v7, %v3879_v1  ;;  %5020 = vmatmul.mubr.bf16.gmra.mrb[252].mxu1 %v4200_v12  ;;  %5462 = vmatmul.mubr.bf16.gmra.mrb[212].mxu0 %v4200_v12  ;;  %v4263_v38 = vsel %vm1362_vm6, %v4233_v22, %v4234_v62  ;;  %v11345_v12 = vld [vmem:[%s21115_s3 + $0x210] sm:$0xff]  ;;  %v11385_v45 = vld [vmem:[%s21116_s4 + $0x218] sm:$0xff] }
 0xa0e   :  { %v3883_v23 = vpop.f32.mrb[146].mxu0  ;;  %v4361_v50 = vsel %vm1461_vm7, %v4331_v24, %v4332_v10 }
 0xa0f   :  { %v4202_v13 = vpack.c.bf16 %v4176_v34, %v4175_v30  ;;  %v4333_v51 = vrot.slane %v4176_v34, 2  ;;  %v4098_v19 = vmul.f32 %v11344_v39, %v4019_v57  ;;  %v3981_v63 = vsub.f32 %v15976_v28, %v3883_v23  ;;  %v3885_v56 = vpop.f32.mrb[147].mxu0 }
 0xa10   :  { %v4235_v5 = vrot.slane %v4176_v34, 1  ;;  %v16902_v52 = vpack.c.bf16 %v4361_v50, %v4362_v40 }
 0xa11   :  { %v4177_v17 = vadd.f32 %v11383_v54, %v4098_v19  ;;  %v4020_v16 = vmul.f32 %v3981_v63, %v3885_v56  ;;  %v4360_v11 = vsel %vm1461_vm7, %v4332_v10, %v4333_v51 }
 0xa12   :  { %v3889_v37 = vpop.f32.mrb[148].mxu0  ;;  %v4262_v28 = vsel %vm1362_vm6, %v4234_v62, %v4235_v5 }
 0xa13   :  { %v4334_v22 = vrot.slane %v4177_v17, 2  ;;  %v4099_v18 = vmul.f32 %v11345_v12, %v4020_v16  ;;  %v3982_v24 = vsub.f32 %v15992_v29, %v3889_v37  ;;  %v3891_v30 = vpop.f32.mrb[149].mxu0  ;;  %v4299_v42 = vpack.c.bf16 %v4262_v28, %v4263_v38  ;;  %v11347_v38 = vld [vmem:[%s21115_s3 + $0x220] sm:$0xff] }
 0xa14   :  { %v4236_v21 = vrot.slane %v4177_v17, 1 }
 0xa15   :  { %v4178_v47 = vadd.f32 %v11384_v58, %v4099_v18  ;;  %v4021_v61 = vmul.f32 %v3982_v24, %v3891_v30  ;;  %5029 = vmatprep.mubr.bf16.mxu1 %v4299_v42  ;;  %5469 = vmatprep.mubr.bf16.mxu0 %v4299_v42  ;;  %v4359_v40 = vsel %vm1461_vm7, %v4333_v51, %v4334_v22  ;;  %v11386_v51 = vld [vmem:[%s21116_s4 + $0x220] sm:$0xff] }
 0xa16   :  { %5030 = vmatmul.mubr.bf16.gmra.mrb[0].mxu1 %v4201_v0  ;;  %5470 = vmatmul.mubr.bf16.gmra.mrb[216].mxu0 %v4201_v0  ;;  %v3895_v29 = vpop.f32.mrb[150].mxu0  ;;  %v4261_v7 = vsel %vm1362_vm6, %v4235_v5, %v4236_v21  ;;  %v16922_v1 = vpack.c.bf16 %v4359_v40, %v4360_v11  ;;  %v11348_v11 = vld [vmem:[%s21115_s3 + $0x228] sm:$0xff] }
 0xa17   :  { %v4203_v62 = vpack.c.bf16 %v4178_v47, %v4177_v17  ;;  %v4100_v10 = vmul.f32 %v11346_v25, %v4021_v61  ;;  %v3983_v39 = vsub.f32 %v15994_v36, %v3895_v29  ;;  %v3897_v34 = vpop.f32.mrb[151].mxu0  ;;  %v4237_v57 = vrot.slane %v4178_v47, 1  ;;  %v11349_v61 = vld [vmem:[%s21115_s3 + $0x230] sm:$0xff] }
 0xa18   :  { %v4335_v54 = vrot.slane %v4178_v47, 2 }
 0xa19   :  { %v4179_v23 = vadd.f32 %v11385_v45, %v4100_v10  ;;  %v4022_v50 = vmul.f32 %v3983_v39, %v3897_v34  ;;  %v4260_v0 = vsel %vm1362_vm6, %v4236_v21, %v4237_v57 }
 0xa1a   :  { %v3901_v19 = vpop.f32.mrb[152].mxu0  ;;  %v4300_v63 = vpack.c.bf16 %v4260_v0, %v4261_v7  ;;  %v4358_v36 = vsel %vm1461_vm7, %v4334_v22, %v4335_v54 }
 0xa1b   :  { %v4101_v56 = vmul.f32 %v11347_v38, %v4022_v50  ;;  %v3984_v12 = vsub.f32 %v16010_v33, %v3901_v19  ;;  %v3903_v5 = vpop.f32.mrb[153].mxu0  ;;  %v4238_v17 = vrot.slane %v4179_v23, 1  ;;  %v4336_v16 = vrot.slane %v4179_v23, 2  ;;  %v11387_v33 = vld [vmem:[%s21116_s4 + $0x228] sm:$0xff] }
 0xa1c   :  { %5039 = vmatprep.mubr.bf16.mxu1 %v4300_v63  ;;  %5477 = vmatprep.mubr.bf16.mxu0 %v4300_v63  ;;  %v11389_v63 = vld [vmem:[%s21116_s4 + $0x238] sm:$0xff] }
 0xa1d   :  { %v4180_v58 = vadd.f32 %v11386_v51, %v4101_v56  ;;  %v4023_v37 = vmul.f32 %v3984_v12, %v3903_v5  ;;  %v4259_v28 = vsel %vm1362_vm6, %v4237_v57, %v4238_v17  ;;  %v4357_v22 = vsel %vm1461_vm7, %v4335_v54, %v4336_v16 }
 0xa1e   :  { %5040 = vmatmul.mubr.bf16.gmra.mrb[4].mxu1 %v4202_v13  ;;  %5478 = vmatmul.mubr.bf16.gmra.mrb[220].mxu0 %v4202_v13  ;;  %v3907_v18 = vpop.f32.mrb[154].mxu0  ;;  %v16946_v24 = vpack.c.bf16 %v4357_v22, %v4358_v36  ;;  %v11388_v13 = vld [vmem:[%s21116_s4 + $0x230] sm:$0xff] }
 0xa1f   :  { %v4204_v30 = vpack.c.bf16 %v4180_v58, %v4179_v23  ;;  %v4337_v42 = vrot.slane %v4180_v58, 2  ;;  %v4102_v25 = vmul.f32 %v11348_v11, %v4023_v37  ;;  %v3985_v21 = vsub.f32 %v16012_v2, %v3907_v18  ;;  %v3909_v47 = vpop.f32.mrb[155].mxu0  ;;  %v11350_v23 = vld [vmem:[%s21115_s3 + $0x238] sm:$0xff] }
 0xa20   :  { %v4239_v40 = vrot.slane %v4180_v58, 1  ;;  %v11351_v58 = vld [vmem:[%s21115_s3 + $0x240] sm:$0xff] }
 0xa21   :  { %v4181_v45 = vadd.f32 %v11387_v33, %v4102_v25  ;;  %v4024_v29 = vmul.f32 %v3985_v21, %v3909_v47  ;;  %v4356_v7 = vsel %vm1461_vm7, %v4336_v16, %v4337_v42  ;;  %v11390_v33 = vld [vmem:[%s21116_s4 + $0x240] sm:$0xff] }
 0xa22   :  { %v3913_v10 = vpop.f32.mrb[156].mxu0  ;;  %v4258_v39 = vsel %vm1362_vm6, %v4238_v17, %v4239_v40 }
 0xa23   :  { %v4338_v2 = vrot.slane %v4181_v45, 2  ;;  %v4103_v34 = vmul.f32 %v11349_v61, %v4024_v29  ;;  %v3986_v57 = vsub.f32 %v16028_v3, %v3913_v10  ;;  %v3915_v38 = vpop.f32.mrb[157].mxu0  ;;  %v4301_v54 = vpack.c.bf16 %v4258_v39, %v4259_v28 }
 0xa24   :  { %v4240_v50 = vrot.slane %v4181_v45, 1 }
 0xa25   :  { %v4182_v0 = vadd.f32 %v11388_v13, %v4103_v34  ;;  %v4025_v51 = vmul.f32 %v3986_v57, %v3915_v38  ;;  %5049 = vmatprep.mubr.bf16.mxu1 %v4301_v54  ;;  %5485 = vmatprep.mubr.bf16.mxu0 %v4301_v54  ;;  %v4355_v19 = vsel %vm1461_vm7, %v4337_v42, %v4338_v2 }
 0xa26   :  { %5050 = vmatmul.mubr.bf16.gmra.mrb[8].mxu1 %v4203_v62  ;;  %5486 = vmatmul.mubr.bf16.gmra.mrb[224].mxu0 %v4203_v62  ;;  %v3919_v3 = vpop.f32.mrb[158].mxu0  ;;  %v4257_v36 = vsel %vm1362_vm6, %v4239_v40, %v4240_v50  ;;  %v16970_v56 = vpack.c.bf16 %v4355_v19, %v4356_v7 }
 0xa27   :  { %v4205_v12 = vpack.c.bf16 %v4182_v0, %v4181_v45  ;;  %v4104_v5 = vmul.f32 %v11350_v23, %v4025_v51  ;;  %v3987_v17 = vsub.f32 %v16030_v59, %v3919_v3  ;;  %v3921_v16 = vpop.f32.mrb[159].mxu0  ;;  %v4241_v11 = vrot.slane %v4182_v0, 1  ;;  %v11352_v45 = vld [vmem:[%s21115_s3 + $0x248] sm:$0xff] }
 0xa28   :  { %v4339_v37 = vrot.slane %v4182_v0, 2 }
 0xa29   :  { %v4183_v28 = vadd.f32 %v11389_v63, %v4104_v5  ;;  %v4026_v22 = vmul.f32 %v3987_v17, %v3921_v16  ;;  %v4256_v62 = vsel %vm1362_vm6, %v4240_v50, %v4241_v11  ;;  %v11353_v50 = vld [vmem:[%s21115_s3 + $0x250] sm:$0xff] }
 0xa2a   :  { %v3925_v18 = vpop.f32.mrb[160].mxu0  ;;  %v4302_v42 = vpack.c.bf16 %v4256_v62, %v4257_v36  ;;  %v4354_v59 = vsel %vm1461_vm7, %v4338_v2, %v4339_v37 }
 0xa2b   :  { %v4105_v25 = vmul.f32 %v11351_v58, %v4026_v22  ;;  %v3988_v21 = vsub.f32 %v16050_v31, %v3925_v18  ;;  %v3927_v47 = vpop.f32.mrb[161].mxu0  ;;  %v4242_v61 = vrot.slane %v4183_v28, 1  ;;  %v4340_v40 = vrot.slane %v4183_v28, 2  ;;  %v11391_v31 = vld [vmem:[%s21116_s4 + $0x248] sm:$0xff]  ;;  %v11354_v58 = vld [vmem:[%s21115_s3 + $0x258] sm:$0xff] }
 0xa2c   :  { %5059 = vmatprep.mubr.bf16.mxu1 %v4302_v42  ;;  %5493 = vmatprep.mubr.bf16.mxu0 %v4302_v42 }
 0xa2d   :  { %v4184_v29 = vadd.f32 %v11390_v33, %v4105_v25  ;;  %v4027_v7 = vmul.f32 %v3988_v21, %v3927_v47  ;;  %v4255_v13 = vsel %vm1362_vm6, %v4241_v11, %v4242_v61  ;;  %v4353_v10 = vsel %vm1461_vm7, %v4339_v37, %v4340_v40  ;;  %v11393_v33 = vld [vmem:[%s21116_s4 + $0x258] sm:$0xff] }
 0xa2e   :  { %5060 = vmatmul.mubr.bf16.gmra.mrb[12].mxu1 %v4204_v30  ;;  %5494 = vmatmul.mubr.bf16.gmra.mrb[228].mxu0 %v4204_v30  ;;  %v3931_v39 = vpop.f32.mrb[162].mxu0  ;;  %v16994_v2 = vpack.c.bf16 %v4353_v10, %v4354_v59  ;;  %v11392_v30 = vld [vmem:[%s21116_s4 + $0x250] sm:$0xff] }
 0xa2f   :  { %v4206_v34 = vpack.c.bf16 %v4184_v29, %v4183_v28  ;;  %v4341_v57 = vrot.slane %v4184_v29, 2  ;;  %v4106_v38 = vmul.f32 %v11352_v45, %v4027_v7  ;;  %v3989_v54 = vsub.f32 %v16053_v20, %v3931_v39  ;;  %v3933_v23 = vpop.f32.mrb[163].mxu0 }
 0xa30   :  { %v4243_v0 = vrot.slane %v4184_v29, 1 }
 0xa31   :  { %v4185_v51 = vadd.f32 %v11391_v31, %v4106_v38  ;;  %v4028_v19 = vmul.f32 %v3989_v54, %v3933_v23  ;;  %v4352_v63 = vsel %vm1461_vm7, %v4340_v40, %v4341_v57  ;;  %v11355_v40 = vld [vmem:[%s21115_s3 + $0x260] sm:$0xff] }
 0xa32   :  { %v3937_v3 = vpop.f32.mrb[164].mxu0  ;;  %v4254_v36 = vsel %vm1362_vm6, %v4242_v61, %v4243_v0 }
 0xa33   :  { %v4342_v20 = vrot.slane %v4185_v51, 2  ;;  %v4107_v5 = vmul.f32 %v11353_v50, %v4028_v19  ;;  %v3990_v17 = vsub.f32 %v16074_v53, %v3937_v3  ;;  %v3939_v16 = vpop.f32.mrb[165].mxu0  ;;  %v4303_v11 = vpack.c.bf16 %v4254_v36, %v4255_v13  ;;  %v11394_v13 = vld [vmem:[%s21116_s4 + $0x260] sm:$0xff]  ;;  %v11356_v50 = vld [vmem:[%s21115_s3 + $0x268] sm:$0xff] }
 0xa34   :  { %v4244_v37 = vrot.slane %v4185_v51, 1 }
 0xa35   :  { %v4186_v28 = vadd.f32 %v11392_v30, %v4107_v5  ;;  %v4029_v22 = vmul.f32 %v3990_v17, %v3939_v16  ;;  %5069 = vmatprep.mubr.bf16.mxu1 %v4303_v11  ;;  %5501 = vmatprep.mubr.bf16.mxu0 %v4303_v11  ;;  %v4351_v62 = vsel %vm1461_vm7, %v4341_v57, %v4342_v20 }
 0xa36   :  { %5070 = vmatmul.mubr.bf16.gmra.mrb[16].mxu1 %v4205_v12  ;;  %5502 = vmatmul.mubr.bf16.gmra.mrb[232].mxu0 %v4205_v12  ;;  %v3943_v53 = vpop.f32.mrb[166].mxu0  ;;  %v4253_v18 = vsel %vm1362_vm6, %v4243_v0, %v4244_v37  ;;  %v17018_v42 = vpack.c.bf16 %v4351_v62, %v4352_v63 }
 0xa37   :  { %v4207_v59 = vpack.c.bf16 %v4186_v28, %v4185_v51  ;;  %v4108_v25 = vmul.f32 %v11354_v58, %v4029_v22  ;;  %v3991_v21 = vsub.f32 %v16076_v48, %v3943_v53  ;;  %v3945_v47 = vpop.f32.mrb[167].mxu0  ;;  %v4245_v61 = vrot.slane %v4186_v28, 1 }
 0xa38   :  { %v4343_v45 = vrot.slane %v4186_v28, 2  ;;  %v21272_v22 = vrot.slane %v16494_v49, 1  ;;  %v21273_v53 = vrot.slane %v16494_v49, 2 }
 0xa39   :  { %v4187_v29 = vadd.f32 %v11393_v33, %v4108_v25  ;;  %v4030_v7 = vmul.f32 %v3991_v21, %v3945_v47  ;;  %v4252_v12 = vsel %vm1362_vm6, %v4244_v37, %v4245_v61 }
 0xa3a   :  { %v3949_v10 = vpop.f32.mrb[168].mxu0  ;;  %v4304_v31 = vpack.c.bf16 %v4252_v12, %v4253_v18  ;;  %v4350_v48 = vsel %vm1461_vm7, %v4342_v20, %v4343_v45 }
 0xa3b   :  { %v4109_v39 = vmul.f32 %v11355_v40, %v4030_v7  ;;  %v3992_v57 = vsub.f32 %v16082_v8, %v3949_v10  ;;  %v3951_v38 = vpop.f32.mrb[169].mxu0  ;;  %v4246_v54 = vrot.slane %v4187_v29, 1  ;;  %v4344_v23 = vrot.slane %v4187_v29, 2  ;;  %v11395_v8 = vld [vmem:[%s21116_s4 + $0x268] sm:$0xff] }
 0xa3c   :  { %5079 = vmatprep.mubr.bf16.mxu1 %v4304_v31  ;;  %5509 = vmatprep.mubr.bf16.mxu0 %v4304_v31  ;;  %v21279_v40 = vld [vmem:[#allocation7_spill] sm:$0xff] }
 0xa3d   :  { %v4188_v0 = vadd.f32 %v11394_v13, %v4109_v39  ;;  %v4031_v51 = vmul.f32 %v3992_v57, %v3951_v38  ;;  %v4251_v19 = vsel %vm1362_vm6, %v4245_v61, %v4246_v54  ;;  %v4349_v63 = vsel %vm1461_vm7, %v4343_v45, %v4344_v23  ;;  %v21281_v45 = vld [vmem:[#allocation9_spill] sm:$0xff]  ;;  %v21282_v39 = vld [vmem:[#allocation10_spill] sm:$0xff] }
 0xa3e   :  { %5080 = vmatmul.mubr.bf16.gmra.mrb[20].mxu1 %v4206_v34  ;;  %5510 = vmatmul.mubr.bf16.gmra.mrb[236].mxu0 %v4206_v34  ;;  %v17042_v30 = vpack.c.bf16 %v4349_v63, %v4350_v48  ;;  %v4307_v61 = vpack.c.bf16 %v16517_v41, %v16517_v41  ;;  %v21274_v41 = vld [vmem:[#allocation2_spill] sm:$0xff]  ;;  %v4405_v57 = vpack.c.bf16 %v21282_v39, %v21282_v39 }
 0xa3f   :  { %v4208_v3 = vpack.c.bf16 %v4188_v0, %v4187_v29  ;;  %v4345_v36 = vrot.slane %v4188_v0, 2  ;;  %v4110_v20 = vmul.f32 %v11356_v50, %v4031_v51  ;;  %v4247_v5 = vrot.slane %v4188_v0, 1 }
 0xa41   :  { %v4189_v17 = vadd.f32 %v11395_v8, %v4110_v20  ;;  %v4250_v16 = vsel %vm1362_vm6, %v4246_v54, %v4247_v5  ;;  %v4348_v11 = vsel %vm1461_vm7, %v4344_v23, %v4345_v36 }
 0xa42   :  { %v4305_v58 = vpack.c.bf16 %v4250_v16, %v4251_v19 }
 0xa43   :  { %v4346_v37 = vrot.slane %v4189_v17, 2  ;;  %v4248_v28 = vrot.slane %v4189_v17, 1  ;;  %v4209_v49 = vpack.c.bf16 %v4189_v17, %v4189_v17 }
 0xa44   :  { %5089 = vmatprep.mubr.bf16.mxu1 %v4305_v58  ;;  %5517 = vmatprep.mubr.bf16.mxu0 %v4305_v58 }
 0xa45   :  { %v4249_v34 = vsel %vm1362_vm6, %v4247_v5, %v4248_v28  ;;  %v4287_v62 = vsel %vm1362_vm6, %v4248_v28, %v21272_v22  ;;  %v4347_v33 = vsel %vm1461_vm7, %v4345_v36, %v4346_v37  ;;  %v4385_v18 = vsel %vm1461_vm7, %v4346_v37, %v21273_v53 }
 0xa46   :  { %5090 = vmatmul.mubr.bf16.gmra.mrb[24].mxu1 %v4207_v59  ;;  %5518 = vmatmul.mubr.bf16.gmra.mrb[240].mxu0 %v4207_v59  ;;  %v4306_v25 = vpack.c.bf16 %v4287_v62, %v4249_v34  ;;  %v17060_v21 = vpack.c.bf16 %v4347_v33, %v4348_v11  ;;  %v17063_v47 = vpack.c.bf16 %v16526_v14, %v4385_v18  ;;  %v21275_v14 = vld [vmem:[#allocation3_spill] sm:$0xff]  ;;  %v21277_v59 = vld [vmem:[#allocation5_spill] sm:$0xff] }
 0xa48   :  { %5099 = vmatprep.mubr.bf16.mxu1 %v4306_v25  ;;  %5525 = vmatprep.mubr.bf16.mxu0 %v4306_v25 }
 0xa4e   :  { %5100 = vmatmul.mubr.bf16.gmra.mrb[28].mxu1 %v4208_v3  ;;  %5526 = vmatmul.mubr.bf16.gmra.mrb[244].mxu0 %v4208_v3 }
 0xa4f   :  { %5109 = vmatprep.mubr.bf16.mxu1 %v4307_v61  ;;  %5533 = vmatprep.mubr.bf16.mxu0 %v4307_v61 }
 0xa56   :  { %5110 = vmatmul.mubr.bf16.gmra.mrb[32].mxu1 %v4209_v49  ;;  %5534 = vmatmul.mubr.bf16.gmra.mrb[248].mxu0 %v4209_v49 }
 0xa57   :  { %12467 = vmatprep.mubr.bf16.mxu0 %v16583_v55  ;;  %5150 = vmatprep.mubr.bf16.mxu1 %v21268_v35 }
 0xa5e   :  { %5151 = vmatmul.mubr.bf16.vlgmr.msra.gmra.mrb[212].mxu1 %v16583_v55  ;;  %12468 = vmatmul.mubr.bf16.vlgmr.msra.gmra.mrb[252].mxu0 %v16637_v9  ;;  %v21276_v55 = vld [vmem:[#allocation4_spill] sm:$0xff] }
 0xa5f   :  { %12471 = vmatprep.mubr.bf16.mxu0 %v16680_v32  ;;  %5160 = vmatprep.mubr.bf16.mxu1 %v21268_v35 }
 0xa60   :  { %13142 = vmatpush3.bf16.msra.mxu1 %v21274_v41 }
 0xa61   :  { %13143 = vmatprep.subr.bf16.mxu1 %v21260_v6 }
 0xa64   :  { %13145 = vmatpush3.bf16.msra.mxu1 %v21275_v14 }
 0xa65   :  { %13146 = vmatprep.subr.bf16.mxu1 %v21260_v6 }
 0xa66   :  { %5161 = vmatmul.mubr.bf16.gmra.mrb[216].mxu1 %v16637_v9  ;;  %12472 = vmatmul.mubr.bf16.gmra.mrb[80].mxu0 %v16726_v27  ;;  %v21278_v9 = vld [vmem:[#allocation6_spill] sm:$0xff] }
 0xa67   :  { %12475 = vmatprep.mubr.bf16.mxu0 %v16756_v60  ;;  %5170 = vmatprep.mubr.bf16.mxu1 %v21268_v35 }
 0xa68   :  { %13148 = vmatpush3.bf16.msra.mxu1 %v21276_v55 }
 0xa69   :  { %13149 = vmatprep.subr.bf16.mxu1 %v21260_v6 }
 0xa6c   :  { %13151 = vmatpush3.bf16.msra.mxu1 %v21277_v59 }
 0xa6d   :  { %13152 = vmatprep.subr.bf16.mxu1 %v21260_v6 }
 0xa6e   :  { %5171 = vmatmul.mubr.bf16.gmra.mrb[220].mxu1 %v16680_v32  ;;  %12476 = vmatmul.mubr.bf16.gmra.mrb[4].mxu0 %v16782_v44  ;;  %v21280_v32 = vld [vmem:[#allocation8_spill] sm:$0xff] }
 0xa6f   :  { %12479 = vmatprep.mubr.bf16.mxu0 %v16806_v43  ;;  %5180 = vmatprep.mubr.bf16.mxu1 %v21268_v35 }
 0xa70   :  { %13154 = vmatpush3.bf16.msra.mxu1 %v21278_v9 }
 0xa71   :  { %13155 = vmatprep.subr.bf16.mxu1 %v21260_v6 }
 0xa74   :  { %13157 = vmatpush3.bf16.msra.mxu1 %v21279_v40 }
 0xa75   :  { %13158 = vmatprep.subr.bf16.mxu1 %v21260_v6 }
 0xa76   :  { %5181 = vmatmul.mubr.bf16.gmra.mrb[224].mxu1 %v16726_v27  ;;  %12480 = vmatmul.mubr.bf16.gmra.mrb[8].mxu0 %v16830_v15 }
 0xa77   :  { %12483 = vmatprep.mubr.bf16.mxu0 %v16854_v26  ;;  %5190 = vmatprep.mubr.bf16.mxu1 %v21268_v35 }
 0xa78   :  { %13160 = vmatpush3.bf16.msra.mxu1 %v21280_v32 }
 0xa79   :  { %13161 = vmatprep.subr.bf16.mxu1 %v21260_v6 }
 0xa7c   :  { %13163 = vmatpush3.bf16.msra.mxu1 %v21281_v45 }
 0xa7d   :  { %13164 = vmatprep.subr.bf16.mxu1 %v21260_v6 }
 0xa7e   :  { %5191 = vmatmul.mubr.bf16.gmra.mrb[228].mxu1 %v16756_v60  ;;  %12484 = vmatmul.mubr.bf16.gmra.mrb[12].mxu0 %v16878_v4 }
 0xa7f   :  { %12487 = vmatprep.mubr.bf16.mxu0 %v16902_v52  ;;  %5200 = vmatprep.mubr.bf16.mxu1 %v21268_v35 }
 0xa86   :  { %5201 = vmatmul.mubr.bf16.gmra.mrb[232].mxu1 %v16782_v44  ;;  %12488 = vmatmul.mubr.bf16.gmra.mrb[16].mxu0 %v16922_v1 }
 0xa87   :  { %12491 = vmatprep.mubr.bf16.mxu0 %v16946_v24  ;;  %5210 = vmatprep.mubr.bf16.mxu1 %v21268_v35 }
 0xa8e   :  { %5211 = vmatmul.mubr.bf16.gmra.mrb[236].mxu1 %v16806_v43  ;;  %12492 = vmatmul.mubr.bf16.gmra.mrb[20].mxu0 %v16970_v56 }
 0xa8f   :  { %12495 = vmatprep.mubr.bf16.mxu0 %v16994_v2  ;;  %5220 = vmatprep.mubr.bf16.mxu1 %v21268_v35 }
 0xa90   :  { %v17113_v27 = vpop.f32.mrb[172].mxu0 }
 0xa91   :  { %v5385_v60 = vpop.f32.mrb[173].mxu0 }
 0xa92   :  { %v17115_v29 = vpop.f32.mrb[174].mxu0 }
 0xa93   :  { %v5388_v44 = vpop.f32.mrb[175].mxu0 }
 0xa96   :  { %5221 = vmatmul.mubr.bf16.gmra.mrb[240].mxu1 %v16830_v15  ;;  %12496 = vmatmul.mubr.bf16.gmra.mrb[24].mxu0 %v17018_v42 }
 0xa97   :  { %12499 = vmatprep.mubr.bf16.mxu0 %v17042_v30  ;;  %5230 = vmatprep.mubr.bf16.mxu1 %v21268_v35 }
 0xa98   :  { %v17121_v43 = vpop.f32.mrb[176].mxu0 }
 0xa99   :  { %v5393_v7 = vpop.f32.mrb[177].mxu0 }
 0xa9a   :  { %v17123_v12 = vpop.f32.mrb[178].mxu0 }
 0xa9b   :  { %v5396_v13 = vpop.f32.mrb[179].mxu0 }
 0xa9e   :  { %5231 = vmatmul.mubr.bf16.gmra.mrb[244].mxu1 %v16854_v26  ;;  %12500 = vmatmul.mubr.bf16.gmra.mrb[28].mxu0 %v17060_v21 }
 0xa9f   :  { %12503 = vmatprep.mubr.bf16.mxu0 %v17063_v47  ;;  %5240 = vmatprep.mubr.bf16.mxu1 %v21268_v35 }
 0xaa0   :  { %v17129_v15 = vpop.f32.mrb[180].mxu0 }
 0xaa1   :  { %v5401_v10 = vpop.f32.mrb[181].mxu0 }
 0xaa2   :  { %v17131_v31 = vpop.f32.mrb[182].mxu0 }
 0xaa3   :  { %v5404_v48 = vpop.f32.mrb[183].mxu0 }
 0xaa6   :  { %5241 = vmatmul.mubr.bf16.gmra.mrb[248].mxu1 %v16878_v4  ;;  %12504 = vmatmul.mubr.bf16.gmra.mrb[32].mxu0 %v4405_v57 }
 0xaa7   :  { %5250 = vmatprep.mubr.bf16.mxu1 %v21268_v35 }
 0xaa8   :  { %v17137_v26 = vpop.f32.mrb[184].mxu0 }
 0xaa9   :  { %v5409_v38 = vpop.f32.mrb[185].mxu0 }
 0xaaa   :  { %v17139_v54 = vpop.f32.mrb[186].mxu0 }
 0xaab   :  { %v5412_v23 = vpop.f32.mrb[187].mxu0 }
 0xaae   :  { %5251 = vmatmul.mubr.bf16.gmra.mrb[252].mxu1 %v16902_v52 }
 0xaaf   :  { %5260 = vmatprep.mubr.bf16.mxu1 %v21268_v35 }
 0xab0   :  { %v17143_v50 = vpop.f32.mrb[188].mxu0 }
 0xab1   :  { %v5417_v0 = vpop.f32.mrb[189].mxu0 }
 0xab2   :  { %v17145_v51 = vpop.f32.mrb[190].mxu0 }
 0xab3   :  { %v5420_v19 = vpop.f32.mrb[191].mxu0 }
 0xab6   :  { %5261 = vmatmul.mubr.bf16.gmra.mrb[0].mxu1 %v16922_v1 }
 0xab7   :  { %5270 = vmatprep.mubr.bf16.mxu1 %v21268_v35 }
 0xab8   :  { %v17149_v4 = vpop.f32.mrb[192].mxu0 }
 0xab9   :  { %v5425_v63 = vpop.f32.mrb[193].mxu0 }
 0xaba   :  { %v17151_v8 = vpop.f32.mrb[194].mxu0 }
 0xabb   :  { %v5428_v3 = vpop.f32.mrb[195].mxu0 }
 0xabe   :  { %5271 = vmatmul.mubr.bf16.gmra.mrb[4].mxu1 %v16946_v24 }
 0xabf   :  { %5280 = vmatprep.mubr.bf16.mxu1 %v21268_v35 }
 0xac0   :  { %v17155_v52 = vpop.f32.mrb[196].mxu0 }
 0xac1   :  { %v5433_v36 = vpop.f32.mrb[197].mxu0 }
 0xac2   :  { %v17157_v20 = vpop.f32.mrb[198].mxu0 }
 0xac3   :  { %v5436_v5 = vpop.f32.mrb[199].mxu0 }
 0xac6   :  { %5281 = vmatmul.mubr.bf16.gmra.mrb[8].mxu1 %v16970_v56 }
 0xac7   :  { %5290 = vmatprep.mubr.bf16.mxu1 %v21268_v35 }
 0xac8   :  { %v17161_v1 = vpop.f32.mrb[200].mxu0 }
 0xac9   :  { %v5441_v17 = vpop.f32.mrb[201].mxu0 }
 0xaca   :  { %v17163_v16 = vpop.f32.mrb[202].mxu0 }
 0xacb   :  { %v5444_v11 = vpop.f32.mrb[203].mxu0 }
 0xace   :  { %5291 = vmatmul.mubr.bf16.gmra.mrb[12].mxu1 %v16994_v2 }
 0xacf   :  { %5300 = vmatprep.mubr.bf16.mxu1 %v21268_v35 }
 0xad0   :  { %v17167_v24 = vpop.f32.mrb[204].mxu0 }
 0xad1   :  { %v5449_v58 = vpop.f32.mrb[205].mxu0 }
 0xad2   :  { %v17169_v37 = vpop.f32.mrb[206].mxu0 }
 0xad3   :  { %v5452_v28 = vpop.f32.mrb[207].mxu0 }
 0xad6   :  { %5301 = vmatmul.mubr.bf16.gmra.mrb[16].mxu1 %v17018_v42 }
 0xad7   :  { %5310 = vmatprep.mubr.bf16.mxu1 %v21268_v35 }
 0xad8   :  { %v17173_v56 = vpop.f32.mrb[208].mxu0 }
 0xad9   :  { %v5457_v34 = vpop.f32.mrb[209].mxu0 }
 0xada   :  { %v17175_v22 = vpop.f32.mrb[210].mxu0 }
 0xadb   :  { %v5460_v62 = vpop.f32.mrb[211].mxu0 }
 0xade   :  { %5311 = vmatmul.mubr.bf16.gmra.mrb[20].mxu1 %v17042_v30 }
 0xadf   :  { %5320 = vmatprep.mubr.bf16.mxu1 %v21268_v35 }
 0xae0   :  { %v17179_v2 = vpop.f32.mrb[212].mxu0 }
 0xae1   :  { %v5465_v33 = vpop.f32.mrb[213].mxu0 }
 0xae2   :  { %v17181_v53 = vpop.f32.mrb[214].mxu0 }
 0xae3   :  { %v5468_v18 = vpop.f32.mrb[215].mxu0 }
 0xae6   :  { %5321 = vmatmul.mubr.bf16.gmra.mrb[24].mxu1 %v17060_v21  ;;  %v21283_v21 = vmov 0.0  }
 0xae7   :  { %5330 = vmatprep.mubr.bf16.mxu1 %v21268_v35 }
 0xae9   :  { %v17185_v42 = vpop.f32.mrb[216].mxu0 }
 0xaea   :  { %v5473_v25 = vpop.f32.mrb[217].mxu0 }
 0xaeb   :  { %v17187_v61 = vpop.f32.mrb[218].mxu0 }
 0xaec   :  { %v5476_v49 = vpop.f32.mrb[219].mxu0 }
 0xaee   :  { %5331 = vmatmul.mubr.bf16.gmra.mrb[28].mxu1 %v17063_v47 }
 0xaef   :  { %5340 = vmatprep.mubr.bf16.mxu1 %v21268_v35 }
 0xaf1   :  { %v17191_v30 = vpop.f32.mrb[220].mxu0 }
 0xaf2   :  { %v5481_v60 = vpop.f32.mrb[221].mxu0 }
 0xaf3   :  { %v17193_v44 = vpop.f32.mrb[222].mxu0 }
 0xaf4   :  { %v5484_v7 = vpop.f32.mrb[223].mxu0 }
 0xaf6   :  { %5341 = vmatmul.mubr.bf16.gmra.mrb[36].mxu1 %v4405_v57 }
 0xaf7   :  { %12539 = vmatprep.mubr.msk.f32.mxu1 %vm13998_vm1, %v21283_v21 }
 0xaf9   :  { %v17197_v13 = vpop.f32.mrb[224].mxu0 }
 0xafa   :  { %v5489_v10 = vpop.f32.mrb[225].mxu0 }
 0xafb   :  { %v17199_v48 = vpop.f32.mrb[226].mxu0 }
 0xafc   :  { %v5492_v39 = vpop.f32.mrb[227].mxu0 }
 0xb01   :  { %v17201_v38 = vpop.f32.mrb[228].mxu0 }
 0xb02   :  { %v5497_v47 = vpop.f32.mrb[229].mxu0 }
 0xb03   :  { %v17203_v23 = vpop.f32.mrb[230].mxu0 }
 0xb04   :  { %v5500_v0 = vpop.f32.mrb[231].mxu0 }
 0xb09   :  { %v17205_v19 = vpop.f32.mrb[232].mxu0 }
 0xb0a   :  { %v5505_v63 = vpop.f32.mrb[233].mxu0 }
 0xb0b   :  { %v17207_v3 = vpop.f32.mrb[234].mxu0 }
 0xb0c   :  { %v5508_v57 = vpop.f32.mrb[235].mxu0 }
 0xb11   :  { %v17209_v36 = vpop.f32.mrb[236].mxu0 }
 0xb12   :  { %v5513_v5 = vpop.f32.mrb[237].mxu0 }
 0xb13   :  { %v17211_v17 = vpop.f32.mrb[238].mxu0 }
 0xb14   :  { %v5516_v11 = vpop.f32.mrb[239].mxu0 }
 0xb19   :  { %v17213_v58 = vpop.f32.mrb[240].mxu0 }
 0xb1a   :  { %v5521_v28 = vpop.f32.mrb[241].mxu0 }
 0xb1b   :  { %v17215_v34 = vpop.f32.mrb[242].mxu0 }
 0xb1c   :  { %v5524_v62 = vpop.f32.mrb[243].mxu0 }
 0xb21   :  { %v17217_v33 = vpop.f32.mrb[244].mxu0 }
 0xb22   :  { %v5529_v18 = vpop.f32.mrb[245].mxu0 }
 0xb23   :  { %v17219_v25 = vpop.f32.mrb[246].mxu0 }
 0xb24   :  { %v5532_v49 = vpop.f32.mrb[247].mxu0 }
 0xb29   :  { %v17221_v60 = vpop.f32.mrb[32].mxu1  ;;  %v17223_v7 = vpop.f32.mrb[248].mxu0 }
 0xb2a   :  { %v17225_v10 = vpop.f32.mrb[33].mxu1  ;;  %v5537_v39 = vpop.f32.mrb[249].mxu0 }
 0xb2b   :  { %v5115_v47 = vpop.f32.mrb[34].mxu1  ;;  %v5538_v0 = vpop.f32.mrb[250].mxu0 }
 0xb2c   :  { %v5116_v63 = vpop.f32.mrb[35].mxu1  ;;  %v5539_v57 = vpop.f32.mrb[251].mxu0 }
 0xb31   :  { %v5152_v5 = vpop.f32.mrb[212].mxu1  ;;  %v12469_v11 = vpop.f32.mrb[252].mxu0 }
 0xb32   :  { %v5584_v28 = vadd.f32 %v12469_v11, %v17121_v43  ;;  %v17228_v62 = vpop.f32.mrb[213].mxu1  ;;  %v5575_v18 = vpop.f32.mrb[253].mxu0 }
 0xb33   :  { %21284 = vst [vmem:[#allocation11_spill] sm:$0xff] %v17228_v62  ;;  %v17231_v49 = vadd.f32 %v5575_v18, %v17113_v27  ;;  %v5156_v35 = vpop.f32.mrb[214].mxu1  ;;  %v12470_v45 = vpop.f32.mrb[254].mxu0  ;;  %v21162_v47 = vrot.slane %v17228_v62, 1 }
 0xb34   :  { %v5587_v32 = vadd.f32 %v12470_v45, %v17123_v12  ;;  %v5158_v40 = vpop.f32.mrb[215].mxu1  ;;  %v5578_v39 = vpop.f32.mrb[255].mxu0  ;;  %v5852_v57 = vrot.slane %v5584_v28, 2  ;;  %v17252_v28 = vld [vmem:[%s21117_s6 + $0x1] ss:$0 sm:$0xff] }
 0xb35   :  { %21285 = vst [vmem:[#allocation12_spill] sm:$0xff] %v17231_v49  ;;  %v5734_v0 = vrot.slane %v5158_v40, 1  ;;  %v5579_v63 = vadd.f32 %v5578_v39, %v17115_v29  ;;  %v21163_v43 = vrot.slane %v17231_v49, 2 }
 0xb36   :  { %v5853_v9 = vrot.slane %v5587_v32, 2 }
 0xb37   :  { %v5809_v27 = vsel %vm1362_vm6, %v21162_v47, %v5734_v0  ;;  %v5851_v11 = vrot.slane %v5579_v63, 2 }
 0xb38   :  { %v5924_v45 = vsel %vm1461_vm7, %v5852_v57, %v5853_v9  ;;  %v5811_v12 = vadd.f32 %v5809_v27, %v5152_v5 }
 0xb39   :  { %v5925_v18 = vsel %vm1461_vm7, %v5851_v11, %v5852_v57  ;;  %v5926_v40 = vsel %vm1461_vm7, %v21163_v43, %v5851_v11  ;;  %v5162_v32 = vpop.f32.mrb[216].mxu1  ;;  %v12473_v29 = vpop.f32.mrb[80].mxu0 }
 0xb3a   :  { %v5928_v39 = vadd.f32 %v5926_v40, %v5811_v12  ;;  %v5600_v63 = vadd.f32 %v12473_v29, %v17137_v26  ;;  %v5164_v47 = vpop.f32.mrb[217].mxu1  ;;  %v5591_v5 = vpop.f32.mrb[81].mxu0 }
 0xb3b   :  { %v5735_v27 = vrot.slane %v5164_v47, 1  ;;  %v5592_v57 = vadd.f32 %v5591_v5, %v17129_v15  ;;  %v5166_v59 = vpop.f32.mrb[218].mxu1  ;;  %v12474_v55 = vpop.f32.mrb[82].mxu0 }
 0xb3c   :  { %v5603_v14 = vadd.f32 %v12474_v55, %v17139_v54  ;;  %v5168_v11 = vpop.f32.mrb[219].mxu1  ;;  %v5594_v43 = vpop.f32.mrb[83].mxu0  ;;  %v5975_v6 = vadd.f32 %v17252_v28, %v5928_v39  ;;  %v5856_v40 = vrot.slane %v5600_v63, 2 }
 0xb3d   :  { %v5808_v41 = vsel %vm1362_vm6, %v5734_v0, %v5735_v27  ;;  %v5854_v49 = vrot.slane %v5592_v57, 2  ;;  %v5736_v12 = vrot.slane %v5168_v11, 1  ;;  %v5595_v26 = vadd.f32 %v5594_v43, %v17131_v31 }
 0xb3e   :  { %v5812_v29 = vadd.f32 %v5808_v41, %v5156_v35  ;;  %v5857_v47 = vrot.slane %v5603_v14, 2  ;;  %v17269_v57 = vmax.f32 %v5975_v6, 0.0 }
 0xb3f   :  { %v5923_v15 = vsel %vm1461_vm7, %v5853_v9, %v5854_v49  ;;  %v5807_v55 = vsel %vm1362_vm6, %v5735_v27, %v5736_v12  ;;  %v5855_v54 = vrot.slane %v5595_v26, 2 }
 0xb40   :  { %v5929_v5 = vadd.f32 %v5925_v18, %v5812_v29  ;;  %v17267_v39 = vsel %vm1461_vm7, %v5856_v40, %v5857_v47  ;;  %v5813_v0 = vadd.f32 %v5807_v55, %v5162_v32 }
 0xb41   :  { %v17273_v31 = vsel %vm1461_vm7, %v5855_v54, %v5856_v40  ;;  %v5922_v35 = vsel %vm1461_vm7, %v5854_v49, %v5855_v54  ;;  %v5172_v41 = vpop.f32.mrb[220].mxu1  ;;  %v12477_v14 = vpop.f32.mrb[4].mxu0  ;;  %v6053_v49 = vmul.f32 %v17269_v57, %v17269_v57 }
 0xb42   :  { %v5930_v9 = vadd.f32 %v5924_v45, %v5813_v0  ;;  %v5616_v43 = vadd.f32 %v12477_v14, %v17149_v4  ;;  %v5174_v18 = vpop.f32.mrb[221].mxu1  ;;  %v5607_v63 = vpop.f32.mrb[5].mxu0  ;;  %v5976_v27 = vadd.f32 %v17252_v28, %v5929_v5 }
 0xb43   :  { %v5737_v11 = vrot.slane %v5174_v18, 1  ;;  %v5608_v6 = vadd.f32 %v5607_v63, %v17143_v50  ;;  %v5176_v32 = vpop.f32.mrb[222].mxu1  ;;  %v12478_v26 = vpop.f32.mrb[6].mxu0 }
 0xb44   :  { %v5619_v40 = vadd.f32 %v12478_v26, %v17151_v8  ;;  %v5178_v29 = vpop.f32.mrb[223].mxu1  ;;  %v5610_v55 = vpop.f32.mrb[7].mxu0  ;;  %v17281_v62 = vmax.f32 %v5976_v27, 0.0  ;;  %v5977_v4 = vadd.f32 %v17252_v28, %v5930_v9  ;;  %v5860_v0 = vrot.slane %v5616_v43, 2 }
 0xb45   :  { %v5806_v45 = vsel %vm1362_vm6, %v5736_v12, %v5737_v11  ;;  %v5858_v54 = vrot.slane %v5608_v6, 2  ;;  %v5738_v5 = vrot.slane %v5178_v29, 1  ;;  %v5611_v50 = vadd.f32 %v5610_v55, %v17145_v51 }
 0xb46   :  { %21286 = vst [vmem:[#allocation10_spill] sm:$0xff] %v17281_v62  ;;  %v5814_v14 = vadd.f32 %v5806_v45, %v5166_v59  ;;  %v5861_v18 = vrot.slane %v5619_v40, 2  ;;  %v6054_v8 = vmul.f32 %v17281_v62, %v17281_v62  ;;  %v17297_v26 = vmax.f32 %v5977_v4, 0.0 }
 0xb47   :  { %v17293_v63 = vsel %vm1461_vm7, %v5857_v47, %v5858_v54  ;;  %v5805_v9 = vsel %vm1362_vm6, %v5737_v11, %v5738_v5  ;;  %v5859_v27 = vrot.slane %v5611_v50, 2  ;;  %v13066_v29 = vpack.c.bf16 %v17281_v62, %v17269_v57 }
 0xb48   :  { %v5931_v12 = vadd.f32 %v5923_v15, %v5814_v14  ;;  %v17301_v51 = vsel %vm1461_vm7, %v5860_v0, %v5861_v18  ;;  %v5815_v59 = vadd.f32 %v5805_v9, %v5172_v41  ;;  %v13064_v43 = vpack.c.bf16 %v6054_v8, %v6053_v49  ;;  %v17316_v15 = vld [vmem:[%s21242_s25 + $0x18] sm:$0x77] }
 0xb49   :  { %v17305_v6 = vsel %vm1461_vm7, %v5859_v27, %v5860_v0  ;;  %v17309_v47 = vsel %vm1461_vm7, %v5858_v54, %v5859_v27  ;;  %v5182_v40 = vpop.f32.mrb[224].mxu1  ;;  %v12481_v11 = vpop.f32.mrb[8].mxu0  ;;  %v6097_v54 = vcombine.high %v17316_v15, %v17316_v15 }
 0xb4a   :  { %v5932_v41 = vadd.f32 %v5922_v35, %v5815_v59  ;;  %v5632_v55 = vadd.f32 %v12481_v11, %v17161_v1  ;;  %v5184_v49 = vpop.f32.mrb[225].mxu1  ;;  %v5623_v4 = vpop.f32.mrb[9].mxu0  ;;  %13065 = vmatprep.subr.bf16.mxu0 %v13064_v43  ;;  %v5978_v45 = vadd.f32 %v17252_v28, %v5931_v12  ;;  %v6055_v1 = vmul.f32 %v17297_v26, %v17297_v26 }
 0xb4b   :  { %v5739_v50 = vrot.slane %v5184_v49, 1  ;;  %v5624_v0 = vadd.f32 %v5623_v4, %v17155_v52  ;;  %v5186_v14 = vpop.f32.mrb[226].mxu1  ;;  %v12482_v8 = vpop.f32.mrb[10].mxu0  ;;  %13067 = vmatpush1.bf16.msra.mxu0 %v13066_v29  ;;  %6165 = vmatprep.mubr.f32.mxu0 %v6097_v54 }
 0xb4c   :  { %v5635_v9 = vadd.f32 %v12482_v8, %v17163_v16  ;;  %v5188_v27 = vpop.f32.mrb[227].mxu1  ;;  %v5626_v35 = vpop.f32.mrb[11].mxu0  ;;  %v17324_v59 = vmax.f32 %v5978_v45, 0.0  ;;  %v5979_v12 = vadd.f32 %v17252_v28, %v5932_v41  ;;  %v5864_v29 = vrot.slane %v5632_v55, 2 }
 0xb4d   :  { %v5804_v43 = vsel %vm1362_vm6, %v5738_v5, %v5739_v50  ;;  %v5862_v11 = vrot.slane %v5624_v0, 2  ;;  %v5740_v52 = vrot.slane %v5188_v27, 1  ;;  %v5627_v49 = vadd.f32 %v5626_v35, %v17157_v20 }
 0xb4e   :  { %v5816_v4 = vadd.f32 %v5804_v43, %v5176_v32  ;;  %v5865_v16 = vrot.slane %v5635_v9, 2  ;;  %v6056_v45 = vmul.f32 %v17324_v59, %v17324_v59  ;;  %v17340_v62 = vmax.f32 %v5979_v12, 0.0 }
 0xb4f   :  { %v17336_v8 = vsel %vm1461_vm7, %v5861_v18, %v5862_v11  ;;  %v5803_v41 = vsel %vm1362_vm6, %v5739_v50, %v5740_v52  ;;  %v5863_v54 = vrot.slane %v5627_v49, 2  ;;  %v13070_v27 = vpack.c.bf16 %v17324_v59, %v17297_v26 }
 0xb50   :  { %v5933_v5 = vadd.f32 %v17273_v31, %v5816_v4  ;;  %v17345_v20 = vsel %vm1461_vm7, %v5864_v29, %v5865_v16  ;;  %v5817_v32 = vadd.f32 %v5803_v41, %v5182_v40  ;;  %v13068_v55 = vpack.c.bf16 %v6056_v45, %v6055_v1 }
 0xb51   :  { %v17349_v0 = vsel %vm1461_vm7, %v5863_v54, %v5864_v29  ;;  %v17353_v18 = vsel %vm1461_vm7, %v5862_v11, %v5863_v54  ;;  %v5192_v50 = vpop.f32.mrb[228].mxu1  ;;  %v12485_v9 = vpop.f32.mrb[12].mxu0 }
 0xb52   :  { %v5934_v31 = vadd.f32 %v17267_v39, %v5817_v32  ;;  %v5648_v35 = vadd.f32 %v12485_v9, %v17173_v56  ;;  %v5194_v12 = vpop.f32.mrb[229].mxu1  ;;  %v5639_v40 = vpop.f32.mrb[13].mxu0  ;;  %13069 = vmatprep.subr.bf16.mxu0 %v13068_v55  ;;  %v5980_v1 = vadd.f32 %v17252_v28, %v5933_v5  ;;  %v6057_v56 = vmul.f32 %v17340_v62, %v17340_v62 }
 0xb53   :  { %v5741_v43 = vrot.slane %v5194_v12, 1  ;;  %v5640_v49 = vadd.f32 %v5639_v40, %v17167_v24  ;;  %v5196_v29 = vpop.f32.mrb[230].mxu1  ;;  %v12486_v11 = vpop.f32.mrb[14].mxu0  ;;  %13071 = vmatpush1.bf16.msra.mxu0 %v13070_v27 }
 0xb54   :  { %v5651_v4 = vadd.f32 %v12486_v11, %v17175_v22  ;;  %v5198_v45 = vpop.f32.mrb[231].mxu1  ;;  %v5642_v41 = vpop.f32.mrb[15].mxu0  ;;  %v17362_v54 = vmax.f32 %v5980_v1, 0.0  ;;  %v5981_v39 = vadd.f32 %v17252_v28, %v5934_v31  ;;  %v5868_v9 = vrot.slane %v5648_v35, 2 }
 0xb55   :  { %v5802_v5 = vsel %vm1362_vm6, %v5740_v52, %v5741_v43  ;;  %v5866_v32 = vrot.slane %v5640_v49, 2  ;;  %v5742_v55 = vrot.slane %v5198_v45, 1  ;;  %v5643_v24 = vadd.f32 %v5642_v41, %v17169_v37 }
 0xb56   :  { %v5818_v27 = vadd.f32 %v5802_v5, %v5186_v14  ;;  %v5869_v12 = vrot.slane %v5651_v4, 2  ;;  %v6058_v22 = vmul.f32 %v17362_v54, %v17362_v54  ;;  %v17378_v11 = vmax.f32 %v5981_v39, 0.0 }
 0xb57   :  { %v17374_v40 = vsel %vm1461_vm7, %v5865_v16, %v5866_v32  ;;  %v5801_v31 = vsel %vm1362_vm6, %v5741_v43, %v5742_v55  ;;  %v5867_v1 = vrot.slane %v5643_v24, 2  ;;  %v13074_v45 = vpack.c.bf16 %v17362_v54, %v17340_v62 }
 0xb58   :  { %v5935_v52 = vadd.f32 %v17293_v63, %v5818_v27  ;;  %v17383_v37 = vsel %vm1461_vm7, %v5868_v9, %v5869_v12  ;;  %v5819_v14 = vadd.f32 %v5801_v31, %v5192_v50  ;;  %v13072_v35 = vpack.c.bf16 %v6058_v22, %v6057_v56 }
 0xb59   :  { %v17387_v49 = vsel %vm1461_vm7, %v5867_v1, %v5868_v9  ;;  %v17391_v16 = vsel %vm1461_vm7, %v5866_v32, %v5867_v1  ;;  %v5202_v43 = vpop.f32.mrb[232].mxu1  ;;  %v12489_v4 = vpop.f32.mrb[16].mxu0 }
 0xb5a   :  { %v5936_v63 = vadd.f32 %v17309_v47, %v5819_v14  ;;  %v5664_v41 = vadd.f32 %v12489_v4, %v17185_v42  ;;  %v5204_v39 = vpop.f32.mrb[233].mxu1  ;;  %v5655_v50 = vpop.f32.mrb[17].mxu0  ;;  %13073 = vmatprep.subr.bf16.mxu0 %v13072_v35  ;;  %v5982_v56 = vadd.f32 %v17252_v28, %v5935_v52  ;;  %v6059_v42 = vmul.f32 %v17378_v11, %v17378_v11 }
 0xb5b   :  { %v5743_v5 = vrot.slane %v5204_v39, 1  ;;  %v5656_v24 = vadd.f32 %v5655_v50, %v17179_v2  ;;  %v5206_v9 = vpop.f32.mrb[234].mxu1  ;;  %v12490_v32 = vpop.f32.mrb[18].mxu0  ;;  %13075 = vmatpush1.bf16.msra.mxu0 %v13074_v45 }
 0xb5c   :  { %v5667_v27 = vadd.f32 %v12490_v32, %v17187_v61  ;;  %v5208_v22 = vpop.f32.mrb[235].mxu1  ;;  %v5658_v31 = vpop.f32.mrb[19].mxu0  ;;  %v17400_v1 = vmax.f32 %v5982_v56, 0.0  ;;  %v5983_v47 = vadd.f32 %v17252_v28, %v5936_v63  ;;  %v5872_v4 = vrot.slane %v5664_v41, 2 }
 0xb5d   :  { %v5800_v52 = vsel %vm1362_vm6, %v5742_v55, %v5743_v5  ;;  %v5870_v14 = vrot.slane %v5656_v24, 2  ;;  %v5744_v35 = vrot.slane %v5208_v22, 1  ;;  %v5659_v2 = vadd.f32 %v5658_v31, %v17181_v53 }
 0xb5e   :  { %v5820_v45 = vadd.f32 %v5800_v52, %v5196_v29  ;;  %v5873_v39 = vrot.slane %v5667_v27, 2  ;;  %v6060_v61 = vmul.f32 %v17400_v1, %v17400_v1  ;;  %v17416_v32 = vmax.f32 %v5983_v47, 0.0 }
 0xb5f   :  { %v17412_v50 = vsel %vm1461_vm7, %v5869_v12, %v5870_v14  ;;  %v5799_v63 = vsel %vm1362_vm6, %v5743_v5, %v5744_v35  ;;  %v5871_v56 = vrot.slane %v5659_v2, 2  ;;  %v13078_v22 = vpack.c.bf16 %v17400_v1, %v17378_v11 }
 0xb60   :  { %v5937_v55 = vadd.f32 %v17305_v6, %v5820_v45  ;;  %v17421_v53 = vsel %vm1461_vm7, %v5872_v4, %v5873_v39  ;;  %v5821_v29 = vadd.f32 %v5799_v63, %v5202_v43  ;;  %v13076_v41 = vpack.c.bf16 %v6060_v61, %v6059_v42 }
 0xb61   :  { %v17425_v24 = vsel %vm1461_vm7, %v5871_v56, %v5872_v4  ;;  %v17429_v12 = vsel %vm1461_vm7, %v5870_v14, %v5871_v56  ;;  %v5212_v5 = vpop.f32.mrb[236].mxu1  ;;  %v12493_v27 = vpop.f32.mrb[20].mxu0 }
 0xb62   :  { %v5938_v6 = vadd.f32 %v17301_v51, %v5821_v29  ;;  %v5680_v31 = vadd.f32 %v12493_v27, %v17197_v13  ;;  %v5214_v47 = vpop.f32.mrb[237].mxu1  ;;  %v5671_v43 = vpop.f32.mrb[21].mxu0  ;;  %13077 = vmatprep.subr.bf16.mxu0 %v13076_v41  ;;  %v5984_v42 = vadd.f32 %v17252_v28, %v5937_v55  ;;  %v6061_v13 = vmul.f32 %v17416_v32, %v17416_v32 }
 0xb63   :  { %v5745_v52 = vrot.slane %v5214_v47, 1  ;;  %v5672_v2 = vadd.f32 %v5671_v43, %v17191_v30  ;;  %v5216_v4 = vpop.f32.mrb[238].mxu1  ;;  %v12494_v14 = vpop.f32.mrb[22].mxu0  ;;  %13079 = vmatpush1.bf16.msra.mxu0 %v13078_v22 }
 0xb64   :  { %v5683_v45 = vadd.f32 %v12494_v14, %v17199_v48  ;;  %v5218_v61 = vpop.f32.mrb[239].mxu1  ;;  %v5674_v63 = vpop.f32.mrb[23].mxu0  ;;  %v17438_v56 = vmax.f32 %v5984_v42, 0.0  ;;  %v5985_v51 = vadd.f32 %v17252_v28, %v5938_v6  ;;  %v5876_v27 = vrot.slane %v5680_v31, 2 }
 0xb65   :  { %v5798_v55 = vsel %vm1362_vm6, %v5744_v35, %v5745_v52  ;;  %v5874_v29 = vrot.slane %v5672_v2, 2  ;;  %v5746_v41 = vrot.slane %v5218_v61, 1  ;;  %v5675_v30 = vadd.f32 %v5674_v63, %v17193_v44 }
 0xb66   :  { %v5822_v22 = vadd.f32 %v5798_v55, %v5206_v9  ;;  %v5877_v47 = vrot.slane %v5683_v45, 2  ;;  %v6062_v48 = vmul.f32 %v17438_v56, %v17438_v56  ;;  %v17454_v14 = vmax.f32 %v5985_v51, 0.0 }
 0xb67   :  { %v17450_v43 = vsel %vm1461_vm7, %v5873_v39, %v5874_v29  ;;  %v5797_v6 = vsel %vm1362_vm6, %v5745_v52, %v5746_v41  ;;  %v5875_v42 = vrot.slane %v5675_v30, 2  ;;  %v13082_v61 = vpack.c.bf16 %v17438_v56, %v17416_v32 }
 0xb68   :  { %v5939_v35 = vadd.f32 %v17336_v8, %v5822_v22  ;;  %v17459_v44 = vsel %vm1461_vm7, %v5876_v27, %v5877_v47  ;;  %v5823_v9 = vadd.f32 %v5797_v6, %v5212_v5  ;;  %v13080_v31 = vpack.c.bf16 %v6062_v48, %v6061_v13 }
 0xb69   :  { %v17463_v2 = vsel %vm1461_vm7, %v5875_v42, %v5876_v27  ;;  %v17467_v39 = vsel %vm1461_vm7, %v5874_v29, %v5875_v42  ;;  %v5222_v52 = vpop.f32.mrb[240].mxu1  ;;  %v12497_v45 = vpop.f32.mrb[24].mxu0 }
 0xb6a   :  { %v5940_v8 = vadd.f32 %v17353_v18, %v5823_v9  ;;  %v5696_v63 = vadd.f32 %v12497_v45, %v17205_v19  ;;  %v5224_v51 = vpop.f32.mrb[241].mxu1  ;;  %v5687_v5 = vpop.f32.mrb[25].mxu0  ;;  %13081 = vmatprep.subr.bf16.mxu0 %v13080_v31  ;;  %v5986_v13 = vadd.f32 %v17252_v28, %v5939_v35  ;;  %v6063_v19 = vmul.f32 %v17454_v14, %v17454_v14 }
 0xb6b   :  { %v5747_v55 = vrot.slane %v5224_v51, 1  ;;  %v5688_v30 = vadd.f32 %v5687_v5, %v17201_v38  ;;  %v5226_v27 = vpop.f32.mrb[242].mxu1  ;;  %v12498_v29 = vpop.f32.mrb[26].mxu0  ;;  %13083 = vmatpush1.bf16.msra.mxu0 %v13082_v61 }
 0xb6c   :  { %v5699_v22 = vadd.f32 %v12498_v29, %v17207_v3  ;;  %v5228_v48 = vpop.f32.mrb[243].mxu1  ;;  %v5690_v6 = vpop.f32.mrb[27].mxu0  ;;  %v17476_v42 = vmax.f32 %v5986_v13, 0.0  ;;  %v5987_v18 = vadd.f32 %v17252_v28, %v5940_v8  ;;  %v5880_v45 = vrot.slane %v5696_v63, 2 }
 0xb6d   :  { %v5796_v35 = vsel %vm1362_vm6, %v5746_v41, %v5747_v55  ;;  %v5878_v9 = vrot.slane %v5688_v30, 2  ;;  %v5748_v31 = vrot.slane %v5228_v48, 1  ;;  %v5691_v38 = vadd.f32 %v5690_v6, %v17203_v23 }
 0xb6e   :  { %21287 = vst [vmem:[#allocation13_spill] sm:$0xff] %v17476_v42  ;;  %v5824_v61 = vadd.f32 %v5796_v35, %v5216_v4  ;;  %v5881_v51 = vrot.slane %v5699_v22, 2  ;;  %v6064_v3 = vmul.f32 %v17476_v42, %v17476_v42  ;;  %v17492_v29 = vmax.f32 %v5987_v18, 0.0 }
 0xb6f   :  { %v17488_v5 = vsel %vm1461_vm7, %v5877_v47, %v5878_v9  ;;  %v5795_v8 = vsel %vm1362_vm6, %v5747_v55, %v5748_v31  ;;  %v5879_v13 = vrot.slane %v5691_v38, 2  ;;  %v13086_v48 = vpack.c.bf16 %v17476_v42, %v17454_v14 }
 0xb70   :  { %v5941_v41 = vadd.f32 %v17349_v0, %v5824_v61  ;;  %v17497_v23 = vsel %vm1461_vm7, %v5880_v45, %v5881_v51  ;;  %v5825_v4 = vadd.f32 %v5795_v8, %v5222_v52  ;;  %v13084_v63 = vpack.c.bf16 %v6064_v3, %v6063_v19 }
 0xb71   :  { %v17501_v30 = vsel %vm1461_vm7, %v5879_v13, %v5880_v45  ;;  %v17505_v47 = vsel %vm1461_vm7, %v5878_v9, %v5879_v13  ;;  %v5232_v55 = vpop.f32.mrb[244].mxu1  ;;  %v12501_v22 = vpop.f32.mrb[28].mxu0 }
 0xb72   :  { %v5942_v0 = vadd.f32 %v17345_v20, %v5825_v4  ;;  %v5712_v6 = vadd.f32 %v12501_v22, %v17213_v58  ;;  %v5234_v18 = vpop.f32.mrb[245].mxu1  ;;  %v5703_v52 = vpop.f32.mrb[29].mxu0  ;;  %13085 = vmatprep.subr.bf16.mxu0 %v13084_v63  ;;  %v5988_v19 = vadd.f32 %v17252_v28, %v5941_v41  ;;  %v6065_v58 = vmul.f32 %v17492_v29, %v17492_v29 }
 0xb73   :  { %v5749_v35 = vrot.slane %v5234_v18, 1  ;;  %v5704_v38 = vadd.f32 %v5703_v52, %v17209_v36  ;;  %v5236_v45 = vpop.f32.mrb[246].mxu1  ;;  %v12502_v9 = vpop.f32.mrb[30].mxu0  ;;  %13087 = vmatpush1.bf16.msra.mxu0 %v13086_v48 }
 0xb74   :  { %v5884_v61 = vrot.slane %v5712_v6, 2  ;;  %v5715_v3 = vadd.f32 %v12502_v9, %v17215_v34  ;;  %v5238_v8 = vpop.f32.mrb[247].mxu1  ;;  %v5706_v13 = vpop.f32.mrb[31].mxu0  ;;  %v17514_v42 = vmax.f32 %v5988_v19, 0.0  ;;  %v5989_v34 = vadd.f32 %v17252_v28, %v5942_v0 }
 0xb75   :  { %v5794_v20 = vsel %vm1362_vm6, %v5748_v31, %v5749_v35  ;;  %v5882_v41 = vrot.slane %v5704_v38, 2  ;;  %v5750_v4 = vrot.slane %v5238_v8, 1  ;;  %v5707_v36 = vadd.f32 %v5706_v13, %v17211_v17 }
 0xb76   :  { %v5826_v63 = vadd.f32 %v5794_v20, %v5226_v27  ;;  %v5885_v22 = vrot.slane %v5715_v3, 2  ;;  %v6066_v48 = vmul.f32 %v17514_v42, %v17514_v42  ;;  %v17550_v13 = vmax.f32 %v5989_v34, 0.0 }
 0xb77   :  { %v17526_v6 = vsel %vm1461_vm7, %v5881_v51, %v5882_v41  ;;  %v5793_v18 = vsel %vm1362_vm6, %v5749_v35, %v5750_v4  ;;  %v5883_v52 = vrot.slane %v5707_v36, 2  ;;  %v13090_v35 = vpack.c.bf16 %v17514_v42, %v17492_v29 }
 0xb78   :  { %v5943_v31 = vadd.f32 %v17374_v40, %v5826_v63  ;;  %v17533_v17 = vsel %vm1461_vm7, %v5884_v61, %v5885_v22  ;;  %v5827_v27 = vadd.f32 %v5793_v18, %v5232_v55  ;;  %v13088_v19 = vpack.c.bf16 %v6066_v48, %v6065_v58 }
 0xb79   :  { %v17537_v38 = vsel %vm1461_vm7, %v5883_v52, %v5884_v61  ;;  %v17541_v51 = vsel %vm1461_vm7, %v5882_v41, %v5883_v52  ;;  %v5242_v0 = vpop.f32.mrb[248].mxu1  ;;  %v12505_v9 = vpop.f32.mrb[32].mxu0  ;;  %v6067_v34 = vmul.f32 %v17550_v13, %v17550_v13 }
 0xb7a   :  { %v5944_v40 = vadd.f32 %v17391_v16, %v5827_v27  ;;  %v17547_v3 = vadd.f32 %v12505_v9, %v17223_v7  ;;  %v5244_v55 = vpop.f32.mrb[249].mxu1  ;;  %v5719_v8 = vpop.f32.mrb[33].mxu0  ;;  %13089 = vmatprep.subr.bf16.mxu0 %v13088_v19  ;;  %v5990_v61 = vadd.f32 %v17252_v28, %v5943_v31 }
 0xb7b   :  { %v5751_v58 = vrot.slane %v5244_v55, 1  ;;  %v5720_v20 = vadd.f32 %v5719_v8, %v17217_v33  ;;  %v5246_v41 = vpop.f32.mrb[250].mxu1  ;;  %v12506_v36 = vpop.f32.mrb[34].mxu0  ;;  %13091 = vmatpush1.bf16.msra.mxu0 %v13090_v35 }
 0xb7c   :  { %v5248_v63 = vpop.f32.mrb[251].mxu1  ;;  %v5722_v48 = vpop.f32.mrb[35].mxu0  ;;  %v17553_v18 = vmax.f32 %v5990_v61, 0.0  ;;  %v5991_v19 = vadd.f32 %v17252_v28, %v5944_v40  ;;  %v5888_v9 = vrot.slane %v17547_v3, 2 }
 0xb7d   :  { %v5792_v7 = vsel %vm1362_vm6, %v5750_v4, %v5751_v58  ;;  %v5886_v16 = vrot.slane %v5720_v20, 2  ;;  %v5752_v52 = vrot.slane %v5248_v63, 1  ;;  %v5723_v27 = vadd.f32 %v5722_v48, %v17219_v25 }
 0xb7e   :  { %v5828_v31 = vadd.f32 %v5792_v7, %v5236_v45  ;;  %v6068_v33 = vmul.f32 %v17553_v18, %v17553_v18  ;;  %v13094_v20 = vpack.c.bf16 %v17553_v18, %v17550_v13 }
 0xb7f   :  { %v17566_v35 = vsel %vm1461_vm7, %v5885_v22, %v5886_v16  ;;  %v5791_v4 = vsel %vm1362_vm6, %v5751_v58, %v5752_v52  ;;  %v5887_v55 = vrot.slane %v5723_v27, 2 }
 0xb80   :  { %v5945_v25 = vadd.f32 %v17387_v49, %v5828_v31  ;;  %v5829_v45 = vadd.f32 %v5791_v4, %v5242_v0  ;;  %v13092_v8 = vpack.c.bf16 %v6068_v33, %v6067_v34  ;;  %v17585_v0 = vmax.f32 %v5991_v19, 0.0 }
 0xb81   :  { %v17575_v61 = vsel %vm1461_vm7, %v5887_v55, %v5888_v9  ;;  %v17579_v40 = vsel %vm1461_vm7, %v5886_v16, %v5887_v55  ;;  %v5252_v22 = vpop.f32.mrb[252].mxu1 }
 0xb82   :  { %v5946_v58 = vadd.f32 %v17383_v37, %v5829_v45  ;;  %v5254_v36 = vpop.f32.mrb[253].mxu1  ;;  %13093 = vmatprep.subr.bf16.mxu0 %v13092_v8  ;;  %v5992_v49 = vadd.f32 %v17252_v28, %v5945_v25  ;;  %v6069_v37 = vmul.f32 %v17585_v0, %v17585_v0 }
 0xb83   :  { %v5753_v63 = vrot.slane %v5254_v36, 1  ;;  %v5256_v48 = vpop.f32.mrb[254].mxu1  ;;  %13095 = vmatpush1.bf16.msra.mxu0 %v13094_v20 }
 0xb84   :  { %v5258_v7 = vpop.f32.mrb[255].mxu1  ;;  %v17587_v27 = vmax.f32 %v5992_v49, 0.0  ;;  %v5993_v19 = vadd.f32 %v17252_v28, %v5946_v58 }
 0xb85   :  { %v5790_v16 = vsel %vm1362_vm6, %v5752_v52, %v5753_v63  ;;  %v5754_v31 = vrot.slane %v5258_v7, 1 }
 0xb86   :  { %v5830_v34 = vadd.f32 %v5790_v16, %v5246_v41  ;;  %v6070_v33 = vmul.f32 %v17587_v27, %v17587_v27  ;;  %v13098_v52 = vpack.c.bf16 %v17587_v27, %v17585_v0  ;;  %v17603_v49 = vmax.f32 %v5993_v19, 0.0 }
 0xb87   :  { %v5789_v4 = vsel %vm1362_vm6, %v5753_v63, %v5754_v31 }
 0xb88   :  { %v5947_v55 = vadd.f32 %v17412_v50, %v5830_v34  ;;  %v5831_v25 = vadd.f32 %v5789_v4, %v5252_v22  ;;  %v13096_v45 = vpack.c.bf16 %v6070_v33, %v6069_v37 }
 0xb89   :  { %v5262_v8 = vpop.f32.mrb[0].mxu1 }
 0xb8a   :  { %v5994_v41 = vadd.f32 %v17252_v28, %v5947_v55  ;;  %v5948_v20 = vadd.f32 %v17429_v12, %v5831_v25  ;;  %v5264_v36 = vpop.f32.mrb[1].mxu1  ;;  %13097 = vmatprep.subr.bf16.mxu0 %v13096_v45  ;;  %v6071_v12 = vmul.f32 %v17603_v49, %v17603_v49 }
 0xb8b   :  { %v5755_v58 = vrot.slane %v5264_v36, 1  ;;  %v5266_v7 = vpop.f32.mrb[2].mxu1  ;;  %13099 = vmatpush1.bf16.msra.mxu0 %v13098_v52 }
 0xb8c   :  { %v5268_v63 = vpop.f32.mrb[3].mxu1  ;;  %v17605_v16 = vmax.f32 %v5994_v41, 0.0  ;;  %v5995_v34 = vadd.f32 %v17252_v28, %v5948_v20 }
 0xb8d   :  { %v5788_v50 = vsel %vm1362_vm6, %v5754_v31, %v5755_v58  ;;  %v5756_v22 = vrot.slane %v5268_v63, 1 }
 0xb8e   :  { %v5832_v37 = vadd.f32 %v5788_v50, %v5256_v48  ;;  %v6072_v33 = vmul.f32 %v17605_v16, %v17605_v16  ;;  %v13102_v31 = vpack.c.bf16 %v17605_v16, %v17603_v49  ;;  %v17621_v20 = vmax.f32 %v5995_v34, 0.0 }
 0xb8f   :  { %v5787_v19 = vsel %vm1362_vm6, %v5755_v58, %v5756_v22 }
 0xb90   :  { %v5949_v4 = vadd.f32 %v17425_v24, %v5832_v37  ;;  %v5833_v55 = vadd.f32 %v5787_v19, %v5262_v8  ;;  %v13100_v25 = vpack.c.bf16 %v6072_v33, %v6071_v12 }
 0xb91   :  { %v5272_v45 = vpop.f32.mrb[4].mxu1 }
 0xb92   :  { %v5996_v52 = vadd.f32 %v17252_v28, %v5949_v4  ;;  %v5950_v48 = vadd.f32 %v17421_v53, %v5833_v55  ;;  %v5274_v41 = vpop.f32.mrb[5].mxu1  ;;  %13101 = vmatprep.subr.bf16.mxu0 %v13100_v25  ;;  %v6073_v53 = vmul.f32 %v17621_v20, %v17621_v20 }
 0xb93   :  { %v5757_v36 = vrot.slane %v5274_v41, 1  ;;  %v5276_v63 = vpop.f32.mrb[6].mxu1  ;;  %13103 = vmatpush1.bf16.msra.mxu0 %v13102_v31 }
 0xb94   :  { %v5278_v58 = vpop.f32.mrb[7].mxu1  ;;  %v17623_v50 = vmax.f32 %v5996_v52, 0.0  ;;  %v5997_v37 = vadd.f32 %v17252_v28, %v5950_v48 }
 0xb95   :  { %v5786_v24 = vsel %vm1362_vm6, %v5756_v22, %v5757_v36  ;;  %v5758_v8 = vrot.slane %v5278_v58, 1 }
 0xb96   :  { %v5834_v12 = vadd.f32 %v5786_v24, %v5266_v7  ;;  %v6074_v34 = vmul.f32 %v17623_v50, %v17623_v50  ;;  %v13106_v22 = vpack.c.bf16 %v17623_v50, %v17621_v20  ;;  %v17639_v48 = vmax.f32 %v5997_v37, 0.0 }
 0xb97   :  { %v5785_v33 = vsel %vm1362_vm6, %v5757_v36, %v5758_v8 }
 0xb98   :  { %v5951_v19 = vadd.f32 %v17450_v43, %v5834_v12  ;;  %v5835_v4 = vadd.f32 %v5785_v33, %v5272_v45  ;;  %v13104_v55 = vpack.c.bf16 %v6074_v34, %v6073_v53 }
 0xb99   :  { %v5282_v25 = vpop.f32.mrb[8].mxu1 }
 0xb9a   :  { %v5998_v31 = vadd.f32 %v17252_v28, %v5951_v19  ;;  %v5952_v7 = vadd.f32 %v17467_v39, %v5835_v4  ;;  %v5284_v52 = vpop.f32.mrb[9].mxu1  ;;  %13105 = vmatprep.subr.bf16.mxu0 %v13104_v55  ;;  %v6075_v39 = vmul.f32 %v17639_v48, %v17639_v48 }
 0xb9b   :  { %v5759_v41 = vrot.slane %v5284_v52, 1  ;;  %v5286_v58 = vpop.f32.mrb[10].mxu1  ;;  %13107 = vmatpush1.bf16.msra.mxu0 %v13106_v22 }
 0xb9c   :  { %v5288_v36 = vpop.f32.mrb[11].mxu1  ;;  %v17641_v24 = vmax.f32 %v5998_v31, 0.0  ;;  %v5999_v12 = vadd.f32 %v17252_v28, %v5952_v7 }
 0xb9d   :  { %v5784_v43 = vsel %vm1362_vm6, %v5758_v8, %v5759_v41  ;;  %v5760_v45 = vrot.slane %v5288_v36, 1 }
 0xb9e   :  { %v5836_v53 = vadd.f32 %v5784_v43, %v5276_v63  ;;  %v6076_v37 = vmul.f32 %v17641_v24, %v17641_v24  ;;  %v13110_v8 = vpack.c.bf16 %v17641_v24, %v17639_v48  ;;  %v17657_v7 = vmax.f32 %v5999_v12, 0.0 }
 0xb9f   :  { %v5783_v34 = vsel %vm1362_vm6, %v5759_v41, %v5760_v45 }
 0xba0   :  { %v5953_v33 = vadd.f32 %v17463_v2, %v5836_v53  ;;  %v5837_v19 = vadd.f32 %v5783_v34, %v5282_v25  ;;  %v13108_v4 = vpack.c.bf16 %v6076_v37, %v6075_v39 }
 0xba1   :  { %v5292_v55 = vpop.f32.mrb[12].mxu1 }
 0xba2   :  { %v6000_v22 = vadd.f32 %v17252_v28, %v5953_v33  ;;  %v5954_v63 = vadd.f32 %v17459_v44, %v5837_v19  ;;  %v5294_v31 = vpop.f32.mrb[13].mxu1  ;;  %13109 = vmatprep.subr.bf16.mxu0 %v13108_v4  ;;  %v6077_v44 = vmul.f32 %v17657_v7, %v17657_v7 }
 0xba3   :  { %v5761_v52 = vrot.slane %v5294_v31, 1  ;;  %v5296_v36 = vpop.f32.mrb[14].mxu1  ;;  %13111 = vmatpush1.bf16.msra.mxu0 %v13110_v8 }
 0xba4   :  { %v5298_v41 = vpop.f32.mrb[15].mxu1  ;;  %v17659_v43 = vmax.f32 %v6000_v22, 0.0  ;;  %v6001_v53 = vadd.f32 %v17252_v28, %v5954_v63 }
 0xba5   :  { %v5782_v2 = vsel %vm1362_vm6, %v5760_v45, %v5761_v52  ;;  %v5762_v25 = vrot.slane %v5298_v41, 1 }
 0xba6   :  { %v5838_v39 = vadd.f32 %v5782_v2, %v5286_v58  ;;  %v6078_v12 = vmul.f32 %v17659_v43, %v17659_v43  ;;  %v13114_v45 = vpack.c.bf16 %v17659_v43, %v17657_v7  ;;  %v17675_v63 = vmax.f32 %v6001_v53, 0.0 }
 0xba7   :  { %v5781_v37 = vsel %vm1362_vm6, %v5761_v52, %v5762_v25 }
 0xba8   :  { %v5955_v34 = vadd.f32 %v17488_v5, %v5838_v39  ;;  %v5839_v33 = vadd.f32 %v5781_v37, %v5292_v55  ;;  %v13112_v19 = vpack.c.bf16 %v6078_v12, %v6077_v44 }
 0xba9   :  { %v5302_v4 = vpop.f32.mrb[16].mxu1 }
 0xbaa   :  { %v6002_v8 = vadd.f32 %v17252_v28, %v5955_v34  ;;  %v5956_v58 = vadd.f32 %v17505_v47, %v5839_v33  ;;  %v5304_v22 = vpop.f32.mrb[17].mxu1  ;;  %13113 = vmatprep.subr.bf16.mxu0 %v13112_v19  ;;  %v6079_v47 = vmul.f32 %v17675_v63, %v17675_v63 }
 0xbab   :  { %v5763_v31 = vrot.slane %v5304_v22, 1  ;;  %v5306_v41 = vpop.f32.mrb[18].mxu1  ;;  %13115 = vmatpush1.bf16.msra.mxu0 %v13114_v45 }
 0xbac   :  { %v5308_v52 = vpop.f32.mrb[19].mxu1  ;;  %v17677_v2 = vmax.f32 %v6002_v8, 0.0  ;;  %v6003_v39 = vadd.f32 %v17252_v28, %v5956_v58 }
 0xbad   :  { %v5780_v5 = vsel %vm1362_vm6, %v5762_v25, %v5763_v31  ;;  %v5764_v55 = vrot.slane %v5308_v52, 1 }
 0xbae   :  { %v5840_v44 = vadd.f32 %v5780_v5, %v5296_v36  ;;  %v6080_v53 = vmul.f32 %v17677_v2, %v17677_v2  ;;  %v13118_v25 = vpack.c.bf16 %v17677_v2, %v17675_v63  ;;  %v17693_v58 = vmax.f32 %v6003_v39, 0.0 }
 0xbaf   :  { %v5779_v12 = vsel %vm1362_vm6, %v5763_v31, %v5764_v55 }
 0xbb0   :  { %v5957_v37 = vadd.f32 %v17501_v30, %v5840_v44  ;;  %v5841_v34 = vadd.f32 %v5779_v12, %v5302_v4  ;;  %v13116_v33 = vpack.c.bf16 %v6080_v53, %v6079_v47 }
 0xbb1   :  { %v5312_v19 = vpop.f32.mrb[20].mxu1 }
 0xbb2   :  { %v6004_v45 = vadd.f32 %v17252_v28, %v5957_v37  ;;  %v5958_v36 = vadd.f32 %v17497_v23, %v5841_v34  ;;  %v5314_v8 = vpop.f32.mrb[21].mxu1  ;;  %13117 = vmatprep.subr.bf16.mxu0 %v13116_v33  ;;  %v6081_v23 = vmul.f32 %v17693_v58, %v17693_v58 }
 0xbb3   :  { %v5765_v22 = vrot.slane %v5314_v8, 1  ;;  %v5316_v52 = vpop.f32.mrb[22].mxu1  ;;  %13119 = vmatpush1.bf16.msra.mxu0 %v13118_v25 }
 0xbb4   :  { %v5318_v31 = vpop.f32.mrb[23].mxu1  ;;  %v17695_v5 = vmax.f32 %v6004_v45, 0.0  ;;  %v6005_v44 = vadd.f32 %v17252_v28, %v5958_v36 }
 0xbb5   :  { %v5778_v30 = vsel %vm1362_vm6, %v5764_v55, %v5765_v22  ;;  %v5766_v4 = vrot.slane %v5318_v31, 1 }
 0xbb6   :  { %v5842_v47 = vadd.f32 %v5778_v30, %v5306_v41  ;;  %v6082_v39 = vmul.f32 %v17695_v5, %v17695_v5  ;;  %v13122_v55 = vpack.c.bf16 %v17695_v5, %v17693_v58  ;;  %v17711_v36 = vmax.f32 %v6005_v44, 0.0 }
 0xbb7   :  { %v5777_v53 = vsel %vm1362_vm6, %v5765_v22, %v5766_v4 }
 0xbb8   :  { %v5959_v12 = vadd.f32 %v17526_v6, %v5842_v47  ;;  %v5843_v37 = vadd.f32 %v5777_v53, %v5312_v19  ;;  %v13120_v34 = vpack.c.bf16 %v6082_v39, %v6081_v23 }
 0xbb9   :  { %v5322_v33 = vpop.f32.mrb[24].mxu1 }
 0xbba   :  { %v6006_v25 = vadd.f32 %v17252_v28, %v5959_v12  ;;  %v5960_v41 = vadd.f32 %v17541_v51, %v5843_v37  ;;  %v5324_v45 = vpop.f32.mrb[25].mxu1  ;;  %13121 = vmatprep.subr.bf16.mxu0 %v13120_v34  ;;  %v6083_v51 = vmul.f32 %v17711_v36, %v17711_v36 }
 0xbbb   :  { %v5767_v8 = vrot.slane %v5324_v45, 1  ;;  %v5326_v31 = vpop.f32.mrb[26].mxu1  ;;  %13123 = vmatpush1.bf16.msra.mxu0 %v13122_v55 }
 0xbbc   :  { %v5328_v22 = vpop.f32.mrb[27].mxu1  ;;  %v17713_v30 = vmax.f32 %v6006_v25, 0.0  ;;  %v6007_v47 = vadd.f32 %v17252_v28, %v5960_v41 }
 0xbbd   :  { %v5776_v6 = vsel %vm1362_vm6, %v5766_v4, %v5767_v8  ;;  %v5768_v19 = vrot.slane %v5328_v22, 1 }
 0xbbe   :  { %v5844_v23 = vadd.f32 %v5776_v6, %v5316_v52  ;;  %v6084_v44 = vmul.f32 %v17713_v30, %v17713_v30  ;;  %v13126_v4 = vpack.c.bf16 %v17713_v30, %v17711_v36  ;;  %v17729_v41 = vmax.f32 %v6007_v47, 0.0 }
 0xbbf   :  { %v5775_v39 = vsel %vm1362_vm6, %v5767_v8, %v5768_v19 }
 0xbc0   :  { %v5961_v53 = vadd.f32 %v17537_v38, %v5844_v23  ;;  %v5845_v12 = vadd.f32 %v5775_v39, %v5322_v33  ;;  %v13124_v37 = vpack.c.bf16 %v6084_v44, %v6083_v51  ;;  %v6085_v47 = vmul.f32 %v17729_v41, %v17729_v41 }
 0xbc1   :  { %v5332_v34 = vpop.f32.mrb[28].mxu1 }
 0xbc2   :  { %v6008_v55 = vadd.f32 %v17252_v28, %v5961_v53  ;;  %v5962_v52 = vadd.f32 %v17533_v17, %v5845_v12  ;;  %v5334_v25 = vpop.f32.mrb[29].mxu1  ;;  %13125 = vmatprep.subr.bf16.mxu0 %v13124_v37  ;;  %v13953_v28 = vld [vmem:[%s21117_s6 + $0x1] ss:$0 sm:$0xff] }
 0xbc3   :  { %v5769_v45 = vrot.slane %v5334_v25, 1  ;;  %v5336_v22 = vpop.f32.mrb[30].mxu1  ;;  %13127 = vmatpush1.bf16.msra.mxu0 %v13126_v4 }
 0xbc4   :  { %v5338_v8 = vpop.f32.mrb[31].mxu1  ;;  %v17731_v6 = vmax.f32 %v6008_v55, 0.0  ;;  %v6009_v23 = vadd.f32 %v13953_v28, %v5962_v52 }
 0xbc5   :  { %v5774_v38 = vsel %vm1362_vm6, %v5768_v19, %v5769_v45  ;;  %v5770_v33 = vrot.slane %v5338_v8, 1 }
 0xbc6   :  { %v5846_v17 = vadd.f32 %v5774_v38, %v5326_v31  ;;  %v6086_v51 = vmul.f32 %v17731_v6, %v17731_v6  ;;  %6166 = vmatmul.mubr.f32.vlgmr.msra.gmra.mrb[170].mxu0 %v17316_v15  ;;  %v13130_v31 = vpack.c.bf16 %v17731_v6, %v17729_v41  ;;  %v17751_v15 = vmax.f32 %v6009_v23, 0.0 }
 0xbc7   :  { %v5773_v44 = vsel %vm1362_vm6, %v5769_v45, %v5770_v33  ;;  %6236 = vmatprep.mubr.f32.mxu0 %v21283_v21 }
 0xbc8   :  { %v5963_v19 = vadd.f32 %v17566_v35, %v5846_v17  ;;  %v5847_v39 = vadd.f32 %v5773_v44, %v5332_v34  ;;  %v13128_v53 = vpack.c.bf16 %v6086_v51, %v6085_v47  ;;  %v6087_v38 = vmul.f32 %v17751_v15, %v17751_v15  ;;  %v21288_v17 = vld [vmem:[#allocation11_spill] sm:$0xff] }
 0xbc9   :  { %v5342_v12 = vpop.f32.mrb[36].mxu1  ;;  %v21289_v23 = vrot.slane %v21288_v17, 1  ;;  %v21293_v17 = vmov 0.0|0.0  }
 0xbca   :  { %v6010_v37 = vadd.f32 %v13953_v28, %v5963_v19  ;;  %v5964_v4 = vadd.f32 %v17579_v40, %v5847_v39  ;;  %v5343_v55 = vadd.f32 %v5342_v12, %v17221_v60  ;;  %v5344_v52 = vpop.f32.mrb[37].mxu1  ;;  %13129 = vmatprep.subr.bf16.mxu0 %v13128_v53  ;;  %v21290_v39 = vld [vmem:[#allocation12_spill] sm:$0xff] }
 0xbcb   :  { %v5345_v25 = vadd.f32 %v5344_v52, %v17225_v10  ;;  %v5346_v45 = vpop.f32.mrb[38].mxu1  ;;  %13131 = vmatpush1.bf16.msra.mxu0 %v13130_v31  ;;  %v21291_v53 = vrot.slane %v21290_v39, 2  ;;  %v21300_v39 = vld [vmem:[#allocation9_spill] sm:$0xff] }
 0xbcc   :  { %v5347_v35 = vpop.f32.mrb[39].mxu1  ;;  %v17754_v34 = vmax.f32 %v6010_v37, 0.0  ;;  %v6011_v47 = vadd.f32 %v13953_v28, %v5964_v4 }
 0xbcd   :  { %v5771_v8 = vrot.slane %v5345_v25, 1  ;;  %v5927_v12 = vsel %vm1461_vm7, %v5888_v9, %v21291_v53 }
 0xbce   :  { %v6088_v40 = vmul.f32 %v17754_v34, %v17754_v34  ;;  %v13134_v31 = vpack.c.bf16 %v17754_v34, %v17751_v15  ;;  %v17775_v4 = vmax.f32 %v6011_v47, 0.0  ;;  %v21296_v47 = vld [vmem:[#allocation5_spill] sm:$0xff] }
 0xbcf   :  { %v5772_v60 = vsel %vm1362_vm6, %v5770_v33, %v5771_v8  ;;  %v5810_v10 = vsel %vm1362_vm6, %v5771_v8, %v21289_v23  ;;  %v13954_v8 = vld [vmem:[%s21112_s13] sm:$0xf]  ;;  %v21294_v23 = vld [vmem:[#allocation3_spill] sm:$0xff] }
 0xbd0   :  { %v5848_v51 = vadd.f32 %v5772_v60, %v5336_v22  ;;  %v5849_v44 = vadd.f32 %v5810_v10, %v5343_v55  ;;  %v13132_v19 = vpack.c.bf16 %v6088_v40, %v6087_v38  ;;  %v6089_v3 = vmul.f32 %v17775_v4, %v17775_v4  ;;  %v21292_v60 = vld [vmem:[#allocation2_spill] sm:$0xff]  ;;  %v21295_v10 = vld [vmem:[#allocation4_spill] sm:$0xff] }
 0xbd2   :  { %v5965_v33 = vadd.f32 %v17575_v61, %v5848_v51  ;;  %v5966_v37 = vadd.f32 %v5927_v12, %v5849_v44  ;;  %13133 = vmatprep.subr.bf16.mxu0 %v13132_v19  ;;  %v21297_v51 = vld [vmem:[#allocation6_spill] sm:$0xff]  ;;  %v21298_v44 = vld [vmem:[#allocation7_spill] sm:$0xff]  ;;  %v21299_v19 = vld [vmem:[#allocation8_spill] sm:$0xff] }
 0xbd3   :  { %13135 = vmatpush1.bf16.msra.mxu0 %v13134_v31 }
 0xbd4   :  { %v6012_v52 = vadd.f32 %v13953_v28, %v5965_v33  ;;  %v6013_v22 = vadd.f32 %v13953_v28, %v5966_v37  ;;  %v11567_v28 = vld [vmem:[%s21242_s25 + $0x20] sm:$0x7] }
 0xbd6   :  { %v17777_v55 = vmax.f32 %v6012_v52, 0.0  ;;  %v17783_v25 = vmax.f32 %v6013_v22, 0.0 }
 0xbd8   :  { %v6090_v9 = vmul.f32 %v17777_v55, %v17777_v55  ;;  %v13138_v61 = vpack.c.bf16 %v17777_v55, %v17775_v4  ;;  %v6091_v35 = vmul.f32 %v17783_v25, %v17783_v25 }
 0xbda   :  { %v13136_v45 = vpack.c.bf16 %v6090_v9, %v6089_v3 }
 0xbdc   :  { %13137 = vmatprep.subr.bf16.mxu0 %v13136_v45 }
 0xbdd   :  { %13139 = vmatpush1.bf16.msra.mxu0 %v13138_v61 }
 0xbde   :  { %6184 = vmatprep.subr.mxu0 %v6091_v35 }
 0xbe1   :  { %6185 = vmatpush1.msra.mxu0 %v17783_v25 }
 0xbe2   :  { %11568 = vmatmul.mubr.msk.f32.vlgmr.msra.gmra.mrb[170].mxu0 %vm200_vm0, %v11567_v28  ;;  %12577 = vmatprep.subr.mxu0 %v21283_v21 }
 0xbe3   :  { %12578 = vmatpush3.msk.msra.mxu0 %vm496_vm2, %v13954_v8  ;;  %12579 = vmatprep.mubr.msk.f32.mxu0 %vm13998_vm1, %v21283_v21 }
 0xbe4   :  { %12582 = vmatprep.subr.mxu0 %v21283_v21 }
 0xcb5   :  { %v6238_v38 = vpop.f32.mrb[170].mxu0 }
 0xcb6   :  { %v6240_v40 = vpop.f32.mrb[171].mxu0  ;;  %12540 = vmatmul.mubr.f32.vlgmr.msra.gmra.mrb[210].mxu1 %v6238_v38 }
 0xcb7   :  { %13166 = vmatpush3.bf16.msra.mxu1 %v21292_v60  ;;  %12574 = vmatprep.mubr.msk.f32.mxu1 %vm13998_vm1, %v21283_v21 }
 0xcb8   :  { %13167 = vmatprep.subr.bf16.mxu1 %v21293_v17 }
 0xcbb   :  { %13169 = vmatpush3.bf16.msra.mxu1 %v21294_v23 }
 0xcbc   :  { %13170 = vmatprep.subr.bf16.mxu1 %v21293_v17 }
 0xcbf   :  { %13172 = vmatpush3.bf16.msra.mxu1 %v21295_v10 }
 0xcc0   :  { %13173 = vmatprep.subr.bf16.mxu1 %v21293_v17 }
 0xcc3   :  { %13175 = vmatpush3.bf16.msra.mxu1 %v21296_v47 }
 0xcc4   :  { %13176 = vmatprep.subr.bf16.mxu1 %v21293_v17 }
 0xcc7   :  { %13178 = vmatpush3.bf16.msra.mxu1 %v21297_v51 }
 0xcc8   :  { %13179 = vmatprep.subr.bf16.mxu1 %v21293_v17 }
 0xccb   :  { %13181 = vmatpush3.bf16.msra.mxu1 %v21298_v44 }
 0xccc   :  { %13182 = vmatprep.subr.bf16.mxu1 %v21293_v17 }
 0xccf   :  { %13184 = vmatpush3.bf16.msra.mxu1 %v21299_v19 }
 0xcd0   :  { %13185 = vmatprep.subr.bf16.mxu1 %v21293_v17 }
 0xcd3   :  { %13187 = vmatpush3.bf16.msra.mxu1 %v21300_v39 }
 0xcd6   :  { %12575 = vmatmul.mubr.f32.vlgmr.msra.gmra.mrb[40].mxu1 %v6240_v40  ;;  %v13955_v40 = vld [vmem:[%s21113_s2] sm:$0xff] }
 0xd89   :  { %v6309_v53 = vpop.f32.mrb[210].mxu1 }
 0xd8a   :  { %v6313_v12 = vmul.f32 0.00125, %v6309_v53  ;;  %v12541_v31 = vpop.f32.mrb[211].mxu1  ;;  %v21301_v53 = vmov 0  }
 0xd8b   :  { %v13957_v31 = vld [vmem:[%s21113_s2 + $0x10] sm:$0xff] }
 0xd8c   :  { %12580 = vmatmul.mubr.msk.f32.vlgmr.msra.gmra.mrb[0].mxu0 %vm492_vm3, %v6313_v12  ;;  %v6385_v37 = vmul.f32 %v6313_v12, %v6313_v12  ;;  %v13956_v12 = vld [vmem:[%s21113_s2 + $0x8] sm:$0xff] }
 0xd8d   :  { %12583 = vmatpush3.msk.msra.mxu0 %vm496_vm2, %v13954_v8  ;;  %12584 = vmatprep.mubr.msk.f32.mxu0 %vm13998_vm1, %v21283_v21 }
 0xda9   :  { %v6380_v33 = vpop.f32.mrb[40].mxu1 }
 0xdaa   :  { %v6384_v52 = vmul.f32 0.00125, %v6380_v33  ;;  %v12576_v22 = vpop.f32.mrb[41].mxu1  ;;  %v13958_v33 = vld [vmem:[%s21113_s2 + $0x18] sm:$0xff] }
 0xdab   :  { %v13961_v22 = vld [vmem:[%s21113_s2 + $0x30] sm:$0xff] }
 0xdac   :  { %v6386_v3 = vsub.f32 %v6384_v52, %v6385_v37  ;;  %v13959_v37 = vld [vmem:[%s21113_s2 + $0x20] sm:$0xff]  ;;  %v13960_v52 = vld [vmem:[%s21113_s2 + $0x28] sm:$0xff] }
 0xdae   :  { %v6387_v9 = vmax.f32 %v6386_v3, 0.0  ;;  %v13712_v3 = vld [vmem:[%s21114_s5 + $0x480] ss:$12 sps:$4 sm:$0xff]  }
 0xdb0   :  { %v6388_v45 = vadd.f32 1e-05, %v6387_v9  ;;  %v13714_v9 = vld [vmem:[%s21114_s5 + $0x484] ss:$12 sps:$4 sm:$0xff]  }
 0xdb1   :  { %7774 = vmatprep.subr.bf16.mxu1 %v13714_v9  ;;  %v13731_v9 = vld [vmem:[%s21114_s5 + $0x4e8] ss:$12 sps:$4 sm:$0xff]  }
 0xdb2   :  { %13869 = vrsqrt.f32 %v6388_v45  ;;  %v13715_v45 = vld [vmem:[%s21114_s5 + $0x488] ss:$12 sps:$4 sm:$0xff]   ;;  %7775 = vmatpush1.bf16.msra.mxu1 %v13712_v3  ;;  %v13730_v3 = vld [vmem:[%s21114_s5 + $0x4e4] ss:$12 sps:$4 sm:$0xff]  }
 0xdbc   :  { %v13870_v61 = vpop.eup %13869 }
 0xdbd   :  { %12585 = vmatmul.mubr.msk.f32.vlgmr.msra.gmra.mrb[36].mxu0 %vm492_vm3, %v13870_v61  ;;  %v13718_v61 = vld [vmem:[%s21114_s5 + $0x49c] ss:$12 sps:$4 sm:$0xff]  }
 0xdbe   :  { %6606 = vmatprep.mubr.f32.mxu0 %v21283_v21  ;;  %7776 = vmatprep.subr.bf16.mxu1 %v13718_v61  ;;  %v13965_v61 = vld [vmem:[%s21113_s2 + $0x50] sm:$0xff] }
 0xe5f   :  { %v6459_v35 = vpop.f32.mrb[0].mxu0 }
 0xe60   :  { %v12581_v28 = vpop.f32.mrb[1].mxu0 }
 0xe61   :  { %v13716_v28 = vld [vmem:[%s21114_s5 + $0x498] ss:$12 sps:$4 sm:$0xff]  }
 0xe62   :  { %7777 = vmatpush1.bf16.msra.mxu1 %v13716_v28  ;;  %v13735_v28 = vld [vmem:[%s21114_s5 + $0x500] ss:$12 sps:$4 sm:$0xff]  }
 0xe90   :  { %v6532_v38 = vpop.f32.mrb[36].mxu0 }
 0xe91   :  { %v12586_v8 = vpop.f32.mrb[37].mxu0  ;;  %11573 = vmatprep.subr.msk.mxu0 %vm761_vm4, %v6532_v38  ;;  %v13962_v38 = vld [vmem:[%s21113_s2 + $0x38] sm:$0xff] }
 0xe92   :  { %11574 = vmatpush1.msk.msra.mxu0 %vm761_vm4, %v6459_v35  ;;  %v13719_v35 = vld [vmem:[%s21114_s5 + $0x4a0] ss:$12 sps:$4 sm:$0xff]  }
 0xe93   :  { %11575 = vmatmul.mubr.msk.f32.vlgmr.msra.gmra.mrb[38].mxu0 %vm643_vm5, %v13955_v40  ;;  %8236 = vmatprep.subr.bf16.mxu0 %v21301_v53  ;;  %v13722_v8 = vld [vmem:[%s21114_s5 + $0x4b4] ss:$12 sps:$4 sm:$0xff]   ;;  %v13723_v40 = vld [vmem:[%s21114_s5 + $0x4b8] ss:$12 sps:$4 sm:$0xff]  }
 0xe94   :  { %6612 = vmatprep.mubr.f32.mxu0 %v21283_v21  ;;  %8237 = vmatpush1.bf16.msra.mxu0 %v13715_v45  ;;  %v13728_v45 = vld [vmem:[%s21114_s5 + $0x4e0] ss:$12 sps:$4 sm:$0xff]  }
 0xe95   :  { %8238 = vmatprep.subr.bf16.mxu0 %v21301_v53  ;;  %7778 = vmatprep.subr.bf16.mxu1 %v13722_v8  ;;  %v13966_v8 = vld [vmem:[%s21113_s2 + $0x58] sm:$0xff] }
 0xe97   :  { %11576 = vmatmul.mubr.msk.f32.gmra.mrb[40].mxu0 %vm643_vm5, %v13956_v12  ;;  %v13720_v12 = vld [vmem:[%s21114_s5 + $0x4b0] ss:$12 sps:$4 sm:$0xff]  }
 0xe98   :  { %6618 = vmatprep.mubr.f32.mxu0 %v21283_v21  ;;  %8239 = vmatpush1.bf16.msra.mxu0 %v13719_v35  ;;  %v13734_v35 = vld [vmem:[%s21114_s5 + $0x4fc] ss:$12 sps:$4 sm:$0xff]  }
 0xe99   :  { %8240 = vmatprep.subr.bf16.mxu0 %v21301_v53  ;;  %7779 = vmatpush1.bf16.msra.mxu1 %v13720_v12  ;;  %v13739_v12 = vld [vmem:[%s21114_s5 + $0x518] ss:$12 sps:$4 sm:$0xff]  }
 0xe9b   :  { %11577 = vmatmul.mubr.msk.f32.gmra.mrb[42].mxu0 %vm643_vm5, %v13957_v31  ;;  %v13963_v31 = vld [vmem:[%s21113_s2 + $0x40] sm:$0xff] }
 0xe9c   :  { %6624 = vmatprep.mubr.f32.mxu0 %v21283_v21  ;;  %8241 = vmatpush1.bf16.msra.mxu0 %v13723_v40  ;;  %v13738_v40 = vld [vmem:[%s21114_s5 + $0x514] ss:$12 sps:$4 sm:$0xff]  }
 0xe9d   :  { %8242 = vmatprep.subr.bf16.mxu0 %v21301_v53 }
 0xe9f   :  { %11578 = vmatmul.mubr.msk.f32.gmra.mrb[44].mxu0 %vm643_vm5, %v13958_v33  ;;  %v13726_v33 = vld [vmem:[%s21114_s5 + $0x4cc] ss:$12 sps:$4 sm:$0xff]  }
 0xea0   :  { %6630 = vmatprep.mubr.f32.mxu0 %v21283_v21  ;;  %7780 = vmatprep.subr.bf16.mxu1 %v13726_v33  ;;  %v13967_v33 = vld [vmem:[%s21113_s2 + $0x60] sm:$0xff] }
 0xea3   :  { %11579 = vmatmul.mubr.msk.f32.gmra.mrb[46].mxu0 %vm643_vm5, %v13959_v37  ;;  %v13727_v37 = vld [vmem:[%s21114_s5 + $0x4d0] ss:$12 sps:$4 sm:$0xff]  }
 0xea4   :  { %6636 = vmatprep.mubr.f32.mxu0 %v21283_v21  ;;  %8243 = vmatpush1.bf16.msra.mxu0 %v13727_v37  ;;  %v13742_v37 = vld [vmem:[%s21114_s5 + $0x52c] ss:$12 sps:$4 sm:$0xff]  }
 0xea5   :  { %8244 = vmatprep.subr.bf16.mxu0 %v21301_v53 }
 0xea7   :  { %11580 = vmatmul.mubr.msk.f32.gmra.mrb[48].mxu0 %vm643_vm5, %v13960_v52  ;;  %v13724_v52 = vld [vmem:[%s21114_s5 + $0x4c8] ss:$12 sps:$4 sm:$0xff]  }
 0xea8   :  { %6642 = vmatprep.mubr.f32.mxu0 %v21283_v21  ;;  %7781 = vmatpush1.bf16.msra.mxu1 %v13724_v52  ;;  %v13743_v52 = vld [vmem:[%s21114_s5 + $0x530] ss:$12 sps:$4 sm:$0xff]  }
 0xea9   :  { %7782 = vmatprep.subr.bf16.mxu1 %v13730_v3  ;;  %8245 = vmatpush1.bf16.msra.mxu0 %v13731_v9  ;;  %v13968_v3 = vld [vmem:[%s21113_s2 + $0x68] sm:$0xff]  ;;  %v13746_v9 = vld [vmem:[%s21114_s5 + $0x544] ss:$12 sps:$4 sm:$0xff]  }
 0xeaa   :  { %8246 = vmatprep.subr.bf16.mxu0 %v21301_v53 }
 0xeab   :  { %11581 = vmatmul.mubr.msk.f32.gmra.mrb[50].mxu0 %vm643_vm5, %v13961_v22  ;;  %v13964_v22 = vld [vmem:[%s21113_s2 + $0x48] sm:$0xff] }
 0xeac   :  { %6648 = vmatprep.mubr.f32.mxu0 %v21283_v21  ;;  %7783 = vmatpush1.bf16.msra.mxu1 %v13728_v45  ;;  %v13747_v45 = vld [vmem:[%s21114_s5 + $0x548] ss:$12 sps:$4 sm:$0xff]  }
 0xead   :  { %7784 = vmatprep.subr.bf16.mxu1 %v13734_v35  ;;  %8247 = vmatpush1.bf16.msra.mxu0 %v13735_v28  ;;  %v13969_v35 = vld [vmem:[%s21113_s2 + $0x70] sm:$0xff]  ;;  %v13750_v28 = vld [vmem:[%s21114_s5 + $0x55c] ss:$12 sps:$4 sm:$0xff]  }
 0xeae   :  { %8248 = vmatprep.subr.bf16.mxu0 %v21301_v53 }
 0xeaf   :  { %11582 = vmatmul.mubr.msk.f32.gmra.mrb[52].mxu0 %vm643_vm5, %v13962_v38  ;;  %v13732_v38 = vld [vmem:[%s21114_s5 + $0x4f8] ss:$12 sps:$4 sm:$0xff]  }
 0xeb0   :  { %6654 = vmatprep.mubr.f32.mxu0 %v21283_v21  ;;  %7785 = vmatpush1.bf16.msra.mxu1 %v13732_v38  ;;  %v13748_v38 = vld [vmem:[%s21114_s5 + $0x558] ss:$12 sps:$4 sm:$0xff]  }
 0xeb1   :  { %7786 = vmatprep.subr.bf16.mxu1 %v13738_v40  ;;  %8249 = vmatpush1.bf16.msra.mxu0 %v13739_v12  ;;  %v13971_v40 = vld [vmem:[%s21113_s2 + $0x80] sm:$0xff]  ;;  %v13972_v12 = vld [vmem:[%s21113_s2 + $0x88] sm:$0xff] }
 0xeb2   :  { %8250 = vmatprep.subr.bf16.mxu0 %v21301_v53 }
 0xeb3   :  { %11583 = vmatmul.mubr.msk.f32.gmra.mrb[54].mxu0 %vm643_vm5, %v13963_v31  ;;  %v13736_v31 = vld [vmem:[%s21114_s5 + $0x510] ss:$12 sps:$4 sm:$0xff]  }
 0xeb4   :  { %6660 = vmatprep.mubr.f32.mxu0 %v21283_v21  ;;  %7787 = vmatpush1.bf16.msra.mxu1 %v13736_v31  ;;  %v13973_v31 = vld [vmem:[%s21113_s2 + $0x90] sm:$0xff] }
 0xeb5   :  { %7788 = vmatprep.subr.bf16.mxu1 %v13742_v37  ;;  %8251 = vmatpush1.bf16.msra.mxu0 %v13743_v52  ;;  %v13975_v37 = vld [vmem:[%s21113_s2 + $0xa0] sm:$0xff] }
 0xeb6   :  { %8252 = vmatprep.subr.bf16.mxu0 %v21301_v53  ;;  %v13751_v52 = vld [vmem:[%s21114_s5 + $0x560] ss:$12 sps:$4 sm:$0xff]  }
 0xeb7   :  { %11584 = vmatmul.mubr.msk.f32.gmra.mrb[56].mxu0 %vm643_vm5, %v13964_v22  ;;  %v13740_v22 = vld [vmem:[%s21114_s5 + $0x528] ss:$12 sps:$4 sm:$0xff]  }
 0xeb8   :  { %6666 = vmatprep.mubr.f32.mxu0 %v21283_v21  ;;  %7789 = vmatpush1.bf16.msra.mxu1 %v13740_v22  ;;  %v13976_v22 = vld [vmem:[%s21113_s2 + $0xa8] sm:$0xff] }
 0xeb9   :  { %7790 = vmatprep.subr.bf16.mxu1 %v13746_v9  ;;  %8253 = vmatpush1.bf16.msra.mxu0 %v13747_v45  ;;  %v13752_v9 = vld [vmem:[%s21114_s5 + $0x570] ss:$12 sps:$4 sm:$0xff]   ;;  %v13755_v45 = vld [vmem:[%s21114_s5 + $0x578] ss:$12 sps:$4 sm:$0xff]  }
 0xeba   :  { %8254 = vmatprep.subr.bf16.mxu0 %v21301_v53 }
 0xebb   :  { %11585 = vmatmul.mubr.msk.f32.gmra.mrb[58].mxu0 %vm643_vm5, %v13965_v61  ;;  %v13744_v61 = vld [vmem:[%s21114_s5 + $0x540] ss:$12 sps:$4 sm:$0xff]  }
 0xebc   :  { %6672 = vmatprep.mubr.f32.mxu0 %v21283_v21  ;;  %7791 = vmatpush1.bf16.msra.mxu1 %v13744_v61  ;;  %v13977_v61 = vld [vmem:[%s21113_s2 + $0xb0] sm:$0xff] }
 0xebd   :  { %7792 = vmatprep.subr.bf16.mxu1 %v13750_v28  ;;  %8255 = vmatpush1.bf16.msra.mxu0 %v13751_v52  ;;  %v13756_v28 = vld [vmem:[%s21114_s5 + $0x588] ss:$12 sps:$4 sm:$0xff]   ;;  %v13764_v52 = vld [vmem:[%s21114_s5 + $0x5b8] ss:$12 sps:$4 sm:$0xff]  }
 0xebe   :  { %8256 = vmatprep.subr.bf16.mxu0 %v21301_v53 }
 0xebf   :  { %11586 = vmatmul.mubr.msk.f32.gmra.mrb[60].mxu0 %vm643_vm5, %v13966_v8  ;;  %v13970_v8 = vld [vmem:[%s21113_s2 + $0x78] sm:$0xff] }
 0xec0   :  { %6678 = vmatprep.mubr.f32.mxu0 %v21283_v21  ;;  %7793 = vmatpush1.bf16.msra.mxu1 %v13748_v38  ;;  %v13759_v38 = vld [vmem:[%s21114_s5 + $0x590] ss:$12 sps:$4 sm:$0xff]  }
 0xec1   :  { %8257 = vmatpush1.bf16.msra.mxu0 %v13755_v45  ;;  %v13768_v45 = vld [vmem:[%s21114_s5 + $0x5d0] ss:$12 sps:$4 sm:$0xff]  }
 0xec2   :  { %8258 = vmatprep.subr.bf16.mxu0 %v21301_v53 }
 0xec3   :  { %11587 = vmatmul.mubr.msk.f32.gmra.mrb[62].mxu0 %vm643_vm5, %v13967_v33  ;;  %v13974_v33 = vld [vmem:[%s21113_s2 + $0x98] sm:$0xff] }
 0xec4   :  { %6684 = vmatprep.mubr.f32.mxu0 %v21283_v21 }
 0xec5   :  { %8259 = vmatpush1.bf16.msra.mxu0 %v13759_v38  ;;  %v13772_v38 = vld [vmem:[%s21114_s5 + $0x5e8] ss:$12 sps:$4 sm:$0xff]  }
 0xec6   :  { %8260 = vmatprep.subr.bf16.mxu0 %v21301_v53 }
 0xec7   :  { %11588 = vmatmul.mubr.msk.f32.gmra.mrb[64].mxu0 %vm643_vm5, %v13968_v3  ;;  %v13754_v3 = vld [vmem:[%s21114_s5 + $0x574] ss:$12 sps:$4 sm:$0xff]  }
 0xec8   :  { %6690 = vmatprep.mubr.f32.mxu0 %v21283_v21  ;;  %7794 = vmatprep.subr.bf16.mxu1 %v13754_v3  ;;  %v13980_v3 = vld [vmem:[%s21113_s2 + $0xc8] sm:$0xff] }
 0xec9   :  { %7795 = vmatpush1.bf16.msra.mxu1 %v13752_v9  ;;  %v13770_v9 = vld [vmem:[%s21114_s5 + $0x5d4] ss:$12 sps:$4 sm:$0xff]  }
 0xecb   :  { %11589 = vmatmul.mubr.msk.f32.gmra.mrb[66].mxu0 %vm643_vm5, %v13969_v35  ;;  %v13758_v35 = vld [vmem:[%s21114_s5 + $0x58c] ss:$12 sps:$4 sm:$0xff]  }
 0xecc   :  { %6696 = vmatprep.mubr.f32.mxu0 %v21283_v21  ;;  %7796 = vmatprep.subr.bf16.mxu1 %v13758_v35  ;;  %v13981_v35 = vld [vmem:[%s21113_s2 + $0xd0] sm:$0xff] }
 0xecd   :  { %7797 = vmatpush1.bf16.msra.mxu1 %v13756_v28  ;;  %v13774_v28 = vld [vmem:[%s21114_s5 + $0x5ec] ss:$12 sps:$4 sm:$0xff]  }
 0xecf   :  { %11590 = vmatmul.mubr.msk.f32.gmra.mrb[68].mxu0 %vm643_vm5, %v13970_v8  ;;  %v13978_v8 = vld [vmem:[%s21113_s2 + $0xb8] sm:$0xff] }
 0xed0   :  { %6702 = vmatprep.mubr.f32.mxu0 %v21283_v21 }
 0xed3   :  { %11591 = vmatmul.mubr.msk.f32.gmra.mrb[70].mxu0 %vm643_vm5, %v13971_v40  ;;  %v13762_v40 = vld [vmem:[%s21114_s5 + $0x5a4] ss:$12 sps:$4 sm:$0xff]  }
 0xed4   :  { %6708 = vmatprep.mubr.f32.mxu0 %v21283_v21  ;;  %7798 = vmatprep.subr.bf16.mxu1 %v13762_v40  ;;  %v13982_v40 = vld [vmem:[%s21113_s2 + $0xd8] sm:$0xff] }
 0xed7   :  { %11592 = vmatmul.mubr.msk.f32.gmra.mrb[72].mxu0 %vm643_vm5, %v13972_v12  ;;  %v13760_v12 = vld [vmem:[%s21114_s5 + $0x5a0] ss:$12 sps:$4 sm:$0xff]  }
 0xed8   :  { %6714 = vmatprep.mubr.f32.mxu0 %v21283_v21  ;;  %7799 = vmatpush1.bf16.msra.mxu1 %v13760_v12  ;;  %v13983_v12 = vld [vmem:[%s21113_s2 + $0xe0] sm:$0xff] }
 0xedb   :  { %11593 = vmatmul.mubr.msk.f32.gmra.mrb[74].mxu0 %vm643_vm5, %v13973_v31  ;;  %v13763_v31 = vld [vmem:[%s21114_s5 + $0x5a8] ss:$12 sps:$4 sm:$0xff]  }
 0xedc   :  { %6720 = vmatprep.mubr.f32.mxu0 %v21283_v21  ;;  %8261 = vmatpush1.bf16.msra.mxu0 %v13763_v31  ;;  %v13984_v31 = vld [vmem:[%s21113_s2 + $0xe8] sm:$0xff] }
 0xedd   :  { %8262 = vmatprep.subr.bf16.mxu0 %v21301_v53 }
 0xedf   :  { %11594 = vmatmul.mubr.msk.f32.gmra.mrb[76].mxu0 %vm643_vm5, %v13974_v33  ;;  %v13979_v33 = vld [vmem:[%s21113_s2 + $0xc0] sm:$0xff] }
 0xee0   :  { %6726 = vmatprep.mubr.f32.mxu0 %v21283_v21 }
 0xee3   :  { %11595 = vmatmul.mubr.msk.f32.gmra.mrb[78].mxu0 %vm643_vm5, %v13975_v37  ;;  %v13766_v37 = vld [vmem:[%s21114_s5 + $0x5bc] ss:$12 sps:$4 sm:$0xff]  }
 0xee4   :  { %6732 = vmatprep.mubr.f32.mxu0 %v21283_v21  ;;  %7800 = vmatprep.subr.bf16.mxu1 %v13766_v37  ;;  %v13986_v37 = vld [vmem:[%s21113_s2 + $0xf8] sm:$0xff] }
 0xee5   :  { %7801 = vmatpush1.bf16.msra.mxu1 %v13764_v52  ;;  %v13987_v52 = vld [vmem:[%s21113_s2 + $0x100] sm:$0xff] }
 0xee6   :  { %7802 = vmatprep.subr.bf16.mxu1 %v13770_v9  ;;  %v13990_v9 = vld [vmem:[%s21113_s2 + $0x118] sm:$0xff] }
 0xee7   :  { %11596 = vmatmul.mubr.msk.f32.gmra.mrb[84].mxu0 %vm643_vm5, %v13976_v22  ;;  %v13767_v22 = vld [vmem:[%s21114_s5 + $0x5c0] ss:$12 sps:$4 sm:$0xff]  }
 0xee8   :  { %6738 = vmatprep.mubr.f32.mxu0 %v21283_v21  ;;  %8263 = vmatpush1.bf16.msra.mxu0 %v13767_v22  ;;  %v13988_v22 = vld [vmem:[%s21113_s2 + $0x108] sm:$0xff] }
 0xee9   :  { %8264 = vmatprep.subr.bf16.mxu0 %v21301_v53  ;;  %7803 = vmatpush1.bf16.msra.mxu1 %v13768_v45  ;;  %v13991_v45 = vld [vmem:[%s21113_s2 + $0x120] sm:$0xff] }
 0xeea   :  { %7804 = vmatprep.subr.bf16.mxu1 %v13774_v28  ;;  %v13778_v28 = vld [vmem:[%s21114_s5 + $0x604] ss:$12 sps:$4 sm:$0xff]  }
 0xeeb   :  { %11597 = vmatmul.mubr.msk.f32.gmra.mrb[86].mxu0 %vm643_vm5, %v13977_v61  ;;  %v13771_v61 = vld [vmem:[%s21114_s5 + $0x5d8] ss:$12 sps:$4 sm:$0xff]  }
 0xeec   :  { %6744 = vmatprep.mubr.f32.mxu0 %v21283_v21  ;;  %8265 = vmatpush1.bf16.msra.mxu0 %v13771_v61  ;;  %v13992_v61 = vld [vmem:[%s21113_s2 + $0x128] sm:$0xff] }
 0xeed   :  { %8266 = vmatprep.subr.bf16.mxu0 %v21301_v53  ;;  %7805 = vmatpush1.bf16.msra.mxu1 %v13772_v38 }
 0xeee   :  { %8005 = vmatprep.subr.bf16.mxu1 %v13778_v28 }
 0xeef   :  { %11598 = vmatmul.mubr.msk.f32.gmra.mrb[2].mxu0 %vm643_vm5, %v13978_v8  ;;  %v13775_v8 = vld [vmem:[%s21114_s5 + $0x5f0] ss:$12 sps:$4 sm:$0xff]  }
 0xef0   :  { %6750 = vmatprep.mubr.f32.mxu0 %v21283_v21  ;;  %8267 = vmatpush1.bf16.msra.mxu0 %v13775_v8 }
 0xef3   :  { %11599 = vmatmul.mubr.msk.f32.gmra.mrb[88].mxu0 %vm643_vm5, %v13979_v33  ;;  %v13985_v33 = vld [vmem:[%s21113_s2 + $0xf0] sm:$0xff] }
 0xef4   :  { %6756 = vmatprep.mubr.f32.mxu0 %v21283_v21 }
 0xef7   :  { %11600 = vmatmul.mubr.msk.f32.gmra.mrb[90].mxu0 %vm643_vm5, %v13980_v3  ;;  %v13989_v3 = vld [vmem:[%s21113_s2 + $0x110] sm:$0xff] }
 0xef8   :  { %6762 = vmatprep.mubr.f32.mxu0 %v21283_v21 }
 0xefb   :  { %11601 = vmatmul.mubr.msk.f32.gmra.mrb[92].mxu0 %vm643_vm5, %v13981_v35  ;;  %v13993_v35 = vld [vmem:[%s21113_s2 + $0x130] sm:$0xff] }
 0xefc   :  { %6768 = vmatprep.mubr.f32.mxu0 %v21283_v21 }
 0xeff   :  { %11602 = vmatmul.mubr.msk.f32.gmra.mrb[94].mxu0 %vm643_vm5, %v13982_v40 }
 0xf00   :  { %6774 = vmatprep.mubr.f32.mxu0 %v21283_v21 }
 0xf03   :  { %11603 = vmatmul.mubr.msk.f32.gmra.mrb[96].mxu0 %vm643_vm5, %v13983_v12  ;;  %v11614_v12 = vld [vmem:[%s21115_s3 + $0x270] sm:$0xff] }
 0xf04   :  { %6780 = vmatprep.mubr.f32.mxu0 %v21283_v21 }
 0xf07   :  { %11604 = vmatmul.mubr.msk.f32.gmra.mrb[98].mxu0 %vm643_vm5, %v13984_v31 }
 0xf08   :  { %6786 = vmatprep.mubr.f32.mxu0 %v21283_v21 }
 0xf0b   :  { %11605 = vmatmul.mubr.msk.f32.gmra.mrb[100].mxu0 %vm643_vm5, %v13985_v33 }
 0xf0c   :  { %6792 = vmatprep.mubr.f32.mxu0 %v21283_v21 }
 0xf0f   :  { %11606 = vmatmul.mubr.msk.f32.gmra.mrb[102].mxu0 %vm643_vm5, %v13986_v37 }
 0xf10   :  { %6798 = vmatprep.mubr.f32.mxu0 %v21283_v21 }
 0xf13   :  { %11607 = vmatmul.mubr.msk.f32.gmra.mrb[104].mxu0 %vm643_vm5, %v13987_v52  ;;  %v11653_v52 = vld [vmem:[%s21116_s4 + $0x270] sm:$0xff] }
 0xf14   :  { %6804 = vmatprep.mubr.f32.mxu0 %v21283_v21 }
 0xf17   :  { %11608 = vmatmul.mubr.msk.f32.gmra.mrb[106].mxu0 %vm643_vm5, %v13988_v22  ;;  %v21302_v22 = vld [vmem:[#allocation10_spill] sm:$0xff] }
 0xf18   :  { %6810 = vmatprep.mubr.f32.mxu0 %v21283_v21 }
 0xf1b   :  { %11609 = vmatmul.mubr.msk.f32.gmra.mrb[108].mxu0 %vm643_vm5, %v13989_v3 }
 0xf1c   :  { %6816 = vmatprep.mubr.f32.mxu0 %v21283_v21 }
 0xf1f   :  { %11610 = vmatmul.mubr.msk.f32.gmra.mrb[110].mxu0 %vm643_vm5, %v13990_v9 }
 0xf20   :  { %6822 = vmatprep.mubr.f32.mxu0 %v21283_v21 }
 0xf23   :  { %11611 = vmatmul.mubr.msk.f32.gmra.mrb[112].mxu0 %vm643_vm5, %v13991_v45  ;;  %v11615_v45 = vld [vmem:[%s21115_s3 + $0x278] sm:$0xff] }
 0xf24   :  { %6828 = vmatprep.mubr.f32.mxu0 %v21283_v21 }
 0xf27   :  { %11612 = vmatmul.mubr.msk.f32.gmra.mrb[114].mxu0 %vm643_vm5, %v13992_v61 }
 0xf28   :  { %6834 = vmatprep.mubr.f32.mxu0 %v21283_v21 }
 0xf2b   :  { %11613 = vmatmul.mubr.msk.f32.gmra.mrb[116].mxu0 %vm643_vm5, %v13993_v35  ;;  %v11654_v35 = vld [vmem:[%s21116_s4 + $0x278] sm:$0xff] }
 0xf66   :  { %v6608_v38 = vpop.f32.mrb[38].mxu0 }
 0xf67   :  { %v6841_v8 = vsub.f32 %v17269_v57, %v6608_v38  ;;  %v6610_v40 = vpop.f32.mrb[39].mxu0 }
 0xf69   :  { %v6880_v31 = vmul.f32 %v6841_v8, %v6610_v40 }
 0xf6a   :  { %v6614_v33 = vpop.f32.mrb[40].mxu0 }
 0xf6b   :  { %v6959_v37 = vmul.f32 %v11614_v12, %v6880_v31  ;;  %v6842_v3 = vsub.f32 %v21302_v22, %v6614_v33  ;;  %v6616_v9 = vpop.f32.mrb[41].mxu0  ;;  %v11616_v12 = vld [vmem:[%s21115_s3 + $0x280] sm:$0xff] }
 0xf6d   :  { %v6881_v57 = vmul.f32 %v6842_v3, %v6616_v9  ;;  %v18195_v61 = vadd.f32 %v11653_v52, %v6959_v37  ;;  %v11655_v37 = vld [vmem:[%s21116_s4 + $0x280] sm:$0xff] }
 0xf6e   :  { %v6620_v28 = vpop.f32.mrb[42].mxu0 }
 0xf6f   :  { %v6960_v38 = vmul.f32 %v11615_v45, %v6881_v57  ;;  %v6843_v8 = vsub.f32 %v17297_v26, %v6620_v28  ;;  %v6622_v40 = vpop.f32.mrb[43].mxu0  ;;  %v21169_v22 = vrot.slane %v18195_v61, 1  ;;  %v11617_v28 = vld [vmem:[%s21115_s3 + $0x288] sm:$0xff] }
 0xf71   :  { %v7039_v31 = vadd.f32 %v11654_v35, %v6960_v38  ;;  %v6882_v33 = vmul.f32 %v6843_v8, %v6622_v40  ;;  %v21170_v35 = vrot.slane %v18195_v61, 2 }
 0xf72   :  { %v6626_v52 = vpop.f32.mrb[44].mxu0 }
 0xf73   :  { %v7077_v3 = vpack.c.bf16 %v7039_v31, %v18195_v61  ;;  %v6961_v9 = vmul.f32 %v11616_v12, %v6882_v33  ;;  %v6844_v45 = vsub.f32 %v17324_v59, %v6626_v52  ;;  %v6628_v26 = vpop.f32.mrb[45].mxu0  ;;  %v7098_v57 = vrot.slane %v7039_v31, 1  ;;  %v11656_v59 = vld [vmem:[%s21116_s4 + $0x288] sm:$0xff] }
 0xf74   :  { %v7196_v38 = vrot.slane %v7039_v31, 2 }
 0xf75   :  { %v7040_v8 = vadd.f32 %v11655_v37, %v6961_v9  ;;  %v6883_v40 = vmul.f32 %v6844_v45, %v6628_v26  ;;  %v18218_v39 = vsel %vm1362_vm6, %v21169_v22, %v7098_v57  ;;  %v11618_v26 = vld [vmem:[%s21115_s3 + $0x290] sm:$0xff] }
 0xf76   :  { %v6632_v12 = vpop.f32.mrb[46].mxu0  ;;  %v18227_v33 = vsel %vm1461_vm7, %v21170_v35, %v7196_v38 }
 0xf77   :  { %v6962_v31 = vmul.f32 %v11617_v28, %v6883_v40  ;;  %v6845_v37 = vsub.f32 %v17340_v62, %v6632_v12  ;;  %v6634_v52 = vpop.f32.mrb[47].mxu0  ;;  %v7099_v9 = vrot.slane %v7040_v8, 1  ;;  %v7197_v45 = vrot.slane %v7040_v8, 2  ;;  %v11657_v62 = vld [vmem:[%s21116_s4 + $0x290] sm:$0xff] }
 0xf79   :  { %v7041_v22 = vadd.f32 %v11656_v59, %v6962_v31  ;;  %v6884_v19 = vmul.f32 %v6845_v37, %v6634_v52  ;;  %v7172_v44 = vsel %vm1362_vm6, %v7098_v57, %v7099_v9  ;;  %v18237_v51 = vsel %vm1461_vm7, %v7196_v38, %v7197_v45  ;;  %v11619_v57 = vld [vmem:[%s21115_s3 + $0x298] sm:$0xff] }
 0xf7a   :  { %v6638_v28 = vpop.f32.mrb[48].mxu0 }
 0xf7b   :  { %v18242_v40 = vpack.c.bf16 %v7041_v22, %v7040_v8  ;;  %v6963_v12 = vmul.f32 %v11618_v26, %v6884_v19  ;;  %v6846_v35 = vsub.f32 %v17362_v54, %v6638_v28  ;;  %v6640_v47 = vpop.f32.mrb[49].mxu0  ;;  %v7100_v59 = vrot.slane %v7041_v22, 1  ;;  %v11658_v8 = vld [vmem:[%s21116_s4 + $0x298] sm:$0xff]  ;;  %v13776_v54 = vld [vmem:[%s21114_s5 + $0x600] ss:$12 sps:$4 sm:$0xff]  }
 0xf7c   :  { %v7198_v31 = vrot.slane %v7041_v22, 2 }
 0xf7d   :  { %v7042_v37 = vadd.f32 %v11657_v62, %v6963_v12  ;;  %v6885_v38 = vmul.f32 %v6846_v35, %v6640_v47  ;;  %v7171_v52 = vsel %vm1362_vm6, %v7099_v9, %v7100_v59  ;;  %v13781_v9 = vld [vmem:[%s21114_s5 + $0x61c] ss:$12 sps:$4 sm:$0xff]  }
 0xf7e   :  { %v6644_v10 = vpop.f32.mrb[50].mxu0  ;;  %v7175_v19 = vpack.c.bf16 %v7171_v52, %v7172_v44  ;;  %v7269_v26 = vsel %vm1461_vm7, %v7197_v45, %v7198_v31  ;;  %v11620_v44 = vld [vmem:[%s21115_s3 + $0x2a0] sm:$0xff] }
 0xf7f   :  { %v6964_v28 = vmul.f32 %v11619_v57, %v6885_v38  ;;  %v6847_v22 = vsub.f32 %v17378_v11, %v6644_v10  ;;  %v6646_v47 = vpop.f32.mrb[51].mxu0  ;;  %v7101_v35 = vrot.slane %v7042_v37, 1  ;;  %v7199_v62 = vrot.slane %v7042_v37, 2  ;;  %v13785_v10 = vld [vmem:[%s21114_s5 + $0x608] ss:$12 sps:$4 sm:$0xff]   ;;  %v11659_v45 = vld [vmem:[%s21116_s4 + $0x2a0] sm:$0xff] }
 0xf80   :  { %7806 = vmatprep.mubr.bf16.mxu1 %v7175_v19  ;;  %8268 = vmatprep.mubr.bf16.mxu0 %v7175_v19  ;;  %v13779_v38 = vld [vmem:[%s21114_s5 + $0x618] ss:$12 sps:$4 sm:$0xff]  }
 0xf81   :  { %v7043_v12 = vadd.f32 %v11658_v8, %v6964_v28  ;;  %v6886_v52 = vmul.f32 %v6847_v22, %v6646_v47  ;;  %7807 = vmatmul.mubr.bf16.vlgmr.msra.gmra.mrb[44].mxu1 %v7077_v3  ;;  %8269 = vmatmul.mubr.bf16.vlgmr.msra.gmra.mrb[120].mxu0 %v7077_v3  ;;  %v7170_v11 = vsel %vm1362_vm6, %v7100_v59, %v7101_v35 }
 0xf82   :  { %v6650_v57 = vpop.f32.mrb[52].mxu0  ;;  %8006 = vmatpush1.bf16.msra.mxu1 %v13776_v54  ;;  %v7268_v3 = vsel %vm1461_vm7, %v7198_v31, %v7199_v62  ;;  %12587 = vmatprep.subr.bf16.mxu0 %v13785_v10  ;;  %v11621_v54 = vld [vmem:[%s21115_s3 + $0x2a8] sm:$0xff] }
 0xf83   :  { %v18278_v8 = vpack.c.bf16 %v7043_v12, %v7042_v37  ;;  %v7200_v59 = vrot.slane %v7043_v12, 2  ;;  %v6965_v19 = vmul.f32 %v11620_v44, %v6886_v52  ;;  %v6848_v28 = vsub.f32 %v17400_v1, %v6650_v57  ;;  %v6652_v22 = vpop.f32.mrb[53].mxu0  ;;  %8007 = vmatprep.subr.bf16.mxu1 %v13781_v9  ;;  %12588 = vmatpush3.bf16.msra.mxu0 %v13785_v10  ;;  %v13786_v37 = vld [vmem:[%s21114_s5 + $0x620] ss:$12 sps:$4 sm:$0xff]  }
 0xf84   :  { %v7102_v47 = vrot.slane %v7043_v12, 1  ;;  %v18284_v23 = vpack.c.bf16 %v7268_v3, %v7269_v26  ;;  %v11660_v9 = vld [vmem:[%s21116_s4 + $0x2a8] sm:$0xff]  ;;  %12589 = vmatprep.subr.bf16.mxu0 %v13786_v37 }
 0xf85   :  { %v18286_v60 = vadd.f32 %v11659_v45, %v6965_v19  ;;  %v6887_v31 = vmul.f32 %v6848_v28, %v6652_v22  ;;  %v7267_v1 = vsel %vm1461_vm7, %v7199_v62, %v7200_v59  ;;  %v11622_v62 = vld [vmem:[%s21115_s3 + $0x2b0] sm:$0xff] }
 0xf86   :  { %v6656_v44 = vpop.f32.mrb[54].mxu0  ;;  %v7169_v12 = vsel %vm1362_vm6, %v7101_v35, %v7102_v47  ;;  %8008 = vmatpush1.bf16.msra.mxu1 %v13779_v38  ;;  %v13784_v35 = vld [vmem:[%s21114_s5 + $0x634] ss:$12 sps:$4 sm:$0xff]  }
 0xf87   :  { %v7201_v26 = vrot.slane %v18286_v60, 2  ;;  %v6966_v52 = vmul.f32 %v11621_v54, %v6887_v31  ;;  %v6849_v10 = vsub.f32 %v17416_v32, %v6656_v44  ;;  %v6658_v45 = vpop.f32.mrb[55].mxu0  ;;  %v7176_v57 = vpack.c.bf16 %v7169_v12, %v7170_v11  ;;  %12590 = vmatpush3.bf16.msra.mxu0 %v13786_v37  ;;  %v13787_v32 = vld [vmem:[%s21114_s5 + $0x638] ss:$12 sps:$4 sm:$0xff]   ;;  %v11661_v38 = vld [vmem:[%s21116_s4 + $0x2b0] sm:$0xff]  ;;  %8009 = vmatprep.subr.bf16.mxu1 %v13784_v35 }
 0xf88   :  { %v7103_v3 = vrot.slane %v18286_v60, 1  ;;  %v13782_v31 = vld [vmem:[%s21114_s5 + $0x630] ss:$12 sps:$4 sm:$0xff]   ;;  %12591 = vmatprep.subr.bf16.mxu0 %v13787_v32 }
 0xf89   :  { %v7045_v19 = vadd.f32 %v11660_v9, %v6966_v52  ;;  %v6888_v28 = vmul.f32 %v6849_v10, %v6658_v45  ;;  %7816 = vmatprep.mubr.bf16.mxu1 %v7176_v57  ;;  %8276 = vmatprep.mubr.bf16.mxu0 %v7176_v57  ;;  %v7266_v11 = vsel %vm1461_vm7, %v7200_v59, %v7201_v26  ;;  %v13788_v45 = vld [vmem:[%s21114_s5 + $0x648] ss:$12 sps:$4 sm:$0xff]  }
 0xf8a   :  { %7817 = vmatmul.mubr.bf16.gmra.mrb[48].mxu1 %v18242_v40  ;;  %8277 = vmatmul.mubr.bf16.gmra.mrb[124].mxu0 %v18242_v40  ;;  %v6662_v22 = vpop.f32.mrb[56].mxu0  ;;  %v7168_v54 = vsel %vm1362_vm6, %v7102_v47, %v7103_v3  ;;  %v18322_v37 = vpack.c.bf16 %v7266_v11, %v7267_v1  ;;  %v11623_v40 = vld [vmem:[%s21115_s3 + $0x2b8] sm:$0xff] }
 0xf8b   :  { %v18325_v59 = vpack.c.bf16 %v7045_v19, %v18286_v60  ;;  %v6967_v9 = vmul.f32 %v11622_v62, %v6888_v28  ;;  %v6850_v44 = vsub.f32 %v17438_v56, %v6662_v22  ;;  %v6664_v12 = vpop.f32.mrb[57].mxu0  ;;  %v7104_v52 = vrot.slane %v7045_v19, 1  ;;  %8010 = vmatpush1.bf16.msra.mxu1 %v13782_v31  ;;  %12592 = vmatpush3.bf16.msra.mxu0 %v13787_v32  ;;  %v13790_v47 = vld [vmem:[%s21114_s5 + $0x64c] ss:$12 sps:$4 sm:$0xff]   ;;  %v13791_v60 = vld [vmem:[%s21114_s5 + $0x650] ss:$12 sps:$4 sm:$0xff]  }
 0xf8c   :  { %v7202_v57 = vrot.slane %v7045_v19, 2  ;;  %v11662_v62 = vld [vmem:[%s21116_s4 + $0x2b8] sm:$0xff]  ;;  %8011 = vmatprep.subr.bf16.mxu1 %v13790_v47  ;;  %12593 = vmatprep.subr.bf16.mxu0 %v13791_v60 }
 0xf8d   :  { %v7046_v1 = vadd.f32 %v11661_v38, %v6967_v9  ;;  %v6889_v56 = vmul.f32 %v6850_v44, %v6664_v12  ;;  %v7167_v10 = vsel %vm1362_vm6, %v7103_v3, %v7104_v52  ;;  %v11624_v3 = vld [vmem:[%s21115_s3 + $0x2c0] sm:$0xff]  ;;  %v13795_v12 = vld [vmem:[%s21114_s5 + $0x668] ss:$12 sps:$4 sm:$0xff]  }
 0xf8e   :  { %v6668_v28 = vpop.f32.mrb[58].mxu0  ;;  %v7177_v35 = vpack.c.bf16 %v7167_v10, %v7168_v54  ;;  %v7265_v19 = vsel %vm1461_vm7, %v7201_v26, %v7202_v57 }
 0xf8f   :  { %v6968_v32 = vmul.f32 %v11623_v40, %v6889_v56  ;;  %v6851_v11 = vsub.f32 %v17454_v14, %v6668_v28  ;;  %v6670_v38 = vpop.f32.mrb[59].mxu0  ;;  %v7105_v22 = vrot.slane %v7046_v1, 1  ;;  %v7203_v31 = vrot.slane %v7046_v1, 2  ;;  %8012 = vmatpush1.bf16.msra.mxu1 %v13788_v45  ;;  %12594 = vmatpush3.bf16.msra.mxu0 %v13791_v60  ;;  %v13794_v14 = vld [vmem:[%s21114_s5 + $0x664] ss:$12 sps:$4 sm:$0xff]   ;;  %v21303_v45 = vld [vmem:[#allocation13_spill] sm:$0xff] }
 0xf90   :  { %7826 = vmatprep.mubr.bf16.mxu1 %v7177_v35  ;;  %8284 = vmatprep.mubr.bf16.mxu0 %v7177_v35  ;;  %v11663_v40 = vld [vmem:[%s21116_s4 + $0x2c0] sm:$0xff] }
 0xf91   :  { %v7047_v9 = vadd.f32 %v11662_v62, %v6968_v32  ;;  %v6890_v44 = vmul.f32 %v6851_v11, %v6670_v38  ;;  %v7166_v54 = vsel %vm1362_vm6, %v7104_v52, %v7105_v22  ;;  %v13792_v52 = vld [vmem:[%s21114_s5 + $0x660] ss:$12 sps:$4 sm:$0xff]   ;;  %v7264_v47 = vsel %vm1461_vm7, %v7202_v57, %v7203_v31  ;;  %8013 = vmatprep.subr.bf16.mxu1 %v13794_v14  ;;  %v13798_v32 = vld [vmem:[%s21114_s5 + $0x67c] ss:$12 sps:$4 sm:$0xff]  }
 0xf92   :  { %7827 = vmatmul.mubr.bf16.gmra.mrb[52].mxu1 %v18278_v8  ;;  %8285 = vmatmul.mubr.bf16.gmra.mrb[128].mxu0 %v18278_v8  ;;  %v6674_v26 = vpop.f32.mrb[60].mxu0  ;;  %v11625_v8 = vld [vmem:[%s21115_s3 + $0x2c8] sm:$0xff]  ;;  %v18378_v11 = vpack.c.bf16 %v7264_v47, %v7265_v19  ;;  %v11626_v47 = vld [vmem:[%s21115_s3 + $0x2d0] sm:$0xff] }
 0xf93   :  { %v18369_v60 = vpack.c.bf16 %v7047_v9, %v7046_v1  ;;  %v7204_v56 = vrot.slane %v7047_v9, 2  ;;  %v6969_v10 = vmul.f32 %v11624_v3, %v6890_v44  ;;  %v6852_v62 = vsub.f32 %v21303_v45, %v6674_v26  ;;  %v6676_v28 = vpop.f32.mrb[61].mxu0  ;;  %12595 = vmatprep.subr.bf16.mxu0 %v13795_v12  ;;  %8014 = vmatpush1.bf16.msra.mxu1 %v13792_v52  ;;  %v13799_v38 = vld [vmem:[%s21114_s5 + $0x680] ss:$12 sps:$4 sm:$0xff]  }
 0xf94   :  { %v7106_v35 = vrot.slane %v7047_v9, 1  ;;  %12596 = vmatpush3.bf16.msra.mxu0 %v13795_v12  ;;  %v11664_v9 = vld [vmem:[%s21116_s4 + $0x2c8] sm:$0xff]  ;;  %8015 = vmatprep.subr.bf16.mxu1 %v13798_v32 }
 0xf95   :  { %v18380_v1 = vadd.f32 %v11663_v40, %v6969_v10  ;;  %v6891_v57 = vmul.f32 %v6852_v62, %v6676_v28  ;;  %v7263_v3 = vsel %vm1461_vm7, %v7203_v31, %v7204_v56  ;;  %v13796_v31 = vld [vmem:[%s21114_s5 + $0x678] ss:$12 sps:$4 sm:$0xff]   ;;  %12597 = vmatprep.subr.bf16.mxu0 %v13799_v38  ;;  %v11665_v28 = vld [vmem:[%s21116_s4 + $0x2d0] sm:$0xff] }
 0xf96   :  { %v6680_v44 = vpop.f32.mrb[62].mxu0  ;;  %v7165_v19 = vsel %vm1362_vm6, %v7105_v22, %v7106_v35 }
 0xf97   :  { %v7205_v14 = vrot.slane %v18380_v1, 2  ;;  %v6970_v40 = vmul.f32 %v11625_v8, %v6891_v57  ;;  %v6853_v12 = vsub.f32 %v17492_v29, %v6680_v44  ;;  %v6682_v26 = vpop.f32.mrb[63].mxu0  ;;  %v7178_v52 = vpack.c.bf16 %v7165_v19, %v7166_v54  ;;  %v13802_v29 = vld [vmem:[%s21114_s5 + $0x694] ss:$12 sps:$4 sm:$0xff]   ;;  %v13803_v54 = vld [vmem:[%s21114_s5 + $0x698] ss:$12 sps:$4 sm:$0xff]   ;;  %8016 = vmatpush1.bf16.msra.mxu1 %v13796_v31 }
 0xf98   :  { %v7107_v10 = vrot.slane %v18380_v1, 1  ;;  %12598 = vmatpush3.bf16.msra.mxu0 %v13799_v38  ;;  %8017 = vmatprep.subr.bf16.mxu1 %v13802_v29  ;;  %v13807_v38 = vld [vmem:[%s21114_s5 + $0x6b0] ss:$12 sps:$4 sm:$0xff]  }
 0xf99   :  { %v7049_v22 = vadd.f32 %v11664_v9, %v6970_v40  ;;  %v6892_v45 = vmul.f32 %v6853_v12, %v6682_v26  ;;  %7836 = vmatprep.mubr.bf16.mxu1 %v7178_v52  ;;  %8292 = vmatprep.mubr.bf16.mxu0 %v7178_v52  ;;  %v7262_v62 = vsel %vm1461_vm7, %v7204_v56, %v7205_v14  ;;  %v11666_v52 = vld [vmem:[%s21116_s4 + $0x2d8] sm:$0xff] }
 0xf9a   :  { %7837 = vmatmul.mubr.bf16.gmra.mrb[56].mxu1 %v18325_v59  ;;  %8293 = vmatmul.mubr.bf16.gmra.mrb[132].mxu0 %v18325_v59  ;;  %v6686_v8 = vpop.f32.mrb[64].mxu0  ;;  %v7164_v32 = vsel %vm1362_vm6, %v7106_v35, %v7107_v10  ;;  %v18416_v57 = vpack.c.bf16 %v7262_v62, %v7263_v3  ;;  %v13800_v59 = vld [vmem:[%s21114_s5 + $0x690] ss:$12 sps:$4 sm:$0xff]  }
 0xf9b   :  { %v18419_v9 = vpack.c.bf16 %v7049_v22, %v18380_v1  ;;  %v6971_v44 = vmul.f32 %v11626_v47, %v6892_v45  ;;  %v6854_v56 = vsub.f32 %v17514_v42, %v6686_v8  ;;  %v6688_v19 = vpop.f32.mrb[65].mxu0  ;;  %v7108_v40 = vrot.slane %v7049_v22, 1  ;;  %v11627_v35 = vld [vmem:[%s21115_s3 + $0x2d8] sm:$0xff]  ;;  %12599 = vmatprep.subr.bf16.mxu0 %v13803_v54  ;;  %8018 = vmatpush1.bf16.msra.mxu1 %v13800_v59 }
 0xf9c   :  { %v13806_v42 = vld [vmem:[%s21114_s5 + $0x6ac] ss:$12 sps:$4 sm:$0xff]   ;;  %v7206_v26 = vrot.slane %v7049_v22, 2  ;;  %12600 = vmatpush3.bf16.msra.mxu0 %v13803_v54  ;;  %v11628_v22 = vld [vmem:[%s21115_s3 + $0x2e0] sm:$0xff] }
 0xf9d   :  { %v7050_v3 = vadd.f32 %v11665_v28, %v6971_v44  ;;  %v6893_v1 = vmul.f32 %v6854_v56, %v6688_v19  ;;  %v7163_v12 = vsel %vm1362_vm6, %v7107_v10, %v7108_v40  ;;  %v13804_v28 = vld [vmem:[%s21114_s5 + $0x6a8] ss:$12 sps:$4 sm:$0xff]   ;;  %8019 = vmatprep.subr.bf16.mxu1 %v13806_v42  ;;  %12601 = vmatprep.subr.bf16.mxu0 %v13807_v38  ;;  %v11667_v54 = vld [vmem:[%s21116_s4 + $0x2e0] sm:$0xff] }
 0xf9e   :  { %v6692_v31 = vpop.f32.mrb[66].mxu0  ;;  %v7179_v47 = vpack.c.bf16 %v7163_v12, %v7164_v32  ;;  %v7261_v32 = vsel %vm1461_vm7, %v7205_v14, %v7206_v26  ;;  %v11629_v42 = vld [vmem:[%s21115_s3 + $0x2e8] sm:$0xff] }
 0xf9f   :  { %v6972_v45 = vmul.f32 %v11627_v35, %v6893_v1  ;;  %v6855_v29 = vsub.f32 %v17550_v13, %v6692_v31  ;;  %v6694_v62 = vpop.f32.mrb[67].mxu0  ;;  %v7109_v10 = vrot.slane %v7050_v3, 1  ;;  %v7207_v8 = vrot.slane %v7050_v3, 2  ;;  %8020 = vmatpush1.bf16.msra.mxu1 %v13804_v28 }
 0xfa0   :  { %7846 = vmatprep.mubr.bf16.mxu1 %v7179_v47  ;;  %8300 = vmatprep.mubr.bf16.mxu0 %v7179_v47 }
 0xfa1   :  { %v7051_v44 = vadd.f32 %v11666_v52, %v6972_v45  ;;  %v6894_v13 = vmul.f32 %v6855_v29, %v6694_v62  ;;  %v7162_v56 = vsel %vm1362_vm6, %v7108_v40, %v7109_v10  ;;  %v7260_v59 = vsel %vm1461_vm7, %v7206_v26, %v7207_v8  ;;  %12602 = vmatpush3.bf16.msra.mxu0 %v13807_v38 }
 0xfa2   :  { %7847 = vmatmul.mubr.bf16.gmra.mrb[60].mxu1 %v18369_v60  ;;  %8301 = vmatmul.mubr.bf16.gmra.mrb[136].mxu0 %v18369_v60  ;;  %v6698_v19 = vpop.f32.mrb[68].mxu0  ;;  %v18461_v31 = vpack.c.bf16 %v7260_v59, %v7261_v32  ;;  %v11630_v32 = vld [vmem:[%s21115_s3 + $0x2f0] sm:$0xff] }
 0xfa3   :  { %v7083_v14 = vpack.c.bf16 %v7051_v44, %v7050_v3  ;;  %v7208_v35 = vrot.slane %v7051_v44, 2  ;;  %v6973_v1 = vmul.f32 %v11628_v22, %v6894_v13  ;;  %v6856_v12 = vsub.f32 %v17553_v18, %v6698_v19  ;;  %v6700_v40 = vpop.f32.mrb[69].mxu0  ;;  %10027 = vmatprep.subr.bf16.mxu0 %v21301_v53  ;;  %v11668_v18 = vld [vmem:[%s21116_s4 + $0x2e8] sm:$0xff] }
 0xfa4   :  { %v7110_v52 = vrot.slane %v7051_v44, 1 }
 0xfa5   :  { %v7052_v60 = vadd.f32 %v11667_v54, %v6973_v1  ;;  %v6895_v47 = vmul.f32 %v6856_v12, %v6700_v40  ;;  %v7259_v3 = vsel %vm1461_vm7, %v7207_v8, %v7208_v35 }
 0xfa6   :  { %v6704_v26 = vpop.f32.mrb[70].mxu0  ;;  %v7161_v38 = vsel %vm1362_vm6, %v7109_v10, %v7110_v52  ;;  %v11669_v10 = vld [vmem:[%s21116_s4 + $0x2f0] sm:$0xff] }
 0xfa7   :  { %v7209_v45 = vrot.slane %v7052_v60, 2  ;;  %v6974_v29 = vmul.f32 %v11629_v42, %v6895_v47  ;;  %v6857_v62 = vsub.f32 %v17585_v0, %v6704_v26  ;;  %v6706_v28 = vpop.f32.mrb[71].mxu0  ;;  %v7180_v22 = vpack.c.bf16 %v7161_v38, %v7162_v56  ;;  %v11631_v42 = vld [vmem:[%s21115_s3 + $0x2f8] sm:$0xff] }
 0xfa8   :  { %v7111_v44 = vrot.slane %v7052_v60, 1 }
 0xfa9   :  { %v7053_v8 = vadd.f32 %v11668_v18, %v6974_v29  ;;  %v6896_v13 = vmul.f32 %v6857_v62, %v6706_v28  ;;  %7856 = vmatprep.mubr.bf16.mxu1 %v7180_v22  ;;  %8308 = vmatprep.mubr.bf16.mxu0 %v7180_v22  ;;  %v7258_v54 = vsel %vm1461_vm7, %v7208_v35, %v7209_v45 }
 0xfaa   :  { %7857 = vmatmul.mubr.bf16.gmra.mrb[64].mxu1 %v18419_v9  ;;  %8309 = vmatmul.mubr.bf16.gmra.mrb[140].mxu0 %v18419_v9  ;;  %v6710_v0 = vpop.f32.mrb[72].mxu0  ;;  %v7160_v56 = vsel %vm1362_vm6, %v7110_v52, %v7111_v44  ;;  %v18484_v19 = vpack.c.bf16 %v7258_v54, %v7259_v3  ;;  %v11670_v52 = vld [vmem:[%s21116_s4 + $0x2f8] sm:$0xff] }
 0xfab   :  { %v7084_v59 = vpack.c.bf16 %v7053_v8, %v7052_v60  ;;  %v6975_v1 = vmul.f32 %v11630_v32, %v6896_v13  ;;  %v6858_v12 = vsub.f32 %v17587_v27, %v6710_v0  ;;  %v6712_v40 = vpop.f32.mrb[73].mxu0  ;;  %v7112_v35 = vrot.slane %v7053_v8, 1  ;;  %v11632_v32 = vld [vmem:[%s21115_s3 + $0x300] sm:$0xff] }
 0xfac   :  { %v7210_v47 = vrot.slane %v7053_v8, 2 }
 0xfad   :  { %v7054_v18 = vadd.f32 %v11669_v10, %v6975_v1  ;;  %v6897_v26 = vmul.f32 %v6858_v12, %v6712_v40  ;;  %v7159_v9 = vsel %vm1362_vm6, %v7111_v44, %v7112_v35 }
 0xfae   :  { %v6716_v60 = vpop.f32.mrb[74].mxu0  ;;  %v7181_v3 = vpack.c.bf16 %v7159_v9, %v7160_v56  ;;  %v7257_v27 = vsel %vm1461_vm7, %v7209_v45, %v7210_v47 }
 0xfaf   :  { %v6976_v38 = vmul.f32 %v11631_v42, %v6897_v26  ;;  %v6859_v29 = vsub.f32 %v17603_v49, %v6716_v60  ;;  %v6718_v62 = vpop.f32.mrb[75].mxu0  ;;  %v7113_v28 = vrot.slane %v7054_v18, 1  ;;  %v7211_v22 = vrot.slane %v7054_v18, 2  ;;  %v11671_v49 = vld [vmem:[%s21116_s4 + $0x300] sm:$0xff] }
 0xfb0   :  { %7866 = vmatprep.mubr.bf16.mxu1 %v7181_v3  ;;  %8316 = vmatprep.mubr.bf16.mxu0 %v7181_v3 }
 0xfb1   :  { %v7055_v44 = vadd.f32 %v11670_v52, %v6976_v38  ;;  %v6898_v8 = vmul.f32 %v6859_v29, %v6718_v62  ;;  %v7158_v13 = vsel %vm1362_vm6, %v7112_v35, %v7113_v28  ;;  %v7256_v45 = vsel %vm1461_vm7, %v7210_v47, %v7211_v22  ;;  %v11633_v47 = vld [vmem:[%s21115_s3 + $0x308] sm:$0xff]  ;;  %v11634_v62 = vld [vmem:[%s21115_s3 + $0x310] sm:$0xff] }
 0xfb2   :  { %7867 = vmatmul.mubr.bf16.gmra.mrb[68].mxu1 %v7083_v14  ;;  %8317 = vmatmul.mubr.bf16.gmra.mrb[144].mxu0 %v7083_v14  ;;  %v6722_v54 = vpop.f32.mrb[76].mxu0  ;;  %v18508_v10 = vpack.c.bf16 %v7256_v45, %v7257_v27 }
 0xfb3   :  { %v18510_v0 = vpack.c.bf16 %v7055_v44, %v7054_v18  ;;  %v7114_v56 = vrot.slane %v7055_v44, 1  ;;  %v7212_v1 = vrot.slane %v7055_v44, 2  ;;  %v6977_v12 = vmul.f32 %v11632_v32, %v6898_v8  ;;  %v6724_v40 = vpop.f32.mrb[77].mxu0 }
 0xfb4   :  { %v6860_v35 = vsub.f32 %v17605_v16, %v6722_v54  ;;  %v11672_v16 = vld [vmem:[%s21116_s4 + $0x308] sm:$0xff] }
 0xfb5   :  { %v7056_v42 = vadd.f32 %v11671_v49, %v6977_v12  ;;  %v7157_v26 = vsel %vm1362_vm6, %v7113_v28, %v7114_v56  ;;  %v7255_v14 = vsel %vm1461_vm7, %v7211_v22, %v7212_v1 }
 0xfb6   :  { %v6899_v9 = vmul.f32 %v6860_v35, %v6724_v40  ;;  %v6728_v18 = vpop.f32.mrb[78].mxu0  ;;  %v7182_v52 = vpack.c.bf16 %v7157_v26, %v7158_v13 }
 0xfb7   :  { %v7115_v60 = vrot.slane %v7056_v42, 1  ;;  %v7213_v3 = vrot.slane %v7056_v42, 2  ;;  %v6861_v27 = vsub.f32 %v17621_v20, %v6728_v18  ;;  %v6730_v38 = vpop.f32.mrb[79].mxu0  ;;  %v11673_v20 = vld [vmem:[%s21116_s4 + $0x310] sm:$0xff] }
 0xfb8   :  { %v6978_v29 = vmul.f32 %v11633_v47, %v6899_v9  ;;  %7876 = vmatprep.mubr.bf16.mxu1 %v7182_v52  ;;  %8324 = vmatprep.mubr.bf16.mxu0 %v7182_v52 }
 0xfb9   :  { %v7254_v28 = vsel %vm1461_vm7, %v7212_v1, %v7213_v3  ;;  %v6900_v22 = vmul.f32 %v6861_v27, %v6730_v38  ;;  %v7156_v32 = vsel %vm1362_vm6, %v7114_v56, %v7115_v60  ;;  %v11635_v56 = vld [vmem:[%s21115_s3 + $0x318] sm:$0xff]  ;;  %v11636_v27 = vld [vmem:[%s21115_s3 + $0x320] sm:$0xff] }
 0xfba   :  { %v7057_v44 = vadd.f32 %v11672_v16, %v6978_v29  ;;  %7877 = vmatmul.mubr.bf16.gmra.mrb[72].mxu1 %v7084_v59  ;;  %8325 = vmatmul.mubr.bf16.gmra.mrb[148].mxu0 %v7084_v59  ;;  %v6734_v8 = vpop.f32.mrb[84].mxu0  ;;  %v18534_v13 = vpack.c.bf16 %v7254_v28, %v7255_v14  ;;  %v11674_v59 = vld [vmem:[%s21116_s4 + $0x318] sm:$0xff] }
 0xfbb   :  { %v6979_v45 = vmul.f32 %v11634_v62, %v6900_v22  ;;  %v6862_v49 = vsub.f32 %v17623_v50, %v6734_v8  ;;  %v6736_v54 = vpop.f32.mrb[85].mxu0 }
 0xfbc   :  { %v7086_v12 = vpack.c.bf16 %v7057_v44, %v7056_v42  ;;  %v7116_v1 = vrot.slane %v7057_v44, 1  ;;  %v7214_v40 = vrot.slane %v7057_v44, 2 }
 0xfbd   :  { %v7058_v35 = vadd.f32 %v11673_v20, %v6979_v45  ;;  %v6901_v47 = vmul.f32 %v6862_v49, %v6736_v54 }
 0xfbe   :  { %v6740_v26 = vpop.f32.mrb[86].mxu0  ;;  %v7155_v14 = vsel %vm1362_vm6, %v7115_v60, %v7116_v1  ;;  %v7253_v50 = vsel %vm1461_vm7, %v7213_v3, %v7214_v40  ;;  %v11675_v3 = vld [vmem:[%s21116_s4 + $0x320] sm:$0xff] }
 0xfbf   :  { %v7117_v42 = vrot.slane %v7058_v35, 1  ;;  %v7215_v9 = vrot.slane %v7058_v35, 2  ;;  %v6980_v18 = vmul.f32 %v11635_v56, %v6901_v47  ;;  %v6863_v52 = vsub.f32 %v17639_v48, %v6740_v26  ;;  %v6742_v16 = vpop.f32.mrb[87].mxu0 }
 0xfc0   :  { %v7183_v38 = vpack.c.bf16 %v7155_v14, %v7156_v32 }
 0xfc1   :  { %v7059_v29 = vadd.f32 %v11674_v59, %v6980_v18  ;;  %v6902_v62 = vmul.f32 %v6863_v52, %v6742_v16  ;;  %v7154_v28 = vsel %vm1362_vm6, %v7116_v1, %v7117_v42  ;;  %v7252_v60 = vsel %vm1461_vm7, %v7214_v40, %v7215_v9  ;;  %v11637_v40 = vld [vmem:[%s21115_s3 + $0x328] sm:$0xff]  ;;  %v11638_v18 = vld [vmem:[%s21115_s3 + $0x330] sm:$0xff] }
 0xfc2   :  { %7886 = vmatprep.mubr.bf16.mxu1 %v7183_v38  ;;  %8332 = vmatprep.mubr.bf16.mxu0 %v7183_v38  ;;  %v6746_v48 = vpop.f32.mrb[2].mxu0  ;;  %v18558_v22 = vpack.c.bf16 %v7252_v60, %v7253_v50 }
 0xfc3   :  { %v18560_v44 = vpack.c.bf16 %v7059_v29, %v7058_v35  ;;  %v7118_v32 = vrot.slane %v7059_v29, 1  ;;  %v7216_v20 = vrot.slane %v7059_v29, 2  ;;  %v6981_v8 = vmul.f32 %v11636_v27, %v6902_v62  ;;  %7887 = vmatmul.mubr.bf16.gmra.mrb[76].mxu1 %v18510_v0  ;;  %8333 = vmatmul.mubr.bf16.gmra.mrb[152].mxu0 %v18510_v0  ;;  %v6748_v45 = vpop.f32.mrb[3].mxu0 }
 0xfc4   :  { %v6864_v49 = vsub.f32 %v17641_v24, %v6746_v48  ;;  %v11676_v24 = vld [vmem:[%s21116_s4 + $0x328] sm:$0xff] }
 0xfc5   :  { %v7251_v54 = vsel %vm1461_vm7, %v7215_v9, %v7216_v20  ;;  %v7060_v1 = vadd.f32 %v11675_v3, %v6981_v8  ;;  %v7153_v56 = vsel %vm1362_vm6, %v7117_v42, %v7118_v32 }
 0xfc6   :  { %v6903_v35 = vmul.f32 %v6864_v49, %v6748_v45  ;;  %v6752_v47 = vpop.f32.mrb[88].mxu0  ;;  %v7184_v59 = vpack.c.bf16 %v7153_v56, %v7154_v28  ;;  %v8940_v49 = vld [vmem:[%s21118_s10] sm:$0xff] }
 0xfc7   :  { %v7119_v26 = vrot.slane %v7060_v1, 1  ;;  %v7217_v14 = vrot.slane %v7060_v1, 2  ;;  %v6865_v0 = vsub.f32 %v17657_v7, %v6752_v47  ;;  %v6754_v50 = vpop.f32.mrb[89].mxu0  ;;  %v11677_v7 = vld [vmem:[%s21116_s4 + $0x330] sm:$0xff]  ;;  %8981 = vperm.xlu0 %13515, %v8940_v49  }
 0xfc8   :  { %v6982_v9 = vmul.f32 %v11637_v40, %v6903_v35  ;;  %7896 = vmatprep.mubr.bf16.mxu1 %v7184_v59  ;;  %8340 = vmatprep.mubr.bf16.mxu0 %v7184_v59 }
 0xfc9   :  { %v7250_v42 = vsel %vm1461_vm7, %v7216_v20, %v7217_v14  ;;  %v6904_v52 = vmul.f32 %v6865_v0, %v6754_v50  ;;  %v7152_v16 = vsel %vm1362_vm6, %v7118_v32, %v7119_v26  ;;  %v11639_v32 = vld [vmem:[%s21115_s3 + $0x338] sm:$0xff] }
 0xfca   :  { %v18583_v27 = vpack.c.bf16 %v7250_v42, %v7251_v54  ;;  %v7061_v38 = vadd.f32 %v11676_v24, %v6982_v9  ;;  %v6758_v29 = vpop.f32.mrb[90].mxu0  ;;  %v11640_v24 = vld [vmem:[%s21115_s3 + $0x340] sm:$0xff] }
 0xfcb   :  { %v6983_v62 = vmul.f32 %v11638_v18, %v6904_v52  ;;  %7897 = vmatmul.mubr.bf16.gmra.mrb[80].mxu1 %v7086_v12  ;;  %8341 = vmatmul.mubr.bf16.gmra.mrb[156].mxu0 %v7086_v12  ;;  %v6866_v28 = vsub.f32 %v17659_v43, %v6758_v29  ;;  %v6760_v60 = vpop.f32.mrb[91].mxu0  ;;  %v11678_v12 = vld [vmem:[%s21116_s4 + $0x338] sm:$0xff]  ;;  %v11679_v18 = vld [vmem:[%s21116_s4 + $0x340] sm:$0xff] }
 0xfcc   :  { %v18589_v3 = vpack.c.bf16 %v7061_v38, %v7060_v1  ;;  %v7120_v48 = vrot.slane %v7061_v38, 1  ;;  %v7218_v20 = vrot.slane %v7061_v38, 2 }
 0xfcd   :  { %v7062_v8 = vadd.f32 %v11677_v7, %v6983_v62  ;;  %v6905_v45 = vmul.f32 %v6866_v28, %v6760_v60  ;;  %v8941_v28 = vld [vmem:[%s21118_s10 + $0x8] sm:$0xff] }
 0xfce   :  { %v6764_v43 = vpop.f32.mrb[92].mxu0  ;;  %v7151_v54 = vsel %vm1362_vm6, %v7119_v26, %v7120_v48  ;;  %v7249_v1 = vsel %vm1461_vm7, %v7217_v14, %v7218_v20  ;;  %8986 = vperm.xlu0 %13515, %v8941_v28  }
 0xfcf   :  { %v7121_v40 = vrot.slane %v7062_v8, 1  ;;  %v7219_v56 = vrot.slane %v7062_v8, 2  ;;  %v6984_v35 = vmul.f32 %v11639_v32, %v6905_v45  ;;  %v6867_v47 = vsub.f32 %v17675_v63, %v6764_v43  ;;  %v6766_v59 = vpop.f32.mrb[93].mxu0 }
 0xfd0   :  { %v7185_v0 = vpack.c.bf16 %v7151_v54, %v7152_v16 }
 0xfd1   :  { %v7063_v50 = vadd.f32 %v11678_v12, %v6984_v35  ;;  %v6906_v9 = vmul.f32 %v6867_v47, %v6766_v59  ;;  %v7150_v26 = vsel %vm1362_vm6, %v7120_v48, %v7121_v40  ;;  %v7248_v14 = vsel %vm1461_vm7, %v7218_v20, %v7219_v56  ;;  %v11641_v20 = vld [vmem:[%s21115_s3 + $0x348] sm:$0xff] }
 0xfd2   :  { %7906 = vmatprep.mubr.bf16.mxu1 %v7185_v0  ;;  %8348 = vmatprep.mubr.bf16.mxu0 %v7185_v0  ;;  %v6770_v63 = vpop.f32.mrb[94].mxu0  ;;  %v18615_v42 = vpack.c.bf16 %v7248_v14, %v7249_v1  ;;  %v11680_v12 = vld [vmem:[%s21116_s4 + $0x348] sm:$0xff]  ;;  %v8944_v1 = vld [vmem:[%s21118_s10 + $0x20] sm:$0xff]  ;;  %v11681_v0 = vld [vmem:[%s21116_s4 + $0x350] sm:$0xff] }
 0xfd3   :  { %v18617_v52 = vpack.c.bf16 %v7063_v50, %v7062_v8  ;;  %v7122_v16 = vrot.slane %v7063_v50, 1  ;;  %v7220_v38 = vrot.slane %v7063_v50, 2  ;;  %v6985_v7 = vmul.f32 %v11640_v24, %v6906_v9  ;;  %7907 = vmatmul.mubr.bf16.gmra.mrb[88].mxu1 %v18560_v44  ;;  %8349 = vmatmul.mubr.bf16.gmra.mrb[160].mxu0 %v18560_v44  ;;  %v6772_v29 = vpop.f32.mrb[95].mxu0 }
 0xfd4   :  { %v6868_v62 = vsub.f32 %v17677_v2, %v6770_v63  ;;  %9001 = vperm.xlu0 %13515, %v8944_v1  }
 0xfd5   :  { %v7247_v60 = vsel %vm1461_vm7, %v7219_v56, %v7220_v38  ;;  %v7064_v48 = vadd.f32 %v11679_v18, %v6985_v7  ;;  %v7149_v32 = vsel %vm1362_vm6, %v7121_v40, %v7122_v16  ;;  %v11642_v40 = vld [vmem:[%s21115_s3 + $0x350] sm:$0xff] }
 0xfd6   :  { %v6907_v44 = vmul.f32 %v6868_v62, %v6772_v29  ;;  %v6776_v8 = vpop.f32.mrb[96].mxu0  ;;  %v7186_v45 = vpack.c.bf16 %v7149_v32, %v7150_v26  ;;  %v8942_v7 = vld [vmem:[%s21118_s10 + $0x10] sm:$0xff] }
 0xfd7   :  { %v7123_v2 = vrot.slane %v7064_v48, 1  ;;  %v7221_v49 = vrot.slane %v7064_v48, 2  ;;  %v6869_v43 = vsub.f32 %v17693_v58, %v6776_v8  ;;  %v6778_v54 = vpop.f32.mrb[97].mxu0  ;;  %v8946_v29 = vld [vmem:[%s21118_s10 + $0x30] sm:$0xff]  ;;  %8991 = vperm.xlu1 %13516, %v8942_v7  }
 0xfd8   :  { %v6986_v56 = vmul.f32 %v11641_v20, %v6907_v44  ;;  %7916 = vmatprep.mubr.bf16.mxu1 %v7186_v45  ;;  %8356 = vmatprep.mubr.bf16.mxu0 %v7186_v45 }
 0xfd9   :  { %v7246_v35 = vsel %vm1461_vm7, %v7220_v38, %v7221_v49  ;;  %v6908_v47 = vmul.f32 %v6869_v43, %v6778_v54  ;;  %v7148_v59 = vsel %vm1362_vm6, %v7122_v16, %v7123_v2  ;;  %v11643_v38 = vld [vmem:[%s21115_s3 + $0x358] sm:$0xff]  ;;  %9011 = vperm.xlu0 %13515, %v8946_v29  }
 0xfda   :  { %v18646_v58 = vpack.c.bf16 %v7246_v35, %v7247_v60  ;;  %v7065_v24 = vadd.f32 %v11680_v12, %v6986_v56  ;;  %v6782_v50 = vpop.f32.mrb[98].mxu0  ;;  %v11644_v12 = vld [vmem:[%s21115_s3 + $0x360] sm:$0xff]  ;;  %v8943_v54 = vld [vmem:[%s21118_s10 + $0x18] sm:$0xff] }
 0xfdb   :  { %v6987_v9 = vmul.f32 %v11642_v40, %v6908_v47  ;;  %7917 = vmatmul.mubr.bf16.gmra.mrb[92].mxu1 %v18589_v3  ;;  %8357 = vmatmul.mubr.bf16.gmra.mrb[164].mxu0 %v18589_v3  ;;  %v6870_v26 = vsub.f32 %v17695_v5, %v6782_v50  ;;  %v6784_v14 = vpop.f32.mrb[99].mxu0  ;;  %v11682_v5 = vld [vmem:[%s21116_s4 + $0x358] sm:$0xff]  ;;  %v11683_v40 = vld [vmem:[%s21116_s4 + $0x360] sm:$0xff] }
 0xfdc   :  { %v18654_v18 = vpack.c.bf16 %v7065_v24, %v7064_v48  ;;  %v7124_v63 = vrot.slane %v7065_v24, 1  ;;  %v7222_v16 = vrot.slane %v7065_v24, 2  ;;  %8996 = vperm.xlu1 %13516, %v8943_v54   ;;  %v11685_v54 = vld [vmem:[%s21116_s4 + $0x370] sm:$0xff] }
 0xfdd   :  { %v7066_v3 = vadd.f32 %v11681_v0, %v6987_v9  ;;  %v6909_v62 = vmul.f32 %v6870_v26, %v6784_v14  ;;  %v8945_v14 = vld [vmem:[%s21118_s10 + $0x28] sm:$0xff] }
 0xfde   :  { %v6788_v28 = vpop.f32.mrb[100].mxu0  ;;  %v7147_v60 = vsel %vm1362_vm6, %v7123_v2, %v7124_v63  ;;  %v7245_v48 = vsel %vm1461_vm7, %v7221_v49, %v7222_v16 }
 0xfdf   :  { %v7125_v20 = vrot.slane %v7066_v3, 1  ;;  %v7223_v32 = vrot.slane %v7066_v3, 2  ;;  %v6988_v44 = vmul.f32 %v11643_v38, %v6909_v62  ;;  %v6871_v8 = vsub.f32 %v17711_v36, %v6788_v28  ;;  %v6790_v45 = vpop.f32.mrb[101].mxu0  ;;  %v8948_v36 = vld [vmem:[%s21118_s10 + $0x40] sm:$0xff]  ;;  %v11645_v38 = vld [vmem:[%s21115_s3 + $0x368] sm:$0xff] }
 0xfe0   :  { %v7187_v43 = vpack.c.bf16 %v7147_v60, %v7148_v59  ;;  %9021 = vperm.xlu0 %13515, %v8948_v36   ;;  %9006 = vperm.xlu1 %13516, %v8945_v14   ;;  %v11684_v28 = vld [vmem:[%s21116_s4 + $0x368] sm:$0xff] }
 0xfe1   :  { %v7067_v1 = vadd.f32 %v11682_v5, %v6988_v44  ;;  %v6910_v2 = vmul.f32 %v6871_v8, %v6790_v45  ;;  %v7146_v49 = vsel %vm1362_vm6, %v7124_v63, %v7125_v20  ;;  %v7244_v56 = vsel %vm1461_vm7, %v7222_v16, %v7223_v32  ;;  %v8947_v44 = vld [vmem:[%s21118_s10 + $0x38] sm:$0xff] }
 0xfe2   :  { %7926 = vmatprep.mubr.bf16.mxu1 %v7187_v43  ;;  %8364 = vmatprep.mubr.bf16.mxu0 %v7187_v43  ;;  %v6794_v35 = vpop.f32.mrb[102].mxu0  ;;  %v18689_v47 = vpack.c.bf16 %v7244_v56, %v7245_v48 }
 0xfe3   :  { %v18691_v59 = vpack.c.bf16 %v7067_v1, %v7066_v3  ;;  %v7126_v24 = vrot.slane %v7067_v1, 1  ;;  %v7224_v0 = vrot.slane %v7067_v1, 2  ;;  %v6989_v50 = vmul.f32 %v11644_v12, %v6910_v2  ;;  %7927 = vmatmul.mubr.bf16.gmra.mrb[96].mxu1 %v18617_v52  ;;  %8365 = vmatmul.mubr.bf16.gmra.mrb[172].mxu0 %v18617_v52  ;;  %v6796_v9 = vpop.f32.mrb[103].mxu0  ;;  %v8950_v3 = vld [vmem:[%s21118_s10 + $0x50] sm:$0xff]  ;;  %v8952_v2 = vld [vmem:[%s21118_s10 + $0x60] sm:$0xff] }
 0xfe4   :  { %v6872_v26 = vsub.f32 %v17713_v30, %v6794_v35  ;;  %9031 = vperm.xlu0 %13515, %v8950_v3   ;;  %9016 = vperm.xlu1 %13516, %v8947_v44   ;;  %v11648_v3 = vld [vmem:[%s21115_s3 + $0x380] sm:$0xff] }
 0xfe5   :  { %v7243_v63 = vsel %vm1461_vm7, %v7223_v32, %v7224_v0  ;;  %v7068_v16 = vadd.f32 %v11683_v40, %v6989_v50  ;;  %v7145_v7 = vsel %vm1362_vm6, %v7125_v20, %v7126_v24  ;;  %v11646_v20 = vld [vmem:[%s21115_s3 + $0x370] sm:$0xff]  ;;  %v8949_v40 = vld [vmem:[%s21118_s10 + $0x48] sm:$0xff]  ;;  %v11647_v50 = vld [vmem:[%s21115_s3 + $0x378] sm:$0xff] }
 0xfe6   :  { %v6911_v52 = vmul.f32 %v6872_v26, %v6796_v9  ;;  %v6800_v29 = vpop.f32.mrb[104].mxu0  ;;  %v7188_v30 = vpack.c.bf16 %v7145_v7, %v7146_v49 }
 0xfe7   :  { %v7127_v62 = vrot.slane %v7068_v16, 1  ;;  %v7225_v5 = vrot.slane %v7068_v16, 2  ;;  %v6873_v60 = vsub.f32 %v17729_v41, %v6800_v29  ;;  %v6802_v48 = vpop.f32.mrb[105].mxu0 }
 0xfe8   :  { %v6990_v32 = vmul.f32 %v11645_v38, %v6911_v52  ;;  %7936 = vmatprep.mubr.bf16.mxu1 %v7188_v30  ;;  %8372 = vmatprep.mubr.bf16.mxu0 %v7188_v30 }
 0xfe9   :  { %v7242_v8 = vsel %vm1461_vm7, %v7224_v0, %v7225_v5  ;;  %v6912_v45 = vmul.f32 %v6873_v60, %v6802_v48  ;;  %v7144_v12 = vsel %vm1362_vm6, %v7126_v24, %v7127_v62  ;;  %9041 = vperm.xlu0 %13515, %v8952_v2   ;;  %9026 = vperm.xlu1 %13516, %v8949_v40  }
 0xfea   :  { %v18723_v41 = vpack.c.bf16 %v7242_v8, %v7243_v63  ;;  %v7069_v43 = vadd.f32 %v11684_v28, %v6990_v32  ;;  %v6806_v1 = vpop.f32.mrb[106].mxu0  ;;  %v8951_v32 = vld [vmem:[%s21118_s10 + $0x58] sm:$0xff]  ;;  %v8956_v8 = vld [vmem:[%s21118_s10 + $0x80] sm:$0xff] }
 0xfeb   :  { %v6991_v49 = vmul.f32 %v11646_v20, %v6912_v45  ;;  %7937 = vmatmul.mubr.bf16.gmra.mrb[100].mxu1 %v18654_v18  ;;  %8373 = vmatmul.mubr.bf16.gmra.mrb[176].mxu0 %v18654_v18  ;;  %v6874_v56 = vsub.f32 %v17731_v6, %v6806_v1  ;;  %v6808_v36 = vpop.f32.mrb[107].mxu0  ;;  %v11686_v6 = vld [vmem:[%s21116_s4 + $0x378] sm:$0xff] }
 0xfec   :  { %v18737_v35 = vpack.c.bf16 %v7069_v43, %v7068_v16  ;;  %v7128_v24 = vrot.slane %v7069_v43, 1  ;;  %v7226_v0 = vrot.slane %v7069_v43, 2  ;;  %v8954_v16 = vld [vmem:[%s21118_s10 + $0x70] sm:$0xff] }
 0xfed   :  { %v7070_v9 = vadd.f32 %v11685_v54, %v6991_v49  ;;  %v6913_v26 = vmul.f32 %v6874_v56, %v6808_v36  ;;  %9051 = vperm.xlu0 %13515, %v8954_v16   ;;  %9036 = vperm.xlu1 %13516, %v8951_v32   ;;  %v11649_v36 = vld [vmem:[%s21115_s3 + $0x388] sm:$0xff]  ;;  %v11650_v16 = vld [vmem:[%s21115_s3 + $0x390] sm:$0xff] }
 0xfee   :  { %v6812_v18 = vpop.f32.mrb[108].mxu0  ;;  %v7143_v14 = vsel %vm1362_vm6, %v7127_v62, %v7128_v24  ;;  %v7241_v63 = vsel %vm1461_vm7, %v7225_v5, %v7226_v0 }
 0xfef   :  { %v7129_v38 = vrot.slane %v7070_v9, 1  ;;  %v7227_v7 = vrot.slane %v7070_v9, 2  ;;  %v6992_v52 = vmul.f32 %v11647_v50, %v6913_v26  ;;  %v6875_v29 = vsub.f32 %v17751_v15, %v6812_v18  ;;  %v6814_v30 = vpop.f32.mrb[109].mxu0  ;;  %v11687_v15 = vld [vmem:[%s21116_s4 + $0x380] sm:$0xff] }
 0xff0   :  { %v7189_v28 = vpack.c.bf16 %v7143_v14, %v7144_v12 }
 0xff1   :  { %v7071_v60 = vadd.f32 %v11686_v6, %v6992_v52  ;;  %v6914_v62 = vmul.f32 %v6875_v29, %v6814_v30  ;;  %v7142_v5 = vsel %vm1362_vm6, %v7128_v24, %v7129_v38  ;;  %v7240_v48 = vsel %vm1461_vm7, %v7226_v0, %v7227_v7  ;;  %9061 = vperm.xlu0 %13515, %v8956_v8   ;;  %v11688_v6 = vld [vmem:[%s21116_s4 + $0x388] sm:$0xff]  ;;  %v11689_v30 = vld [vmem:[%s21116_s4 + $0x390] sm:$0xff]  ;;  %v11651_v8 = vld [vmem:[%s21115_s3 + $0x398] sm:$0xff] }
 0xff2   :  { %7946 = vmatprep.mubr.bf16.mxu1 %v7189_v28  ;;  %8380 = vmatprep.mubr.bf16.mxu0 %v7189_v28  ;;  %v6818_v20 = vpop.f32.mrb[110].mxu0  ;;  %v18766_v44 = vpack.c.bf16 %v7240_v48, %v7241_v63  ;;  %v8955_v28 = vld [vmem:[%s21118_s10 + $0x78] sm:$0xff] }
 0xff3   :  { %v18771_v45 = vpack.c.bf16 %v7071_v60, %v7070_v9  ;;  %v7130_v12 = vrot.slane %v7071_v60, 1  ;;  %v7228_v43 = vrot.slane %v7071_v60, 2  ;;  %v6993_v54 = vmul.f32 %v11648_v3, %v6914_v62  ;;  %7947 = vmatmul.mubr.bf16.gmra.mrb[104].mxu1 %v18691_v59  ;;  %8381 = vmatmul.mubr.bf16.gmra.mrb[180].mxu0 %v18691_v59  ;;  %v6820_v1 = vpop.f32.mrb[111].mxu0  ;;  %v8958_v59 = vld [vmem:[%s21118_s10 + $0x90] sm:$0xff]  ;;  %v8960_v60 = vld [vmem:[%s21118_s10 + $0xa0] sm:$0xff] }
 0xff4   :  { %v6876_v2 = vsub.f32 %v17754_v34, %v6818_v20  ;;  %v8953_v34 = vld [vmem:[%s21118_s10 + $0x68] sm:$0xff] }
 0xff5   :  { %v7239_v49 = vsel %vm1461_vm7, %v7227_v7, %v7228_v43  ;;  %v7072_v56 = vadd.f32 %v11687_v15, %v6993_v54  ;;  %v7141_v40 = vsel %vm1362_vm6, %v7129_v38, %v7130_v12  ;;  %9046 = vperm.xlu1 %13516, %v8953_v34   ;;  %9071 = vperm.xlu0 %13515, %v8958_v59   ;;  %v11690_v54 = vld [vmem:[%s21116_s4 + $0x398] sm:$0xff] }
 0xff6   :  { %v6915_v24 = vmul.f32 %v6876_v2, %v6820_v1  ;;  %v6824_v0 = vpop.f32.mrb[112].mxu0  ;;  %v7190_v50 = vpack.c.bf16 %v7141_v40, %v7142_v5  ;;  %v8957_v2 = vld [vmem:[%s21118_s10 + $0x88] sm:$0xff] }
 0xff7   :  { %v7131_v9 = vrot.slane %v7072_v56, 1  ;;  %v7229_v26 = vrot.slane %v7072_v56, 2  ;;  %v6877_v18 = vsub.f32 %v17775_v4, %v6824_v0  ;;  %v6826_v14 = vpop.f32.mrb[113].mxu0  ;;  %v11652_v0 = vld [vmem:[%s21115_s3 + $0x3a0] sm:$0xff] }
 0xff8   :  { %v6994_v63 = vmul.f32 %v11649_v36, %v6915_v24  ;;  %7956 = vmatprep.mubr.bf16.mxu1 %v7190_v50  ;;  %8388 = vmatprep.mubr.bf16.mxu0 %v7190_v50 }
 0xff9   :  { %v7238_v38 = vsel %vm1461_vm7, %v7228_v43, %v7229_v26  ;;  %v6916_v7 = vmul.f32 %v6877_v18, %v6826_v14  ;;  %v7140_v52 = vsel %vm1362_vm6, %v7130_v12, %v7131_v9  ;;  %9056 = vperm.xlu1 %13516, %v8955_v28   ;;  %9081 = vperm.xlu0 %13515, %v8960_v60   ;;  %v8959_v14 = vld [vmem:[%s21118_s10 + $0x98] sm:$0xff]  ;;  %v8962_v28 = vld [vmem:[%s21118_s10 + $0xb0] sm:$0xff] }
 0xffa   :  { %v18800_v29 = vpack.c.bf16 %v7238_v38, %v7239_v49  ;;  %v7073_v4 = vadd.f32 %v11688_v6, %v6994_v63  ;;  %v6830_v3 = vpop.f32.mrb[114].mxu0  ;;  %v8977_v6 = vld [vmem:[%s21118_s10 + $0x128] sm:$0xff] }
 0xffb   :  { %v6995_v62 = vmul.f32 %v11650_v16, %v6916_v7  ;;  %7957 = vmatmul.mubr.bf16.gmra.mrb[108].mxu1 %v18737_v35  ;;  %8389 = vmatmul.mubr.bf16.gmra.mrb[184].mxu0 %v18737_v35  ;;  %v6878_v5 = vsub.f32 %v17777_v55, %v6830_v3  ;;  %v6832_v48 = vpop.f32.mrb[115].mxu0 }
 0xffc   :  { %v7094_v32 = vpack.c.bf16 %v7073_v4, %v7072_v56  ;;  %v7132_v15 = vrot.slane %v7073_v4, 1  ;;  %v7230_v20 = vrot.slane %v7073_v4, 2 }
 0xffd   :  { %v7074_v12 = vadd.f32 %v11689_v30, %v6995_v62  ;;  %v6917_v43 = vmul.f32 %v6878_v5, %v6832_v48  ;;  %9066 = vperm.xlu1 %13516, %v8957_v2   ;;  %9166 = vperm.xlu0 %13515, %v8977_v6   ;;  %v8968_v2 = vld [vmem:[%s21118_s10 + $0xe0] sm:$0xff] }
 0xffe   :  { %v6836_v1 = vpop.f32.mrb[116].mxu0  ;;  %v7139_v55 = vsel %vm1362_vm6, %v7131_v9, %v7132_v15  ;;  %v7237_v35 = vsel %vm1461_vm7, %v7229_v26, %v7230_v20 }
 0xfff   :  { %v7133_v49 = vrot.slane %v7074_v12, 1  ;;  %v7231_v56 = vrot.slane %v7074_v12, 2  ;;  %v6996_v36 = vmul.f32 %v11651_v8, %v6917_v43  ;;  %v6879_v40 = vsub.f32 %v17783_v25, %v6836_v1  ;;  %v6838_v24 = vpop.f32.mrb[117].mxu0  ;;  %v11691_v25 = vld [vmem:[%s21116_s4 + $0x3a0] sm:$0xff] }
0x1000   :  { %v7191_v50 = vpack.c.bf16 %v7139_v55, %v7140_v52  ;;  %v21305_v8 = vrot.slane %v18195_v61, 2  ;;  %v8964_v55 = vld [vmem:[%s21118_s10 + $0xc0] sm:$0xff] }
0x1001   :  { %v7075_v34 = vadd.f32 %v11690_v54, %v6996_v36  ;;  %v6918_v59 = vmul.f32 %v6879_v40, %v6838_v24  ;;  %v7138_v9 = vsel %vm1362_vm6, %v7132_v15, %v7133_v49  ;;  %v7236_v26 = vsel %vm1461_vm7, %v7230_v20, %v7231_v56  ;;  %9076 = vperm.xlu1 %13516, %v8959_v14   ;;  %v8972_v40 = vld [vmem:[%s21118_s10 + $0x100] sm:$0xff]  ;;  %v8969_v24 = vld [vmem:[%s21118_s10 + $0xe8] sm:$0xff] }
0x1002   :  { %7966 = vmatprep.mubr.bf16.mxu1 %v7191_v50  ;;  %8396 = vmatprep.mubr.bf16.mxu0 %v7191_v50  ;;  %v18841_v18 = vpack.c.bf16 %v7236_v26, %v7237_v35  ;;  %v21304_v15 = vrot.slane %v18195_v61, 1  ;;  %v8978_v61 = vld [vmem:[%s21118_s10 + $0x130] sm:$0xff]  ;;  %v8963_v35 = vld [vmem:[%s21118_s10 + $0xb8] sm:$0xff] }
0x1003   :  { %v7095_v63 = vpack.c.bf16 %v7075_v34, %v7074_v12  ;;  %v7134_v16 = vrot.slane %v7075_v34, 1  ;;  %v7232_v38 = vrot.slane %v7075_v34, 2  ;;  %v6997_v7 = vmul.f32 %v11652_v0, %v6918_v59  ;;  %7967 = vmatmul.mubr.bf16.gmra.mrb[112].mxu1 %v18771_v45  ;;  %8397 = vmatmul.mubr.bf16.gmra.mrb[188].mxu0 %v18771_v45  ;;  %v8961_v45 = vld [vmem:[%s21118_s10 + $0xa8] sm:$0xff]  ;;  %v8974_v0 = vld [vmem:[%s21118_s10 + $0x110] sm:$0xff]  ;;  %v8971_v50 = vld [vmem:[%s21118_s10 + $0xf8] sm:$0xff] }
0x1004   :  { %9091 = vperm.xlu0 %13515, %v8962_v28   ;;  %v8976_v34 = vld [vmem:[%s21118_s10 + $0x120] sm:$0xff]  ;;  %v8973_v59 = vld [vmem:[%s21118_s10 + $0x108] sm:$0xff] }
0x1005   :  { %v7235_v52 = vsel %vm1461_vm7, %v7231_v56, %v7232_v38  ;;  %v7076_v4 = vadd.f32 %v11691_v25, %v6997_v7  ;;  %v7137_v30 = vsel %vm1362_vm6, %v7133_v49, %v7134_v16  ;;  %9086 = vperm.xlu1 %13516, %v8961_v45   ;;  %v8965_v49 = vld [vmem:[%s21118_s10 + $0xc8] sm:$0xff]  ;;  %v8970_v56 = vld [vmem:[%s21118_s10 + $0xf0] sm:$0xff] }
0x1006   :  { %v7192_v3 = vpack.c.bf16 %v7137_v30, %v7138_v9  ;;  %v8975_v9 = vld [vmem:[%s21118_s10 + $0x118] sm:$0xff]  ;;  %v13816_v28 = vld [vmem:[%s21119_s8 + $0x24] ss:$8 sps:$4 sm:$0xff]  }
0x1007   :  { %v7135_v60 = vrot.slane %v7076_v4, 1  ;;  %v7233_v62 = vrot.slane %v7076_v4, 2  ;;  %v7096_v36 = vpack.c.bf16 %v7076_v4, %v7076_v4  ;;  %v13813_v4 = vld [vmem:[%s21119_s8 + $0x14] ss:$8 sps:$4 sm:$0xff]  }
0x1008   :  { %7976 = vmatprep.mubr.bf16.mxu1 %v7192_v3  ;;  %8404 = vmatprep.mubr.bf16.mxu0 %v7192_v3 }
0x1009   :  { %v7234_v5 = vsel %vm1461_vm7, %v7232_v38, %v7233_v62  ;;  %v7136_v48 = vsel %vm1362_vm6, %v7134_v16, %v7135_v60  ;;  %v7174_v20 = vsel %vm1362_vm6, %v7135_v60, %v21304_v15  ;;  %v7272_v12 = vsel %vm1461_vm7, %v7233_v62, %v21305_v8  ;;  %9101 = vperm.xlu0 %13515, %v8964_v55   ;;  %v13810_v38 = vld [vmem:[%s21119_s8 + $0x4] ss:$8 sps:$4 sm:$0xff]   ;;  %v13814_v62 = vld [vmem:[%s21119_s8 + $0x20] ss:$8 sps:$4 sm:$0xff]   ;;  %v13823_v55 = vld [vmem:[%s21119_s8 + $0x50] ss:$8 sps:$4 sm:$0xff]  }
0x100a   :  { %v18870_v43 = vpack.c.bf16 %v7234_v5, %v7235_v52  ;;  %v7193_v54 = vpack.c.bf16 %v7174_v20, %v7136_v48  ;;  %v18873_v1 = vpack.c.bf16 %v18227_v33, %v7272_v12  ;;  %9171 = vperm.xlu1 %13516, %v8978_v61   ;;  %v8966_v33 = vld [vmem:[%s21118_s10 + $0xd0] sm:$0xff]  ;;  %9574 = vmatprep.subr.bf16.mxu1 %v13810_v38  ;;  %v13822_v20 = vld [vmem:[%s21119_s8 + $0x44] ss:$8 sps:$4 sm:$0xff]  }
0x100b   :  { %7977 = vmatmul.mubr.bf16.gmra.mrb[116].mxu1 %v7094_v32  ;;  %8405 = vmatmul.mubr.bf16.gmra.mrb[192].mxu0 %v7094_v32  ;;  %v7194_v32 = vpack.c.bf16 %v18218_v39, %v18218_v39  ;;  %v8967_v39 = vld [vmem:[%s21118_s10 + $0xd8] sm:$0xff] }
0x100c   :  { %7986 = vmatprep.mubr.bf16.mxu1 %v7193_v54  ;;  %8412 = vmatprep.mubr.bf16.mxu0 %v7193_v54  ;;  %v13817_v5 = vld [vmem:[%s21119_s8 + $0x30] ss:$8 sps:$4 sm:$0xff]   ;;  %v13825_v54 = vld [vmem:[%s21119_s8 + $0x54] ss:$8 sps:$4 sm:$0xff]  }
0x100d   :  { %9111 = vperm.xlu0 %13515, %v8966_v33  }
0x100e   :  { %9096 = vperm.xlu1 %13516, %v8963_v35   ;;  %v13828_v35 = vld [vmem:[%s21119_s8 + $0x64] ss:$8 sps:$4 sm:$0xff]  }
0x1011   :  { %9121 = vperm.xlu0 %13515, %v8968_v2  }
0x1012   :  { %9106 = vperm.xlu1 %13516, %v8965_v49   ;;  %v13831_v49 = vld [vmem:[%s21119_s8 + $0x74] ss:$8 sps:$4 sm:$0xff]  }
0x1013   :  { %7987 = vmatmul.mubr.bf16.gmra.mrb[120].mxu1 %v7095_v63  ;;  %8413 = vmatmul.mubr.bf16.gmra.mrb[196].mxu0 %v7095_v63  ;;  %v18974_v63 = vpack.c.bf16 %v18237_v51, %v18237_v51  ;;  %v13808_v51 = vld [vmem:[%s21119_s8] ss:$8 sps:$4 sm:$0xff]  }
0x1014   :  { %7996 = vmatprep.mubr.bf16.mxu1 %v7194_v32  ;;  %8420 = vmatprep.mubr.bf16.mxu0 %v7194_v32 }
0x1015   :  { %9131 = vperm.xlu0 %13515, %v8970_v56   ;;  %v13829_v56 = vld [vmem:[%s21119_s8 + $0x70] ss:$8 sps:$4 sm:$0xff]  }
0x1016   :  { %9116 = vperm.xlu1 %13516, %v8967_v39  }
0x1019   :  { %9141 = vperm.xlu0 %13515, %v8972_v40  }
0x101a   :  { %9126 = vperm.xlu1 %13516, %v8969_v24  }
0x101b   :  { %7997 = vmatmul.mubr.bf16.gmra.mrb[124].mxu1 %v7096_v36  ;;  %8421 = vmatmul.mubr.bf16.gmra.mrb[200].mxu0 %v7096_v36 }
0x101c   :  { %12603 = vmatprep.mubr.bf16.mxu0 %v18284_v23  ;;  %8037 = vmatprep.mubr.bf16.mxu1 %v21301_v53 }
0x101d   :  { %9151 = vperm.xlu0 %13515, %v8974_v0  }
0x101e   :  { %9136 = vperm.xlu1 %13516, %v8971_v50  }
0x1021   :  { %9161 = vperm.xlu0 %13515, %v8976_v34  }
0x1022   :  { %9146 = vperm.xlu1 %13516, %v8973_v59  }
0x1023   :  { %8038 = vmatmul.mubr.bf16.vlgmr.msra.gmra.mrb[44].mxu1 %v18284_v23  ;;  %12604 = vmatmul.mubr.bf16.vlgmr.msra.gmra.mrb[204].mxu0 %v18322_v37 }
0x1024   :  { %12607 = vmatprep.mubr.bf16.mxu0 %v18378_v11  ;;  %8047 = vmatprep.mubr.bf16.mxu1 %v21301_v53 }
0x1025   :  { %9575 = vmatpush1.bf16.msra.mxu1 %v13808_v51 }
0x1026   :  { %9156 = vperm.xlu1 %13516, %v8975_v9   ;;  %9576 = vmatprep.subr.bf16.mxu1 %v13813_v4 }
0x102b   :  { %8048 = vmatmul.mubr.bf16.gmra.mrb[48].mxu1 %v18322_v37  ;;  %12608 = vmatmul.mubr.bf16.gmra.mrb[208].mxu0 %v18416_v57 }
0x102c   :  { %12611 = vmatprep.mubr.bf16.mxu0 %v18461_v31  ;;  %8057 = vmatprep.mubr.bf16.mxu1 %v21301_v53 }
0x1033   :  { %8058 = vmatmul.mubr.bf16.gmra.mrb[52].mxu1 %v18378_v11  ;;  %12612 = vmatmul.mubr.bf16.gmra.mrb[212].mxu0 %v18484_v19 }
0x1034   :  { %12615 = vmatprep.mubr.bf16.mxu0 %v18508_v10  ;;  %8067 = vmatprep.mubr.bf16.mxu1 %v21301_v53 }
0x103b   :  { %8068 = vmatmul.mubr.bf16.gmra.mrb[56].mxu1 %v18416_v57  ;;  %12616 = vmatmul.mubr.bf16.gmra.mrb[216].mxu0 %v18534_v13 }
0x103c   :  { %12619 = vmatprep.mubr.bf16.mxu0 %v18558_v22  ;;  %8077 = vmatprep.mubr.bf16.mxu1 %v21301_v53 }
0x1043   :  { %8078 = vmatmul.mubr.bf16.gmra.mrb[60].mxu1 %v18461_v31  ;;  %12620 = vmatmul.mubr.bf16.gmra.mrb[220].mxu0 %v18583_v27 }
0x1044   :  { %12623 = vmatprep.mubr.bf16.mxu0 %v18615_v42  ;;  %8087 = vmatprep.mubr.bf16.mxu1 %v21301_v53 }
0x104b   :  { %8088 = vmatmul.mubr.bf16.gmra.mrb[64].mxu1 %v18484_v19  ;;  %12624 = vmatmul.mubr.bf16.gmra.mrb[224].mxu0 %v18646_v58 }
0x104c   :  { %12627 = vmatprep.mubr.bf16.mxu0 %v18689_v47  ;;  %8097 = vmatprep.mubr.bf16.mxu1 %v21301_v53 }
0x1053   :  { %8098 = vmatmul.mubr.bf16.gmra.mrb[68].mxu1 %v18508_v10  ;;  %12628 = vmatmul.mubr.bf16.gmra.mrb[228].mxu0 %v18723_v41 }
0x1054   :  { %12631 = vmatprep.mubr.bf16.mxu0 %v18766_v44  ;;  %v18951_v23 = vpop.f32.mrb[120].mxu0  ;;  %8107 = vmatprep.mubr.bf16.mxu1 %v21301_v53 }
0x1055   :  { %v8272_v37 = vpop.f32.mrb[121].mxu0 }
0x1056   :  { %v18954_v11 = vpop.f32.mrb[122].mxu0 }
0x1057   :  { %v8275_v57 = vpop.f32.mrb[123].mxu0 }
0x105b   :  { %8108 = vmatmul.mubr.bf16.gmra.mrb[72].mxu1 %v18534_v13  ;;  %12632 = vmatmul.mubr.bf16.gmra.mrb[232].mxu0 %v18800_v29 }
0x105c   :  { %12635 = vmatprep.mubr.bf16.mxu0 %v18841_v18  ;;  %8117 = vmatprep.mubr.bf16.mxu1 %v21301_v53 }
0x105d   :  { %v18960_v31 = vpop.f32.mrb[124].mxu0 }
0x105e   :  { %v8280_v19 = vpop.f32.mrb[125].mxu0 }
0x105f   :  { %v18962_v10 = vpop.f32.mrb[126].mxu0 }
0x1060   :  { %v8283_v26 = vpop.f32.mrb[127].mxu0 }
0x1063   :  { %8118 = vmatmul.mubr.bf16.gmra.mrb[76].mxu1 %v18558_v22  ;;  %12636 = vmatmul.mubr.bf16.gmra.mrb[236].mxu0 %v18870_v43 }
0x1064   :  { %12639 = vmatprep.mubr.bf16.mxu0 %v18873_v1  ;;  %8127 = vmatprep.mubr.bf16.mxu1 %v21301_v53 }
0x1065   :  { %v18968_v13 = vpop.f32.mrb[128].mxu0 }
0x1066   :  { %v8288_v6 = vpop.f32.mrb[129].mxu0 }
0x1067   :  { %v18970_v25 = vpop.f32.mrb[130].mxu0 }
0x1068   :  { %v8291_v14 = vpop.f32.mrb[131].mxu0 }
0x106b   :  { %8128 = vmatmul.mubr.bf16.gmra.mrb[80].mxu1 %v18583_v27  ;;  %12640 = vmatmul.mubr.bf16.gmra.mrb[240].mxu0 %v18974_v63  ;;  %v13811_v27 = vld [vmem:[%s21119_s8 + $0x10] ss:$8 sps:$4 sm:$0xff]  }
0x106c   :  { %8137 = vmatprep.mubr.bf16.mxu1 %v21301_v53  ;;  %9577 = vmatpush1.bf16.msra.mxu1 %v13811_v27 }
0x106d   :  { %v18979_v22 = vpop.f32.mrb[132].mxu0  ;;  %9578 = vmatprep.subr.bf16.mxu1 %v13816_v28 }
0x106e   :  { %v8296_v16 = vpop.f32.mrb[133].mxu0 }
0x106f   :  { %v18984_v7 = vpop.f32.mrb[134].mxu0 }
0x1070   :  { %v8299_v52 = vpop.f32.mrb[135].mxu0  ;;  %9579 = vmatpush1.bf16.msra.mxu1 %v13814_v62 }
0x1073   :  { %8138 = vmatmul.mubr.bf16.gmra.mrb[88].mxu1 %v18615_v42  ;;  %v13819_v42 = vld [vmem:[%s21119_s8 + $0x34] ss:$8 sps:$4 sm:$0xff]  }
0x1074   :  { %8147 = vmatprep.mubr.bf16.mxu1 %v21301_v53  ;;  %9580 = vmatprep.subr.bf16.mxu1 %v13819_v42 }
0x1075   :  { %v18997_v30 = vpop.f32.mrb[136].mxu0  ;;  %9581 = vmatpush1.bf16.msra.mxu1 %v13817_v5 }
0x1076   :  { %v8304_v3 = vpop.f32.mrb[137].mxu0  ;;  %9582 = vmatprep.subr.bf16.mxu1 %v13822_v20 }
0x1077   :  { %v19002_v60 = vpop.f32.mrb[138].mxu0 }
0x1078   :  { %v8307_v45 = vpop.f32.mrb[139].mxu0 }
0x107b   :  { %8148 = vmatmul.mubr.bf16.gmra.mrb[92].mxu1 %v18646_v58  ;;  %v13820_v58 = vld [vmem:[%s21119_s8 + $0x40] ss:$8 sps:$4 sm:$0xff]  }
0x107c   :  { %8157 = vmatprep.mubr.bf16.mxu1 %v21301_v53  ;;  %9583 = vmatpush1.bf16.msra.mxu1 %v13820_v58 }
0x107d   :  { %v19015_v48 = vpop.f32.mrb[140].mxu0  ;;  %9584 = vmatprep.subr.bf16.mxu1 %v13825_v54 }
0x107e   :  { %v8312_v15 = vpop.f32.mrb[141].mxu0 }
0x107f   :  { %v19020_v8 = vpop.f32.mrb[142].mxu0 }
0x1080   :  { %v8315_v12 = vpop.f32.mrb[143].mxu0  ;;  %9585 = vmatpush1.bf16.msra.mxu1 %v13823_v55 }
0x1081   :  { %9586 = vmatprep.subr.bf16.mxu1 %v13828_v35 }
0x1083   :  { %8158 = vmatmul.mubr.bf16.gmra.mrb[96].mxu1 %v18689_v47  ;;  %v13826_v47 = vld [vmem:[%s21119_s8 + $0x60] ss:$8 sps:$4 sm:$0xff]  }
0x1084   :  { %8167 = vmatprep.mubr.bf16.mxu1 %v21301_v53  ;;  %9587 = vmatpush1.bf16.msra.mxu1 %v13826_v47 }
0x1085   :  { %v19033_v61 = vpop.f32.mrb[144].mxu0  ;;  %9588 = vmatprep.subr.bf16.mxu1 %v13831_v49 }
0x1086   :  { %v8320_v33 = vpop.f32.mrb[145].mxu0 }
0x1087   :  { %v19038_v32 = vpop.f32.mrb[146].mxu0 }
0x1088   :  { %v8323_v2 = vpop.f32.mrb[147].mxu0  ;;  %9589 = vmatpush1.bf16.msra.mxu1 %v13829_v56  ;;  %v13832_v56 = vld [vmem:[%s21120_s7] sm:$0xff]  }
0x1089   :  { %10028 = vmatpush1.bf16.msra.mxu0 %v13832_v56 }
0x108a   :  { %10029 = vmatprep.subr.bf16.mxu0 %v21301_v53 }
0x108b   :  { %8168 = vmatmul.mubr.bf16.gmra.mrb[100].mxu1 %v18723_v41 }
0x108c   :  { %8177 = vmatprep.mubr.bf16.mxu1 %v21301_v53 }
0x108d   :  { %v19051_v39 = vpop.f32.mrb[148].mxu0 }
0x108e   :  { %v8328_v36 = vpop.f32.mrb[149].mxu0 }
0x108f   :  { %v19053_v40 = vpop.f32.mrb[150].mxu0 }
0x1090   :  { %v8331_v24 = vpop.f32.mrb[151].mxu0 }
0x1093   :  { %8178 = vmatmul.mubr.bf16.gmra.mrb[104].mxu1 %v18766_v44 }
0x1094   :  { %8187 = vmatprep.mubr.bf16.mxu1 %v21301_v53 }
0x1096   :  { %v19057_v0 = vpop.f32.mrb[152].mxu0 }
0x1097   :  { %v8336_v41 = vpop.f32.mrb[153].mxu0 }
0x1098   :  { %v19059_v50 = vpop.f32.mrb[154].mxu0 }
0x1099   :  { %v8339_v34 = vpop.f32.mrb[155].mxu0 }
0x109a   :  { %v13833_v34 = vld [vmem:[%s21120_s7 + $0x8] sm:$0xff]  }
0x109b   :  { %8188 = vmatmul.mubr.bf16.gmra.mrb[108].mxu1 %v18800_v29  ;;  %10030 = vmatpush1.bf16.msra.mxu0 %v13833_v34 }
0x109c   :  { %8197 = vmatprep.mubr.bf16.mxu1 %v21301_v53  ;;  %10031 = vmatprep.subr.bf16.mxu0 %v21301_v53 }
0x109e   :  { %v19063_v59 = vpop.f32.mrb[156].mxu0 }
0x109f   :  { %v8344_v9 = vpop.f32.mrb[157].mxu0 }
0x10a0   :  { %v19065_v37 = vpop.f32.mrb[158].mxu0 }
0x10a1   :  { %v8347_v57 = vpop.f32.mrb[159].mxu0 }
0x10a3   :  { %8198 = vmatmul.mubr.bf16.gmra.mrb[112].mxu1 %v18841_v18 }
0x10a4   :  { %8207 = vmatprep.mubr.bf16.mxu1 %v21301_v53 }
0x10a6   :  { %v19069_v44 = vpop.f32.mrb[160].mxu0 }
0x10a7   :  { %v8352_v19 = vpop.f32.mrb[161].mxu0 }
0x10a8   :  { %v19071_v26 = vpop.f32.mrb[162].mxu0  ;;  %v13834_v19 = vld [vmem:[%s21120_s7 + $0x10] sm:$0xff]  }
0x10a9   :  { %v8355_v6 = vpop.f32.mrb[163].mxu0  ;;  %10032 = vmatpush1.bf16.msra.mxu0 %v13834_v19 }
0x10aa   :  { %10033 = vmatprep.subr.bf16.mxu0 %v21301_v53 }
0x10ab   :  { %8208 = vmatmul.mubr.bf16.gmra.mrb[116].mxu1 %v18870_v43 }
0x10ac   :  { %8217 = vmatprep.mubr.bf16.mxu1 %v21301_v53 }
0x10ae   :  { %v19075_v29 = vpop.f32.mrb[164].mxu0 }
0x10af   :  { %v8360_v14 = vpop.f32.mrb[165].mxu0 }
0x10b0   :  { %v19077_v16 = vpop.f32.mrb[166].mxu0 }
0x10b1   :  { %v8363_v38 = vpop.f32.mrb[167].mxu0 }
0x10b3   :  { %8218 = vmatmul.mubr.bf16.gmra.mrb[120].mxu1 %v18873_v1 }
0x10b4   :  { %8227 = vmatprep.mubr.bf16.mxu1 %v21301_v53 }
0x10b6   :  { %v19081_v18 = vpop.f32.mrb[172].mxu0 }
0x10b7   :  { %v8368_v51 = vpop.f32.mrb[173].mxu0 }
0x10b8   :  { %v19083_v52 = vpop.f32.mrb[174].mxu0 }
0x10b9   :  { %v8371_v27 = vpop.f32.mrb[175].mxu0 }
0x10bb   :  { %8228 = vmatmul.mubr.bf16.gmra.mrb[128].mxu1 %v18974_v63 }
0x10bc   :  { %9606 = vmatprep.mubr.bf16.mxu1 %v21301_v53 }
0x10be   :  { %v19087_v43 = vpop.f32.mrb[176].mxu0 }
0x10bf   :  { %v8376_v4 = vpop.f32.mrb[177].mxu0 }
0x10c0   :  { %v19089_v3 = vpop.f32.mrb[178].mxu0 }
0x10c1   :  { %v8379_v28 = vpop.f32.mrb[179].mxu0 }
0x10c2   :  { %v13835_v28 = vld [vmem:[%s21120_s7 + $0x18] sm:$0xff]  }
0x10c3   :  { %10034 = vmatpush1.bf16.msra.mxu0 %v13835_v28 }
0x10c4   :  { %10035 = vmatprep.subr.bf16.mxu0 %v21301_v53 }
0x10c6   :  { %v19091_v62 = vpop.f32.mrb[180].mxu0 }
0x10c7   :  { %v8384_v1 = vpop.f32.mrb[181].mxu0 }
0x10c8   :  { %v19093_v45 = vpop.f32.mrb[182].mxu0 }
0x10c9   :  { %v8387_v42 = vpop.f32.mrb[183].mxu0 }
0x10ce   :  { %v19095_v5 = vpop.f32.mrb[184].mxu0 }
0x10cf   :  { %v8392_v15 = vpop.f32.mrb[185].mxu0 }
0x10d0   :  { %v19097_v20 = vpop.f32.mrb[186].mxu0  ;;  %v13836_v15 = vld [vmem:[%s21120_s7 + $0x20] sm:$0xff]  }
0x10d1   :  { %v8395_v63 = vpop.f32.mrb[187].mxu0  ;;  %10036 = vmatpush1.bf16.msra.mxu0 %v13836_v15 }
0x10d2   :  { %10037 = vmatprep.subr.bf16.mxu0 %v21301_v53 }
0x10d6   :  { %v19099_v58 = vpop.f32.mrb[188].mxu0 }
0x10d7   :  { %v8400_v12 = vpop.f32.mrb[189].mxu0 }
0x10d8   :  { %v19101_v54 = vpop.f32.mrb[190].mxu0 }
0x10d9   :  { %v8403_v55 = vpop.f32.mrb[191].mxu0 }
0x10de   :  { %v19103_v33 = vpop.f32.mrb[192].mxu0 }
0x10df   :  { %v8408_v35 = vpop.f32.mrb[193].mxu0 }
0x10e0   :  { %v19105_v47 = vpop.f32.mrb[194].mxu0 }
0x10e1   :  { %v8411_v2 = vpop.f32.mrb[195].mxu0 }
0x10e6   :  { %v19107_v49 = vpop.f32.mrb[196].mxu0 }
0x10e7   :  { %v8416_v36 = vpop.f32.mrb[197].mxu0 }
0x10e8   :  { %v19112_v24 = vpop.f32.mrb[198].mxu0 }
0x10e9   :  { %21306 = vst [vmem:[#allocation11_spill] sm:$0xff] %v19112_v24  ;;  %v8419_v41 = vpop.f32.mrb[199].mxu0 }
0x10ee   :  { %v19119_v9 = vpop.f32.mrb[124].mxu1  ;;  %v19121_v57 = vpop.f32.mrb[200].mxu0 }
0x10ef   :  { %21307 = vst [vmem:[#allocation12_spill] sm:$0xff] %v19119_v9  ;;  %v19126_v6 = vpop.f32.mrb[125].mxu1  ;;  %v8424_v14 = vpop.f32.mrb[201].mxu0 }
0x10f0   :  { %21308 = vst [vmem:[#allocation10_spill] sm:$0xff] %v19126_v6  ;;  %v8002_v38 = vpop.f32.mrb[126].mxu1  ;;  %v8425_v51 = vpop.f32.mrb[202].mxu0 }
0x10f1   :  { %v8003_v27 = vpop.f32.mrb[127].mxu1  ;;  %v8426_v4 = vpop.f32.mrb[203].mxu0  ;;  %v13837_v38 = vld [vmem:[%s21120_s7 + $0x28] sm:$0xff]  }
0x10f2   :  { %10038 = vmatpush1.bf16.msra.mxu0 %v13837_v38 }
0x10f3   :  { %10039 = vmatprep.subr.bf16.mxu0 %v21301_v53 }
0x10f6   :  { %v8039_v1 = vpop.f32.mrb[44].mxu1  ;;  %v12605_v42 = vpop.f32.mrb[204].mxu0 }
0x10f7   :  { %v8471_v63 = vadd.f32 %v12605_v42, %v18960_v31  ;;  %v19137_v12 = vpop.f32.mrb[45].mxu1  ;;  %v8462_v55 = vpop.f32.mrb[205].mxu0 }
0x10f8   :  { %21309 = vst [vmem:[#allocation13_spill] sm:$0xff] %v19137_v12  ;;  %v19140_v35 = vadd.f32 %v8462_v55, %v18951_v23  ;;  %v8043_v2 = vpop.f32.mrb[46].mxu1  ;;  %v12606_v56 = vpop.f32.mrb[206].mxu0  ;;  %v21172_v19 = vrot.slane %v19137_v12, 1 }
0x10f9   :  { %v8474_v36 = vadd.f32 %v12606_v56, %v18962_v10  ;;  %v8045_v41 = vpop.f32.mrb[47].mxu1  ;;  %v8465_v34 = vpop.f32.mrb[207].mxu0  ;;  %v8739_v23 = vrot.slane %v8471_v63, 2  ;;  %v19166_v63 = vld [vmem:[%s21117_s6 + $0x2] ss:$0 sm:$0xff] }
0x10fa   :  { %21310 = vst [vmem:[#allocation14_spill] sm:$0xff] %v19140_v35  ;;  %v8621_v14 = vrot.slane %v8045_v41, 1  ;;  %v8466_v31 = vadd.f32 %v8465_v34, %v18954_v11  ;;  %v21171_v27 = vrot.slane %v19140_v35, 2 }
0x10fb   :  { %v8740_v51 = vrot.slane %v8474_v36, 2 }
0x10fc   :  { %v8696_v10 = vsel %vm1362_vm6, %v21172_v19, %v8621_v14  ;;  %v8738_v4 = vrot.slane %v8466_v31, 2 }
0x10fd   :  { %v8811_v28 = vsel %vm1461_vm7, %v8739_v23, %v8740_v51  ;;  %v8698_v42 = vadd.f32 %v8696_v10, %v8039_v1  ;;  %v13838_v1 = vld [vmem:[%s21120_s7 + $0x30] sm:$0xff]  }
0x10fe   :  { %v8812_v11 = vsel %vm1461_vm7, %v8738_v4, %v8739_v23  ;;  %v8813_v15 = vsel %vm1461_vm7, %v21171_v27, %v8738_v4  ;;  %v8049_v55 = vpop.f32.mrb[48].mxu1  ;;  %v12609_v56 = vpop.f32.mrb[208].mxu0  ;;  %10040 = vmatpush1.bf16.msra.mxu0 %v13838_v1 }
0x10ff   :  { %v8815_v36 = vadd.f32 %v8813_v15, %v8698_v42  ;;  %v8487_v41 = vadd.f32 %v12609_v56, %v18979_v22  ;;  %v8051_v34 = vpop.f32.mrb[49].mxu1  ;;  %v8478_v31 = vpop.f32.mrb[209].mxu0  ;;  %10041 = vmatprep.subr.bf16.mxu0 %v21301_v53 }
0x1100   :  { %v8622_v38 = vrot.slane %v8051_v34, 1  ;;  %v8479_v23 = vadd.f32 %v8478_v31, %v18968_v13  ;;  %v8053_v10 = vpop.f32.mrb[50].mxu1  ;;  %v12610_v4 = vpop.f32.mrb[210].mxu0  ;;  %v13839_v13 = vld [vmem:[%s21120_s7 + $0x38] sm:$0xff]  }
0x1101   :  { %v8862_v27 = vadd.f32 %v19166_v63, %v8815_v36  ;;  %v8490_v19 = vadd.f32 %v12610_v4, %v18984_v7  ;;  %v8055_v17 = vpop.f32.mrb[51].mxu1  ;;  %v8481_v35 = vpop.f32.mrb[211].mxu0  ;;  %v8743_v1 = vrot.slane %v8487_v41, 2 }
0x1102   :  { %v8695_v42 = vsel %vm1362_vm6, %v8621_v14, %v8622_v38  ;;  %v8741_v22 = vrot.slane %v8479_v23, 2  ;;  %v8623_v15 = vrot.slane %v8055_v17, 1  ;;  %v8482_v56 = vadd.f32 %v8481_v35, %v18970_v25  ;;  %v8982_v31 = vpop.permute.xlu0 %8981  ;;  %10042 = vmatpush1.bf16.msra.mxu0 %v13839_v13 }
0x1103   :  { %v8699_v34 = vadd.f32 %v8695_v42, %v8043_v2  ;;  %v8744_v36 = vrot.slane %v8490_v19, 2  ;;  %v8901_v7 = vmax.f32 %v8862_v27, 0.0  ;;  %10043 = vmatprep.subr.bf16.mxu0 %v21301_v53 }
0x1104   :  { %v8810_v4 = vsel %vm1461_vm7, %v8740_v51, %v8741_v22  ;;  %v8694_v12 = vsel %vm1362_vm6, %v8622_v38, %v8623_v15  ;;  %v8742_v14 = vrot.slane %v8482_v56, 2 }
0x1105   :  { %v8816_v17 = vadd.f32 %v8812_v11, %v8699_v34  ;;  %v19188_v25 = vsel %vm1461_vm7, %v8743_v1, %v8744_v36  ;;  %v8700_v35 = vadd.f32 %v8694_v12, %v8049_v55  ;;  %v13840_v11 = vld [vmem:[%s21120_s7 + $0x40] sm:$0xff]   ;;  %v19202_v42 = vmul.f32 %v8982_v31, %v8901_v7 }
0x1106   :  { %v19193_v2 = vsel %vm1461_vm7, %v8742_v14, %v8743_v1  ;;  %v8809_v19 = vsel %vm1461_vm7, %v8741_v22, %v8742_v14  ;;  %v8059_v51 = vpop.f32.mrb[52].mxu1  ;;  %v12613_v27 = vpop.f32.mrb[212].mxu0  ;;  %10044 = vmatpush1.bf16.msra.mxu0 %v13840_v11 }
0x1107   :  { %v8863_v41 = vadd.f32 %v19166_v63, %v8816_v17  ;;  %v8817_v38 = vadd.f32 %v8811_v28, %v8700_v35  ;;  %v8503_v12 = vadd.f32 %v12613_v27, %v19015_v48  ;;  %v8061_v55 = vpop.f32.mrb[53].mxu1  ;;  %v8494_v23 = vpop.f32.mrb[213].mxu0  ;;  %10045 = vmatprep.subr.bf16.mxu0 %v21301_v53 }
0x1108   :  { %v8624_v56 = vrot.slane %v8061_v55, 1  ;;  %v8495_v13 = vadd.f32 %v8494_v23, %v18997_v30  ;;  %v19205_v1 = vpop.f32.mrb[54].mxu1  ;;  %v12614_v22 = vpop.f32.mrb[214].mxu0 }
0x1109   :  { %v8902_v34 = vmax.f32 %v8863_v41, 0.0  ;;  %v8864_v14 = vadd.f32 %v19166_v63, %v8817_v38  ;;  %v8747_v17 = vrot.slane %v8503_v12, 2  ;;  %v19210_v28 = vadd.f32 %v12614_v22, %v19020_v8  ;;  %v8065_v48 = vpop.f32.mrb[55].mxu1  ;;  %v8497_v35 = vpop.f32.mrb[215].mxu0  ;;  %v13841_v41 = vld [vmem:[%s21120_s7 + $0x48] sm:$0xff]  }
0x110a   :  { %v8987_v31 = vpop.permute.xlu0 %8986  ;;  %v8693_v30 = vsel %vm1362_vm6, %v8623_v15, %v8624_v56  ;;  %v8745_v7 = vrot.slane %v8495_v13, 2  ;;  %v8625_v27 = vrot.slane %v8065_v48, 1  ;;  %v8498_v11 = vadd.f32 %v8497_v35, %v19002_v60  ;;  %v8992_v23 = vpop.permute.xlu1 %8991  ;;  %10046 = vmatpush1.bf16.msra.mxu0 %v13841_v41 }
0x110b   :  { %v19219_v38 = vmul.f32 %v8987_v31, %v8902_v34  ;;  %v8903_v8 = vmax.f32 %v8864_v14, 0.0  ;;  %v8701_v12 = vadd.f32 %v8693_v30, %v8053_v10  ;;  %v8748_v55 = vrot.slane %v19210_v28, 2  ;;  %10047 = vmatprep.subr.bf16.mxu0 %v21301_v53 }
0x110c   :  { %v19224_v22 = vsel %vm1461_vm7, %v8744_v36, %v8745_v7  ;;  %v8692_v15 = vsel %vm1362_vm6, %v8624_v56, %v8625_v27  ;;  %v8746_v13 = vrot.slane %v8498_v11, 2 }
0x110d   :  { %v19231_v34 = vpack.c.bf16 %v19219_v38, %v19202_v42  ;;  %v19233_v14 = vmul.f32 %v8992_v23, %v8903_v8  ;;  %v8818_v10 = vadd.f32 %v8810_v4, %v8701_v12  ;;  %v19237_v28 = vsel %vm1461_vm7, %v8747_v17, %v8748_v55  ;;  %v13842_v4 = vld [vmem:[%s21120_s7 + $0x50] sm:$0xff]   ;;  %v13844_v8 = vld [vmem:[%s21120_s7 + $0x58] sm:$0xff]  }
0x110e   :  { %v8702_v36 = vadd.f32 %v8692_v15, %v8059_v51  ;;  %v19242_v56 = vsel %vm1461_vm7, %v8746_v13, %v8747_v17  ;;  %v19246_v48 = vsel %vm1461_vm7, %v8745_v7, %v8746_v13  ;;  %v8069_v35 = vpop.f32.mrb[56].mxu1  ;;  %v12617_v31 = vpop.f32.mrb[216].mxu0  ;;  %v9234_v30 = vrot.slane %v19219_v38, 7  ;;  %10048 = vmatpush1.bf16.msra.mxu0 %v13842_v4  ;;  %v13843_v4 = vld [vmem:[%s21120_s7 + $0x80] sm:$0xff]  }
0x110f   :  { %21311 = vst [vmem:[#allocation15_spill] sm:$0xff] %v19231_v34  ;;  %v8865_v11 = vadd.f32 %v19166_v63, %v8818_v10  ;;  %v19254_v51 = vadd.f32 %v12617_v31, %v19051_v39  ;;  %v8071_v41 = vpop.f32.mrb[57].mxu1  ;;  %v8510_v17 = vpop.f32.mrb[217].mxu0  ;;  %9607 = vmatmul.mubr.bf16.vlgmr.msra.gmra.mrb[132].mxu1 %v19231_v34  ;;  %v21312_v39 = vrot.slane %v19202_v42, 7  ;;  %10049 = vmatprep.subr.bf16.mxu0 %v21301_v53 }
0x1110   :  { %v8819_v12 = vadd.f32 %v8809_v19, %v8702_v36  ;;  %v8626_v23 = vrot.slane %v8071_v41, 1  ;;  %v8511_v15 = vadd.f32 %v8510_v17, %v19033_v61  ;;  %v19260_v13 = vpop.f32.mrb[58].mxu1  ;;  %v12618_v60 = vpop.f32.mrb[218].mxu0  ;;  %9616 = vmatprep.mubr.bf16.mxu1 %v21301_v53  ;;  %v21314_v41 = vrot.slane %v19233_v14, 7  ;;  %12643 = vmatprep.subr.bf16.mxu1 %v13843_v4 }
0x1111   :  { %v19267_v10 = vsel %vm9272_vm8, %v21312_v39, %v9234_v30  ;;  %v8904_v31 = vmax.f32 %v8865_v11, 0.0  ;;  %v8751_v7 = vrot.slane %v19254_v51, 2  ;;  %v19271_v19 = vadd.f32 %v12618_v60, %v19053_v40  ;;  %v19273_v36 = vpop.f32.mrb[59].mxu1  ;;  %v8513_v61 = vpop.f32.mrb[219].mxu0  ;;  %12644 = vmatpush3.bf16.msra.mxu1 %v13843_v4 }
0x1112   :  { %21313 = vst [vmem:[#allocation16_spill] sm:$0xff] %v19267_v10  ;;  %v19283_v17 = vsel %vm9272_vm8, %v9234_v30, %v21314_v41  ;;  %v8997_v11 = vpop.permute.xlu1 %8996  ;;  %v8866_v51 = vadd.f32 %v19166_v63, %v8819_v12  ;;  %v8691_v40 = vsel %vm1362_vm6, %v8625_v27, %v8626_v23  ;;  %v8749_v60 = vrot.slane %v8511_v15, 2  ;;  %10050 = vmatpush1.bf16.msra.mxu0 %v13844_v8  ;;  %v13845_v8 = vld [vmem:[%s21120_s7 + $0x88] sm:$0xff]  }
0x1113   :  { %21315 = vst [vmem:[#allocation17_spill] sm:$0xff] %v19283_v17  ;;  %v8627_v39 = vrot.slane %v19273_v36, 1  ;;  %v19292_v34 = vmul.f32 %v8997_v11, %v8904_v31  ;;  %v8703_v6 = vadd.f32 %v8691_v40, %v19205_v1  ;;  %v21177_v30 = vrot.slane %v19271_v19, 2  ;;  %v9002_v36 = vpop.permute.xlu0 %9001  ;;  %10051 = vmatprep.subr.bf16.mxu0 %v21301_v53  ;;  %12645 = vmatprep.subr.bf16.mxu1 %v13845_v8 }
0x1114   :  { %v8514_v41 = vadd.f32 %v8513_v61, %v19038_v32  ;;  %v8905_v12 = vmax.f32 %v8866_v51, 0.0  ;;  %v19299_v27 = vsel %vm1461_vm7, %v8748_v55, %v8749_v60 }
0x1115   :  { %v8690_v15 = vsel %vm1362_vm6, %v8626_v23, %v8627_v39  ;;  %v19307_v1 = vpack.c.bf16 %v19292_v34, %v19233_v14  ;;  %v8820_v32 = vadd.f32 %v19193_v2, %v8703_v6  ;;  %v19314_v55 = vsel %vm1461_vm7, %v8751_v7, %v21177_v30  ;;  %v13846_v6 = vld [vmem:[%s21120_s7 + $0x60] sm:$0xff]   ;;  %12646 = vmatpush3.bf16.msra.mxu1 %v13845_v8  ;;  %v13848_v8 = vld [vmem:[%s21120_s7 + $0x68] sm:$0xff]  }
0x1116   :  { %v8704_v61 = vadd.f32 %v8690_v15, %v8069_v35  ;;  %v19320_v23 = vmul.f32 %v9002_v36, %v8905_v12  ;;  %v8750_v4 = vrot.slane %v8514_v41, 2  ;;  %v8079_v11 = vpop.f32.mrb[60].mxu1  ;;  %v12621_v51 = vpop.f32.mrb[220].mxu0  ;;  %10052 = vmatpush1.bf16.msra.mxu0 %v13846_v6 }
0x1117   :  { %21316 = vst [vmem:[#allocation18_spill] sm:$0xff] %v19307_v1  ;;  %v8867_v35 = vadd.f32 %v19166_v63, %v8820_v32  ;;  %v8535_v31 = vadd.f32 %v12621_v51, %v19063_v59  ;;  %v8081_v30 = vpop.f32.mrb[61].mxu1  ;;  %v8526_v12 = vpop.f32.mrb[221].mxu0  ;;  %9617 = vmatmul.mubr.bf16.gmra.mrb[136].mxu1 %v19307_v1  ;;  %10053 = vmatprep.subr.bf16.mxu0 %v21301_v53 }
0x1118   :  { %v8821_v15 = vadd.f32 %v19188_v25, %v8704_v61  ;;  %v19335_v2 = vsel %vm1461_vm7, %v8750_v4, %v8751_v7  ;;  %v19339_v32 = vsel %vm1461_vm7, %v8749_v60, %v8750_v4  ;;  %v8628_v25 = vrot.slane %v8081_v30, 1  ;;  %v19341_v61 = vpop.f32.mrb[62].mxu1  ;;  %v12622_v59 = vpop.f32.mrb[222].mxu0  ;;  %9626 = vmatprep.mubr.bf16.mxu1 %v21301_v53  ;;  %v13847_v60 = vld [vmem:[%s21120_s7 + $0x90] sm:$0xff]  }
0x1119   :  { %v8906_v51 = vmax.f32 %v8867_v35, 0.0  ;;  %v8755_v40 = vrot.slane %v8535_v31, 2  ;;  %v8527_v36 = vadd.f32 %v8526_v12, %v19057_v0  ;;  %v19346_v1 = vpop.f32.mrb[63].mxu1  ;;  %v8529_v7 = vpop.f32.mrb[223].mxu0  ;;  %v19355_v6 = vadd.f32 %v12622_v59, %v19065_v37  ;;  %12647 = vmatprep.subr.bf16.mxu1 %v13847_v60 }
0x111a   :  { %v8868_v41 = vadd.f32 %v19166_v63, %v8821_v15  ;;  %v9007_v30 = vpop.permute.xlu1 %9006  ;;  %v8689_v4 = vsel %vm1362_vm6, %v8627_v39, %v8628_v25  ;;  %v8629_v31 = vrot.slane %v19346_v1, 1  ;;  %v8530_v0 = vadd.f32 %v8529_v7, %v19059_v50  ;;  %v9012_v17 = vpop.permute.xlu0 %9011  ;;  %10054 = vmatpush1.bf16.msra.mxu0 %v13848_v8  ;;  %12648 = vmatpush3.bf16.msra.mxu1 %v13847_v60  ;;  %v13849_v7 = vld [vmem:[%s21120_s7 + $0x98] sm:$0xff]   ;;  %v13850_v8 = vld [vmem:[%s21120_s7 + $0x70] sm:$0xff]  }
0x111b   :  { %v19362_v35 = vmul.f32 %v9007_v30, %v8906_v51  ;;  %v8705_v12 = vadd.f32 %v8689_v4, %v19260_v13  ;;  %v8753_v10 = vrot.slane %v8527_v36, 2  ;;  %v8756_v39 = vrot.slane %v19355_v6, 2  ;;  %10055 = vmatprep.subr.bf16.mxu0 %v21301_v53  ;;  %12649 = vmatprep.subr.bf16.mxu1 %v13849_v7 }
0x111c   :  { %v8907_v15 = vmax.f32 %v8868_v41, 0.0  ;;  %v8688_v37 = vsel %vm1362_vm6, %v8628_v25, %v8629_v31  ;;  %v8754_v1 = vrot.slane %v8530_v0, 2  ;;  %v21317_v50 = vrot.slane %v19320_v23, 1 }
0x111d   :  { %v21318_v59 = vrot.slane %v19292_v34, 1  ;;  %v19378_v13 = vpack.c.bf16 %v19362_v35, %v19320_v23  ;;  %v8822_v25 = vadd.f32 %v19224_v22, %v8705_v12  ;;  %v21321_v30 = vrot.slane %v19271_v19, 2 }
0x111e   :  { %v19381_v36 = vmul.f32 %v9012_v17, %v8907_v15  ;;  %v19396_v6 = vsel %vm1461_vm7, %v8755_v40, %v8756_v39  ;;  %v8706_v17 = vadd.f32 %v8688_v37, %v8079_v11  ;;  %v19400_v22 = vsel %vm1461_vm7, %v8754_v1, %v8755_v40  ;;  %v8089_v60 = vpop.f32.mrb[64].mxu1  ;;  %v12625_v0 = vpop.f32.mrb[224].mxu0  ;;  %10056 = vmatpush1.bf16.msra.mxu0 %v13850_v8  ;;  %v13851_v8 = vld [vmem:[%s21120_s7 + $0xa0] sm:$0xff]  }
0x111f   :  { %v19374_v51 = vsel %vm1362_vm6, %v21318_v59, %v21317_v50  ;;  %21320 = vst [vmem:[#allocation20_spill] sm:$0xff] %v19378_v13  ;;  %v19392_v4 = vsel %vm1461_vm7, %v21321_v30, %v8753_v10  ;;  %21322 = vst [vmem:[#allocation21_spill] sm:$0xff] %v19396_v6  ;;  %v8869_v19 = vadd.f32 %v19166_v63, %v8822_v25  ;;  %v8091_v11 = vpop.f32.mrb[65].mxu1  ;;  %v8542_v37 = vpop.f32.mrb[225].mxu0  ;;  %9627 = vmatmul.mubr.bf16.gmra.mrb[140].mxu1 %v19378_v13 }
0x1120   :  { %21319 = vst [vmem:[#allocation19_spill] sm:$0xff] %v19374_v51  ;;  %21323 = vst [vmem:[#allocation22_spill] sm:$0xff] %v19400_v22  ;;  %v19408_v15 = vsel %vm1461_vm7, %v8753_v10, %v8754_v1  ;;  %v19411_v12 = vadd.f32 %v12625_v0, %v19075_v29  ;;  %v8823_v50 = vadd.f32 %v19246_v48, %v8706_v17  ;;  %v8630_v59 = vrot.slane %v8091_v11, 1  ;;  %v19417_v25 = vpop.f32.mrb[66].mxu1  ;;  %v12626_v41 = vpop.f32.mrb[226].mxu0 }
0x1121   :  { %v8543_v30 = vadd.f32 %v8542_v37, %v19069_v44  ;;  %9636 = vmatprep.mubr.bf16.mxu1 %v21301_v53  ;;  %v21324_v29 = vrot.slane %v19362_v35, 1  ;;  %v21325_v10 = vrot.slane %v19320_v23, 1  ;;  %v8908_v0 = vmax.f32 %v8869_v19, 0.0  ;;  %v8095_v44 = vpop.f32.mrb[67].mxu1  ;;  %v8545_v11 = vpop.f32.mrb[227].mxu0  ;;  %12650 = vmatpush3.bf16.msra.mxu1 %v13849_v7  ;;  %v13852_v37 = vld [vmem:[%s21120_s7 + $0x78] sm:$0xff]  }
0x1122   :  { %v8759_v48 = vrot.slane %v19411_v12, 2  ;;  %v19430_v17 = vadd.f32 %v12626_v41, %v19077_v16  ;;  %10057 = vmatprep.subr.bf16.mxu0 %v21301_v53  ;;  %v21327_v19 = vrot.slane %v19292_v34, 1  ;;  %v21328_v12 = vrot.slane %v19233_v14, 1  ;;  %v9017_v41 = vpop.permute.xlu1 %9016  ;;  %12651 = vmatprep.subr.bf16.mxu1 %v13851_v8 }
0x1123   :  { %v19426_v1 = vsel %vm1362_vm6, %v21325_v10, %v21324_v29  ;;  %v8870_v7 = vadd.f32 %v19166_v63, %v8823_v50  ;;  %v8687_v29 = vsel %vm1362_vm6, %v8629_v31, %v8630_v59  ;;  %v8757_v10 = vrot.slane %v8543_v30, 2  ;;  %10058 = vmatpush1.bf16.msra.mxu0 %v13852_v37 }
0x1124   :  { %21326 = vst [vmem:[#allocation23_spill] sm:$0xff] %v19426_v1  ;;  %v19445_v16 = vsel %vm1362_vm6, %v21328_v12, %v21327_v19  ;;  %v8631_v40 = vrot.slane %v8095_v44, 1  ;;  %v19450_v13 = vmul.f32 %v9017_v41, %v8908_v0  ;;  %v8707_v9 = vadd.f32 %v8687_v29, %v19341_v61  ;;  %v9022_v0 = vpop.permute.xlu0 %9021 }
0x1125   :  { %v21182_v6 = vrot.slane %v19430_v17, 2  ;;  %v8546_v22 = vadd.f32 %v8545_v11, %v19071_v26  ;;  %v8909_v24 = vmax.f32 %v8870_v7, 0.0  ;;  %v19457_v19 = vsel %vm1461_vm7, %v8756_v39, %v8757_v10  ;;  %12652 = vmatpush3.bf16.msra.mxu1 %v13851_v8  ;;  %v13853_v11 = vld [vmem:[%s21120_s7 + $0xa8] sm:$0xff]  }
0x1126   :  { %v8686_v50 = vsel %vm1362_vm6, %v8630_v59, %v8631_v40  ;;  %v21329_v31 = vmov %v21328_v12  ;;  %v21330_v30 = vrot.slane %v19219_v38, 1  ;;  %v19471_v26 = vpack.c.bf16 %v19450_v13, %v19381_v36  ;;  %v8099_v41 = vpop.f32.mrb[68].mxu1  ;;  %v12629_v7 = vpop.f32.mrb[228].mxu0  ;;  %12653 = vmatprep.subr.bf16.mxu1 %v13853_v11 }
0x1127   :  { %v8824_v39 = vadd.f32 %v19242_v56, %v8707_v9  ;;  %v19478_v59 = vsel %vm1461_vm7, %v8759_v48, %v21182_v6  ;;  %v8708_v44 = vadd.f32 %v8686_v50, %v8089_v60  ;;  %v19483_v37 = vmul.f32 %v9022_v0, %v8909_v24  ;;  %v8101_v50 = vpop.f32.mrb[69].mxu1 }
0x1128   :  { %v19467_v61 = vsel %vm1362_vm6, %v21330_v30, %v21329_v31  ;;  %21331 = vst [vmem:[#allocation24_spill] sm:$0xff] %v19471_v26  ;;  %v8758_v12 = vrot.slane %v8546_v22, 2  ;;  %v8567_v8 = vadd.f32 %v12629_v7, %v19087_v43  ;;  %v8558_v31 = vpop.f32.mrb[229].mxu0  ;;  %9637 = vmatmul.mubr.bf16.gmra.mrb[144].mxu1 %v19471_v26 }
0x1129   :  { %v8871_v29 = vadd.f32 %v19166_v63, %v8824_v39  ;;  %v8825_v60 = vadd.f32 %v19237_v28, %v8708_v44  ;;  %v8632_v28 = vrot.slane %v8101_v50, 1  ;;  %v19503_v39 = vpop.f32.mrb[70].mxu1  ;;  %v12630_v43 = vpop.f32.mrb[230].mxu0  ;;  %9646 = vmatprep.mubr.bf16.mxu1 %v21301_v53  ;;  %v8559_v9 = vadd.f32 %v8558_v31, %v19081_v18  ;;  %12654 = vmatpush3.bf16.msra.mxu1 %v13853_v11 }
0x112a   :  { %v19497_v30 = vsel %vm1461_vm7, %v8758_v12, %v8759_v48  ;;  %v19501_v0 = vsel %vm1461_vm7, %v8757_v10, %v8758_v12  ;;  %v8763_v56 = vrot.slane %v8567_v8, 2  ;;  %v8105_v24 = vpop.f32.mrb[71].mxu1  ;;  %v8561_v22 = vpop.f32.mrb[231].mxu0  ;;  %v13854_v48 = vld [vmem:[%s21120_s7 + $0xb0] sm:$0xff]   ;;  %v8570_v50 = vadd.f32 %v12630_v43, %v19089_v3 }
0x112b   :  { %v8910_v44 = vmax.f32 %v8871_v29, 0.0  ;;  %v8872_v7 = vadd.f32 %v19166_v63, %v8825_v60  ;;  %v9027_v10 = vpop.permute.xlu1 %9026  ;;  %v8685_v12 = vsel %vm1362_vm6, %v8631_v40, %v8632_v28  ;;  %v8633_v6 = vrot.slane %v8105_v24, 1  ;;  %12655 = vmatprep.subr.bf16.mxu1 %v13854_v48  ;;  %v9032_v11 = vpop.permute.xlu0 %9031 }
0x112c   :  { %v8562_v29 = vadd.f32 %v8561_v22, %v19083_v52  ;;  %v8709_v18 = vadd.f32 %v8685_v12, %v19417_v25  ;;  %v8761_v31 = vrot.slane %v8559_v9, 2  ;;  %v8764_v26 = vrot.slane %v8570_v50, 2 }
0x112d   :  { %v19515_v60 = vmul.f32 %v9027_v10, %v8910_v44  ;;  %v8911_v8 = vmax.f32 %v8872_v7, 0.0  ;;  %v8684_v51 = vsel %vm1362_vm6, %v8632_v28, %v8633_v6  ;;  %v21332_v40 = vrot.slane %v19320_v23, 7  ;;  %12656 = vmatpush3.bf16.msra.mxu1 %v13854_v48 }
0x112e   :  { %v8762_v1 = vrot.slane %v8562_v29, 2  ;;  %v21333_v3 = vrot.slane %v19292_v34, 7  ;;  %v8826_v22 = vadd.f32 %v19299_v27, %v8709_v18  ;;  %v21336_v28 = vrot.slane %v19430_v17, 2  ;;  %v8109_v12 = vpop.f32.mrb[72].mxu1  ;;  %v12633_v50 = vpop.f32.mrb[232].mxu0  ;;  %v13855_v27 = vld [vmem:[%s21120_s7 + $0xb8] sm:$0xff]  }
0x112f   :  { %v19530_v24 = vpack.c.bf16 %v19515_v60, %v19483_v37  ;;  %v21186_v25 = vrot.slane %v19515_v60, 1  ;;  %v19533_v9 = vmul.f32 %v9032_v11, %v8911_v8  ;;  %v19544_v44 = vsel %vm1461_vm7, %v8763_v56, %v8764_v26  ;;  %v8111_v8 = vpop.f32.mrb[73].mxu1  ;;  %12657 = vmatprep.subr.bf16.mxu1 %v13855_v27 }
0x1130   :  { %v19526_v52 = vsel %vm9272_vm8, %v21333_v3, %v21332_v40  ;;  %v19540_v43 = vsel %vm1461_vm7, %v21336_v28, %v8761_v31  ;;  %v8710_v7 = vadd.f32 %v8684_v51, %v8099_v41  ;;  %v19548_v10 = vsel %vm1461_vm7, %v8762_v1, %v8763_v56  ;;  %v8574_v51 = vpop.f32.mrb[233].mxu0 }
0x1131   :  { %21334 = vst [vmem:[#allocation25_spill] sm:$0xff] %v19526_v52  ;;  %21335 = vst [vmem:[#allocation26_spill] sm:$0xff] %v19530_v24  ;;  %v8873_v17 = vadd.f32 %v19166_v63, %v8826_v22  ;;  %v19556_v48 = vsel %vm1461_vm7, %v8761_v31, %v8762_v1  ;;  %v8583_v29 = vadd.f32 %v12633_v50, %v19095_v5  ;;  %9647 = vmatmul.mubr.bf16.gmra.mrb[148].mxu1 %v19530_v24  ;;  %v19570_v31 = vpop.f32.mrb[74].mxu1  ;;  %v12634_v5 = vpop.f32.mrb[234].mxu0 }
0x1132   :  { %v21337_v41 = vmov %v21333_v3  ;;  %v21338_v56 = vrot.slane %v19233_v14, 7  ;;  %v8827_v11 = vadd.f32 %v19339_v32, %v8710_v7  ;;  %v8634_v40 = vrot.slane %v8111_v8, 1  ;;  %9656 = vmatprep.mubr.bf16.mxu1 %v21301_v53  ;;  %v8115_v28 = vpop.f32.mrb[75].mxu1  ;;  %v8577_v50 = vpop.f32.mrb[235].mxu0  ;;  %12658 = vmatpush3.bf16.msra.mxu1 %v13855_v27 }
0x1133   :  { %v8575_v1 = vadd.f32 %v8574_v51, %v19091_v62  ;;  %v8912_v3 = vmax.f32 %v8873_v17, 0.0  ;;  %v8767_v14 = vrot.slane %v8583_v29, 2  ;;  %v19576_v22 = vadd.f32 %v12634_v5, %v19097_v20  ;;  %v9037_v62 = vpop.permute.xlu1 %9036  ;;  %12796 = vmatprep.subr.bf16.mxu1 %v21283_v21 }
0x1134   :  { %v19566_v18 = vsel %vm9272_vm8, %v21338_v56, %v21337_v41  ;;  %v9339_v32 = vrot.slane %v19450_v13, 1  ;;  %v8874_v7 = vadd.f32 %v19166_v63, %v8827_v11  ;;  %v8683_v8 = vsel %vm1362_vm6, %v8633_v6, %v8634_v40 }
0x1135   :  { %21339 = vst [vmem:[#allocation27_spill] sm:$0xff] %v19566_v18  ;;  %v8765_v51 = vrot.slane %v8575_v1, 2  ;;  %v8635_v41 = vrot.slane %v8115_v28, 1  ;;  %v19583_v17 = vmul.f32 %v9037_v62, %v8912_v3  ;;  %v8711_v20 = vadd.f32 %v8683_v8, %v19503_v39  ;;  %v9042_v39 = vpop.permute.xlu0 %9041 }
0x1136   :  { %v8768_v29 = vrot.slane %v19576_v22, 2  ;;  %v8578_v27 = vadd.f32 %v8577_v50, %v19093_v45  ;;  %v8913_v56 = vmax.f32 %v8874_v7, 0.0  ;;  %v21340_v11 = vrot.slane %v19483_v37, 1  ;;  %v8119_v28 = vpop.f32.mrb[76].mxu1  ;;  %v12637_v50 = vpop.f32.mrb[236].mxu0 }
0x1137   :  { %v19590_v5 = vsel %vm1461_vm7, %v8764_v26, %v8765_v51  ;;  %v8682_v6 = vsel %vm1362_vm6, %v8634_v40, %v8635_v41  ;;  %v19604_v45 = vpack.c.bf16 %v19583_v17, %v19533_v9  ;;  %v8828_v3 = vadd.f32 %v19335_v2, %v8711_v20  ;;  %v8590_v34 = vpop.f32.mrb[237].mxu0 }
0x1138   :  { %v19600_v1 = vsel %vm1362_vm6, %v21340_v11, %v21186_v25  ;;  %v19609_v26 = vsel %vm1461_vm7, %v8767_v14, %v8768_v29  ;;  %v8712_v40 = vadd.f32 %v8682_v6, %v8109_v12  ;;  %v8766_v22 = vrot.slane %v8578_v27, 2  ;;  %v8121_v6 = vpop.f32.mrb[77].mxu1 }
0x1139   :  { %21341 = vst [vmem:[#allocation28_spill] sm:$0xff] %v19600_v1  ;;  %21342 = vst [vmem:[#allocation29_spill] sm:$0xff] %v19604_v45  ;;  %v21343_v62 = vmov %v21340_v11  ;;  %v21345_v8 = vrot.slane %v19381_v36, 1  ;;  %v8875_v20 = vadd.f32 %v19166_v63, %v8828_v3  ;;  %v8599_v27 = vadd.f32 %v12637_v50, %v19103_v33  ;;  %9657 = vmatmul.mubr.bf16.gmra.mrb[152].mxu1 %v19604_v45  ;;  %v12638_v50 = vpop.f32.mrb[238].mxu0  ;;  %v9047_v45 = vpop.permute.xlu1 %9046 }
0x113a   :  { %v19615_v7 = vsel %vm1362_vm6, %v9339_v32, %v21343_v62  ;;  %v8829_v12 = vadd.f32 %v19314_v55, %v8712_v40  ;;  %v21347_v25 = vrot.slane %v19362_v35, 1  ;;  %v19640_v3 = vsel %vm1461_vm7, %v8766_v22, %v8767_v14  ;;  %v8123_v40 = vpop.f32.mrb[78].mxu1  ;;  %9666 = vmatprep.mubr.bf16.mxu1 %v21301_v53 }
0x113b   :  { %21344 = vst [vmem:[#allocation30_spill] sm:$0xff] %v19615_v7  ;;  %v19621_v11 = vsel %vm1362_vm6, %v21345_v8, %v9339_v32  ;;  %v21346_v62 = vmov %v21345_v8  ;;  %v19636_v8 = vmul.f32 %v9042_v39, %v8913_v56  ;;  %v19644_v33 = vsel %vm1461_vm7, %v8765_v51, %v8766_v22  ;;  %v8125_v39 = vpop.f32.mrb[79].mxu1 }
0x113c   :  { %v19634_v32 = vsel %vm1362_vm6, %v21347_v25, %v21346_v62  ;;  %v8636_v55 = vrot.slane %v8121_v6, 1  ;;  %v8914_v2 = vmax.f32 %v8875_v20, 0.0  ;;  %v8876_v21 = vadd.f32 %v19166_v63, %v8829_v12  ;;  %v8593_v62 = vpop.f32.mrb[239].mxu0 }
0x113d   :  { %21348 = vst [vmem:[#allocation31_spill] sm:$0xff] %v19634_v32  ;;  %v8771_v25 = vrot.slane %v8599_v27, 2  ;;  %v8591_v56 = vadd.f32 %v8590_v34, %v19099_v58  ;;  %v8602_v51 = vadd.f32 %v12638_v50, %v19105_v47  ;;  %v8637_v22 = vrot.slane %v8125_v39, 1 }
0x113e   :  { %v8681_v14 = vsel %vm1362_vm6, %v8635_v41, %v8636_v55  ;;  %v8594_v6 = vadd.f32 %v8593_v62, %v19101_v54  ;;  %v19653_v24 = vmul.f32 %v9047_v45, %v8914_v2  ;;  %v8915_v18 = vmax.f32 %v8876_v21, 0.0  ;;  %v9052_v41 = vpop.permute.xlu0 %9051  ;;  %v12641_v39 = vpop.f32.mrb[240].mxu0 }
0x113f   :  { %v8713_v20 = vadd.f32 %v8681_v14, %v19570_v31  ;;  %v8769_v12 = vrot.slane %v8591_v56, 2  ;;  %v8772_v27 = vrot.slane %v8602_v51, 2  ;;  %v8680_v58 = vsel %vm1362_vm6, %v8636_v55, %v8637_v22  ;;  %v8129_v56 = vpop.f32.mrb[80].mxu1  ;;  %v8606_v51 = vpop.f32.mrb[241].mxu0 }
0x1140   :  { %v8770_v34 = vrot.slane %v8594_v6, 2  ;;  %v19663_v54 = vpack.c.bf16 %v19653_v24, %v19636_v8  ;;  %v8714_v55 = vadd.f32 %v8680_v58, %v8119_v28  ;;  %v8131_v14 = vpop.f32.mrb[81].mxu1  ;;  %v8607_v58 = vadd.f32 %v8606_v51, %v19107_v49 }
0x1141   :  { %v8830_v31 = vadd.f32 %v19392_v4, %v8713_v20  ;;  %v19669_v45 = vsel %vm1461_vm7, %v8768_v29, %v8769_v12  ;;  %v19673_v2 = vsel %vm1461_vm7, %v8771_v25, %v8772_v27  ;;  %v19685_v29 = vadd.f32 %v12641_v39, %v19121_v57 }
0x1142   :  { %21349 = vst [vmem:[#allocation32_spill] sm:$0xff] %v19663_v54  ;;  %v19677_v50 = vsel %vm1461_vm7, %v8770_v34, %v8771_v25  ;;  %v19682_v4 = vsel %vm1461_vm7, %v8769_v12, %v8770_v34  ;;  %9667 = vmatmul.mubr.bf16.gmra.mrb[156].mxu1 %v19663_v54  ;;  %v19690_v25 = vmul.f32 %v9052_v41, %v8915_v18  ;;  %v8638_v20 = vrot.slane %v8131_v14, 1  ;;  %v12642_v12 = vpop.f32.mrb[242].mxu0  ;;  %v9057_v18 = vpop.permute.xlu1 %9056 }
0x1143   :  { %v8877_v62 = vadd.f32 %v19166_v63, %v8830_v31  ;;  %v8831_v6 = vadd.f32 %v19408_v15, %v8714_v55  ;;  %v8133_v31 = vpop.f32.mrb[82].mxu1  ;;  %9676 = vmatprep.mubr.bf16.mxu1 %v21301_v53  ;;  %v8609_v52 = vpop.f32.mrb[243].mxu0  ;;  %v9238_v47 = vrot.slane %v19362_v35, 7  ;;  %v21193_v28 = vrot.slane %v19381_v36, 7  ;;  %v21350_v12 = vld [vmem:[#allocation11_spill] sm:$0xff] }
0x1144   :  { %v8135_v39 = vpop.f32.mrb[83].mxu1  ;;  %v8679_v15 = vsel %vm1362_vm6, %v8637_v22, %v8638_v20  ;;  %v8773_v49 = vrot.slane %v8607_v58, 2  ;;  %v9062_v14 = vpop.permute.xlu0 %9061  ;;  %v8610_v34 = vadd.f32 %v8609_v52, %v21350_v12  ;;  %v9342_v21 = vrot.slane %v19533_v9, 1  ;;  %v21353_v52 = vld [vmem:[#allocation22_spill] sm:$0xff] }
0x1145   :  { %v8916_v57 = vmax.f32 %v8877_v62, 0.0  ;;  %v8878_v41 = vadd.f32 %v19166_v63, %v8831_v6  ;;  %v8639_v55 = vrot.slane %v8135_v39, 1  ;;  %v8715_v62 = vadd.f32 %v8679_v15, %v8123_v40 }
0x1146   :  { %v19707_v35 = vsel %vm1461_vm7, %v8772_v27, %v8773_v49  ;;  %v19715_v22 = vsel %vm9272_vm8, %v9238_v47, %v21193_v28  ;;  %v8774_v39 = vrot.slane %v8610_v34, 2  ;;  %v8139_v27 = vpop.f32.mrb[88].mxu1  ;;  %v9343_v15 = vrot.slane %v19583_v17, 1  ;;  %v9067_v7 = vpop.permute.xlu1 %9066 }
0x1147   :  { %v19701_v51 = vmul.f32 %v9057_v18, %v8916_v57  ;;  %v8917_v54 = vmax.f32 %v8878_v41, 0.0  ;;  %v8678_v6 = vsel %vm1362_vm6, %v8638_v20, %v8639_v55  ;;  %21351 = vst [vmem:[#allocation11_spill] sm:$0xff] %v19715_v22  ;;  %v8832_v58 = vadd.f32 %v21353_v52, %v8715_v62 }
0x1148   :  { %v8716_v57 = vadd.f32 %v8678_v6, %v8129_v56  ;;  %v21354_v41 = vrot.slane %v19320_v23, 7  ;;  %v21356_v12 = vrot.slane %v19653_v24, 1  ;;  %v21357_v28 = vrot.slane %v19636_v8, 1  ;;  %v21359_v56 = vld [vmem:[#allocation21_spill] sm:$0xff]  ;;  %v8141_v6 = vpop.f32.mrb[89].mxu1 }
0x1149   :  { %v19719_v40 = vpack.c.bf16 %v19701_v51, %v19690_v25  ;;  %v19722_v18 = vmul.f32 %v9062_v14, %v8917_v54  ;;  %v8879_v54 = vadd.f32 %v19166_v63, %v8832_v58  ;;  %v21360_v23 = vrot.slane %v19685_v29, 2 }
0x114a   :  { %v19728_v20 = vsel %vm9272_vm8, %v21354_v41, %v9238_v47  ;;  %v19737_v62 = vsel %vm1362_vm6, %v21357_v28, %v21356_v12  ;;  %v8833_v34 = vadd.f32 %v21359_v56, %v8716_v57  ;;  %v19749_v14 = vsel %vm1461_vm7, %v8773_v49, %v8774_v39  ;;  %v8143_v41 = vpop.f32.mrb[90].mxu1  ;;  %v9072_v49 = vpop.permute.xlu0 %9071 }
0x114b   :  { %21352 = vst [vmem:[#allocation33_spill] sm:$0xff] %v19719_v40  ;;  %21355 = vst [vmem:[#allocation22_spill] sm:$0xff] %v19728_v20  ;;  %v19745_v47 = vsel %vm1461_vm7, %v8774_v39, %v21360_v23  ;;  %9677 = vmatmul.mubr.bf16.gmra.mrb[160].mxu1 %v19719_v40  ;;  %v9348_v28 = vrot.slane %v19722_v18, 1  ;;  %v8640_v52 = vrot.slane %v8141_v6, 1  ;;  %v21361_v57 = vrot.slane %v19636_v8, 1  ;;  %v8145_v23 = vpop.f32.mrb[91].mxu1 }
0x114c   :  { %21358 = vst [vmem:[#allocation34_spill] sm:$0xff] %v19737_v62  ;;  %9686 = vmatprep.mubr.bf16.mxu1 %v21301_v53  ;;  %v8918_v39 = vmax.f32 %v8879_v54, 0.0  ;;  %v8880_v56 = vadd.f32 %v19166_v63, %v8833_v34  ;;  %v19765_v6 = vsel %vm1362_vm6, %v9342_v21, %v9343_v15  ;;  %v21363_v40 = vrot.slane %v19515_v60, 1 }
0x114d   :  { %v19760_v12 = vsel %vm1362_vm6, %v9343_v15, %v21361_v57  ;;  %v8677_v57 = vsel %vm1362_vm6, %v8639_v55, %v8640_v52  ;;  %v8641_v1 = vrot.slane %v8145_v23, 1  ;;  %v9240_v32 = vrot.slane %v19450_v13, 7 }
0x114e   :  { %21362 = vst [vmem:[#allocation21_spill] sm:$0xff] %v19760_v12  ;;  %v19771_v58 = vsel %vm1362_vm6, %v21363_v40, %v9342_v21  ;;  %v19779_v20 = vmul.f32 %v9067_v7, %v8918_v39  ;;  %v8919_v15 = vmax.f32 %v8880_v56, 0.0  ;;  %v8717_v22 = vadd.f32 %v8677_v57, %v8133_v31  ;;  %v8149_v56 = vpop.f32.mrb[92].mxu1 }
0x114f   :  { %v8676_v21 = vsel %vm1362_vm6, %v8640_v52, %v8641_v1  ;;  %v9241_v40 = vrot.slane %v19483_v37, 7  ;;  %v9346_v55 = vrot.slane %v19690_v25, 1  ;;  %v9347_v23 = vrot.slane %v19701_v51, 1 }
0x1150   :  { %v19789_v54 = vpack.c.bf16 %v19779_v20, %v19722_v18  ;;  %v9349_v7 = vrot.slane %v19779_v20, 1  ;;  %v19792_v39 = vmul.f32 %v9072_v49, %v8919_v15  ;;  %v8834_v31 = vadd.f32 %v19457_v19, %v8717_v22  ;;  %v9082_v49 = vpop.permute.xlu0 %9081  ;;  %v8151_v19 = vpop.f32.mrb[93].mxu1 }
0x1151   :  { %v8718_v13 = vadd.f32 %v8676_v21, %v8139_v27  ;;  %v19797_v52 = vsel %vm9272_vm8, %v9240_v32, %v9241_v40  ;;  %v21366_v37 = vrot.slane %v19381_v36, 7  ;;  %v19807_v34 = vsel %vm1362_vm6, %v9347_v23, %v9348_v28  ;;  %v9077_v27 = vpop.permute.xlu1 %9076  ;;  %v8153_v12 = vpop.f32.mrb[94].mxu1 }
0x1152   :  { %21364 = vst [vmem:[#allocation35_spill] sm:$0xff] %v19789_v54  ;;  %21365 = vst [vmem:[#allocation36_spill] sm:$0xff] %v19797_v52  ;;  %v8881_v15 = vadd.f32 %v19166_v63, %v8834_v31  ;;  %v19815_v36 = vsel %vm1362_vm6, %v9348_v28, %v9349_v7  ;;  %v21370_v31 = vrot.slane %v19653_v24, 1  ;;  %v8155_v62 = vpop.f32.mrb[95].mxu1 }
0x1153   :  { %v19803_v57 = vsel %vm9272_vm8, %v21366_v37, %v9240_v32  ;;  %21368 = vst [vmem:[#allocation38_spill] sm:$0xff] %v19807_v34  ;;  %9687 = vmatmul.mubr.bf16.gmra.mrb[164].mxu1 %v19789_v54  ;;  %21369 = vst [vmem:[#allocation39_spill] sm:$0xff] %v19815_v36  ;;  %v19819_v32 = vsel %vm1362_vm6, %v9346_v55, %v9347_v23  ;;  %v8835_v21 = vadd.f32 %v19501_v0, %v8718_v13  ;;  %v19873_v23 = vld [vmem:[%s21117_s6 + $0x2] ss:$0 sm:$0xff] }
0x1154   :  { %21367 = vst [vmem:[#allocation37_spill] sm:$0xff] %v19803_v57  ;;  %v8642_v37 = vrot.slane %v8151_v19, 1  ;;  %9696 = vmatprep.mubr.bf16.mxu1 %v21301_v53  ;;  %v19827_v22 = vsel %vm1362_vm6, %v21370_v31, %v9346_v55  ;;  %v8920_v54 = vmax.f32 %v8881_v15, 0.0  ;;  %v9242_v0 = vrot.slane %v19515_v60, 7 }
0x1155   :  { %v9243_v13 = vrot.slane %v19533_v9, 7  ;;  %v8882_v19 = vadd.f32 %v19166_v63, %v8835_v21  ;;  %v8643_v52 = vrot.slane %v8155_v62, 1  ;;  %v9350_v55 = vrot.slane %v19792_v39, 1  ;;  %v9087_v21 = vpop.permute.xlu1 %9086 }
0x1156   :  { %v8675_v57 = vsel %vm1362_vm6, %v8641_v1, %v8642_v37  ;;  %v19839_v31 = vmul.f32 %v9077_v27, %v8920_v54  ;;  %v19847_v60 = vsel %vm9272_vm8, %v9241_v40, %v9242_v0  ;;  %v9246_v1 = vrot.slane %v19653_v24, 7 }
0x1157   :  { %v8719_v28 = vadd.f32 %v8675_v57, %v8143_v41  ;;  %v19843_v15 = vsel %vm9272_vm8, %v9242_v0, %v9243_v13  ;;  %v8921_v9 = vmax.f32 %v8882_v19, 0.0  ;;  %v8674_v63 = vsel %vm1362_vm6, %v8642_v37, %v8643_v52  ;;  %v19857_v41 = vpop.permute.xlu0 %9166  ;;  %v8159_v0 = vpop.f32.mrb[96].mxu1 }
0x1158   :  { %v19855_v62 = vsel %vm1362_vm6, %v9349_v7, %v9350_v55  ;;  %v19861_v54 = vpack.c.bf16 %v19839_v31, %v19792_v39  ;;  %v8720_v57 = vadd.f32 %v8674_v63, %v8149_v56  ;;  %v9351_v27 = vrot.slane %v19839_v31, 1 }
0x1159   :  { %21371 = vst [vmem:[#allocation40_spill] sm:$0xff] %v19855_v62  ;;  %v8836_v40 = vadd.f32 %v19497_v30, %v8719_v28  ;;  %v19865_v37 = vmul.f32 %v9082_v49, %v8921_v9  ;;  %v9244_v19 = vrot.slane %v19583_v17, 7  ;;  %v9245_v7 = vrot.slane %v19636_v8, 7  ;;  %v8161_v28 = vpop.f32.mrb[97].mxu1  ;;  %v19914_v36 = vpop.permute.xlu1 %9171 }
0x115a   :  { %21372 = vst [vmem:[#allocation41_spill] sm:$0xff] %v19861_v54  ;;  %v8837_v56 = vadd.f32 %v19478_v59, %v8720_v57  ;;  %v19880_v49 = vsel %vm1362_vm6, %v9350_v55, %v9351_v27  ;;  %v9247_v17 = vrot.slane %v19690_v25, 7  ;;  %v8644_v8 = vrot.slane %v8161_v28, 1  ;;  %v8163_v9 = vpop.f32.mrb[98].mxu1 }
0x115b   :  { %v8883_v30 = vadd.f32 %v19873_v23, %v8836_v40  ;;  %9697 = vmatmul.mubr.bf16.gmra.mrb[168].mxu1 %v19861_v54  ;;  %21373 = vst [vmem:[#allocation42_spill] sm:$0xff] %v19880_v49  ;;  %v9352_v24 = vrot.slane %v19865_v37, 1  ;;  %v19889_v59 = vsel %vm9272_vm8, %v9244_v19, %v9245_v7  ;;  %v8165_v55 = vpop.f32.mrb[99].mxu1  ;;  %v19894_v25 = vsel %vm9272_vm8, %v9243_v13, %v9244_v19  ;;  %v9092_v34 = vpop.permute.xlu0 %9091 }
0x115c   :  { %9706 = vmatprep.mubr.bf16.mxu1 %v21301_v53  ;;  %v8884_v57 = vadd.f32 %v19873_v23, %v8837_v56  ;;  %v19898_v28 = vsel %vm9272_vm8, %v9246_v1, %v9247_v17  ;;  %v8673_v54 = vsel %vm1362_vm6, %v8643_v52, %v8644_v8  ;;  %v8645_v63 = vrot.slane %v8165_v55, 1 }
0x115d   :  { %v8922_v40 = vmax.f32 %v8883_v30, 0.0  ;;  %v19904_v62 = vsel %vm1362_vm6, %v9351_v27, %v9352_v24  ;;  %v8721_v13 = vadd.f32 %v8673_v54, %v8153_v12  ;;  %v19912_v19 = vsel %vm9272_vm8, %v9245_v7, %v9246_v1 }
0x115e   :  { %v8923_v49 = vmax.f32 %v8884_v57, 0.0  ;;  %v8672_v52 = vsel %vm1362_vm6, %v8644_v8, %v8645_v63  ;;  %v9248_v55 = vrot.slane %v19701_v51, 7  ;;  %v8169_v57 = vpop.f32.mrb[100].mxu1 }
0x115f   :  { %v19908_v56 = vmul.f32 %v9087_v21, %v8922_v40  ;;  %v9249_v21 = vrot.slane %v19722_v18, 7  ;;  %v8838_v7 = vadd.f32 %v19540_v43, %v8721_v13  ;;  %v8722_v40 = vadd.f32 %v8672_v52, %v8159_v0  ;;  %v8171_v30 = vpop.f32.mrb[101].mxu1 }
0x1160   :  { %v19927_v54 = vmul.f32 %v9092_v34, %v8923_v49  ;;  %v19936_v51 = vsel %vm9272_vm8, %v9247_v17, %v9248_v55  ;;  %v9250_v18 = vrot.slane %v19779_v20, 7  ;;  %v8646_v17 = vrot.slane %v8171_v30, 1  ;;  %v8173_v13 = vpop.f32.mrb[102].mxu1  ;;  %v9097_v30 = vpop.permute.xlu1 %9096 }
0x1161   :  { %v19924_v12 = vpack.c.bf16 %v19908_v56, %v19865_v37  ;;  %v9353_v1 = vrot.slane %v19908_v56, 1  ;;  %v19932_v8 = vsel %vm9272_vm8, %v9248_v55, %v9249_v21  ;;  %21376 = vst [vmem:[#allocation45_spill] sm:$0xff] %v19936_v51  ;;  %v8885_v27 = vadd.f32 %v19873_v23, %v8838_v7  ;;  %v8175_v7 = vpop.f32.mrb[103].mxu1 }
0x1162   :  { %21375 = vst [vmem:[#allocation44_spill] sm:$0xff] %v19932_v8  ;;  %v9354_v34 = vrot.slane %v19927_v54, 1  ;;  %v8839_v49 = vadd.f32 %v19556_v48, %v8722_v40  ;;  %v9251_v52 = vrot.slane %v19792_v39, 7  ;;  %v19959_v0 = vsel %vm9272_vm8, %v9249_v21, %v9250_v18 }
0x1163   :  { %21374 = vst [vmem:[#allocation43_spill] sm:$0xff] %v19924_v12  ;;  %9707 = vmatmul.mubr.bf16.gmra.mrb[172].mxu1 %v19924_v12  ;;  %v19943_v43 = vsel %vm1362_vm6, %v9352_v24, %v9353_v1  ;;  %v8924_v55 = vmax.f32 %v8885_v27, 0.0  ;;  %21377 = vst [vmem:[#allocation46_spill] sm:$0xff] %v19959_v0  ;;  %v9252_v48 = vrot.slane %v19839_v31, 7  ;;  %v8671_v20 = vsel %vm1362_vm6, %v8645_v63, %v8646_v17 }
0x1164   :  { %9716 = vmatprep.mubr.bf16.mxu1 %v21301_v53  ;;  %v19955_v24 = vsel %vm1362_vm6, %v9353_v1, %v9354_v34  ;;  %v8886_v40 = vadd.f32 %v19873_v23, %v8839_v49  ;;  %v8647_v12 = vrot.slane %v8175_v7, 1  ;;  %v19967_v39 = vsel %vm9272_vm8, %v9250_v18, %v9251_v52 }
0x1165   :  { %21378 = vst [vmem:[#allocation47_spill] sm:$0xff] %v19967_v39  ;;  %v9197_v27 = vmul.f32 %v9097_v30, %v8924_v55  ;;  %v8723_v1 = vadd.f32 %v8671_v20, %v8163_v9  ;;  %v9253_v21 = vrot.slane %v19865_v37, 7  ;;  %v19976_v49 = vsel %vm9272_vm8, %v9251_v52, %v9252_v48  ;;  %v9102_v20 = vpop.permute.xlu0 %9101 }
0x1166   :  { %v8925_v8 = vmax.f32 %v8886_v40, 0.0  ;;  %v8670_v31 = vsel %vm1362_vm6, %v8646_v17, %v8647_v12  ;;  %21379 = vst [vmem:[#allocation48_spill] sm:$0xff] %v19976_v49  ;;  %v21380_v63 = vrot.slane %v19219_v38, 1  ;;  %v21381_v18 = vrot.slane %v19202_v42, 1  ;;  %v8179_v40 = vpop.f32.mrb[104].mxu1 }
0x1167   :  { %v19987_v55 = vpack.c.bf16 %v9197_v27, %v19927_v54  ;;  %v8840_v37 = vadd.f32 %v19548_v10, %v8723_v1  ;;  %v8724_v7 = vadd.f32 %v8670_v31, %v8169_v57  ;;  %v9355_v17 = vrot.slane %v9197_v27, 1  ;;  %v9107_v57 = vpop.permute.xlu1 %9106 }
0x1168   :  { %v19984_v9 = vsel %vm1362_vm6, %v21381_v18, %v21380_v63  ;;  %v9198_v30 = vmul.f32 %v9102_v20, %v8925_v8  ;;  %v19992_v52 = vsel %vm9272_vm8, %v9252_v48, %v9253_v21  ;;  %v9254_v38 = vrot.slane %v19908_v56, 7  ;;  %v8181_v18 = vpop.f32.mrb[105].mxu1 }
0x1169   :  { %21382 = vst [vmem:[#allocation49_spill] sm:$0xff] %v19984_v9  ;;  %21383 = vst [vmem:[#allocation50_spill] sm:$0xff] %v19987_v55  ;;  %v8887_v51 = vadd.f32 %v19873_v23, %v8840_v37  ;;  %v8841_v63 = vadd.f32 %v19544_v44, %v8724_v7  ;;  %v20000_v10 = vsel %vm1362_vm6, %v9354_v34, %v9355_v17  ;;  %v8648_v1 = vrot.slane %v8181_v18, 1  ;;  %v8183_v48 = vpop.f32.mrb[106].mxu1 }
0x116a   :  { %21384 = vst [vmem:[#allocation51_spill] sm:$0xff] %v19992_v52  ;;  %v9356_v8 = vrot.slane %v9198_v30, 1  ;;  %v9255_v44 = vrot.slane %v19927_v54, 7  ;;  %v8185_v37 = vpop.f32.mrb[107].mxu1  ;;  %v20011_v34 = vsel %vm9272_vm8, %v9253_v21, %v9254_v38  ;;  %v9256_v7 = vrot.slane %v9197_v27, 7  ;;  %v9112_v27 = vpop.permute.xlu0 %9111 }
0x116b   :  { %9717 = vmatmul.mubr.bf16.gmra.mrb[176].mxu1 %v19987_v55  ;;  %v8926_v31 = vmax.f32 %v8887_v51, 0.0  ;;  %v8888_v20 = vadd.f32 %v19873_v23, %v8841_v63  ;;  %21385 = vst [vmem:[#allocation52_spill] sm:$0xff] %v20011_v34  ;;  %v8669_v18 = vsel %vm1362_vm6, %v8647_v12, %v8648_v1  ;;  %v8649_v55 = vrot.slane %v8185_v37, 1 }
0x116c   :  { %9726 = vmatprep.mubr.bf16.mxu1 %v21301_v53  ;;  %v20017_v9 = vsel %vm1362_vm6, %v9355_v17, %v9356_v8  ;;  %v20021_v54 = vsel %vm9272_vm8, %v9254_v38, %v9255_v44  ;;  %v8725_v56 = vadd.f32 %v8669_v18, %v8173_v13  ;;  %v9257_v12 = vrot.slane %v9198_v30, 7 }
0x116d   :  { %21386 = vst [vmem:[#allocation53_spill] sm:$0xff] %v20021_v54  ;;  %v9199_v51 = vmul.f32 %v9107_v57, %v8926_v31  ;;  %v8927_v63 = vmax.f32 %v8888_v20, 0.0  ;;  %v8668_v49 = vsel %vm1362_vm6, %v8648_v1, %v8649_v55  ;;  %v20029_v37 = vsel %vm9272_vm8, %v9255_v44, %v9256_v7 }
0x116e   :  { %21387 = vst [vmem:[#allocation54_spill] sm:$0xff] %v20029_v37  ;;  %v8842_v57 = vadd.f32 %v19590_v5, %v8725_v56  ;;  %v8726_v31 = vadd.f32 %v8668_v49, %v8179_v40  ;;  %v8189_v13 = vpop.f32.mrb[108].mxu1  ;;  %v20036_v20 = vsel %vm9272_vm8, %v9256_v7, %v9257_v12  ;;  %v9117_v5 = vpop.permute.xlu1 %9116 }
0x116f   :  { %v20031_v17 = vpack.c.bf16 %v9199_v51, %v9198_v30  ;;  %v9357_v52 = vrot.slane %v9199_v51, 1  ;;  %v9200_v38 = vmul.f32 %v9112_v27, %v8927_v63  ;;  %21389 = vst [vmem:[#allocation56_spill] sm:$0xff] %v20036_v20  ;;  %v9258_v18 = vrot.slane %v9199_v51, 7  ;;  %v8191_v21 = vpop.f32.mrb[109].mxu1  ;;  %v9122_v20 = vpop.permute.xlu0 %9121 }
0x1170   :  { %v8889_v1 = vadd.f32 %v19873_v23, %v8842_v57  ;;  %v8843_v49 = vadd.f32 %v19644_v33, %v8726_v31  ;;  %v8650_v40 = vrot.slane %v8191_v21, 1  ;;  %v8193_v56 = vpop.f32.mrb[110].mxu1 }
0x1171   :  { %21388 = vst [vmem:[#allocation55_spill] sm:$0xff] %v20031_v17  ;;  %v20042_v30 = vsel %vm1362_vm6, %v9356_v8, %v9357_v52  ;;  %v9358_v44 = vrot.slane %v9200_v38, 1  ;;  %v9259_v51 = vrot.slane %v9200_v38, 7  ;;  %v8195_v27 = vpop.f32.mrb[111].mxu1  ;;  %v20056_v57 = vsel %vm9272_vm8, %v9257_v12, %v9258_v18 }
0x1172   :  { %v8928_v63 = vmax.f32 %v8889_v1, 0.0  ;;  %21390 = vst [vmem:[#allocation57_spill] sm:$0xff] %v20056_v57  ;;  %v8890_v33 = vadd.f32 %v19873_v23, %v8843_v49  ;;  %v8667_v21 = vsel %vm1362_vm6, %v8649_v55, %v8650_v40  ;;  %v8651_v31 = vrot.slane %v8195_v27, 1 }
0x1173   :  { %9727 = vmatmul.mubr.bf16.gmra.mrb[180].mxu1 %v20031_v17  ;;  %v20052_v8 = vsel %vm1362_vm6, %v9357_v52, %v9358_v44  ;;  %v20063_v7 = vsel %vm9272_vm8, %v9258_v18, %v9259_v51  ;;  %v8727_v17 = vadd.f32 %v8667_v21, %v8183_v48  ;;  %v9132_v52 = vpop.permute.xlu0 %9131 }
0x1174   :  { %9736 = vmatprep.mubr.bf16.mxu1 %v21301_v53  ;;  %21391 = vst [vmem:[#allocation58_spill] sm:$0xff] %v20063_v7  ;;  %v9201_v1 = vmul.f32 %v9117_v5, %v8928_v63  ;;  %v8929_v37 = vmax.f32 %v8890_v33, 0.0  ;;  %v8666_v12 = vsel %vm1362_vm6, %v8650_v40, %v8651_v31 }
0x1175   :  { %v8844_v49 = vadd.f32 %v19640_v3, %v8727_v17  ;;  %v8728_v55 = vadd.f32 %v8666_v12, %v8189_v13 }
0x1176   :  { %v20069_v34 = vpack.c.bf16 %v9201_v1, %v9200_v38  ;;  %v9359_v27 = vrot.slane %v9201_v1, 1  ;;  %v9202_v54 = vmul.f32 %v9122_v20, %v8929_v37  ;;  %v8199_v0 = vpop.f32.mrb[112].mxu1  ;;  %v9260_v18 = vrot.slane %v9201_v1, 7  ;;  %v9127_v1 = vpop.permute.xlu1 %9126 }
0x1177   :  { %v8891_v5 = vadd.f32 %v19873_v23, %v8844_v49  ;;  %v8845_v48 = vadd.f32 %v19609_v26, %v8728_v55  ;;  %v8201_v63 = vpop.f32.mrb[113].mxu1 }
0x1178   :  { %21392 = vst [vmem:[#allocation59_spill] sm:$0xff] %v20069_v34  ;;  %v20077_v40 = vsel %vm1362_vm6, %v9358_v44, %v9359_v27  ;;  %v9360_v38 = vrot.slane %v9202_v54, 1  ;;  %v8652_v33 = vrot.slane %v8201_v63, 1  ;;  %v8203_v21 = vpop.f32.mrb[114].mxu1  ;;  %v9261_v37 = vrot.slane %v9202_v54, 7 }
0x1179   :  { %v8930_v17 = vmax.f32 %v8891_v5, 0.0  ;;  %v8892_v13 = vadd.f32 %v19873_v23, %v8845_v48  ;;  %v8205_v26 = vpop.f32.mrb[115].mxu1  ;;  %v20085_v20 = vsel %vm9272_vm8, %v9259_v51, %v9260_v18 }
0x117a   :  { %21393 = vst [vmem:[#allocation60_spill] sm:$0xff] %v20085_v20  ;;  %v8665_v44 = vsel %vm1362_vm6, %v8651_v31, %v8652_v33  ;;  %v8653_v12 = vrot.slane %v8205_v26, 1  ;;  %v20091_v49 = vsel %vm1362_vm6, %v9359_v27, %v9360_v38  ;;  %v20095_v55 = vsel %vm9272_vm8, %v9260_v18, %v9261_v37 }
0x117b   :  { %9737 = vmatmul.mubr.bf16.gmra.mrb[184].mxu1 %v20069_v34  ;;  %21394 = vst [vmem:[#allocation61_spill] sm:$0xff] %v20095_v55  ;;  %v9203_v5 = vmul.f32 %v9127_v1, %v8930_v17  ;;  %v8931_v48 = vmax.f32 %v8892_v13, 0.0  ;;  %v8729_v63 = vadd.f32 %v8665_v44, %v8193_v56 }
0x117c   :  { %9746 = vmatprep.mubr.bf16.mxu1 %v21301_v53  ;;  %v8664_v3 = vsel %vm1362_vm6, %v8652_v33, %v8653_v12 }
0x117d   :  { %v20101_v31 = vpack.c.bf16 %v9203_v5, %v9202_v54  ;;  %v9361_v26 = vrot.slane %v9203_v5, 1  ;;  %v9204_v34 = vmul.f32 %v9132_v52, %v8931_v48  ;;  %v8846_v27 = vadd.f32 %v19669_v45, %v8729_v63  ;;  %v9142_v45 = vpop.permute.xlu0 %9141 }
0x117e   :  { %v8730_v57 = vadd.f32 %v8664_v3, %v8199_v0  ;;  %v8209_v7 = vpop.f32.mrb[116].mxu1  ;;  %v9262_v18 = vrot.slane %v9203_v5, 7 }
0x117f   :  { %21395 = vst [vmem:[#allocation62_spill] sm:$0xff] %v20101_v31  ;;  %v8893_v17 = vadd.f32 %v19873_v23, %v8846_v27  ;;  %v8211_v13 = vpop.f32.mrb[117].mxu1  ;;  %v20108_v56 = vsel %vm1362_vm6, %v9360_v38, %v9361_v26  ;;  %v9362_v1 = vrot.slane %v9204_v34, 1  ;;  %v9263_v33 = vrot.slane %v9204_v34, 7 }
0x1180   :  { %v8847_v54 = vadd.f32 %v19682_v4, %v8730_v57  ;;  %v8654_v44 = vrot.slane %v8211_v13, 1  ;;  %v8213_v52 = vpop.f32.mrb[118].mxu1  ;;  %v20116_v0 = vsel %vm9272_vm8, %v9261_v37, %v9262_v18  ;;  %v9137_v57 = vpop.permute.xlu1 %9136 }
0x1181   :  { %21396 = vst [vmem:[#allocation63_spill] sm:$0xff] %v20116_v0  ;;  %v8932_v3 = vmax.f32 %v8893_v17, 0.0  ;;  %v8215_v5 = vpop.f32.mrb[119].mxu1  ;;  %v20120_v38 = vsel %vm1362_vm6, %v9361_v26, %v9362_v1  ;;  %v20124_v4 = vsel %vm9272_vm8, %v9262_v18, %v9263_v33 }
0x1182   :  { %v8894_v48 = vadd.f32 %v19873_v23, %v8847_v54  ;;  %v8663_v63 = vsel %vm1362_vm6, %v8653_v12, %v8654_v44  ;;  %v8655_v27 = vrot.slane %v8215_v5, 1 }
0x1183   :  { %9747 = vmatmul.mubr.bf16.gmra.mrb[188].mxu1 %v20101_v31  ;;  %v9205_v17 = vmul.f32 %v9137_v57, %v8932_v3  ;;  %v8731_v13 = vadd.f32 %v8663_v63, %v8203_v21 }
0x1184   :  { %9756 = vmatprep.mubr.bf16.mxu1 %v21301_v53  ;;  %v8933_v51 = vmax.f32 %v8894_v48, 0.0  ;;  %v8662_v26 = vsel %vm1362_vm6, %v8654_v44, %v8655_v27  ;;  %v9147_v48 = vpop.permute.xlu1 %9146 }
0x1185   :  { %v20133_v31 = vpack.c.bf16 %v9205_v17, %v9204_v34  ;;  %v8848_v18 = vadd.f32 %v19677_v50, %v8731_v13  ;;  %v8732_v20 = vadd.f32 %v8662_v26, %v8209_v7  ;;  %v9363_v54 = vrot.slane %v9205_v17, 1 }
0x1186   :  { %v9206_v55 = vmul.f32 %v9142_v45, %v8933_v51  ;;  %v8219_v39 = vpop.f32.mrb[120].mxu1  ;;  %v9264_v12 = vrot.slane %v9205_v17, 7 }
0x1187   :  { %21397 = vst [vmem:[#allocation64_spill] sm:$0xff] %v20133_v31  ;;  %v8895_v5 = vadd.f32 %v19873_v23, %v8848_v18  ;;  %v8849_v37 = vadd.f32 %v19673_v2, %v8732_v20  ;;  %v8221_v3 = vpop.f32.mrb[121].mxu1  ;;  %v20141_v21 = vsel %vm1362_vm6, %v9362_v1, %v9363_v54 }
0x1188   :  { %v9364_v34 = vrot.slane %v9206_v55, 1  ;;  %v8656_v44 = vrot.slane %v8221_v3, 1  ;;  %v8223_v57 = vpop.f32.mrb[122].mxu1  ;;  %v9265_v7 = vrot.slane %v9206_v55, 7  ;;  %v20149_v20 = vsel %vm9272_vm8, %v9263_v33, %v9264_v12 }
0x1189   :  { %v8934_v51 = vmax.f32 %v8895_v5, 0.0  ;;  %v8896_v45 = vadd.f32 %v19873_v23, %v8849_v37  ;;  %v8225_v2 = vpop.f32.mrb[123].mxu1  ;;  %v9152_v5 = vpop.permute.xlu0 %9151 }
0x118a   :  { %v8661_v1 = vsel %vm1362_vm6, %v8655_v27, %v8656_v44  ;;  %v8657_v63 = vrot.slane %v8225_v2, 1  ;;  %v20155_v17 = vsel %vm1362_vm6, %v9363_v54, %v9364_v34  ;;  %v20159_v13 = vsel %vm9272_vm8, %v9264_v12, %v9265_v7 }
0x118b   :  { %9757 = vmatmul.mubr.bf16.gmra.mrb[192].mxu1 %v20133_v31  ;;  %v9207_v26 = vmul.f32 %v9147_v48, %v8934_v51  ;;  %v8935_v37 = vmax.f32 %v8896_v45, 0.0  ;;  %v8733_v18 = vadd.f32 %v8661_v1, %v8213_v52  ;;  %v21399_v45 = vld [vmem:[#allocation12_spill] sm:$0xff] }
0x118c   :  { %9766 = vmatprep.mubr.bf16.mxu1 %v21301_v53  ;;  %v8660_v3 = vsel %vm1362_vm6, %v8656_v44, %v8657_v63 }
0x118d   :  { %v20165_v27 = vpack.c.bf16 %v9207_v26, %v9206_v55  ;;  %v9365_v2 = vrot.slane %v9207_v26, 1  ;;  %v9208_v50 = vmul.f32 %v9152_v5, %v8935_v37  ;;  %v8850_v54 = vadd.f32 %v19707_v35, %v8733_v18  ;;  %v21400_v37 = vld [vmem:[#allocation10_spill] sm:$0xff]  ;;  %v9162_v33 = vpop.permute.xlu0 %9161 }
0x118e   :  { %v8734_v31 = vadd.f32 %v8660_v3, %v8219_v39  ;;  %v8229_v0 = vpop.f32.mrb[128].mxu1  ;;  %v9266_v12 = vrot.slane %v9207_v26, 7 }
0x118f   :  { %21398 = vst [vmem:[#allocation65_spill] sm:$0xff] %v20165_v27  ;;  %v8897_v51 = vadd.f32 %v19873_v23, %v8850_v54  ;;  %v8230_v52 = vadd.f32 %v8229_v0, %v21399_v45  ;;  %v8231_v48 = vpop.f32.mrb[129].mxu1  ;;  %v20173_v1 = vsel %vm1362_vm6, %v9364_v34, %v9365_v2  ;;  %v9366_v55 = vrot.slane %v9208_v50, 1 }
0x1190   :  { %v8851_v44 = vadd.f32 %v19749_v14, %v8734_v31  ;;  %v8232_v5 = vadd.f32 %v8231_v48, %v21400_v37  ;;  %v8233_v35 = vpop.f32.mrb[130].mxu1  ;;  %v9267_v26 = vrot.slane %v9208_v50, 7  ;;  %v20186_v34 = vsel %vm9272_vm8, %v9265_v7, %v9266_v12  ;;  %v9157_v14 = vpop.permute.xlu1 %9156 }
0x1191   :  { %v8936_v0 = vmax.f32 %v8897_v51, 0.0  ;;  %v8234_v18 = vpop.f32.mrb[131].mxu1  ;;  %v20182_v3 = vsel %vm1362_vm6, %v9365_v2, %v9366_v55  ;;  %21401 = vst [vmem:[#allocation12_spill] sm:$0xff] %v20186_v34  ;;  %v21402_v35 = vld [vmem:[#allocation13_spill] sm:$0xff] }
0x1192   :  { %v8898_v31 = vadd.f32 %v19873_v23, %v8851_v44  ;;  %v8658_v54 = vrot.slane %v8232_v5, 1  ;;  %v20191_v45 = vsel %vm9272_vm8, %v9266_v12, %v9267_v26  ;;  %v21403_v18 = vrot.slane %v21402_v35, 1 }
0x1193   :  { %9767 = vmatmul.mubr.bf16.gmra.mrb[196].mxu1 %v20165_v27  ;;  %v9209_v48 = vmul.f32 %v9157_v14, %v8936_v0  ;;  %v21404_v27 = vld [vmem:[#allocation14_spill] sm:$0xff]  ;;  %v21406_v14 = vrot.slane %v19685_v29, 2 }
0x1194   :  { %9776 = vmatprep.mubr.bf16.mxu1 %v21301_v53  ;;  %v8937_v37 = vmax.f32 %v8898_v31, 0.0  ;;  %v8659_v2 = vsel %vm1362_vm6, %v8657_v63, %v8658_v54  ;;  %v8697_v7 = vsel %vm1362_vm6, %v8658_v54, %v21403_v18  ;;  %v21405_v0 = vrot.slane %v21404_v27, 2 }
0x1195   :  { %v20201_v44 = vpack.c.bf16 %v9209_v48, %v9208_v50  ;;  %v8735_v5 = vadd.f32 %v8659_v2, %v8223_v57  ;;  %v8736_v39 = vadd.f32 %v8697_v7, %v8230_v52  ;;  %v9367_v12 = vrot.slane %v9209_v48, 1 }
0x1196   :  { %v8814_v31 = vsel %vm1461_vm7, %v21406_v14, %v21405_v0  ;;  %v9210_v51 = vmul.f32 %v9162_v33, %v8937_v37  ;;  %v9268_v63 = vrot.slane %v9209_v48, 7 }
0x1197   :  { %v8852_v35 = vadd.f32 %v19745_v47, %v8735_v5  ;;  %v8853_v34 = vadd.f32 %v8814_v31, %v8736_v39  ;;  %v20213_v50 = vsel %vm1362_vm6, %v9366_v55, %v9367_v12 }
0x1198   :  { %v9368_v57 = vrot.slane %v9210_v51, 1  ;;  %v9426_v29 = vpack.c.bf16 %v20213_v50, %v20182_v3  ;;  %v9269_v27 = vrot.slane %v9210_v51, 7  ;;  %v20220_v33 = vsel %vm9272_vm8, %v9267_v26, %v9268_v63  ;;  %v21467_v3 = vld [vmem:[#allocation51_spill] sm:$0xff]  ;;  %v21468_v50 = vld [vmem:[#allocation48_spill] sm:$0xff] }
0x1199   :  { %v8899_v47 = vadd.f32 %v19873_v23, %v8852_v35  ;;  %v8900_v52 = vadd.f32 %v19873_v23, %v8853_v34  ;;  %v21408_v35 = vrot.slane %v19202_v42, 1 }
0x119a   :  { %v20226_v39 = vsel %vm1362_vm6, %v9367_v12, %v9368_v57  ;;  %v20230_v55 = vsel %vm9272_vm8, %v9268_v63, %v9269_v27 }
0x119b   :  { %9777 = vmatmul.mubr.bf16.gmra.mrb[200].mxu1 %v20201_v44  ;;  %v8938_v54 = vmax.f32 %v8899_v47, 0.0  ;;  %v8939_v48 = vmax.f32 %v8900_v52, 0.0  ;;  %v9330_v37 = vpack.c.bf16 %v20230_v55, %v20220_v33  ;;  %v21409_v47 = vld [vmem:[#allocation15_spill] sm:$0xff]  ;;  %v21410_v52 = vld [vmem:[#allocation17_spill] sm:$0xff] }
0x119c   :  { %9786 = vmatprep.mubr.bf16.mxu1 %v21301_v53 }
0x119d   :  { %v9211_v26 = vmul.f32 %v19857_v41, %v8938_v54  ;;  %v9212_v2 = vmul.f32 %v19914_v36, %v8939_v48  ;;  %v21407_v36 = vrot.slane %v19202_v42, 7  ;;  %v21411_v54 = vld [vmem:[#allocation16_spill] sm:$0xff]  ;;  %v21413_v42 = vpack.c.bf16 %v19445_v16, %v19467_v61 }
0x119e   :  { %v21412_v48 = vpack.c.bf16 %v21410_v52, %v21411_v54  ;;  %v21427_v61 = vld [vmem:[#allocation28_spill] sm:$0xff]  ;;  %v21430_v52 = vpack.c.bf16 %v19765_v6, %v19771_v58  ;;  %v21440_v58 = vpack.c.bf16 %v19843_v15, %v19847_v60  ;;  %v21441_v6 = vld [vmem:[#allocation39_spill] sm:$0xff]  ;;  %v21450_v15 = vpack.c.bf16 %v20000_v10, %v19955_v24 }
0x119f   :  { %v20236_v18 = vpack.c.bf16 %v9211_v26, %v9210_v51  ;;  %v9369_v23 = vrot.slane %v9211_v26, 1  ;;  %v9270_v34 = vrot.slane %v9211_v26, 7  ;;  %v9271_v7 = vrot.slane %v9212_v2, 7  ;;  %v21414_v26 = vld [vmem:[#allocation18_spill] sm:$0xff]  ;;  %v21431_v54 = vld [vmem:[#allocation24_spill] sm:$0xff] }
0x11a0   :  { %v9370_v5 = vrot.slane %v9212_v2, 1  ;;  %v21451_v60 = vld [vmem:[#allocation32_spill] sm:$0xff]  ;;  %v21459_v10 = vpack.c.bf16 %v20108_v56, %v20091_v49 }
0x11a1   :  { %v20241_v12 = vsel %vm1362_vm6, %v9368_v57, %v9369_v23  ;;  %v20245_v0 = vsel %vm9272_vm8, %v9269_v27, %v9270_v34  ;;  %v9273_v41 = vsel %vm9272_vm8, %v9270_v34, %v9271_v7  ;;  %v9311_v51 = vsel %vm9272_vm8, %v9271_v7, %v21407_v36  ;;  %v21416_v34 = vld [vmem:[#allocation27_spill] sm:$0xff] }
0x11a2   :  { %v9427_v14 = vpack.c.bf16 %v20241_v12, %v20226_v39  ;;  %v20258_v31 = vsel %vm1362_vm6, %v9369_v23, %v9370_v5  ;;  %v9312_v63 = vpack.c.bf16 %v9311_v51, %v9273_v41  ;;  %v20264_v57 = vsel %vm1362_vm6, %v9370_v5, %v21408_v35  ;;  %v21415_v23 = vld [vmem:[#allocation25_spill] sm:$0xff]  ;;  %v21418_v5 = vld [vmem:[#allocation23_spill] sm:$0xff]  ;;  %v21425_v35 = vld [vmem:[#allocation22_spill] sm:$0xff] }
0x11a3   :  { %9787 = vmatmul.mubr.bf16.gmra.mrb[204].mxu1 %v20236_v18  ;;  %v9428_v27 = vpack.c.bf16 %v20264_v57, %v20258_v31  ;;  %v21417_v7 = vpack.c.bf16 %v21415_v23, %v21416_v34  ;;  %v21419_v41 = vld [vmem:[#allocation19_spill] sm:$0xff]  ;;  %v21423_v31 = vld [vmem:[#allocation20_spill] sm:$0xff]  ;;  %v21428_v57 = vld [vmem:[#allocation30_spill] sm:$0xff] }
0x11a4   :  { %9796 = vmatprep.mubr.bf16.mxu1 %v21301_v53  ;;  %10059 = vmatprep.mubr.bf16.mxu0 %v9312_v63  ;;  %v20269_v53 = vpack.c.bf16 %v9212_v2, %v9212_v2  ;;  %v21420_v2 = vpack.c.bf16 %v21418_v5, %v21419_v41  ;;  %v21421_v36 = vld [vmem:[#allocation31_spill] sm:$0xff]  ;;  %v21436_v23 = vld [vmem:[#allocation21_spill] sm:$0xff]  ;;  %v21439_v5 = vld [vmem:[#allocation26_spill] sm:$0xff] }
0x11a5   :  { %10060 = vmatmul.mubr.bf16.vlgmr.msra.gmra.mrb[244].mxu0 %v21409_v47  ;;  %v21422_v51 = vpack.c.bf16 %v19621_v11, %v21421_v36  ;;  %v21424_v63 = vld [vmem:[#allocation11_spill] sm:$0xff]  ;;  %v21429_v47 = vpack.c.bf16 %v21427_v61, %v21428_v57  ;;  %v21442_v41 = vld [vmem:[#allocation38_spill] sm:$0xff]  ;;  %v21471_v39 = vld [vmem:[#allocation49_spill] sm:$0xff] }
0x11a6   :  { %10067 = vmatprep.mubr.bf16.mxu0 %v21412_v48  ;;  %v21426_v16 = vpack.c.bf16 %v21424_v63, %v21425_v35  ;;  %v21432_v48 = vld [vmem:[#allocation36_spill] sm:$0xff]  ;;  %v21444_v36 = vld [vmem:[#allocation42_spill] sm:$0xff]  ;;  %v21447_v63 = vld [vmem:[#allocation29_spill] sm:$0xff]  ;;  %v21452_v35 = vpack.c.bf16 %v19898_v28, %v19912_v19  ;;  %v21460_v19 = vpack.c.bf16 %v20141_v21, %v20120_v38  ;;  %v21465_v38 = vpack.c.bf16 %v20173_v1, %v20155_v17 }
0x11a7   :  { %v21461_v57 = vld [vmem:[#allocation35_spill] sm:$0xff]  ;;  %v21466_v17 = vld [vmem:[#allocation41_spill] sm:$0xff]  ;;  %v9429_v12 = vpack.c.bf16 %v21471_v39, %v21471_v39 }
0x11ab   :  { %9797 = vmatmul.mubr.bf16.gmra.mrb[84].mxu1 %v20269_v53 }
0x11ac   :  { %12659 = vmatprep.mubr.bf16.mxu1 %v21413_v42  ;;  %v21433_v42 = vld [vmem:[#allocation37_spill] sm:$0xff] }
0x11ad   :  { %10068 = vmatmul.mubr.bf16.gmra.mrb[248].mxu0 %v21414_v26  ;;  %v21434_v11 = vpack.c.bf16 %v21432_v48, %v21433_v42  ;;  %v21435_v26 = vld [vmem:[#allocation34_spill] sm:$0xff] }
0x11ae   :  { %10075 = vmatprep.mubr.bf16.mxu0 %v21417_v7  ;;  %v21437_v34 = vpack.c.bf16 %v21435_v26, %v21436_v23  ;;  %v21438_v7 = vpack.c.bf16 %v19819_v32, %v19827_v22  ;;  %v21448_v22 = vpack.c.bf16 %v19889_v59, %v19894_v25  ;;  %v21449_v32 = vpack.c.bf16 %v19943_v43, %v19904_v62  ;;  %v21455_v62 = vld [vmem:[#allocation33_spill] sm:$0xff]  ;;  %v21456_v25 = vld [vmem:[#allocation44_spill] sm:$0xff] }
0x11af   :  { %v21454_v59 = vpack.c.bf16 %v20077_v40, %v20052_v8  ;;  %v21457_v43 = vld [vmem:[#allocation45_spill] sm:$0xff] }
0x11b0   :  { %v21458_v24 = vpack.c.bf16 %v21456_v25, %v21457_v43  ;;  %v21475_v43 = vmov 0.0  }
0x11b3   :  { %12660 = vmatmul.mubr.bf16.vlgmr.msra.gmra.mrb[32].mxu1 %v21420_v2  ;;  %v21443_v2 = vpack.c.bf16 %v21441_v6, %v21442_v41 }
0x11b4   :  { %12663 = vmatprep.mubr.bf16.mxu1 %v21422_v51  ;;  %v21445_v51 = vld [vmem:[#allocation40_spill] sm:$0xff] }
0x11b5   :  { %10076 = vmatmul.mubr.bf16.gmra.mrb[252].mxu0 %v21423_v31  ;;  %v21446_v31 = vpack.c.bf16 %v21444_v36, %v21445_v51 }
0x11b6   :  { %10083 = vmatprep.mubr.bf16.mxu0 %v21426_v16  ;;  %v21453_v16 = vpack.c.bf16 %v20042_v30, %v20017_v9 }
0x11bb   :  { %12664 = vmatmul.mubr.bf16.gmra.mrb[212].mxu1 %v21429_v47  ;;  %v21462_v47 = vld [vmem:[#allocation47_spill] sm:$0xff] }
0x11bc   :  { %12667 = vmatprep.mubr.bf16.mxu1 %v21430_v52  ;;  %v21463_v52 = vld [vmem:[#allocation46_spill] sm:$0xff] }
0x11bd   :  { %10084 = vmatmul.mubr.bf16.gmra.mrb[80].mxu0 %v21431_v54  ;;  %v21464_v49 = vpack.c.bf16 %v21462_v47, %v21463_v52 }
0x11be   :  { %10091 = vmatprep.mubr.bf16.mxu0 %v21434_v11 }
0x11c3   :  { %12668 = vmatmul.mubr.bf16.gmra.mrb[216].mxu1 %v21437_v34 }
0x11c4   :  { %12671 = vmatprep.mubr.bf16.mxu1 %v21438_v7 }
0x11c5   :  { %10092 = vmatmul.mubr.bf16.gmra.mrb[4].mxu0 %v21439_v5 }
0x11c6   :  { %10099 = vmatprep.mubr.bf16.mxu0 %v21440_v58 }
0x11cb   :  { %12672 = vmatmul.mubr.bf16.gmra.mrb[220].mxu1 %v21443_v2 }
0x11cc   :  { %12675 = vmatprep.mubr.bf16.mxu1 %v21446_v31 }
0x11cd   :  { %10100 = vmatmul.mubr.bf16.gmra.mrb[8].mxu0 %v21447_v63 }
0x11ce   :  { %10107 = vmatprep.mubr.bf16.mxu0 %v21448_v22 }
0x11d3   :  { %12676 = vmatmul.mubr.bf16.gmra.mrb[224].mxu1 %v21449_v32 }
0x11d4   :  { %12679 = vmatprep.mubr.bf16.mxu1 %v21450_v15 }
0x11d5   :  { %10108 = vmatmul.mubr.bf16.gmra.mrb[12].mxu0 %v21451_v60  ;;  %v21470_v60 = vld [vmem:[#allocation43_spill] sm:$0xff] }
0x11d6   :  { %10115 = vmatprep.mubr.bf16.mxu0 %v21452_v35 }
0x11db   :  { %12680 = vmatmul.mubr.bf16.gmra.mrb[228].mxu1 %v21453_v16 }
0x11dc   :  { %12683 = vmatprep.mubr.bf16.mxu1 %v21454_v59 }
0x11dd   :  { %10116 = vmatmul.mubr.bf16.gmra.mrb[16].mxu0 %v21455_v62 }
0x11de   :  { %10123 = vmatprep.mubr.bf16.mxu0 %v21458_v24 }
0x11e2   :  { %v20345_v28 = vpop.f32.mrb[132].mxu1 }
0x11e3   :  { %12684 = vmatmul.mubr.bf16.gmra.mrb[232].mxu1 %v21459_v10  ;;  %v20350_v9 = vpop.f32.mrb[133].mxu1  ;;  %v21234_v8 = vrot.slane %v20345_v28, 7 }
0x11e4   :  { %12687 = vmatprep.mubr.bf16.mxu1 %v21460_v19  ;;  %v9612_v30 = vpop.f32.mrb[134].mxu1 }
0x11e5   :  { %v9806_v40 = vrot.slane %v9612_v30, 7  ;;  %v20353_v61 = vpop.f32.mrb[135].mxu1  ;;  %10124 = vmatmul.mubr.bf16.gmra.mrb[20].mxu0 %v21461_v57 }
0x11e6   :  { %10131 = vmatprep.mubr.bf16.mxu0 %v21464_v49  ;;  %v21233_v42 = vrot.slane %v20353_v61, 1  ;;  %v21476_v49 = vld [vmem:[#allocation50_spill] sm:$0xff] }
0x11e7   :  { %v20363_v56 = vsel %vm9272_vm8, %v21234_v8, %v9806_v40 }
0x11ea   :  { %v9618_v21 = vpop.f32.mrb[136].mxu1 }
0x11eb   :  { %12688 = vmatmul.mubr.bf16.gmra.mrb[236].mxu1 %v21465_v38  ;;  %v9807_v54 = vrot.slane %v9618_v21, 7  ;;  %v9620_v48 = vpop.f32.mrb[137].mxu1  ;;  %v21477_v21 = vld [vmem:[#allocation56_spill] sm:$0xff] }
0x11ec   :  { %12691 = vmatprep.mubr.bf16.mxu1 %v9426_v29  ;;  %v10413_v11 = vrot.slane %v9620_v48, 1  ;;  %v9622_v26 = vpop.f32.mrb[138].mxu1  ;;  %v21469_v29 = vpack.c.bf16 %v21467_v3, %v21468_v50 }
0x11ed   :  { %v9808_v23 = vrot.slane %v9622_v26, 7  ;;  %v9624_v34 = vpop.f32.mrb[139].mxu1  ;;  %v20374_v7 = vsel %vm9272_vm8, %v9806_v40, %v9807_v54  ;;  %10132 = vmatmul.mubr.bf16.gmra.mrb[24].mxu0 %v21466_v17 }
0x11ee   :  { %v10414_v5 = vrot.slane %v9624_v34, 1  ;;  %v20381_v1 = vsel %vm1362_vm6, %v21233_v42, %v10413_v11  ;;  %10139 = vmatprep.mubr.bf16.mxu0 %v21469_v29 }
0x11ef   :  { %v20388_v58 = vsel %vm9272_vm8, %v9807_v54, %v9808_v23  ;;  %v21478_v54 = vld [vmem:[#allocation54_spill] sm:$0xff] }
0x11f0   :  { %v20392_v6 = vsel %vm1362_vm6, %v10413_v11, %v10414_v5  ;;  %v21479_v48 = vpack.c.bf16 %v21477_v21, %v21478_v54 }
0x11f2   :  { %v9628_v41 = vpop.f32.mrb[140].mxu1 }
0x11f3   :  { %12692 = vmatmul.mubr.bf16.gmra.mrb[240].mxu1 %v9427_v14  ;;  %v9809_v2 = vrot.slane %v9628_v41, 7  ;;  %v9630_v36 = vpop.f32.mrb[141].mxu1  ;;  %v21472_v14 = vld [vmem:[#allocation53_spill] sm:$0xff] }
0x11f4   :  { %12695 = vmatprep.mubr.bf16.mxu1 %v9428_v27  ;;  %v10415_v51 = vrot.slane %v9630_v36, 1  ;;  %v9632_v31 = vpop.f32.mrb[142].mxu1  ;;  %v21473_v27 = vld [vmem:[#allocation52_spill] sm:$0xff] }
0x11f5   :  { %v9810_v63 = vrot.slane %v9632_v31, 7  ;;  %v9634_v22 = vpop.f32.mrb[143].mxu1  ;;  %v20399_v32 = vsel %vm9272_vm8, %v9808_v23, %v9809_v2  ;;  %10140 = vmatmul.mubr.bf16.gmra.mrb[28].mxu0 %v21470_v60  ;;  %v21474_v16 = vpack.c.bf16 %v21472_v14, %v21473_v27  ;;  %v21481_v31 = vld [vmem:[#allocation58_spill] sm:$0xff] }
0x11f6   :  { %v10416_v15 = vrot.slane %v9634_v22, 1  ;;  %v20404_v35 = vsel %vm1362_vm6, %v10414_v5, %v10415_v51 }
0x11f7   :  { %10147 = vmatprep.mubr.bf16.mxu0 %v21474_v16  ;;  %v20413_v59 = vsel %vm9272_vm8, %v9809_v2, %v9810_v63 }
0x11f8   :  { %v20417_v62 = vsel %vm1362_vm6, %v10415_v51, %v10416_v15  ;;  %v21480_v51 = vld [vmem:[#allocation55_spill] sm:$0xff] }
0x11fb   :  { %12696 = vmatmul.mubr.bf16.gmra.mrb[244].mxu1 %v9429_v12  ;;  %v9638_v25 = vpop.f32.mrb[144].mxu1 }
0x11fc   :  { %12812 = vmatprep.mubr.msk.bf16.mxu1 %vm13998_vm1, %v21475_v43  ;;  %v9811_v24 = vrot.slane %v9638_v25, 7  ;;  %v9640_v10 = vpop.f32.mrb[145].mxu1 }
0x11fd   :  { %v10417_v19 = vrot.slane %v9640_v10, 1  ;;  %v9642_v30 = vpop.f32.mrb[146].mxu1  ;;  %10148 = vmatmul.mubr.bf16.gmra.mrb[32].mxu0 %v21476_v49 }
0x11fe   :  { %v9812_v40 = vrot.slane %v9642_v30, 7  ;;  %v9644_v57 = vpop.f32.mrb[147].mxu1  ;;  %v20423_v47 = vsel %vm9272_vm8, %v9810_v63, %v9811_v24  ;;  %10155 = vmatprep.mubr.bf16.mxu0 %v21479_v48  ;;  %v21482_v63 = vld [vmem:[#allocation57_spill] sm:$0xff] }
0x11ff   :  { %v10418_v52 = vrot.slane %v9644_v57, 1  ;;  %v20428_v38 = vsel %vm1362_vm6, %v10416_v15, %v10417_v19  ;;  %v21483_v22 = vpack.c.bf16 %v21481_v31, %v21482_v63  ;;  %v21485_v57 = vld [vmem:[#allocation61_spill] sm:$0xff]  ;;  %v21488_v31 = vld [vmem:[#allocation62_spill] sm:$0xff]  ;;  %v21489_v63 = vld [vmem:[#allocation63_spill] sm:$0xff] }
0x1200   :  { %v20435_v11 = vsel %vm9272_vm8, %v9811_v24, %v9812_v40 }
0x1201   :  { %v20439_v26 = vsel %vm1362_vm6, %v10417_v19, %v10418_v52 }
0x1204   :  { %v9648_v23 = vpop.f32.mrb[148].mxu1 }
0x1205   :  { %v9813_v34 = vrot.slane %v9648_v23, 7  ;;  %v9650_v5 = vpop.f32.mrb[149].mxu1  ;;  %10156 = vmatmul.mubr.bf16.gmra.mrb[168].mxu0 %v21480_v51 }
0x1206   :  { %v10419_v17 = vrot.slane %v9650_v5, 1  ;;  %v9652_v3 = vpop.f32.mrb[150].mxu1  ;;  %10163 = vmatprep.mubr.bf16.mxu0 %v21483_v22  ;;  %v21490_v22 = vpack.c.bf16 %v20124_v4, %v21489_v63 }
0x1207   :  { %v9814_v50 = vrot.slane %v9652_v3, 7  ;;  %v9654_v29 = vpop.f32.mrb[151].mxu1  ;;  %v20443_v41 = vsel %vm9272_vm8, %v9812_v40, %v9813_v34  ;;  %v21484_v40 = vld [vmem:[#allocation59_spill] sm:$0xff] }
0x1208   :  { %v20447_v2 = vsel %vm1362_vm6, %v10418_v52, %v10419_v17  ;;  %v10420_v36 = vrot.slane %v9654_v29, 1  ;;  %v21486_v52 = vld [vmem:[#allocation60_spill] sm:$0xff] }
0x1209   :  { %v20455_v15 = vsel %vm9272_vm8, %v9813_v34, %v9814_v50  ;;  %v21487_v49 = vpack.c.bf16 %v21485_v57, %v21486_v52 }
0x120a   :  { %v20459_v60 = vsel %vm1362_vm6, %v10419_v17, %v10420_v36 }
0x120c   :  { %v9658_v39 = vpop.f32.mrb[152].mxu1 }
0x120d   :  { %v9815_v12 = vrot.slane %v9658_v39, 7  ;;  %v9660_v14 = vpop.f32.mrb[153].mxu1  ;;  %10164 = vmatmul.mubr.bf16.gmra.mrb[36].mxu0 %v21484_v40 }
0x120e   :  { %v10421_v27 = vrot.slane %v9660_v14, 1  ;;  %v9662_v16 = vpop.f32.mrb[154].mxu1  ;;  %10171 = vmatprep.mubr.bf16.mxu0 %v21487_v49  ;;  %v21491_v49 = vld [vmem:[#allocation64_spill] sm:$0xff] }
0x120f   :  { %v9816_v25 = vrot.slane %v9662_v16, 7  ;;  %v9664_v24 = vpop.f32.mrb[155].mxu1  ;;  %v20463_v10 = vsel %vm9272_vm8, %v9814_v50, %v9815_v12 }
0x1210   :  { %v20467_v19 = vsel %vm1362_vm6, %v10420_v36, %v10421_v27  ;;  %v10422_v30 = vrot.slane %v9664_v24, 1 }
0x1211   :  { %v20475_v21 = vsel %vm9272_vm8, %v9815_v12, %v9816_v25 }
0x1212   :  { %v20479_v54 = vsel %vm1362_vm6, %v10421_v27, %v10422_v30 }
0x1215   :  { %v9668_v48 = vpop.f32.mrb[156].mxu1  ;;  %10172 = vmatmul.mubr.bf16.gmra.mrb[40].mxu0 %v21488_v31 }
0x1216   :  { %v9817_v23 = vrot.slane %v9668_v48, 7  ;;  %v9670_v34 = vpop.f32.mrb[157].mxu1  ;;  %10179 = vmatprep.mubr.bf16.mxu0 %v21490_v22  ;;  %v21492_v48 = vpack.c.bf16 %v20159_v13, %v20149_v20 }
0x1217   :  { %v10423_v5 = vrot.slane %v9670_v34, 1  ;;  %v9672_v17 = vpop.f32.mrb[158].mxu1 }
0x1218   :  { %v9818_v3 = vrot.slane %v9672_v17, 7  ;;  %v9674_v50 = vpop.f32.mrb[159].mxu1  ;;  %v20483_v29 = vsel %vm9272_vm8, %v9816_v25, %v9817_v23 }
0x1219   :  { %v20487_v36 = vsel %vm1362_vm6, %v10422_v30, %v10423_v5  ;;  %v10424_v51 = vrot.slane %v9674_v50, 1 }
0x121a   :  { %v20495_v39 = vsel %vm9272_vm8, %v9817_v23, %v9818_v3 }
0x121b   :  { %v20499_v12 = vsel %vm1362_vm6, %v10423_v5, %v10424_v51 }
0x121d   :  { %10180 = vmatmul.mubr.bf16.gmra.mrb[44].mxu0 %v21491_v49 }
0x121e   :  { %v9678_v14 = vpop.f32.mrb[160].mxu1  ;;  %10187 = vmatprep.mubr.bf16.mxu0 %v21492_v48 }
0x121f   :  { %v9819_v27 = vrot.slane %v9678_v14, 7  ;;  %v9680_v16 = vpop.f32.mrb[161].mxu1  ;;  %v21493_v14 = vld [vmem:[#allocation65_spill] sm:$0xff] }
0x1220   :  { %v10425_v25 = vrot.slane %v9680_v16, 1  ;;  %v9682_v24 = vpop.f32.mrb[162].mxu1 }
0x1221   :  { %v9820_v30 = vrot.slane %v9682_v24, 7  ;;  %v9684_v40 = vpop.f32.mrb[163].mxu1  ;;  %v20503_v57 = vsel %vm9272_vm8, %v9818_v3, %v9819_v27 }
0x1222   :  { %v20507_v4 = vsel %vm1362_vm6, %v10424_v51, %v10425_v25  ;;  %v10426_v52 = vrot.slane %v9684_v40, 1 }
0x1223   :  { %v20515_v23 = vsel %vm9272_vm8, %v9819_v27, %v9820_v30  ;;  %v21494_v27 = vld [vmem:[#allocation12_spill] sm:$0xff] }
0x1224   :  { %v20519_v34 = vsel %vm1362_vm6, %v10425_v25, %v10426_v52  ;;  %v21495_v16 = vpack.c.bf16 %v20191_v45, %v21494_v27 }
0x1225   :  { %10188 = vmatmul.mubr.bf16.gmra.mrb[48].mxu0 %v21493_v14 }
0x1226   :  { %v9688_v5 = vpop.f32.mrb[164].mxu1  ;;  %10195 = vmatprep.mubr.bf16.mxu0 %v21495_v16 }
0x1227   :  { %v9821_v17 = vrot.slane %v9688_v5, 7  ;;  %v9690_v3 = vpop.f32.mrb[165].mxu1 }
0x1228   :  { %v10427_v50 = vrot.slane %v9690_v3, 1  ;;  %v9692_v51 = vpop.f32.mrb[166].mxu1 }
0x1229   :  { %v9822_v31 = vrot.slane %v9692_v51, 7  ;;  %v9694_v63 = vpop.f32.mrb[167].mxu1  ;;  %v20523_v22 = vsel %vm9272_vm8, %v9820_v30, %v9821_v17 }
0x122a   :  { %v20527_v20 = vsel %vm1362_vm6, %v10426_v52, %v10427_v50  ;;  %v10428_v13 = vrot.slane %v9694_v63, 1 }
0x122b   :  { %v20535_v25 = vsel %vm9272_vm8, %v9821_v17, %v9822_v31 }
0x122c   :  { %v20539_v24 = vsel %vm1362_vm6, %v10427_v50, %v10428_v13 }
0x122d   :  { %10196 = vmatmul.mubr.bf16.gmra.mrb[52].mxu0 %v20201_v44  ;;  %v9331_v44 = vpack.c.bf16 %v20245_v0, %v20245_v0 }
0x122e   :  { %v9698_v30 = vpop.f32.mrb[168].mxu1  ;;  %10203 = vmatprep.mubr.bf16.mxu0 %v9330_v37 }
0x122f   :  { %v9823_v40 = vrot.slane %v9698_v30, 7  ;;  %v9700_v49 = vpop.f32.mrb[169].mxu1 }
0x1230   :  { %v10429_v52 = vrot.slane %v9700_v49, 1  ;;  %v9702_v48 = vpop.f32.mrb[170].mxu1 }
0x1231   :  { %v9824_v5 = vrot.slane %v9702_v48, 7  ;;  %v9704_v3 = vpop.f32.mrb[171].mxu1  ;;  %v20543_v51 = vsel %vm9272_vm8, %v9822_v31, %v9823_v40 }
0x1232   :  { %v20547_v45 = vsel %vm1362_vm6, %v10428_v13, %v10429_v52  ;;  %v10430_v17 = vrot.slane %v9704_v3, 1 }
0x1233   :  { %v20555_v50 = vsel %vm9272_vm8, %v9823_v40, %v9824_v5 }
0x1234   :  { %v20559_v63 = vsel %vm1362_vm6, %v10429_v52, %v10430_v17 }
0x1235   :  { %10204 = vmatmul.mubr.bf16.gmra.mrb[56].mxu0 %v20236_v18 }
0x1236   :  { %v9708_v31 = vpop.f32.mrb[172].mxu1  ;;  %10211 = vmatprep.mubr.bf16.mxu0 %v9331_v44 }
0x1237   :  { %v9825_v14 = vrot.slane %v9708_v31, 7  ;;  %v9710_v27 = vpop.f32.mrb[173].mxu1 }
0x1238   :  { %v10431_v13 = vrot.slane %v9710_v27, 1  ;;  %v9712_v16 = vpop.f32.mrb[174].mxu1 }
0x1239   :  { %v9826_v30 = vrot.slane %v9712_v16, 7  ;;  %v9714_v49 = vpop.f32.mrb[175].mxu1  ;;  %v20565_v33 = vsel %vm9272_vm8, %v9824_v5, %v9825_v14 }
0x123a   :  { %v20569_v55 = vsel %vm1362_vm6, %v10430_v17, %v10431_v13  ;;  %v10432_v37 = vrot.slane %v9714_v49, 1 }
0x123b   :  { %v20574_v40 = vsel %vm9272_vm8, %v9825_v14, %v9826_v30 }
0x123c   :  { %v20578_v52 = vsel %vm1362_vm6, %v10431_v13, %v10432_v37 }
0x123d   :  { %10212 = vmatmul.mubr.bf16.gmra.mrb[60].mxu0 %v20269_v53 }
0x123e   :  { %v9718_v0 = vpop.f32.mrb[176].mxu1 }
0x123f   :  { %v9827_v48 = vrot.slane %v9718_v0, 7  ;;  %v9720_v5 = vpop.f32.mrb[177].mxu1 }
0x1240   :  { %v10433_v3 = vrot.slane %v9720_v5, 1  ;;  %v9722_v31 = vpop.f32.mrb[178].mxu1 }
0x1241   :  { %v9828_v27 = vrot.slane %v9722_v31, 7  ;;  %v9724_v17 = vpop.f32.mrb[179].mxu1  ;;  %v20582_v16 = vsel %vm9272_vm8, %v9826_v30, %v9827_v48 }
0x1242   :  { %21496 = vst [vmem:[#allocation10_spill] sm:$0xff] %v20582_v16  ;;  %v20586_v18 = vsel %vm1362_vm6, %v10432_v37, %v10433_v3  ;;  %v10434_v14 = vrot.slane %v9724_v17, 1 }
0x1243   :  { %v20591_v13 = vsel %vm9272_vm8, %v9827_v48, %v9828_v27 }
0x1244   :  { %21497 = vst [vmem:[#allocation13_spill] sm:$0xff] %v20591_v13  ;;  %v20595_v49 = vsel %vm1362_vm6, %v10433_v3, %v10434_v14 }
0x1245   :  { %21498 = vst [vmem:[#allocation14_spill] sm:$0xff] %v20595_v49 }
0x1246   :  { %v9728_v44 = vpop.f32.mrb[180].mxu1 }
0x1247   :  { %v9829_v0 = vrot.slane %v9728_v44, 7  ;;  %v9730_v5 = vpop.f32.mrb[181].mxu1 }
0x1248   :  { %v10435_v30 = vrot.slane %v9730_v5, 1  ;;  %v9732_v31 = vpop.f32.mrb[182].mxu1 }
0x1249   :  { %v9830_v42 = vrot.slane %v9732_v31, 7  ;;  %v9734_v8 = vpop.f32.mrb[183].mxu1  ;;  %v20599_v37 = vsel %vm9272_vm8, %v9828_v27, %v9829_v0 }
0x124a   :  { %21499 = vst [vmem:[#allocation15_spill] sm:$0xff] %v20599_v37  ;;  %v20603_v53 = vsel %vm1362_vm6, %v10434_v14, %v10435_v30  ;;  %v10436_v48 = vrot.slane %v9734_v8, 1 }
0x124b   :  { %21500 = vst [vmem:[#allocation17_spill] sm:$0xff] %v20603_v53  ;;  %v20607_v3 = vsel %vm9272_vm8, %v9829_v0, %v9830_v42 }
0x124c   :  { %21501 = vst [vmem:[#allocation16_spill] sm:$0xff] %v20607_v3  ;;  %v20611_v17 = vsel %vm1362_vm6, %v10435_v30, %v10436_v48 }
0x124d   :  { %21502 = vst [vmem:[#allocation18_spill] sm:$0xff] %v20611_v17 }
0x124e   :  { %v9738_v44 = vpop.f32.mrb[184].mxu1 }
0x124f   :  { %v9831_v5 = vrot.slane %v9738_v44, 7  ;;  %v9740_v31 = vpop.f32.mrb[185].mxu1 }
0x1250   :  { %v10437_v43 = vrot.slane %v9740_v31, 1  ;;  %v9742_v49 = vpop.f32.mrb[186].mxu1 }
0x1251   :  { %v9832_v27 = vrot.slane %v9742_v49, 7  ;;  %v9744_v37 = vpop.f32.mrb[187].mxu1  ;;  %v20615_v14 = vsel %vm9272_vm8, %v9830_v42, %v9831_v5 }
0x1252   :  { %21503 = vst [vmem:[#allocation25_spill] sm:$0xff] %v20615_v14  ;;  %v20619_v8 = vsel %vm1362_vm6, %v10436_v48, %v10437_v43  ;;  %v10438_v0 = vrot.slane %v9744_v37, 1 }
0x1253   :  { %21504 = vst [vmem:[#allocation27_spill] sm:$0xff] %v20619_v8  ;;  %v20623_v30 = vsel %vm9272_vm8, %v9831_v5, %v9832_v27 }
0x1254   :  { %21505 = vst [vmem:[#allocation23_spill] sm:$0xff] %v20623_v30  ;;  %v20627_v44 = vsel %vm1362_vm6, %v10437_v43, %v10438_v0 }
0x1255   :  { %21506 = vst [vmem:[#allocation19_spill] sm:$0xff] %v20627_v44 }
0x1256   :  { %v9748_v31 = vpop.f32.mrb[188].mxu1 }
0x1257   :  { %v9833_v49 = vrot.slane %v9748_v31, 7  ;;  %v9750_v17 = vpop.f32.mrb[189].mxu1 }
0x1258   :  { %v10439_v3 = vrot.slane %v9750_v17, 1  ;;  %v9752_v53 = vpop.f32.mrb[190].mxu1 }
0x1259   :  { %v9834_v42 = vrot.slane %v9752_v53, 7  ;;  %v9754_v14 = vpop.f32.mrb[191].mxu1  ;;  %v20631_v48 = vsel %vm9272_vm8, %v9832_v27, %v9833_v49 }
0x125a   :  { %21507 = vst [vmem:[#allocation31_spill] sm:$0xff] %v20631_v48  ;;  %v20635_v37 = vsel %vm1362_vm6, %v10438_v0, %v10439_v3  ;;  %v10440_v5 = vrot.slane %v9754_v14, 1 }
0x125b   :  { %21508 = vst [vmem:[#allocation20_spill] sm:$0xff] %v20635_v37  ;;  %v20639_v43 = vsel %vm9272_vm8, %v9833_v49, %v9834_v42 }
0x125c   :  { %21509 = vst [vmem:[#allocation11_spill] sm:$0xff] %v20639_v43  ;;  %v20643_v31 = vsel %vm1362_vm6, %v10439_v3, %v10440_v5 }
0x125d   :  { %21510 = vst [vmem:[#allocation22_spill] sm:$0xff] %v20643_v31 }
0x125e   :  { %v9758_v17 = vpop.f32.mrb[192].mxu1 }
0x125f   :  { %v9835_v53 = vrot.slane %v9758_v17, 7  ;;  %v9760_v44 = vpop.f32.mrb[193].mxu1 }
0x1260   :  { %v10441_v30 = vrot.slane %v9760_v44, 1  ;;  %v9762_v8 = vpop.f32.mrb[194].mxu1 }
0x1261   :  { %v9836_v27 = vrot.slane %v9762_v8, 7  ;;  %v9764_v48 = vpop.f32.mrb[195].mxu1  ;;  %v20647_v0 = vsel %vm9272_vm8, %v9834_v42, %v9835_v53 }
0x1262   :  { %21511 = vst [vmem:[#allocation28_spill] sm:$0xff] %v20647_v0  ;;  %v20651_v14 = vsel %vm1362_vm6, %v10440_v5, %v10441_v30  ;;  %v10442_v49 = vrot.slane %v9764_v48, 1 }
0x1263   :  { %21512 = vst [vmem:[#allocation30_spill] sm:$0xff] %v20651_v14  ;;  %v20655_v3 = vsel %vm9272_vm8, %v9835_v53, %v9836_v27 }
0x1264   :  { %21513 = vst [vmem:[#allocation24_spill] sm:$0xff] %v20655_v3  ;;  %v20659_v17 = vsel %vm1362_vm6, %v10441_v30, %v10442_v49 }
0x1265   :  { %21514 = vst [vmem:[#allocation36_spill] sm:$0xff] %v20659_v17 }
0x1266   :  { %v9768_v44 = vpop.f32.mrb[196].mxu1 }
0x1267   :  { %v9837_v8 = vrot.slane %v9768_v44, 7  ;;  %v9770_v31 = vpop.f32.mrb[197].mxu1 }
0x1268   :  { %v10443_v43 = vrot.slane %v9770_v31, 1  ;;  %v9772_v37 = vpop.f32.mrb[198].mxu1 }
0x1269   :  { %v9838_v42 = vrot.slane %v9772_v37, 7  ;;  %v9774_v0 = vpop.f32.mrb[199].mxu1  ;;  %v20663_v5 = vsel %vm9272_vm8, %v9836_v27, %v9837_v8 }
0x126a   :  { %21515 = vst [vmem:[#allocation37_spill] sm:$0xff] %v20663_v5  ;;  %v20667_v48 = vsel %vm1362_vm6, %v10442_v49, %v10443_v43  ;;  %v10444_v53 = vrot.slane %v9774_v0, 1 }
0x126b   :  { %21516 = vst [vmem:[#allocation34_spill] sm:$0xff] %v20667_v48  ;;  %v20671_v30 = vsel %vm9272_vm8, %v9837_v8, %v9838_v42 }
0x126c   :  { %21517 = vst [vmem:[#allocation21_spill] sm:$0xff] %v20671_v30  ;;  %v20675_v44 = vsel %vm1362_vm6, %v10443_v43, %v10444_v53 }
0x126d   :  { %21518 = vst [vmem:[#allocation26_spill] sm:$0xff] %v20675_v44 }
0x126e   :  { %v9778_v31 = vpop.f32.mrb[200].mxu1 }
0x126f   :  { %v9839_v37 = vrot.slane %v9778_v31, 7  ;;  %v9780_v17 = vpop.f32.mrb[201].mxu1 }
0x1270   :  { %v10445_v3 = vrot.slane %v9780_v17, 1  ;;  %v9782_v14 = vpop.f32.mrb[202].mxu1 }
0x1271   :  { %v9840_v27 = vrot.slane %v9782_v14, 7  ;;  %v9784_v5 = vpop.f32.mrb[203].mxu1  ;;  %v20679_v49 = vsel %vm9272_vm8, %v9838_v42, %v9839_v37 }
0x1272   :  { %21519 = vst [vmem:[#allocation39_spill] sm:$0xff] %v20679_v49  ;;  %v20683_v0 = vsel %vm1362_vm6, %v10444_v53, %v10445_v3  ;;  %v10446_v8 = vrot.slane %v9784_v5, 1 }
0x1273   :  { %21520 = vst [vmem:[#allocation38_spill] sm:$0xff] %v20683_v0  ;;  %v20687_v43 = vsel %vm9272_vm8, %v9839_v37, %v9840_v27 }
0x1274   :  { %21521 = vst [vmem:[#allocation42_spill] sm:$0xff] %v20687_v43  ;;  %v20691_v31 = vsel %vm1362_vm6, %v10445_v3, %v10446_v8 }
0x1275   :  { %21522 = vst [vmem:[#allocation40_spill] sm:$0xff] %v20691_v31 }
0x1276   :  { %v9788_v17 = vpop.f32.mrb[204].mxu1 }
0x1277   :  { %v9841_v14 = vrot.slane %v9788_v17, 7  ;;  %v9790_v44 = vpop.f32.mrb[205].mxu1 }
0x1278   :  { %v10447_v30 = vrot.slane %v9790_v44, 1  ;;  %v9792_v48 = vpop.f32.mrb[206].mxu1  ;;  %v10061_v43 = vpop.f32.mrb[244].mxu0 }
0x1279   :  { %v9842_v42 = vrot.slane %v9792_v48, 7  ;;  %v9794_v49 = vpop.f32.mrb[207].mxu1  ;;  %v20695_v53 = vsel %vm9272_vm8, %v9840_v27, %v9841_v14  ;;  %v10063_v48 = vpop.f32.mrb[245].mxu0 }
0x127a   :  { %21523 = vst [vmem:[#allocation29_spill] sm:$0xff] %v20695_v53  ;;  %v20699_v5 = vsel %vm1362_vm6, %v10446_v8, %v10447_v30  ;;  %v10448_v37 = vrot.slane %v9794_v49, 1  ;;  %v10064_v17 = vpop.f32.mrb[246].mxu0 }
0x127b   :  { %21524 = vst [vmem:[#allocation32_spill] sm:$0xff] %v20699_v5  ;;  %v20703_v3 = vsel %vm9272_vm8, %v9841_v14, %v9842_v42  ;;  %v10065_v31 = vadd.f32 %v10064_v17, %v20363_v56  ;;  %v10066_v27 = vpop.f32.mrb[247].mxu0  ;;  %v21528_v14 = vrot.slane %v20345_v28, 7 }
0x127c   :  { %21525 = vst [vmem:[#allocation33_spill] sm:$0xff] %v20703_v3  ;;  %v20707_v44 = vsel %vm1362_vm6, %v10447_v30, %v10448_v37 }
0x127d   :  { %21526 = vst [vmem:[#allocation44_spill] sm:$0xff] %v20707_v44  ;;  %v21237_v44 = vrot.slane %v20350_v9, 1 }
0x127e   :  { %v9798_v53 = vpop.f32.mrb[84].mxu1 }
0x127f   :  { %v9843_v0 = vrot.slane %v9798_v53, 7  ;;  %v20710_v13 = vpop.f32.mrb[85].mxu1 }
0x1280   :  { %21527 = vst [vmem:[#allocation45_spill] sm:$0xff] %v20710_v13  ;;  %v21236_v49 = vrot.slane %v20710_v13, 1  ;;  %v9802_v8 = vpop.f32.mrb[86].mxu1  ;;  %v10069_v48 = vpop.f32.mrb[248].mxu0 }
0x1281   :  { %v9803_v5 = vpop.f32.mrb[87].mxu1  ;;  %v9882_v3 = vsel %vm9272_vm8, %v9843_v0, %v21528_v14  ;;  %v20719_v30 = vsel %vm9272_vm8, %v9842_v42, %v9843_v0  ;;  %v10070_v17 = vadd.f32 %v10069_v48, %v20374_v7 }
0x1282   :  { %21529 = vst [vmem:[#allocation35_spill] sm:$0xff] %v20719_v30  ;;  %v20725_v56 = vsel %vm1362_vm6, %v10448_v37, %v21236_v49  ;;  %v10062_v53 = vadd.f32 %v10061_v43, %v9882_v3  ;;  %v10071_v5 = vpop.f32.mrb[249].mxu0  ;;  %v21530_v37 = vrot.slane %v20353_v61, 1 }
0x1283   :  { %v10072_v27 = vpop.f32.mrb[250].mxu0 }
0x1284   :  { %v10073_v28 = vadd.f32 %v10072_v27, %v20388_v58  ;;  %v10074_v8 = vpop.f32.mrb[251].mxu0  ;;  %v10487_v7 = vsel %vm1362_vm6, %v21237_v44, %v21530_v37  ;;  %v20740_v58 = vld [vmem:[%s21121_s9] ss:$0 sm:$0xff] }
0x1286   :  { %v12661_v14 = vpop.f32.mrb[32].mxu1 }
0x1287   :  { %v10262_v0 = vadd.f32 %v12661_v14, %v10070_v17  ;;  %v10253_v42 = vpop.f32.mrb[33].mxu1 }
0x1288   :  { %v10254_v30 = vadd.f32 %v10253_v42, %v10062_v53  ;;  %v12662_v13 = vpop.f32.mrb[34].mxu1  ;;  %v10077_v5 = vpop.f32.mrb[252].mxu0 }
0x1289   :  { %v10491_v16 = vadd.f32 %v20392_v6, %v10262_v0  ;;  %v10265_v43 = vadd.f32 %v12662_v13, %v10073_v28  ;;  %v10256_v3 = vpop.f32.mrb[35].mxu1  ;;  %v10078_v61 = vadd.f32 %v10077_v5, %v20399_v32  ;;  %v10079_v27 = vpop.f32.mrb[253].mxu0 }
0x128a   :  { %v10489_v48 = vadd.f32 %v10487_v7, %v10254_v30  ;;  %v10257_v17 = vadd.f32 %v10256_v3, %v10065_v31  ;;  %v10080_v28 = vpop.f32.mrb[254].mxu0  ;;  %v20754_v30 = vld [vmem:[%s21122_s11] sm:$0x77] }
0x128b   :  { %v10492_v53 = vadd.f32 %v20404_v35, %v10265_v43  ;;  %v20746_v8 = vadd.f32 %v20740_v58, %v10491_v16  ;;  %v10081_v32 = vadd.f32 %v10080_v28, %v20413_v59  ;;  %v10082_v31 = vpop.f32.mrb[255].mxu0  ;;  %v10578_v14 = vcombine.high %v20754_v30, %v20754_v30 }
0x128c   :  { %v10490_v6 = vadd.f32 %v20381_v1, %v10257_v17  ;;  %v20757_v35 = vadd.f32 %v20740_v58, %v10489_v48 }
0x128d   :  { %v20749_v13 = vadd.f32 %v20740_v58, %v10492_v53  ;;  %10646 = vmatprep.mubr.f32.mxu0 %v10578_v14 }
0x128e   :  { %v20760_v1 = vadd.f32 %v20740_v58, %v10490_v6  ;;  %v12665_v16 = vpop.f32.mrb[212].mxu1 }
0x128f   :  { %v13194_v0 = vpack.c.bf16 %v20749_v13, %v20746_v8  ;;  %v10269_v42 = vpop.f32.mrb[213].mxu1  ;;  %v21533_v13 = vld [vmem:[#allocation14_spill] sm:$0xff] }
0x1290   :  { %v13190_v37 = vpack.c.bf16 %v20760_v1, %v20757_v35  ;;  %v10270_v7 = vadd.f32 %v10269_v42, %v10078_v61  ;;  %v12666_v43 = vpop.f32.mrb[214].mxu1  ;;  %v10085_v59 = vpop.f32.mrb[80].mxu0 }
0x1291   :  { %v10272_v3 = vpop.f32.mrb[215].mxu1  ;;  %v10086_v5 = vadd.f32 %v10085_v59, %v20423_v47  ;;  %v10087_v6 = vpop.f32.mrb[81].mxu0 }
0x1292   :  { %v10493_v48 = vadd.f32 %v20417_v62, %v10270_v7  ;;  %v10273_v17 = vadd.f32 %v10272_v3, %v10081_v32  ;;  %v10088_v27 = vpop.f32.mrb[82].mxu0 }
0x1293   :  { %v10278_v61 = vadd.f32 %v12665_v16, %v10086_v5  ;;  %v10089_v14 = vadd.f32 %v10088_v27, %v20435_v11  ;;  %v10090_v42 = vpop.f32.mrb[83].mxu0 }
0x1294   :  { %v10494_v53 = vadd.f32 %v20428_v38, %v10273_v17  ;;  %v20773_v28 = vadd.f32 %v20740_v58, %v10493_v48 }
0x1295   :  { %v10495_v38 = vadd.f32 %v20439_v26, %v10278_v61  ;;  %v10281_v47 = vadd.f32 %v12666_v43, %v10089_v14 }
0x1296   :  { %v20776_v31 = vadd.f32 %v20740_v58, %v10494_v53  ;;  %v12669_v49 = vpop.f32.mrb[216].mxu1 }
0x1297   :  { %v10285_v62 = vpop.f32.mrb[217].mxu1  ;;  %v10496_v48 = vadd.f32 %v20447_v2, %v10281_v47  ;;  %v20784_v59 = vadd.f32 %v20740_v58, %v10495_v38 }
0x1298   :  { %v13198_v32 = vpack.c.bf16 %v20776_v31, %v20773_v28  ;;  %v12670_v7 = vpop.f32.mrb[218].mxu1  ;;  %v10093_v17 = vpop.f32.mrb[4].mxu0 }
0x1299   :  { %v10288_v3 = vpop.f32.mrb[219].mxu1  ;;  %v20787_v16 = vadd.f32 %v20740_v58, %v10496_v48  ;;  %v10094_v11 = vadd.f32 %v10093_v17, %v20443_v41  ;;  %v10095_v53 = vpop.f32.mrb[5].mxu0 }
0x129a   :  { %v10096_v5 = vpop.f32.mrb[6].mxu0 }
0x129b   :  { %v10286_v6 = vadd.f32 %v10285_v62, %v10094_v11  ;;  %v10097_v27 = vadd.f32 %v10096_v5, %v20455_v15  ;;  %v10098_v26 = vpop.f32.mrb[7].mxu0  ;;  %v13202_v61 = vpack.c.bf16 %v20787_v16, %v20784_v59 }
0x129d   :  { %v10497_v14 = vadd.f32 %v20459_v60, %v10286_v6  ;;  %v10289_v42 = vadd.f32 %v10288_v3, %v10097_v27 }
0x129e   :  { %v12673_v43 = vpop.f32.mrb[220].mxu1 }
0x129f   :  { %v10301_v2 = vpop.f32.mrb[221].mxu1  ;;  %v10498_v48 = vadd.f32 %v20467_v19, %v10289_v42  ;;  %v20796_v41 = vadd.f32 %v20740_v58, %v10497_v14 }
0x12a0   :  { %v12674_v38 = vpop.f32.mrb[222].mxu1  ;;  %v10101_v44 = vpop.f32.mrb[8].mxu0 }
0x12a1   :  { %v10304_v47 = vpop.f32.mrb[223].mxu1  ;;  %v20799_v62 = vadd.f32 %v20740_v58, %v10498_v48  ;;  %v10102_v15 = vadd.f32 %v10101_v44, %v20463_v10  ;;  %v10103_v17 = vpop.f32.mrb[9].mxu0 }
0x12a2   :  { %v10104_v11 = vpop.f32.mrb[10].mxu0 }
0x12a3   :  { %v10294_v53 = vadd.f32 %v12669_v49, %v10102_v15  ;;  %v10105_v5 = vadd.f32 %v10104_v11, %v20475_v21  ;;  %v10106_v60 = vpop.f32.mrb[11].mxu0  ;;  %v13206_v19 = vpack.c.bf16 %v20799_v62, %v20796_v41 }
0x12a5   :  { %v10499_v27 = vadd.f32 %v20479_v54, %v10294_v53  ;;  %v10297_v26 = vadd.f32 %v12670_v7, %v10105_v5 }
0x12a6   :  { %v20803_v3 = vpop.f32.mrb[224].mxu1 }
0x12a7   :  { %v10317_v6 = vpop.f32.mrb[225].mxu1  ;;  %v10500_v10 = vadd.f32 %v20487_v36, %v10297_v26  ;;  %v20812_v49 = vadd.f32 %v20740_v58, %v10499_v27 }
0x12a8   :  { %v20808_v14 = vpop.f32.mrb[226].mxu1  ;;  %v10109_v44 = vpop.f32.mrb[12].mxu0 }
0x12a9   :  { %v10320_v42 = vpop.f32.mrb[227].mxu1  ;;  %v20815_v21 = vadd.f32 %v20740_v58, %v10500_v10  ;;  %v10110_v48 = vadd.f32 %v10109_v44, %v20483_v29  ;;  %v10111_v15 = vpop.f32.mrb[13].mxu0 }
0x12aa   :  { %v10112_v17 = vpop.f32.mrb[14].mxu0 }
0x12ab   :  { %v10302_v11 = vadd.f32 %v10301_v2, %v10110_v48  ;;  %v10113_v54 = vadd.f32 %v10112_v17, %v20495_v39  ;;  %v10114_v7 = vpop.f32.mrb[15].mxu0 }
0x12ad   :  { %v10501_v60 = vadd.f32 %v20499_v12, %v10302_v11  ;;  %v10305_v27 = vadd.f32 %v10304_v47, %v10113_v54 }
0x12ae   :  { %v20819_v53 = vpop.f32.mrb[228].mxu1 }
0x12af   :  { %v20823_v5 = vpop.f32.mrb[229].mxu1  ;;  %v10502_v29 = vadd.f32 %v20507_v4, %v10305_v27  ;;  %v20832_v39 = vadd.f32 %v20740_v58, %v10501_v60 }
0x12b0   :  { %v20826_v26 = vpop.f32.mrb[230].mxu1  ;;  %v10117_v2 = vpop.f32.mrb[16].mxu0 }
0x12b1   :  { %v20828_v10 = vpop.f32.mrb[231].mxu1  ;;  %v20835_v44 = vadd.f32 %v20740_v58, %v10502_v29  ;;  %v10118_v48 = vadd.f32 %v10117_v2, %v20503_v57  ;;  %v10119_v15 = vpop.f32.mrb[17].mxu0 }
0x12b2   :  { %v10120_v17 = vpop.f32.mrb[18].mxu0 }
0x12b3   :  { %v10310_v7 = vadd.f32 %v12673_v43, %v10118_v48  ;;  %v10121_v12 = vadd.f32 %v10120_v17, %v20515_v23  ;;  %v10122_v47 = vpop.f32.mrb[19].mxu0 }
0x12b5   :  { %v10503_v60 = vadd.f32 %v20519_v34, %v10310_v7  ;;  %v10313_v27 = vadd.f32 %v12674_v38, %v10121_v12 }
0x12b6   :  { %v20839_v11 = vpop.f32.mrb[232].mxu1 }
0x12b7   :  { %v20843_v54 = vpop.f32.mrb[233].mxu1  ;;  %v10504_v57 = vadd.f32 %v20527_v20, %v10313_v27  ;;  %v20852_v23 = vadd.f32 %v20740_v58, %v10503_v60 }
0x12b8   :  { %v20846_v29 = vpop.f32.mrb[234].mxu1  ;;  %v10125_v43 = vpop.f32.mrb[20].mxu0 }
0x12b9   :  { %v20848_v36 = vpop.f32.mrb[235].mxu1  ;;  %v20855_v2 = vadd.f32 %v20740_v58, %v10504_v57  ;;  %v10126_v48 = vadd.f32 %v10125_v43, %v20523_v22  ;;  %v10127_v15 = vpop.f32.mrb[21].mxu0 }
0x12ba   :  { %v10128_v17 = vpop.f32.mrb[22].mxu0 }
0x12bb   :  { %v10318_v47 = vadd.f32 %v10317_v6, %v10126_v48  ;;  %v10129_v34 = vadd.f32 %v10128_v17, %v20535_v25  ;;  %v10130_v38 = vpop.f32.mrb[23].mxu0 }
0x12bd   :  { %v10505_v60 = vadd.f32 %v20539_v24, %v10318_v47  ;;  %v10321_v27 = vadd.f32 %v10320_v42, %v10129_v34 }
0x12be   :  { %v20859_v7 = vpop.f32.mrb[236].mxu1 }
0x12bf   :  { %v20863_v12 = vpop.f32.mrb[237].mxu1  ;;  %v10506_v22 = vadd.f32 %v20547_v45, %v10321_v27  ;;  %v10551_v48 = vadd.f32 %v20740_v58, %v10505_v60 }
0x12c0   :  { %v20866_v57 = vpop.f32.mrb[238].mxu1  ;;  %v10133_v6 = vpop.f32.mrb[24].mxu0 }
0x12c1   :  { %v20868_v4 = vpop.f32.mrb[239].mxu1  ;;  %v10134_v25 = vadd.f32 %v10133_v6, %v20543_v51  ;;  %v10135_v43 = vpop.f32.mrb[25].mxu0  ;;  %v10552_v15 = vadd.f32 %v20740_v58, %v10506_v22 }
0x12c2   :  { %v10136_v17 = vpop.f32.mrb[26].mxu0 }
0x12c3   :  { %v10326_v38 = vadd.f32 %v20803_v3, %v10134_v25  ;;  %v10137_v24 = vadd.f32 %v10136_v17, %v20555_v50  ;;  %v10138_v42 = vpop.f32.mrb[27].mxu0  ;;  %v13188_v34 = vpack.c.bf16 %v10552_v15, %v10551_v48 }
0x12c5   :  { %v10507_v45 = vadd.f32 %v20559_v63, %v10326_v38  ;;  %v10329_v51 = vadd.f32 %v20808_v14, %v10137_v24  ;;  %13189 = vmatprep.subr.bf16.mxu0 %v13188_v34  ;;  %v21531_v24 = vld [vmem:[#allocation10_spill] sm:$0xff] }
0x12c6   :  { %v20876_v47 = vpop.f32.mrb[240].mxu1  ;;  %13191 = vmatpush3.bf16.msra.mxu0 %v13190_v37 }
0x12c7   :  { %v20878_v20 = vpop.f32.mrb[241].mxu1  ;;  %v10508_v50 = vadd.f32 %v20569_v55, %v10329_v51  ;;  %v10553_v25 = vadd.f32 %v20740_v58, %v10507_v45 }
0x12c8   :  { %v20882_v27 = vpop.f32.mrb[242].mxu1  ;;  %v10141_v60 = vpop.f32.mrb[28].mxu0 }
0x12c9   :  { %v20887_v3 = vpop.f32.mrb[243].mxu1  ;;  %v10142_v22 = vadd.f32 %v10141_v60, %v20565_v33  ;;  %v10143_v6 = vpop.f32.mrb[29].mxu0  ;;  %v10554_v63 = vadd.f32 %v20740_v58, %v10508_v50  ;;  %v21532_v50 = vld [vmem:[#allocation13_spill] sm:$0xff] }
0x12ca   :  { %v10144_v14 = vpop.f32.mrb[30].mxu0 }
0x12cb   :  { %v10334_v43 = vadd.f32 %v20823_v5, %v10142_v22  ;;  %v10145_v48 = vadd.f32 %v10144_v14, %v20574_v40  ;;  %v10146_v15 = vpop.f32.mrb[31].mxu0  ;;  %v13192_v1 = vpack.c.bf16 %v10554_v63, %v10553_v25  ;;  %v21535_v14 = vld [vmem:[#allocation15_spill] sm:$0xff] }
0x12cd   :  { %v10509_v55 = vadd.f32 %v20578_v52, %v10334_v43  ;;  %v10337_v33 = vadd.f32 %v20828_v10, %v10145_v48  ;;  %13193 = vmatprep.subr.bf16.mxu0 %v13192_v1 }
0x12ce   :  { %v20895_v35 = vpop.f32.mrb[244].mxu1  ;;  %13195 = vmatpush3.bf16.msra.mxu0 %v13194_v0 }
0x12cf   :  { %v20897_v37 = vpop.f32.mrb[245].mxu1  ;;  %v10510_v40 = vadd.f32 %v20586_v18, %v10337_v33  ;;  %v10555_v45 = vadd.f32 %v20740_v58, %v10509_v55  ;;  %v21534_v18 = vld [vmem:[#allocation17_spill] sm:$0xff]  ;;  %v21536_v33 = vld [vmem:[#allocation16_spill] sm:$0xff] }
0x12d0   :  { %v12698_v17 = vpop.f32.mrb[246].mxu1  ;;  %v10149_v5 = vpop.f32.mrb[32].mxu0 }
0x12d1   :  { %v20904_v38 = vpop.f32.mrb[247].mxu1  ;;  %v10150_v42 = vadd.f32 %v10149_v5, %v21531_v24  ;;  %v10151_v34 = vpop.f32.mrb[33].mxu0  ;;  %v10556_v52 = vadd.f32 %v20740_v58, %v10510_v40  ;;  %v21537_v5 = vld [vmem:[#allocation18_spill] sm:$0xff] }
0x12d2   :  { %v10152_v51 = vpop.f32.mrb[34].mxu0  ;;  %v21539_v34 = vld [vmem:[#allocation25_spill] sm:$0xff] }
0x12d3   :  { %v10342_v10 = vadd.f32 %v20819_v53, %v10150_v42  ;;  %v10153_v60 = vadd.f32 %v10152_v51, %v21532_v50  ;;  %v10154_v22 = vpop.f32.mrb[35].mxu0  ;;  %v13196_v8 = vpack.c.bf16 %v10556_v52, %v10555_v45 }
0x12d5   :  { %v10511_v0 = vadd.f32 %v21533_v13, %v10342_v10  ;;  %v10345_v6 = vadd.f32 %v20826_v26, %v10153_v60  ;;  %13197 = vmatprep.subr.bf16.mxu0 %v13196_v8  ;;  %v21540_v60 = vld [vmem:[#allocation23_spill] sm:$0xff] }
0x12d6   :  { %13199 = vmatpush3.bf16.msra.mxu0 %v13198_v32  ;;  %v21538_v32 = vld [vmem:[#allocation27_spill] sm:$0xff] }
0x12d7   :  { %v10512_v25 = vadd.f32 %v21534_v18, %v10345_v6  ;;  %v10557_v53 = vadd.f32 %v20740_v58, %v10511_v0  ;;  %v21541_v13 = vld [vmem:[#allocation19_spill] sm:$0xff] }
0x12d8   :  { %v10157_v63 = vpop.f32.mrb[168].mxu0  ;;  %v21543_v18 = vld [vmem:[#allocation31_spill] sm:$0xff] }
0x12d9   :  { %v10158_v43 = vadd.f32 %v10157_v63, %v21535_v14  ;;  %v10159_v48 = vpop.f32.mrb[169].mxu0  ;;  %v10558_v15 = vadd.f32 %v20740_v58, %v10512_v25 }
0x12da   :  { %v10160_v1 = vpop.f32.mrb[170].mxu0 }
0x12db   :  { %v10350_v55 = vadd.f32 %v20843_v54, %v10158_v43  ;;  %v10161_v26 = vadd.f32 %v10160_v1, %v21536_v33  ;;  %v10162_v17 = vpop.f32.mrb[171].mxu0  ;;  %v13200_v40 = vpack.c.bf16 %v10558_v15, %v10557_v53  ;;  %v21544_v53 = vld [vmem:[#allocation11_spill] sm:$0xff]  ;;  %v21547_v33 = vld [vmem:[#allocation30_spill] sm:$0xff] }
0x12dd   :  { %v10513_v28 = vadd.f32 %v21537_v5, %v10350_v55  ;;  %v10353_v31 = vadd.f32 %v20848_v36, %v10161_v26  ;;  %13201 = vmatprep.subr.bf16.mxu0 %v13200_v40  ;;  %v21545_v55 = vld [vmem:[#allocation22_spill] sm:$0xff]  ;;  %v21548_v40 = vld [vmem:[#allocation28_spill] sm:$0xff] }
0x12de   :  { %13203 = vmatpush3.bf16.msra.mxu0 %v13202_v61  ;;  %v21542_v61 = vld [vmem:[#allocation20_spill] sm:$0xff] }
0x12df   :  { %v10514_v24 = vadd.f32 %v21538_v32, %v10353_v31  ;;  %v10559_v54 = vadd.f32 %v20740_v58, %v10513_v28 }
0x12e0   :  { %v10165_v42 = vpop.f32.mrb[36].mxu0 }
0x12e1   :  { %v10166_v45 = vadd.f32 %v10165_v42, %v21539_v34  ;;  %v10167_v52 = vpop.f32.mrb[37].mxu0  ;;  %v10560_v51 = vadd.f32 %v20740_v58, %v10514_v24  ;;  %v21549_v42 = vld [vmem:[#allocation24_spill] sm:$0xff] }
0x12e2   :  { %v10168_v10 = vpop.f32.mrb[38].mxu0  ;;  %v21550_v52 = vld [vmem:[#allocation36_spill] sm:$0xff] }
0x12e3   :  { %v10358_v50 = vadd.f32 %v20839_v11, %v10166_v45  ;;  %v10169_v36 = vadd.f32 %v10168_v10, %v21540_v60  ;;  %v10170_v22 = vpop.f32.mrb[39].mxu0  ;;  %v13204_v8 = vpack.c.bf16 %v10560_v51, %v10559_v54  ;;  %v21551_v54 = vpack.c.bf16 %v20835_v44, %v20832_v39  ;;  %v21552_v51 = vld [vmem:[#allocation34_spill] sm:$0xff]  ;;  %v21553_v60 = vld [vmem:[#allocation37_spill] sm:$0xff] }
0x12e5   :  { %v10515_v59 = vadd.f32 %v21541_v13, %v10358_v50  ;;  %v10361_v16 = vadd.f32 %v20846_v29, %v10169_v36  ;;  %13205 = vmatprep.subr.bf16.mxu0 %v13204_v8 }
0x12e6   :  { %13207 = vmatpush3.bf16.msra.mxu0 %v13206_v19  ;;  %v21546_v19 = vpack.c.bf16 %v20815_v21, %v20812_v49 }
0x12e7   :  { %v10516_v0 = vadd.f32 %v21542_v61, %v10361_v16  ;;  %v10561_v11 = vadd.f32 %v20740_v58, %v10515_v59  ;;  %v21554_v16 = vld [vmem:[#allocation21_spill] sm:$0xff] }
0x12e8   :  { %v10173_v6 = vpop.f32.mrb[40].mxu0 }
0x12e9   :  { %v10174_v25 = vadd.f32 %v10173_v6, %v21543_v18  ;;  %v10175_v63 = vpop.f32.mrb[41].mxu0  ;;  %v10562_v14 = vadd.f32 %v20740_v58, %v10516_v0  ;;  %v21555_v6 = vld [vmem:[#allocation26_spill] sm:$0xff]  ;;  %v21556_v18 = vpack.c.bf16 %v20855_v2, %v20852_v23 }
0x12ea   :  { %v10176_v43 = vpop.f32.mrb[42].mxu0  ;;  %v21561_v2 = vld [vmem:[#allocation42_spill] sm:$0xff] }
0x12eb   :  { %v10366_v48 = vadd.f32 %v20863_v12, %v10174_v25  ;;  %v10177_v29 = vadd.f32 %v10176_v43, %v21544_v53  ;;  %v10178_v15 = vpop.f32.mrb[43].mxu0  ;;  %v13208_v1 = vpack.c.bf16 %v10562_v14, %v10561_v11  ;;  %v21557_v25 = vld [vmem:[#allocation38_spill] sm:$0xff]  ;;  %v21558_v11 = vmov 0.0|0.0  }
0x12ec   :  { %v21560_v15 = vmov 0.0  }
0x12ed   :  { %v10517_v41 = vadd.f32 %v21545_v55, %v10366_v48  ;;  %v10369_v62 = vadd.f32 %v20868_v4, %v10177_v29  ;;  %13209 = vmatprep.subr.bf16.mxu0 %v13208_v1  ;;  %v21559_v48 = vld [vmem:[#allocation39_spill] sm:$0xff] }
0x12ee   :  { %13211 = vmatpush3.bf16.msra.mxu0 %v21546_v19 }
0x12ef   :  { %v10518_v26 = vadd.f32 %v21547_v33, %v10369_v62  ;;  %v10563_v12 = vadd.f32 %v20740_v58, %v10517_v41  ;;  %v21562_v62 = vld [vmem:[#allocation40_spill] sm:$0xff] }
0x12f0   :  { %v10181_v17 = vpop.f32.mrb[44].mxu0 }
0x12f1   :  { %v10182_v5 = vadd.f32 %v10181_v17, %v21548_v40  ;;  %v10183_v28 = vpop.f32.mrb[45].mxu0  ;;  %v10564_v31 = vadd.f32 %v20740_v58, %v10518_v26  ;;  %v21563_v26 = vld [vmem:[#allocation32_spill] sm:$0xff] }
0x12f2   :  { %v10184_v32 = vpop.f32.mrb[46].mxu0  ;;  %v21564_v28 = vld [vmem:[#allocation29_spill] sm:$0xff] }
0x12f3   :  { %v10374_v24 = vadd.f32 %v20859_v7, %v10182_v5  ;;  %v10185_v4 = vadd.f32 %v10184_v32, %v21549_v42  ;;  %v10186_v34 = vpop.f32.mrb[47].mxu0  ;;  %v13212_v45 = vpack.c.bf16 %v10564_v31, %v10563_v12 }
0x12f4   :  { %v21566_v34 = vld [vmem:[#allocation44_spill] sm:$0xff] }
0x12f5   :  { %v10519_v49 = vadd.f32 %v21550_v52, %v10374_v24  ;;  %v10377_v21 = vadd.f32 %v20866_v57, %v10185_v4  ;;  %13213 = vmatprep.subr.bf16.mxu0 %v13212_v45  ;;  %v21565_v24 = vld [vmem:[#allocation33_spill] sm:$0xff] }
0x12f6   :  { %13215 = vmatpush3.bf16.msra.mxu0 %v21551_v54 }
0x12f7   :  { %v10520_v10 = vadd.f32 %v21552_v51, %v10377_v21  ;;  %v10565_v7 = vadd.f32 %v20740_v58, %v10519_v49 }
0x12f8   :  { %v10189_v50 = vpop.f32.mrb[48].mxu0 }
0x12f9   :  { %v10190_v36 = vadd.f32 %v10189_v50, %v21553_v60  ;;  %v10191_v22 = vpop.f32.mrb[49].mxu0  ;;  %v10566_v8 = vadd.f32 %v20740_v58, %v10520_v10  ;;  %v21567_v10 = vld [vmem:[#allocation35_spill] sm:$0xff] }
0x12fa   :  { %v10192_v13 = vpop.f32.mrb[50].mxu0 }
0x12fb   :  { %v10382_v59 = vadd.f32 %v20878_v20, %v10190_v36  ;;  %v10193_v57 = vadd.f32 %v10192_v13, %v21554_v16  ;;  %v10194_v61 = vpop.f32.mrb[51].mxu0  ;;  %v13216_v0 = vpack.c.bf16 %v10566_v8, %v10565_v7  ;;  %v21569_v8 = vld [vmem:[#allocation45_spill] sm:$0xff]  ;;  %v10575_v16 = vld [vmem:[%s21122_s11 + $0x8] sm:$0x7] }
0x12fc   :  { %v21570_v13 = vrot.slane %v21569_v8, 1  ;;  %v21575_v61 = vld [vmem:[#allocation6_spill] sm:$0xff] }
0x12fd   :  { %v10521_v39 = vadd.f32 %v21555_v6, %v10382_v59  ;;  %v10385_v44 = vadd.f32 %v20887_v3, %v10193_v57  ;;  %13217 = vmatprep.subr.bf16.mxu0 %v13216_v0  ;;  %v21576_v0 = vld [vmem:[#allocation7_spill] sm:$0xff]  ;;  %v21577_v6 = vld [vmem:[#allocation8_spill] sm:$0xff] }
0x12fe   :  { %13219 = vmatpush3.bf16.msra.mxu0 %v21556_v18 }
0x12ff   :  { %v10522_v63 = vadd.f32 %v21557_v25, %v10385_v44  ;;  %13220 = vmatprep.subr.bf16.mxu0 %v21558_v11  ;;  %v10567_v20 = vadd.f32 %v20740_v58, %v10521_v39  ;;  %v21578_v39 = vld [vmem:[#allocation9_spill] sm:$0xff] }
0x1300   :  { %v10197_v14 = vpop.f32.mrb[52].mxu0 }
0x1301   :  { %v10568_v43 = vadd.f32 %v20740_v58, %v10522_v63  ;;  %v10198_v53 = vadd.f32 %v10197_v14, %v21559_v48  ;;  %v10199_v29 = vpop.f32.mrb[53].mxu0  ;;  %10647 = vmatmul.mubr.f32.vlgmr.msra.gmra.mrb[118].mxu0 %v20754_v30  ;;  %v13995_v48 = vld [vmem:[%s21112_s13] sm:$0xf] }
0x1302   :  { %v10200_v3 = vpop.f32.mrb[54].mxu0  ;;  %12713 = vmatprep.mubr.msk.f32.mxu0 %vm13998_vm1, %v21560_v15 }
0x1303   :  { %v10390_v23 = vadd.f32 %v20876_v47, %v10198_v53  ;;  %v10201_v1 = vadd.f32 %v10200_v3, %v21561_v2  ;;  %v10202_v55 = vpop.f32.mrb[55].mxu0  ;;  %v13221_v41 = vpack.c.bf16 %v10568_v43, %v10567_v20 }
0x1305   :  { %v10523_v19 = vadd.f32 %v21562_v62, %v10390_v23  ;;  %v10393_v33 = vadd.f32 %v20882_v27, %v10201_v1  ;;  %13222 = vmatpush3.bf16.msra.mxu0 %v13221_v41 }
0x1306   :  { %13223 = vmatprep.subr.bf16.mxu0 %v21558_v11 }
0x1307   :  { %v10524_v17 = vadd.f32 %v21563_v26, %v10393_v33  ;;  %v10569_v40 = vadd.f32 %v20740_v58, %v10523_v19  ;;  %v13857_v33 = vld [vmem:[%s21123_s16] sm:$0xff]   ;;  %v13858_v26 = vld [vmem:[%s21123_s16 + $0x8] sm:$0xff]  }
0x1308   :  { %v10205_v30 = vpop.f32.mrb[56].mxu0  ;;  %12797 = vmatpush3.bf16.msra.mxu1 %v13857_v33 }
0x1309   :  { %v10570_v5 = vadd.f32 %v20740_v58, %v10524_v17  ;;  %v10206_v47 = vadd.f32 %v10205_v30, %v21564_v28  ;;  %v10207_v12 = vpop.f32.mrb[57].mxu0  ;;  %12798 = vmatprep.subr.bf16.mxu1 %v21560_v15  ;;  %v13859_v17 = vld [vmem:[%s21123_s16 + $0x10] sm:$0xff]   ;;  %v13860_v30 = vld [vmem:[%s21123_s16 + $0x18] sm:$0xff]  }
0x130a   :  { %v10208_v31 = vpop.f32.mrb[58].mxu0  ;;  %v13863_v28 = vld [vmem:[%s21123_s16 + $0x30] sm:$0xff]  }
0x130b   :  { %v10398_v32 = vadd.f32 %v20897_v37, %v10206_v47  ;;  %v10209_v42 = vadd.f32 %v10208_v31, %v21565_v24  ;;  %v10210_v4 = vpop.f32.mrb[59].mxu0  ;;  %v13224_v27 = vpack.c.bf16 %v10570_v5, %v10569_v40  ;;  %v13861_v40 = vld [vmem:[%s21123_s16 + $0x20] sm:$0xff]   ;;  %v13862_v5 = vld [vmem:[%s21123_s16 + $0x28] sm:$0xff]   ;;  %v13864_v47 = vld [vmem:[%s21123_s16 + $0x38] sm:$0xff]  }
0x130c   :  { %12799 = vmatpush3.bf16.msra.mxu1 %v13858_v26 }
0x130d   :  { %v10525_v45 = vadd.f32 %v21566_v34, %v10398_v32  ;;  %v10401_v52 = vadd.f32 %v20904_v38, %v10209_v42  ;;  %13225 = vmatpush3.bf16.msra.mxu0 %v13224_v27  ;;  %v21568_v38 = vrot.slane %v20350_v9, 1  ;;  %v21571_v9 = vld [vmem:[#allocation2_spill] sm:$0xff]  ;;  %12800 = vmatprep.subr.bf16.mxu1 %v21560_v15 }
0x130e   :  { %13226 = vmatprep.subr.bf16.mxu0 %v21558_v11  ;;  %v11908_v42 = vld [vmem:[%s21124_s14] ss:$0 sm:$0xff] }
0x130f   :  { %v10526_v49 = vadd.f32 %v20725_v56, %v10401_v52  ;;  %v10571_v54 = vadd.f32 %v20740_v58, %v10525_v45  ;;  %v10488_v56 = vsel %vm1362_vm6, %v21570_v13, %v21568_v38  ;;  %v11909_v34 = vld [vmem:[%s21125_s15] ss:$0 sm:$0xff] }
0x1310   :  { %v10213_v21 = vpop.f32.mrb[60].mxu0  ;;  %12801 = vmatpush3.bf16.msra.mxu1 %v13859_v17 }
0x1311   :  { %v10572_v51 = vadd.f32 %v20740_v58, %v10526_v49  ;;  %v10214_v37 = vadd.f32 %v10213_v21, %v21567_v10  ;;  %v10215_v50 = vpop.f32.mrb[61].mxu0  ;;  %12802 = vmatprep.subr.bf16.mxu1 %v21560_v15 }
0x1312   :  { %v10216_v60 = vpop.f32.mrb[62].mxu0 }
0x1313   :  { %v10406_v36 = vadd.f32 %v20895_v35, %v10214_v37  ;;  %v10217_v22 = vpop.f32.mrb[63].mxu0  ;;  %v13227_v7 = vpack.c.bf16 %v10572_v51, %v10571_v54  ;;  %v21573_v35 = vld [vmem:[#allocation4_spill] sm:$0xff] }
0x1314   :  { %12803 = vmatpush3.bf16.msra.mxu1 %v13860_v30 }
0x1315   :  { %v10527_v59 = vadd.f32 %v10488_v56, %v10406_v36  ;;  %13228 = vmatpush3.bf16.msra.mxu0 %v13227_v7  ;;  %12804 = vmatprep.subr.bf16.mxu1 %v21560_v15 }
0x1316   :  { %12711 = vmatprep.subr.mxu0 %v21560_v15 }
0x1317   :  { %v10573_v57 = vadd.f32 %v20740_v58, %v10527_v59  ;;  %v21574_v58 = vld [vmem:[#allocation5_spill] sm:$0xff] }
0x1318   :  { %12805 = vmatpush3.bf16.msra.mxu1 %v13861_v40 }
0x1319   :  { %12712 = vmatpush3.msra.mxu0 %v10573_v57  ;;  %12806 = vmatprep.subr.bf16.mxu1 %v21560_v15 }
0x131a   :  { %12714 = vmatmul.mubr.msk.f32.vlgmr.msra.gmra.mrb[0].mxu0 %vm200_vm0, %v10575_v16  ;;  %13229 = vmatprep.subr.bf16.mxu0 %v21558_v11 }
0x131b   :  { %13231 = vmatpush3.bf16.msra.mxu0 %v21571_v9  ;;  %12748 = vmatprep.mubr.msk.f32.mxu0 %vm13998_vm1, %v21560_v15 }
0x131c   :  { %13232 = vmatprep.subr.bf16.mxu0 %v21558_v11  ;;  %12807 = vmatpush3.bf16.msra.mxu1 %v13862_v5 }
0x131d   :  { %12808 = vmatprep.subr.bf16.mxu1 %v21560_v15 }
0x131f   :  { %13234 = vmatpush3.bf16.msra.mxu0 %v21572_v46 }
0x1320   :  { %13235 = vmatprep.subr.bf16.mxu0 %v21558_v11  ;;  %12809 = vmatpush3.bf16.msra.mxu1 %v13863_v28 }
0x1321   :  { %12810 = vmatprep.subr.bf16.mxu1 %v21560_v15 }
0x1323   :  { %13237 = vmatpush3.bf16.msra.mxu0 %v21573_v35 }
0x1324   :  { %13238 = vmatprep.subr.bf16.mxu0 %v21558_v11  ;;  %12811 = vmatpush3.bf16.msra.mxu1 %v13864_v47 }
0x1327   :  { %13240 = vmatpush3.bf16.msra.mxu0 %v21574_v58 }
0x1328   :  { %13241 = vmatprep.subr.bf16.mxu0 %v21558_v11 }
0x132b   :  { %13243 = vmatpush3.bf16.msra.mxu0 %v21575_v61 }
0x132c   :  { %13244 = vmatprep.subr.bf16.mxu0 %v21558_v11 }
0x132f   :  { %13246 = vmatpush3.bf16.msra.mxu0 %v21576_v0 }
0x1330   :  { %13247 = vmatprep.subr.bf16.mxu0 %v21558_v11 }
0x1333   :  { %13249 = vmatpush3.bf16.msra.mxu0 %v21577_v6 }
0x1334   :  { %13250 = vmatprep.subr.bf16.mxu0 %v21558_v11 }
0x1337   :  { %13252 = vmatpush3.bf16.msra.mxu0 %v21578_v39 }
0x1338   :  { %13253 = vmatprep.subr.bf16.mxu0 %v21558_v11 }
0x13d4   :  { %v12177_v44 = vpop.f32.mrb[118].mxu0 }
0x13d5   :  { %v12178_v18 = vpop.f32.mrb[119].mxu0 }
0x13d6   :  { %v12179_v25 = vadd.f32 %v12178_v18, %v12177_v44 }
0x13ed   :  { %v10718_v63 = vpop.f32.mrb[0].mxu0 }
0x13ee   :  { %v21030_v14 = vadd.f32 %v12179_v25, %v10718_v63  ;;  %v12715_v20 = vpop.f32.mrb[1].mxu0 }
0x13f0   :  { %12749 = vmatmul.mubr.f32.vlgmr.msra.gmra.mrb[64].mxu0 %v21030_v14  ;;  %v10793_v43 = vmul.f32 %v21030_v14, %v21030_v14 }
0x13f1   :  { %13255 = vmatpush3.bf16.msra.mxu0 %v21571_v9  ;;  %12783 = vmatprep.mubr.msk.f32.mxu0 %vm13998_vm1, %v21560_v15 }
0x13f2   :  { %13256 = vmatprep.subr.bf16.mxu0 %v21558_v11 }
0x13f5   :  { %13258 = vmatpush3.bf16.msra.mxu0 %v21572_v46 }
0x13f6   :  { %13259 = vmatprep.subr.bf16.mxu0 %v21558_v11 }
0x13f9   :  { %13261 = vmatpush3.bf16.msra.mxu0 %v21573_v35 }
0x13fa   :  { %13262 = vmatprep.subr.bf16.mxu0 %v21558_v11 }
0x13fd   :  { %13264 = vmatpush3.bf16.msra.mxu0 %v21574_v58 }
0x13fe   :  { %13265 = vmatprep.subr.bf16.mxu0 %v21558_v11 }
0x1401   :  { %13267 = vmatpush3.bf16.msra.mxu0 %v21575_v61 }
0x1402   :  { %13268 = vmatprep.subr.bf16.mxu0 %v21558_v11 }
0x1405   :  { %13270 = vmatpush3.bf16.msra.mxu0 %v21576_v0 }
0x1406   :  { %13271 = vmatprep.subr.bf16.mxu0 %v21558_v11 }
0x1409   :  { %13273 = vmatpush3.bf16.msra.mxu0 %v21577_v6 }
0x140a   :  { %13274 = vmatprep.subr.bf16.mxu0 %v21558_v11 }
0x140d   :  { %13276 = vmatpush3.bf16.msra.mxu0 %v21578_v39 }
0x140e   :  { %12786 = vmatprep.subr.mxu0 %v21560_v15 }
0x1410   :  { %12784 = vmatmul.mubr.f32.vlgmr.msra.gmra.mrb[66].mxu0 %v10793_v43 }
0x1411   :  { %12787 = vmatpush3.msk.msra.mxu0 %vm496_vm2, %v13995_v48  ;;  %12788 = vmatprep.mubr.msk.f32.mxu0 %vm13998_vm1, %v21560_v15 }
0x1412   :  { %12791 = vmatprep.subr.mxu0 %v21560_v15 }
0x14c3   :  { %v10788_v11 = vpop.f32.mrb[64].mxu0 }
0x14c4   :  { %v10792_v53 = vmul.f32 0.03125, %v10788_v11  ;;  %v12750_v29 = vpop.f32.mrb[65].mxu0 }
0x14c6   :  { %12789 = vmatmul.mubr.msk.f32.vlgmr.msra.gmra.mrb[68].mxu0 %vm492_vm3, %v10792_v53  ;;  %v10865_v23 = vmul.f32 %v10792_v53, %v10792_v53 }
0x14c7   :  { %12792 = vmatpush3.msk.msra.mxu0 %vm496_vm2, %v13995_v48  ;;  %12793 = vmatprep.mubr.msk.f32.mxu0 %vm13998_vm1, %v21560_v15  ;;  %v11910_v15 = vld [vmem:[%s21126_s17] ss:$0 sm:$0xff] }
0x14e3   :  { %v10860_v3 = vpop.f32.mrb[66].mxu0 }
0x14e4   :  { %v10864_v2 = vmul.f32 0.03125, %v10860_v3  ;;  %v12785_v1 = vpop.f32.mrb[67].mxu0 }
0x14e6   :  { %v10866_v55 = vsub.f32 %v10864_v2, %v10865_v23 }
0x14e8   :  { %v10867_v41 = vmax.f32 %v10866_v55, 0.0 }
0x14ea   :  { %v10868_v62 = vadd.f32 1e-05, %v10867_v41 }
0x14ec   :  { %13871 = vrsqrt.f32 %v10868_v62 }
0x14f6   :  { %v13872_v19 = vpop.eup %13871 }
0x14f7   :  { %12794 = vmatmul.mubr.msk.f32.vlgmr.msra.gmra.mrb[70].mxu0 %vm492_vm3, %v13872_v19 }
0x1599   :  { %v10939_v12 = vpop.f32.mrb[68].mxu0 }
0x159a   :  { %v12790_v31 = vpop.f32.mrb[69].mxu0  ;;  %v11016_v32 = vsub.f32 %v21030_v14, %v10939_v12 }
0x15ca   :  { %v11012_v24 = vpop.f32.mrb[70].mxu0 }
0x15cb   :  { %v11017_v4 = vmul.f32 %v11016_v32, %v11012_v24  ;;  %v12795_v27 = vpop.f32.mrb[71].mxu0 }
0x15cd   :  { %v11025_v45 = vmul.f32 %v11908_v42, %v11017_v4 }
0x15cf   :  { %v11033_v52 = vadd.f32 %v11909_v34, %v11025_v45 }
0x15d1   :  { %v11034_v49 = vpack.c.bf16 %v11033_v52, %v11033_v52 }
0x15d3   :  { %12813 = vmatmul.mubr.bf16.vlgmr.msra.gmra.mrb[248].mxu1 %v11034_v49 }
0x16a6   :  { %v11140_v21 = vpop.f32.mrb[248].mxu1 }
0x16a7   :  { %v11141_v54 = vadd.f32 %v11910_v15, %v11140_v21  ;;  %v12814_v51 = vpop.f32.mrb[249].mxu1 }
0x16a8   :  { %v11143_v10 = vpop.f32.mrb[250].mxu1 }
0x16a9   :  { %11146 = vst [vmem:[%s21127_s18] sm:$0x7] %v11141_v54  ;;  %v12815_v37 = vpop.f32.mrb[251].mxu1 }

</bundles_post_ra>
